<compile_context>
chip_gen: v7x
topology: tpu7x:2x2x1
jax: 0.10.0
libtpu: 0.0.40
codegen_flags: <defaults>
</compile_context>

<pallas_src>
import functools

import jax
import jax.numpy as jnp
from jax.experimental import pallas as pl
from jax.experimental.pallas import tpu as pltpu


def _round_up(x, m):
    return ((x + m - 1) // m) * m


def _vmem_limit_bytes():
    # Generation-aware scoped-VMEM cap (v5e/v6e: 128 MiB physical, v7x: 64 MiB).
    try:
        cap = pltpu.get_tpu_info().vmem_capacity_bytes
        return max(32 * 1024 * 1024, cap - 8 * 1024 * 1024)
    except Exception:  # pragma: no cover - conservative fallback
        return 32 * 1024 * 1024


def _layer_norm(x, gamma, beta, eps=1e-5):
    mu = jnp.mean(x, axis=-1, keepdims=True)
    var = jnp.mean(jnp.square(x - mu), axis=-1, keepdims=True)
    return (x - mu) * jax.lax.rsqrt(var + eps) * gamma + beta


# ----------------------------------------------------------------------------
# Shared post-norm transformer encoder layer (runs inside a kernel).
#   x2       : [nb*seq, D] f32 value (nb independent sequences of length seq)
#   qkv_scr  : VMEM [nb*seq, 3*nh*hp] bf16      (hp = padded per-head width, >=128)
#   attn_scr : VMEM [nb*seq, nh*hp]   bf16
# Weights are head-block padded: each head occupies a 128-aligned lane block, so
# per-head slices are full-vreg selects (no masked stores / cross-lane relayout).
# ----------------------------------------------------------------------------
def _encoder_layer(x2, params, qkv_scr, attn_scr, *, nb, seq, num_heads):
    (wqkv, bqkv, wo, bo, g1, be1, w1, b1, w2, b2, g2, be2) = params
    hp = wqkv.shape[-1] // (3 * num_heads)

    # fused, scale-folded QKV projection: one wide bf16 MXU matmul, f32 accumulation
    xb = x2.astype(jnp.bfloat16)
    qkv = jnp.dot(xb, wqkv[...], preferred_element_type=jnp.float32) + bqkv[...]
    qkv_scr[...] = qkv.astype(jnp.bfloat16)

    # multi-head attention: 128-lane-aligned per-head slices, full-tile MXU matmuls
    for h in range(num_heads):
        q = qkv_scr[:, h * hp:(h + 1) * hp].reshape(nb, seq, hp)
        k = qkv_scr[:, (num_heads + h) * hp:(num_heads + h + 1) * hp].reshape(nb, seq, hp)
        v = qkv_scr[:, (2 * num_heads + h) * hp:(2 * num_heads + h + 1) * hp].reshape(nb, seq, hp)
        s = jnp.einsum('bqd,bkd->bqk', q, k, preferred_element_type=jnp.float32)
        s = s - jnp.max(s, axis=-1, keepdims=True)
        e = jnp.exp(s)
        p = e * pl.reciprocal(jnp.sum(e, axis=-1, keepdims=True), approx=True)
        o = jnp.einsum('bqk,bkd->bqd', p.astype(jnp.bfloat16), v,
                       preferred_element_type=jnp.float32)
        attn_scr[:, h * hp:(h + 1) * hp] = o.reshape(nb * seq, hp).astype(jnp.bfloat16)

    # single full-width output projection (zero-padded Wo rows -> exact)
    attn = jnp.dot(attn_scr[...], wo[...],
                   preferred_element_type=jnp.float32) + bo[...]

    h1 = _layer_norm(x2 + attn, g1[...], be1[...])

    # FFN (ReLU), hidden width zero-padded to a lane multiple
    f = jnp.dot(h1.astype(jnp.bfloat16), w1[...],
                preferred_element_type=jnp.float32) + b1[...]
    f = jnp.maximum(f, 0.0)
    f = jnp.dot(f.astype(jnp.bfloat16), w2[...],
                preferred_element_type=jnp.float32) + b2[...]

    return _layer_norm(h1 + f, g2[...], be2[...])


# ----------------------------------------------------------------------------
# One fused SAINT block kernel: column encoder + intersample (row) encoder,
# optionally followed by the classification head (mean -> LN -> ReLU -> Linear).
# ----------------------------------------------------------------------------
def _saint_block_kernel(x_ref, g_ref, *refs, num_heads, with_head):
    col_p = refs[0:12]
    row_p = refs[12:24]
    i = 24
    if with_head:
        avg_ref, hg_ref, hbe_ref, hw_ref, hb_ref = refs[i:i + 5]
        i += 5
    o_ref = refs[i]
    qkvc_scr, attnc_scr, xrow_scr, qkvr_scr, attnr_scr = refs[i + 1:i + 6]

    B, F, H = x_ref.shape

    # --- column encoder over the F feature tokens of each sample ---------------
    x_col = x_ref[...].reshape(B * F, H)            # free leading-dim reshape
    col_out = _encoder_layer(x_col, col_p, qkvc_scr, attnc_scr,
                             nb=B, seq=F, num_heads=num_heads)

    # --- col -> row relayout: exact 0/1 gather matmuls on the idle MXU ---------
    # xrow[b, f*H:(f+1)*H] = col_out[b*F + f, :]
    for f in range(F):
        xrow_scr[:, f * H:(f + 1) * H] = jnp.dot(
            g_ref[f], col_out, preferred_element_type=jnp.float32)

    # --- intersample (row) encoder over the batch ------------------------------
    row_out = _encoder_layer(xrow_scr[...], row_p, qkvr_scr, attnr_scr,
                             nb=1, seq=B, num_heads=num_heads)

    if not with_head:
        o_ref[...] = row_out.astype(o_ref.dtype)    # lane-dense [B, F*H]
    else:
        # head: mean over features via a constant averaging matrix (MXU),
        # then LayerNorm -> ReLU -> Linear (output lane-padded to 128)
        m = jnp.dot(row_out, avg_ref[...], preferred_element_type=jnp.float32)
        hh = _layer_norm(m, hg_ref[...], hbe_ref[...])
        hh = jnp.maximum(hh, 0.0)
        y = jnp.dot(hh.astype(jnp.bfloat16), hw_ref[...],
                    preferred_element_type=jnp.float32) + hb_ref[...]
        o_ref[...] = y.astype(o_ref.dtype)


def saint_block(x3, col_p, row_p, gmat, num_heads, head_pack=None):
    B, F, H = x3.shape
    nh = num_heads
    hp_col = col_p[0].shape[1] // (3 * nh)
    hp_row = row_p[0].shape[1] // (3 * nh)
    with_head = head_pack is not None

    inputs = [x3, gmat] + list(col_p) + list(row_p)
    if with_head:
        inputs += list(head_pack)
        out_shape = jax.ShapeDtypeStruct((B, head_pack[3].shape[1]), jnp.float32)
    else:
        out_shape = jax.ShapeDtypeStruct((B, F * H), jnp.float32)

    scratch = [
        pltpu.VMEM((B * F, 3 * nh * hp_col), jnp.bfloat16),   # col QKV
        pltpu.VMEM((B * F, nh * hp_col), jnp.bfloat16),       # col attn concat
        pltpu.VMEM((B, F * H), jnp.float32),                  # row-layout x
        pltpu.VMEM((B, 3 * nh * hp_row), jnp.bfloat16),       # row QKV
        pltpu.VMEM((B, nh * hp_row), jnp.bfloat16),           # row attn concat
    ]
    return pl.pallas_call(
        functools.partial(_saint_block_kernel, num_heads=nh, with_head=with_head),
        out_shape=out_shape,
        in_specs=[pl.BlockSpec(memory_space=pltpu.MemorySpace.VMEM)] * len(inputs),
        out_specs=pl.BlockSpec(memory_space=pltpu.MemorySpace.VMEM),
        scratch_shapes=scratch,
        compiler_params=pltpu.CompilerParams(vmem_limit_bytes=_vmem_limit_bytes()),
    )(*inputs)


def saint_forward(x, packed_layers, head_pack, gmat, out_dim, num_heads):
    B, F, H = x.shape
    L = len(packed_layers)
    for li, (col_p, row_p) in enumerate(packed_layers):
        if li < L - 1:
            # block output is lane-dense [B, F*H]; the reshape back to [B,F,H] is a
            # free metadata-only reshape of the contiguous HBM array.
            x = saint_block(x, col_p, row_p, gmat, num_heads).reshape(B, F, H)
        else:
            y = saint_block(x, col_p, row_p, gmat, num_heads, head_pack=head_pack)
            return y[:, :out_dim]


# ----------------------------------------------------------------------------
# Parameter init (logical, float32) + packing into padded kernel layout
# ----------------------------------------------------------------------------
def init_logical_encoder_layer(key, d_model, num_heads, d_ff):
    k1, k2, k3, k4, k5, k6, k7, k8 = jax.random.split(key, 8)
    s = 0.02
    return dict(
        wqkv=jax.random.normal(k1, (d_model, 3 * d_model), jnp.float32) * s,
        bqkv=jax.random.normal(k2, (3 * d_model,), jnp.float32) * s,
        wo=jax.random.normal(k3, (d_model, d_model), jnp.float32) * s,
        bo=jax.random.normal(k4, (d_model,), jnp.float32) * s,
        g1=jnp.ones((d_model,), jnp.float32), be1=jnp.zeros((d_model,), jnp.float32),
        w1=jax.random.normal(k5, (d_model, d_ff), jnp.float32) * s,
        b1=jax.random.normal(k6, (d_ff,), jnp.float32) * s,
        w2=jax.random.normal(k7, (d_ff, d_model), jnp.float32) * s,
        b2=jax.random.normal(k8, (d_model,), jnp.float32) * s,
        g2=jnp.ones((d_model,), jnp.float32), be2=jnp.zeros((d_model,), jnp.float32),
        num_heads=num_heads, d_model=d_model, d_ff=d_ff)


def pack_encoder_layer(lp):
    d, nh, dff = lp["d_model"], lp["num_heads"], lp["d_ff"]
    hd = d // nh
    hp = _round_up(hd, 128)                # padded per-head lane width
    dffp = _round_up(dff, 128)             # padded FFN width
    scale = 1.0 / float(hd) ** 0.5

    wqkv = lp["wqkv"].reshape(d, 3, nh, hd)
    wqkv = wqkv.at[:, 0].multiply(scale)   # fold softmax scale into Q weights
    wqkv = jnp.pad(wqkv, ((0, 0), (0, 0), (0, 0), (0, hp - hd))).reshape(d, 3 * nh * hp)

    bqkv = lp["bqkv"].reshape(3, nh, hd)
    bqkv = bqkv.at[0].multiply(scale)      # ...and into the Q bias
    bqkv = jnp.pad(bqkv, ((0, 0), (0, 0), (0, hp - hd))).reshape(1, 3 * nh * hp)

    wo = lp["wo"].reshape(nh, hd, d)
    wo = jnp.pad(wo, ((0, 0), (0, hp - hd), (0, 0))).reshape(nh * hp, d)

    w1 = jnp.pad(lp["w1"], ((0, 0), (0, dffp - dff)))
    b1 = jnp.pad(lp["b1"], (0, dffp - dff)).reshape(1, dffp)
    w2 = jnp.pad(lp["w2"], ((0, dffp - dff), (0, 0)))

    return [wqkv.astype(jnp.bfloat16), bqkv,
            wo.astype(jnp.bfloat16), lp["bo"].reshape(1, d),
            lp["g1"].reshape(1, d), lp["be1"].reshape(1, d),
            w1.astype(jnp.bfloat16), b1,
            w2.astype(jnp.bfloat16), lp["b2"].reshape(1, d),
            lp["g2"].reshape(1, d), lp["be2"].reshape(1, d)]


def init_saint(key, hidden, out_dim, num_feats, num_layers, num_heads):
    logical = []
    row_dim = num_feats * hidden
    for _ in range(num_layers):
        key, kc, kr = jax.random.split(key, 3)
        logical.append((init_logical_encoder_layer(kc, hidden, num_heads, 2 * hidden),
                        init_logical_encoder_layer(kr, row_dim, num_heads, 2 * row_dim)))
    key, kw, kb = jax.random.split(key, 3)
    head_logical = dict(
        g=jnp.ones((hidden,), jnp.float32), b=jnp.zeros((hidden,), jnp.float32),
        w=jax.random.normal(kw, (hidden, out_dim), jnp.float32) * 0.02,
        bias=jax.random.normal(kb, (out_dim,), jnp.float32) * 0.02)
    return logical, head_logical


def pack_saint(logical, head_logical, num_feats, hidden, out_dim):
    packed = [(pack_encoder_layer(c), pack_encoder_layer(r)) for c, r in logical]
    out_pad = _round_up(out_dim, 128)
    hw = jnp.pad(head_logical["w"], ((0, 0), (0, out_pad - out_dim))).astype(jnp.bfloat16)
    hb = jnp.pad(head_logical["bias"], (0, out_pad - out_dim)).reshape(1, out_pad)
    # constant feature-averaging matrix: avg[f*H + h, h] = 1/F  (mean via one matmul)
    rows = jnp.arange(num_feats * hidden)[:, None]
    cols = jnp.arange(hidden)[None, :]
    avg = ((rows % hidden) == cols).astype(jnp.float32) / float(num_feats)
    head_pack = [avg,
                 head_logical["g"].reshape(1, hidden),
                 head_logical["b"].reshape(1, hidden),
                 hw, hb]
    return packed, head_pack


def make_gather_mat(batch, num_feats):
    # G[f, b, b*F + f] = 1  -> exact in-kernel col->row relayout via matmul
    f = jnp.arange(num_feats)[:, None, None]
    b = jnp.arange(batch)[None, :, None]
    r = jnp.arange(batch * num_feats)[None, None, :]
    return (r == b * num_feats + f).astype(jnp.float32)


# ----------------------------------------------------------------------------
# Pure-JAX float32 reference (standard unpadded attention) for correctness.
# ----------------------------------------------------------------------------
def _ref_ln(x, g, b, eps=1e-5):
    mu = x.mean(-1, keepdims=True)
    var = ((x - mu) ** 2).mean(-1, keepdims=True)
    return (x - mu) / jnp.sqrt(var + eps) * g + b


def _ref_encoder(x2, lp, nb, seq):
    d, nh = lp["d_model"], lp["num_heads"]
    hd = d // nh
    qkv = x2 @ lp["wqkv"] + lp["bqkv"]
    q, k, v = jnp.split(qkv, 3, axis=-1)
    heads = lambda t: t.reshape(nb, seq, nh, hd).transpose(0, 2, 1, 3)
    q, k, v = heads(q), heads(k), heads(v)
    s = jnp.einsum('bhqd,bhkd->bhqk', q, k) / jnp.sqrt(float(hd))
    p = jax.nn.softmax(s, axis=-1)
    o = jnp.einsum('bhqk,bhkd->bhqd', p, v).transpose(0, 2, 1, 3).reshape(nb * seq, d)
    attn = o @ lp["wo"] + lp["bo"]
    h1 = _ref_ln(x2 + attn, lp["g1"], lp["be1"])
    f = jnp.maximum(h1 @ lp["w1"] + lp["b1"], 0.0) @ lp["w2"] + lp["b2"]
    return _ref_ln(h1 + f, lp["g2"], lp["be2"])


def saint_ref(x, logical_layers, head_lp):
    B, F, H = x.shape
    for col_lp, row_lp in logical_layers:
        xc = _ref_encoder(x.reshape(B * F, H), col_lp, B, F).reshape(B, F, H)
        x = _ref_encoder(xc.reshape(B, F * H), row_lp, 1, B).reshape(B, F, H)
    m = x.mean(axis=1)
    h = jnp.maximum(_ref_ln(m, head_lp["g"], head_lp["b"]), 0.0)
    return h @ head_lp["w"] + head_lp["bias"]


if __name__ == "__main__":
    BATCH, NUM_FEATS, HIDDEN, OUT_DIM = 8, 8, 32, 4
    NUM_LAYERS, NUM_HEADS = 2, 4

    key = jax.random.PRNGKey(0)
    key, k_x, k_p = jax.random.split(key, 3)
    x = jax.random.normal(k_x, (BATCH, NUM_FEATS, HIDDEN), jnp.float32)

    logical, head_logical = init_saint(k_p, HIDDEN, OUT_DIM, NUM_FEATS,
                                       NUM_LAYERS, NUM_HEADS)
    packed, head_pack = pack_saint(logical, head_logical, NUM_FEATS, HIDDEN, OUT_DIM)
    gmat = make_gather_mat(BATCH, NUM_FEATS)

    out = saint_forward(x, packed, head_pack, gmat, OUT_DIM, NUM_HEADS)
    out = jax.block_until_ready(out)

    ref = saint_ref(x, logical, head_logical)

    assert out.shape == (BATCH, OUT_DIM)
    assert bool(jnp.all(jnp.isfinite(out)))
    assert bool(jnp.allclose(out, ref, atol=2e-2, rtol=2e-2)), (
        "max abs err %.3e" % float(jnp.max(jnp.abs(out - ref))))
    print("KERNEL_OK")
</pallas_src>

<mosaic_0001>
module attributes {stable_mosaic.version = 11 : i64} {
  func.func @_saint_block_kernel(%arg0: memref<8x8x32xf32, #tpu.memory_space<vmem>>, %arg1: memref<8x8x64xf32, #tpu.memory_space<vmem>>, %arg2: memref<32x1536xbf16, #tpu.memory_space<vmem>>, %arg3: memref<1x1536xf32, #tpu.memory_space<vmem>>, %arg4: memref<512x32xbf16, #tpu.memory_space<vmem>>, %arg5: memref<1x32xf32, #tpu.memory_space<vmem>>, %arg6: memref<1x32xf32, #tpu.memory_space<vmem>>, %arg7: memref<1x32xf32, #tpu.memory_space<vmem>>, %arg8: memref<32x128xbf16, #tpu.memory_space<vmem>>, %arg9: memref<1x128xf32, #tpu.memory_space<vmem>>, %arg10: memref<128x32xbf16, #tpu.memory_space<vmem>>, %arg11: memref<1x32xf32, #tpu.memory_space<vmem>>, %arg12: memref<1x32xf32, #tpu.memory_space<vmem>>, %arg13: memref<1x32xf32, #tpu.memory_space<vmem>>, %arg14: memref<256x1536xbf16, #tpu.memory_space<vmem>>, %arg15: memref<1x1536xf32, #tpu.memory_space<vmem>>, %arg16: memref<512x256xbf16, #tpu.memory_space<vmem>>, %arg17: memref<1x256xf32, #tpu.memory_space<vmem>>, %arg18: memref<1x256xf32, #tpu.memory_space<vmem>>, %arg19: memref<1x256xf32, #tpu.memory_space<vmem>>, %arg20: memref<256x512xbf16, #tpu.memory_space<vmem>>, %arg21: memref<1x512xf32, #tpu.memory_space<vmem>>, %arg22: memref<512x256xbf16, #tpu.memory_space<vmem>>, %arg23: memref<1x256xf32, #tpu.memory_space<vmem>>, %arg24: memref<1x256xf32, #tpu.memory_space<vmem>>, %arg25: memref<1x256xf32, #tpu.memory_space<vmem>>, %arg26: memref<8x256xf32, #tpu.memory_space<vmem>>, %arg27: memref<64x1536xbf16, #tpu.memory_space<vmem>>, %arg28: memref<64x512xbf16, #tpu.memory_space<vmem>>, %arg29: memref<8x256xf32, #tpu.memory_space<vmem>>, %arg30: memref<8x1536xbf16, #tpu.memory_space<vmem>>, %arg31: memref<8x512xbf16, #tpu.memory_space<vmem>>) attributes {dimension_semantics = [], scalar_prefetch = 0 : i64, scratch_operands = 5 : i64, tpu.core_type = #tpu.core_type<tc>} {
    %c0 = arith.constant 0 : index
    %c0_0 = arith.constant 0 : index
    %c0_1 = arith.constant 0 : index
    %0 = vector.load %arg0[%c0, %c0_0, %c0_1] : memref<8x8x32xf32, #tpu.memory_space<vmem>>, vector<8x8x32xf32>
    %1 = vector.shape_cast %0 : vector<8x8x32xf32> to vector<64x32xf32>
    %2 = arith.truncf %1 : vector<64x32xf32> to vector<64x32xbf16>
    %c0_2 = arith.constant 0 : index
    %c0_3 = arith.constant 0 : index
    %3 = vector.load %arg2[%c0_2, %c0_3] : memref<32x1536xbf16, #tpu.memory_space<vmem>>, vector<32x1536xbf16>
    %cst = arith.constant dense<0.000000e+00> : vector<64x1536xf32>
    %4 = tpu.matmul %2, %3, %cst {dimension_numbers = #tpu.dot_dimension_numbers<[1], [0], [0], [1], [0, 0, 1, 1], [], []>} : vector<64x32xbf16>, vector<32x1536xbf16>, vector<64x1536xf32> -> vector<64x1536xf32>
    %c0_4 = arith.constant 0 : index
    %c0_5 = arith.constant 0 : index
    %5 = vector.load %arg3[%c0_4, %c0_5] : memref<1x1536xf32, #tpu.memory_space<vmem>>, vector<1x1536xf32>
    %6 = vector.broadcast %5 : vector<1x1536xf32> to vector<64x1536xf32>
    %7 = arith.addf %4, %6 : vector<64x1536xf32>
    %8 = arith.truncf %7 : vector<64x1536xf32> to vector<64x1536xbf16>
    %c0_6 = arith.constant 0 : index
    %c0_7 = arith.constant 0 : index
    %9 = vector.load %arg27[%c0_6, %c0_7] : memref<64x1536xbf16, #tpu.memory_space<vmem>>, vector<64x1536xbf16>
    tpu.vector_store %arg27[%c0_6, %c0_7], %8 {strides = array<i32>} : memref<64x1536xbf16, #tpu.memory_space<vmem>>, vector<64x1536xbf16>,
    %c0_8 = arith.constant 0 : index
    %c0_9 = arith.constant 0 : index
    %10 = vector.load %arg27[%c0_8, %c0_9] : memref<64x1536xbf16, #tpu.memory_space<vmem>>, vector<64x128xbf16>
    %11 = vector.shape_cast %10 : vector<64x128xbf16> to vector<8x8x128xbf16>
    %c0_10 = arith.constant 0 : index
    %c512 = arith.constant 512 : index
    %12 = vector.load %arg27[%c0_10, %c512] : memref<64x1536xbf16, #tpu.memory_space<vmem>>, vector<64x128xbf16>
    %13 = vector.shape_cast %12 : vector<64x128xbf16> to vector<8x8x128xbf16>
    %c0_11 = arith.constant 0 : index
    %c1024 = arith.constant 1024 : index
    %14 = vector.load %arg27[%c0_11, %c1024] : memref<64x1536xbf16, #tpu.memory_space<vmem>>, vector<64x128xbf16>
    %15 = vector.shape_cast %14 : vector<64x128xbf16> to vector<8x8x128xbf16>
    "tpu.trace_start"() <{level = 10 : i32, message = "bqd,bkd->bqk"}> : () -> ()
    %cst_12 = arith.constant dense<0.000000e+00> : vector<8x8x8xf32>
    %16 = tpu.matmul %11, %13, %cst_12 {dimension_numbers = #tpu.dot_dimension_numbers<[2], [2], [1], [1], [0, 0, 0, 1, 1, 1], [0], [0]>} : vector<8x8x128xbf16>, vector<8x8x128xbf16>, vector<8x8x8xf32> -> vector<8x8x8xf32>
    "tpu.trace_stop"() : () -> ()
    %cst_13 = arith.constant dense<0xFF800000> : vector<8x8xf32>
    %17 = vector.multi_reduction <maximumf>, %16, %cst_13 [2] : vector<8x8x8xf32> to vector<8x8xf32>
    %18 = vector.shape_cast %17 : vector<8x8xf32> to vector<8x8x1xf32>
    %19 = vector.broadcast %18 : vector<8x8x1xf32> to vector<8x8x8xf32>
    %20 = arith.subf %16, %19 : vector<8x8x8xf32>
    %21 = math.exp %20 : vector<8x8x8xf32>
    %cst_14 = arith.constant dense<0.000000e+00> : vector<8x8xf32>
    %22 = vector.multi_reduction <add>, %21, %cst_14 [2] : vector<8x8x8xf32> to vector<8x8xf32>
    %23 = vector.shape_cast %22 : vector<8x8xf32> to vector<8x8x1xf32>
    %24 = tpu.reciprocal %23 {approx = true} : vector<8x8x1xf32> -> vector<8x8x1xf32>
    %25 = vector.broadcast %24 : vector<8x8x1xf32> to vector<8x8x8xf32>
    %26 = arith.mulf %21, %25 : vector<8x8x8xf32>
    %27 = arith.truncf %26 : vector<8x8x8xf32> to vector<8x8x8xbf16>
    "tpu.trace_start"() <{level = 10 : i32, message = "bqk,bkd->bqd"}> : () -> ()
    %cst_15 = arith.constant dense<0.000000e+00> : vector<8x8x128xf32>
    %28 = tpu.matmul %27, %15, %cst_15 {dimension_numbers = #tpu.dot_dimension_numbers<[2], [1], [1], [2], [0, 0, 0, 1, 1, 2], [0], [0]>} : vector<8x8x8xbf16>, vector<8x8x128xbf16>, vector<8x8x128xf32> -> vector<8x8x128xf32>
    "tpu.trace_stop"() : () -> ()
    %29 = vector.shape_cast %28 : vector<8x8x128xf32> to vector<64x128xf32>
    %30 = arith.truncf %29 : vector<64x128xf32> to vector<64x128xbf16>
    %c0_16 = arith.constant 0 : index
    %c0_17 = arith.constant 0 : index
    %31 = vector.load %arg28[%c0_16, %c0_17] : memref<64x512xbf16, #tpu.memory_space<vmem>>, vector<64x128xbf16>
    tpu.vector_store %arg28[%c0_16, %c0_17], %30 {strides = array<i32>} : memref<64x512xbf16, #tpu.memory_space<vmem>>, vector<64x128xbf16>,
    %c0_18 = arith.constant 0 : index
    %c128 = arith.constant 128 : index
    %32 = vector.load %arg27[%c0_18, %c128] : memref<64x1536xbf16, #tpu.memory_space<vmem>>, vector<64x128xbf16>
    %33 = vector.shape_cast %32 : vector<64x128xbf16> to vector<8x8x128xbf16>
    %c0_19 = arith.constant 0 : index
    %c640 = arith.constant 640 : index
    %34 = vector.load %arg27[%c0_19, %c640] : memref<64x1536xbf16, #tpu.memory_space<vmem>>, vector<64x128xbf16>
    %35 = vector.shape_cast %34 : vector<64x128xbf16> to vector<8x8x128xbf16>
    %c0_20 = arith.constant 0 : index
    %c1152 = arith.constant 1152 : index
    %36 = vector.load %arg27[%c0_20, %c1152] : memref<64x1536xbf16, #tpu.memory_space<vmem>>, vector<64x128xbf16>
    %37 = vector.shape_cast %36 : vector<64x128xbf16> to vector<8x8x128xbf16>
    "tpu.trace_start"() <{level = 10 : i32, message = "bqd,bkd->bqk"}> : () -> ()
    %cst_21 = arith.constant dense<0.000000e+00> : vector<8x8x8xf32>
    %38 = tpu.matmul %33, %35, %cst_21 {dimension_numbers = #tpu.dot_dimension_numbers<[2], [2], [1], [1], [0, 0, 0, 1, 1, 1], [0], [0]>} : vector<8x8x128xbf16>, vector<8x8x128xbf16>, vector<8x8x8xf32> -> vector<8x8x8xf32>
    "tpu.trace_stop"() : () -> ()
    %cst_22 = arith.constant dense<0xFF800000> : vector<8x8xf32>
    %39 = vector.multi_reduction <maximumf>, %38, %cst_22 [2] : vector<8x8x8xf32> to vector<8x8xf32>
    %40 = vector.shape_cast %39 : vector<8x8xf32> to vector<8x8x1xf32>
    %41 = vector.broadcast %40 : vector<8x8x1xf32> to vector<8x8x8xf32>
    %42 = arith.subf %38, %41 : vector<8x8x8xf32>
    %43 = math.exp %42 : vector<8x8x8xf32>
    %cst_23 = arith.constant dense<0.000000e+00> : vector<8x8xf32>
    %44 = vector.multi_reduction <add>, %43, %cst_23 [2] : vector<8x8x8xf32> to vector<8x8xf32>
    %45 = vector.shape_cast %44 : vector<8x8xf32> to vector<8x8x1xf32>
    %46 = tpu.reciprocal %45 {approx = true} : vector<8x8x1xf32> -> vector<8x8x1xf32>
    %47 = vector.broadcast %46 : vector<8x8x1xf32> to vector<8x8x8xf32>
    %48 = arith.mulf %43, %47 : vector<8x8x8xf32>
    %49 = arith.truncf %48 : vector<8x8x8xf32> to vector<8x8x8xbf16>
    "tpu.trace_start"() <{level = 10 : i32, message = "bqk,bkd->bqd"}> : () -> ()
    %cst_24 = arith.constant dense<0.000000e+00> : vector<8x8x128xf32>
    %50 = tpu.matmul %49, %37, %cst_24 {dimension_numbers = #tpu.dot_dimension_numbers<[2], [1], [1], [2], [0, 0, 0, 1, 1, 2], [0], [0]>} : vector<8x8x8xbf16>, vector<8x8x128xbf16>, vector<8x8x128xf32> -> vector<8x8x128xf32>
    "tpu.trace_stop"() : () -> ()
    %51 = vector.shape_cast %50 : vector<8x8x128xf32> to vector<64x128xf32>
    %52 = arith.truncf %51 : vector<64x128xf32> to vector<64x128xbf16>
    %c0_25 = arith.constant 0 : index
    %c128_26 = arith.constant 128 : index
    %53 = vector.load %arg28[%c0_25, %c128_26] : memref<64x512xbf16, #tpu.memory_space<vmem>>, vector<64x128xbf16>
    tpu.vector_store %arg28[%c0_25, %c128_26], %52 {strides = array<i32>} : memref<64x512xbf16, #tpu.memory_space<vmem>>, vector<64x128xbf16>,
    %c0_27 = arith.constant 0 : index
    %c256 = arith.constant 256 : index
    %54 = vector.load %arg27[%c0_27, %c256] : memref<64x1536xbf16, #tpu.memory_space<vmem>>, vector<64x128xbf16>
    %55 = vector.shape_cast %54 : vector<64x128xbf16> to vector<8x8x128xbf16>
    %c0_28 = arith.constant 0 : index
    %c768 = arith.constant 768 : index
    %56 = vector.load %arg27[%c0_28, %c768] : memref<64x1536xbf16, #tpu.memory_space<vmem>>, vector<64x128xbf16>
    %57 = vector.shape_cast %56 : vector<64x128xbf16> to vector<8x8x128xbf16>
    %c0_29 = arith.constant 0 : index
    %c1280 = arith.constant 1280 : index
    %58 = vector.load %arg27[%c0_29, %c1280] : memref<64x1536xbf16, #tpu.memory_space<vmem>>, vector<64x128xbf16>
    %59 = vector.shape_cast %58 : vector<64x128xbf16> to vector<8x8x128xbf16>
    "tpu.trace_start"() <{level = 10 : i32, message = "bqd,bkd->bqk"}> : () -> ()
    %cst_30 = arith.constant dense<0.000000e+00> : vector<8x8x8xf32>
    %60 = tpu.matmul %55, %57, %cst_30 {dimension_numbers = #tpu.dot_dimension_numbers<[2], [2], [1], [1], [0, 0, 0, 1, 1, 1], [0], [0]>} : vector<8x8x128xbf16>, vector<8x8x128xbf16>, vector<8x8x8xf32> -> vector<8x8x8xf32>
    "tpu.trace_stop"() : () -> ()
    %cst_31 = arith.constant dense<0xFF800000> : vector<8x8xf32>
    %61 = vector.multi_reduction <maximumf>, %60, %cst_31 [2] : vector<8x8x8xf32> to vector<8x8xf32>
    %62 = vector.shape_cast %61 : vector<8x8xf32> to vector<8x8x1xf32>
    %63 = vector.broadcast %62 : vector<8x8x1xf32> to vector<8x8x8xf32>
    %64 = arith.subf %60, %63 : vector<8x8x8xf32>
    %65 = math.exp %64 : vector<8x8x8xf32>
    %cst_32 = arith.constant dense<0.000000e+00> : vector<8x8xf32>
    %66 = vector.multi_reduction <add>, %65, %cst_32 [2] : vector<8x8x8xf32> to vector<8x8xf32>
    %67 = vector.shape_cast %66 : vector<8x8xf32> to vector<8x8x1xf32>
    %68 = tpu.reciprocal %67 {approx = true} : vector<8x8x1xf32> -> vector<8x8x1xf32>
    %69 = vector.broadcast %68 : vector<8x8x1xf32> to vector<8x8x8xf32>
    %70 = arith.mulf %65, %69 : vector<8x8x8xf32>
    %71 = arith.truncf %70 : vector<8x8x8xf32> to vector<8x8x8xbf16>
    "tpu.trace_start"() <{level = 10 : i32, message = "bqk,bkd->bqd"}> : () -> ()
    %cst_33 = arith.constant dense<0.000000e+00> : vector<8x8x128xf32>
    %72 = tpu.matmul %71, %59, %cst_33 {dimension_numbers = #tpu.dot_dimension_numbers<[2], [1], [1], [2], [0, 0, 0, 1, 1, 2], [0], [0]>} : vector<8x8x8xbf16>, vector<8x8x128xbf16>, vector<8x8x128xf32> -> vector<8x8x128xf32>
    "tpu.trace_stop"() : () -> ()
    %73 = vector.shape_cast %72 : vector<8x8x128xf32> to vector<64x128xf32>
    %74 = arith.truncf %73 : vector<64x128xf32> to vector<64x128xbf16>
    %c0_34 = arith.constant 0 : index
    %c256_35 = arith.constant 256 : index
    %75 = vector.load %arg28[%c0_34, %c256_35] : memref<64x512xbf16, #tpu.memory_space<vmem>>, vector<64x128xbf16>
    tpu.vector_store %arg28[%c0_34, %c256_35], %74 {strides = array<i32>} : memref<64x512xbf16, #tpu.memory_space<vmem>>, vector<64x128xbf16>,
    %c0_36 = arith.constant 0 : index
    %c384 = arith.constant 384 : index
    %76 = vector.load %arg27[%c0_36, %c384] : memref<64x1536xbf16, #tpu.memory_space<vmem>>, vector<64x128xbf16>
    %77 = vector.shape_cast %76 : vector<64x128xbf16> to vector<8x8x128xbf16>
    %c0_37 = arith.constant 0 : index
    %c896 = arith.constant 896 : index
    %78 = vector.load %arg27[%c0_37, %c896] : memref<64x1536xbf16, #tpu.memory_space<vmem>>, vector<64x128xbf16>
    %79 = vector.shape_cast %78 : vector<64x128xbf16> to vector<8x8x128xbf16>
    %c0_38 = arith.constant 0 : index
    %c1408 = arith.constant 1408 : index
    %80 = vector.load %arg27[%c0_38, %c1408] : memref<64x1536xbf16, #tpu.memory_space<vmem>>, vector<64x128xbf16>
    %81 = vector.shape_cast %80 : vector<64x128xbf16> to vector<8x8x128xbf16>
    "tpu.trace_start"() <{level = 10 : i32, message = "bqd,bkd->bqk"}> : () -> ()
    %cst_39 = arith.constant dense<0.000000e+00> : vector<8x8x8xf32>
    %82 = tpu.matmul %77, %79, %cst_39 {dimension_numbers = #tpu.dot_dimension_numbers<[2], [2], [1], [1], [0, 0, 0, 1, 1, 1], [0], [0]>} : vector<8x8x128xbf16>, vector<8x8x128xbf16>, vector<8x8x8xf32> -> vector<8x8x8xf32>
    "tpu.trace_stop"() : () -> ()
    %cst_40 = arith.constant dense<0xFF800000> : vector<8x8xf32>
    %83 = vector.multi_reduction <maximumf>, %82, %cst_40 [2] : vector<8x8x8xf32> to vector<8x8xf32>
    %84 = vector.shape_cast %83 : vector<8x8xf32> to vector<8x8x1xf32>
    %85 = vector.broadcast %84 : vector<8x8x1xf32> to vector<8x8x8xf32>
    %86 = arith.subf %82, %85 : vector<8x8x8xf32>
    %87 = math.exp %86 : vector<8x8x8xf32>
    %cst_41 = arith.constant dense<0.000000e+00> : vector<8x8xf32>
    %88 = vector.multi_reduction <add>, %87, %cst_41 [2] : vector<8x8x8xf32> to vector<8x8xf32>
    %89 = vector.shape_cast %88 : vector<8x8xf32> to vector<8x8x1xf32>
    %90 = tpu.reciprocal %89 {approx = true} : vector<8x8x1xf32> -> vector<8x8x1xf32>
    %91 = vector.broadcast %90 : vector<8x8x1xf32> to vector<8x8x8xf32>
    %92 = arith.mulf %87, %91 : vector<8x8x8xf32>
    %93 = arith.truncf %92 : vector<8x8x8xf32> to vector<8x8x8xbf16>
    "tpu.trace_start"() <{level = 10 : i32, message = "bqk,bkd->bqd"}> : () -> ()
    %cst_42 = arith.constant dense<0.000000e+00> : vector<8x8x128xf32>
    %94 = tpu.matmul %93, %81, %cst_42 {dimension_numbers = #tpu.dot_dimension_numbers<[2], [1], [1], [2], [0, 0, 0, 1, 1, 2], [0], [0]>} : vector<8x8x8xbf16>, vector<8x8x128xbf16>, vector<8x8x128xf32> -> vector<8x8x128xf32>
    "tpu.trace_stop"() : () -> ()
    %95 = vector.shape_cast %94 : vector<8x8x128xf32> to vector<64x128xf32>
    %96 = arith.truncf %95 : vector<64x128xf32> to vector<64x128xbf16>
    %c0_43 = arith.constant 0 : index
    %c384_44 = arith.constant 384 : index
    %97 = vector.load %arg28[%c0_43, %c384_44] : memref<64x512xbf16, #tpu.memory_space<vmem>>, vector<64x128xbf16>
    tpu.vector_store %arg28[%c0_43, %c384_44], %96 {strides = array<i32>} : memref<64x512xbf16, #tpu.memory_space<vmem>>, vector<64x128xbf16>,
    %c0_45 = arith.constant 0 : index
    %c0_46 = arith.constant 0 : index
    %98 = vector.load %arg28[%c0_45, %c0_46] : memref<64x512xbf16, #tpu.memory_space<vmem>>, vector<64x512xbf16>
    %c0_47 = arith.constant 0 : index
    %c0_48 = arith.constant 0 : index
    %99 = vector.load %arg4[%c0_47, %c0_48] : memref<512x32xbf16, #tpu.memory_space<vmem>>, vector<512x32xbf16>
    %cst_49 = arith.constant dense<0.000000e+00> : vector<64x32xf32>
    %100 = tpu.matmul %98, %99, %cst_49 {dimension_numbers = #tpu.dot_dimension_numbers<[1], [0], [0], [1], [0, 0, 1, 1], [], []>} : vector<64x512xbf16>, vector<512x32xbf16>, vector<64x32xf32> -> vector<64x32xf32>
    %c0_50 = arith.constant 0 : index
    %c0_51 = arith.constant 0 : index
    %101 = vector.load %arg5[%c0_50, %c0_51] : memref<1x32xf32, #tpu.memory_space<vmem>>, vector<1x32xf32>
    %102 = vector.broadcast %101 : vector<1x32xf32> to vector<64x32xf32>
    %103 = arith.addf %100, %102 : vector<64x32xf32>
    %104 = arith.addf %1, %103 : vector<64x32xf32>
    %c0_52 = arith.constant 0 : index
    %c0_53 = arith.constant 0 : index
    %105 = vector.load %arg6[%c0_52, %c0_53] : memref<1x32xf32, #tpu.memory_space<vmem>>, vector<1x32xf32>
    %c0_54 = arith.constant 0 : index
    %c0_55 = arith.constant 0 : index
    %106 = vector.load %arg7[%c0_54, %c0_55] : memref<1x32xf32, #tpu.memory_space<vmem>>, vector<1x32xf32>
    %cst_56 = arith.constant dense<0.000000e+00> : vector<64xf32>
    %107 = vector.multi_reduction <add>, %104, %cst_56 [1] : vector<64x32xf32> to vector<64xf32>
    %108 = vector.shape_cast %107 : vector<64xf32> to vector<64x1xf32>
    %cst_57 = arith.constant 3.200000e+01 : f32
    %109 = vector.broadcast %cst_57 : f32 to vector<64x1xf32>
    %110 = arith.divf %108, %109 : vector<64x1xf32>
    %111 = vector.broadcast %110 : vector<64x1xf32> to vector<64x32xf32>
    %112 = arith.subf %104, %111 : vector<64x32xf32>
    %113 = arith.mulf %112, %112 : vector<64x32xf32>
    %cst_58 = arith.constant dense<0.000000e+00> : vector<64xf32>
    %114 = vector.multi_reduction <add>, %113, %cst_58 [1] : vector<64x32xf32> to vector<64xf32>
    %115 = vector.shape_cast %114 : vector<64xf32> to vector<64x1xf32>
    %cst_59 = arith.constant 3.200000e+01 : f32
    %116 = vector.broadcast %cst_59 : f32 to vector<64x1xf32>
    %117 = arith.divf %115, %116 : vector<64x1xf32>
    %118 = vector.broadcast %110 : vector<64x1xf32> to vector<64x32xf32>
    %119 = arith.subf %104, %118 : vector<64x32xf32>
    %cst_60 = arith.constant 9.99999974E-6 : f32
    %120 = vector.broadcast %cst_60 : f32 to vector<64x1xf32>
    %121 = arith.addf %117, %120 : vector<64x1xf32>
    %122 = math.rsqrt %121 : vector<64x1xf32>
    %123 = vector.broadcast %122 : vector<64x1xf32> to vector<64x32xf32>
    %124 = arith.mulf %119, %123 : vector<64x32xf32>
    %125 = vector.broadcast %105 : vector<1x32xf32> to vector<64x32xf32>
    %126 = arith.mulf %124, %125 : vector<64x32xf32>
    %127 = vector.broadcast %106 : vector<1x32xf32> to vector<64x32xf32>
    %128 = arith.addf %126, %127 : vector<64x32xf32>
    %129 = arith.truncf %128 : vector<64x32xf32> to vector<64x32xbf16>
    %c0_61 = arith.constant 0 : index
    %c0_62 = arith.constant 0 : index
    %130 = vector.load %arg8[%c0_61, %c0_62] : memref<32x128xbf16, #tpu.memory_space<vmem>>, vector<32x128xbf16>
    %cst_63 = arith.constant dense<0.000000e+00> : vector<64x128xf32>
    %131 = tpu.matmul %129, %130, %cst_63 {dimension_numbers = #tpu.dot_dimension_numbers<[1], [0], [0], [1], [0, 0, 1, 1], [], []>} : vector<64x32xbf16>, vector<32x128xbf16>, vector<64x128xf32> -> vector<64x128xf32>
    %c0_64 = arith.constant 0 : index
    %c0_65 = arith.constant 0 : index
    %132 = vector.load %arg9[%c0_64, %c0_65] : memref<1x128xf32, #tpu.memory_space<vmem>>, vector<1x128xf32>
    %133 = vector.broadcast %132 : vector<1x128xf32> to vector<64x128xf32>
    %134 = arith.addf %131, %133 : vector<64x128xf32>
    %cst_66 = arith.constant 0.000000e+00 : f32
    %135 = vector.broadcast %cst_66 : f32 to vector<64x128xf32>
    %136 = arith.maximumf %134, %135 : vector<64x128xf32>
    %137 = arith.truncf %136 : vector<64x128xf32> to vector<64x128xbf16>
    %c0_67 = arith.constant 0 : index
    %c0_68 = arith.constant 0 : index
    %138 = vector.load %arg10[%c0_67, %c0_68] : memref<128x32xbf16, #tpu.memory_space<vmem>>, vector<128x32xbf16>
    %cst_69 = arith.constant dense<0.000000e+00> : vector<64x32xf32>
    %139 = tpu.matmul %137, %138, %cst_69 {dimension_numbers = #tpu.dot_dimension_numbers<[1], [0], [0], [1], [0, 0, 1, 1], [], []>} : vector<64x128xbf16>, vector<128x32xbf16>, vector<64x32xf32> -> vector<64x32xf32>
    %c0_70 = arith.constant 0 : index
    %c0_71 = arith.constant 0 : index
    %140 = vector.load %arg11[%c0_70, %c0_71] : memref<1x32xf32, #tpu.memory_space<vmem>>, vector<1x32xf32>
    %141 = vector.broadcast %140 : vector<1x32xf32> to vector<64x32xf32>
    %142 = arith.addf %139, %141 : vector<64x32xf32>
    %143 = arith.addf %128, %142 : vector<64x32xf32>
    %c0_72 = arith.constant 0 : index
    %c0_73 = arith.constant 0 : index
    %144 = vector.load %arg12[%c0_72, %c0_73] : memref<1x32xf32, #tpu.memory_space<vmem>>, vector<1x32xf32>
    %c0_74 = arith.constant 0 : index
    %c0_75 = arith.constant 0 : index
    %145 = vector.load %arg13[%c0_74, %c0_75] : memref<1x32xf32, #tpu.memory_space<vmem>>, vector<1x32xf32>
    %cst_76 = arith.constant dense<0.000000e+00> : vector<64xf32>
    %146 = vector.multi_reduction <add>, %143, %cst_76 [1] : vector<64x32xf32> to vector<64xf32>
    %147 = vector.shape_cast %146 : vector<64xf32> to vector<64x1xf32>
    %cst_77 = arith.constant 3.200000e+01 : f32
    %148 = vector.broadcast %cst_77 : f32 to vector<64x1xf32>
    %149 = arith.divf %147, %148 : vector<64x1xf32>
    %150 = vector.broadcast %149 : vector<64x1xf32> to vector<64x32xf32>
    %151 = arith.subf %143, %150 : vector<64x32xf32>
    %152 = arith.mulf %151, %151 : vector<64x32xf32>
    %cst_78 = arith.constant dense<0.000000e+00> : vector<64xf32>
    %153 = vector.multi_reduction <add>, %152, %cst_78 [1] : vector<64x32xf32> to vector<64xf32>
    %154 = vector.shape_cast %153 : vector<64xf32> to vector<64x1xf32>
    %cst_79 = arith.constant 3.200000e+01 : f32
    %155 = vector.broadcast %cst_79 : f32 to vector<64x1xf32>
    %156 = arith.divf %154, %155 : vector<64x1xf32>
    %157 = vector.broadcast %149 : vector<64x1xf32> to vector<64x32xf32>
    %158 = arith.subf %143, %157 : vector<64x32xf32>
    %cst_80 = arith.constant 9.99999974E-6 : f32
    %159 = vector.broadcast %cst_80 : f32 to vector<64x1xf32>
    %160 = arith.addf %156, %159 : vector<64x1xf32>
    %161 = math.rsqrt %160 : vector<64x1xf32>
    %162 = vector.broadcast %161 : vector<64x1xf32> to vector<64x32xf32>
    %163 = arith.mulf %158, %162 : vector<64x32xf32>
    %164 = vector.broadcast %144 : vector<1x32xf32> to vector<64x32xf32>
    %165 = arith.mulf %163, %164 : vector<64x32xf32>
    %166 = vector.broadcast %145 : vector<1x32xf32> to vector<64x32xf32>
    %167 = arith.addf %165, %166 : vector<64x32xf32>
    %c0_81 = arith.constant 0 : index
    %c0_82 = arith.constant 0 : index
    %c0_83 = arith.constant 0 : index
    %168 = vector.load %arg1[%c0_81, %c0_82, %c0_83] : memref<8x8x64xf32, #tpu.memory_space<vmem>>, vector<1x8x64xf32>
    %169 = vector.shape_cast %168 : vector<1x8x64xf32> to vector<8x64xf32>
    %cst_84 = arith.constant dense<0.000000e+00> : vector<8x32xf32>
    %170 = tpu.matmul %169, %167, %cst_84 {dimension_numbers = #tpu.dot_dimension_numbers<[1], [0], [0], [1], [0, 0, 1, 1], [], []>} : vector<8x64xf32>, vector<64x32xf32>, vector<8x32xf32> -> vector<8x32xf32>
    %c0_85 = arith.constant 0 : index
    %c0_86 = arith.constant 0 : index
    %171 = vector.load %arg29[%c0_85, %c0_86] : memref<8x256xf32, #tpu.memory_space<vmem>>, vector<8x32xf32>
    tpu.vector_store %arg29[%c0_85, %c0_86], %170 {strides = array<i32>} : memref<8x256xf32, #tpu.memory_space<vmem>>, vector<8x32xf32>,
    %c1 = arith.constant 1 : index
    %c0_87 = arith.constant 0 : index
    %c0_88 = arith.constant 0 : index
    %172 = vector.load %arg1[%c1, %c0_87, %c0_88] : memref<8x8x64xf32, #tpu.memory_space<vmem>>, vector<1x8x64xf32>
    %173 = vector.shape_cast %172 : vector<1x8x64xf32> to vector<8x64xf32>
    %cst_89 = arith.constant dense<0.000000e+00> : vector<8x32xf32>
    %174 = tpu.matmul %173, %167, %cst_89 {dimension_numbers = #tpu.dot_dimension_numbers<[1], [0], [0], [1], [0, 0, 1, 1], [], []>} : vector<8x64xf32>, vector<64x32xf32>, vector<8x32xf32> -> vector<8x32xf32>
    %c0_90 = arith.constant 0 : index
    %c32 = arith.constant 32 : index
    %175 = vector.load %arg29[%c0_90, %c32] : memref<8x256xf32, #tpu.memory_space<vmem>>, vector<8x32xf32>
    tpu.vector_store %arg29[%c0_90, %c32], %174 {strides = array<i32>} : memref<8x256xf32, #tpu.memory_space<vmem>>, vector<8x32xf32>,
    %c2 = arith.constant 2 : index
    %c0_91 = arith.constant 0 : index
    %c0_92 = arith.constant 0 : index
    %176 = vector.load %arg1[%c2, %c0_91, %c0_92] : memref<8x8x64xf32, #tpu.memory_space<vmem>>, vector<1x8x64xf32>
    %177 = vector.shape_cast %176 : vector<1x8x64xf32> to vector<8x64xf32>
    %cst_93 = arith.constant dense<0.000000e+00> : vector<8x32xf32>
    %178 = tpu.matmul %177, %167, %cst_93 {dimension_numbers = #tpu.dot_dimension_numbers<[1], [0], [0], [1], [0, 0, 1, 1], [], []>} : vector<8x64xf32>, vector<64x32xf32>, vector<8x32xf32> -> vector<8x32xf32>
    %c0_94 = arith.constant 0 : index
    %c64 = arith.constant 64 : index
    %179 = vector.load %arg29[%c0_94, %c64] : memref<8x256xf32, #tpu.memory_space<vmem>>, vector<8x32xf32>
    tpu.vector_store %arg29[%c0_94, %c64], %178 {strides = array<i32>} : memref<8x256xf32, #tpu.memory_space<vmem>>, vector<8x32xf32>,
    %c3 = arith.constant 3 : index
    %c0_95 = arith.constant 0 : index
    %c0_96 = arith.constant 0 : index
    %180 = vector.load %arg1[%c3, %c0_95, %c0_96] : memref<8x8x64xf32, #tpu.memory_space<vmem>>, vector<1x8x64xf32>
    %181 = vector.shape_cast %180 : vector<1x8x64xf32> to vector<8x64xf32>
    %cst_97 = arith.constant dense<0.000000e+00> : vector<8x32xf32>
    %182 = tpu.matmul %181, %167, %cst_97 {dimension_numbers = #tpu.dot_dimension_numbers<[1], [0], [0], [1], [0, 0, 1, 1], [], []>} : vector<8x64xf32>, vector<64x32xf32>, vector<8x32xf32> -> vector<8x32xf32>
    %c0_98 = arith.constant 0 : index
    %c96 = arith.constant 96 : index
    %183 = vector.load %arg29[%c0_98, %c96] : memref<8x256xf32, #tpu.memory_space<vmem>>, vector<8x32xf32>
    tpu.vector_store %arg29[%c0_98, %c96], %182 {strides = array<i32>} : memref<8x256xf32, #tpu.memory_space<vmem>>, vector<8x32xf32>,
    %c4 = arith.constant 4 : index
    %c0_99 = arith.constant 0 : index
    %c0_100 = arith.constant 0 : index
    %184 = vector.load %arg1[%c4, %c0_99, %c0_100] : memref<8x8x64xf32, #tpu.memory_space<vmem>>, vector<1x8x64xf32>
    %185 = vector.shape_cast %184 : vector<1x8x64xf32> to vector<8x64xf32>
    %cst_101 = arith.constant dense<0.000000e+00> : vector<8x32xf32>
    %186 = tpu.matmul %185, %167, %cst_101 {dimension_numbers = #tpu.dot_dimension_numbers<[1], [0], [0], [1], [0, 0, 1, 1], [], []>} : vector<8x64xf32>, vector<64x32xf32>, vector<8x32xf32> -> vector<8x32xf32>
    %c0_102 = arith.constant 0 : index
    %c128_103 = arith.constant 128 : index
    %187 = vector.load %arg29[%c0_102, %c128_103] : memref<8x256xf32, #tpu.memory_space<vmem>>, vector<8x32xf32>
    tpu.vector_store %arg29[%c0_102, %c128_103], %186 {strides = array<i32>} : memref<8x256xf32, #tpu.memory_space<vmem>>, vector<8x32xf32>,
    %c5 = arith.constant 5 : index
    %c0_104 = arith.constant 0 : index
    %c0_105 = arith.constant 0 : index
    %188 = vector.load %arg1[%c5, %c0_104, %c0_105] : memref<8x8x64xf32, #tpu.memory_space<vmem>>, vector<1x8x64xf32>
    %189 = vector.shape_cast %188 : vector<1x8x64xf32> to vector<8x64xf32>
    %cst_106 = arith.constant dense<0.000000e+00> : vector<8x32xf32>
    %190 = tpu.matmul %189, %167, %cst_106 {dimension_numbers = #tpu.dot_dimension_numbers<[1], [0], [0], [1], [0, 0, 1, 1], [], []>} : vector<8x64xf32>, vector<64x32xf32>, vector<8x32xf32> -> vector<8x32xf32>
    %c0_107 = arith.constant 0 : index
    %c160 = arith.constant 160 : index
    %191 = vector.load %arg29[%c0_107, %c160] : memref<8x256xf32, #tpu.memory_space<vmem>>, vector<8x32xf32>
    tpu.vector_store %arg29[%c0_107, %c160], %190 {strides = array<i32>} : memref<8x256xf32, #tpu.memory_space<vmem>>, vector<8x32xf32>,
    %c6 = arith.constant 6 : index
    %c0_108 = arith.constant 0 : index
    %c0_109 = arith.constant 0 : index
    %192 = vector.load %arg1[%c6, %c0_108, %c0_109] : memref<8x8x64xf32, #tpu.memory_space<vmem>>, vector<1x8x64xf32>
    %193 = vector.shape_cast %192 : vector<1x8x64xf32> to vector<8x64xf32>
    %cst_110 = arith.constant dense<0.000000e+00> : vector<8x32xf32>
    %194 = tpu.matmul %193, %167, %cst_110 {dimension_numbers = #tpu.dot_dimension_numbers<[1], [0], [0], [1], [0, 0, 1, 1], [], []>} : vector<8x64xf32>, vector<64x32xf32>, vector<8x32xf32> -> vector<8x32xf32>
    %c0_111 = arith.constant 0 : index
    %c192 = arith.constant 192 : index
    %195 = vector.load %arg29[%c0_111, %c192] : memref<8x256xf32, #tpu.memory_space<vmem>>, vector<8x32xf32>
    tpu.vector_store %arg29[%c0_111, %c192], %194 {strides = array<i32>} : memref<8x256xf32, #tpu.memory_space<vmem>>, vector<8x32xf32>,
    %c7 = arith.constant 7 : index
    %c0_112 = arith.constant 0 : index
    %c0_113 = arith.constant 0 : index
    %196 = vector.load %arg1[%c7, %c0_112, %c0_113] : memref<8x8x64xf32, #tpu.memory_space<vmem>>, vector<1x8x64xf32>
    %197 = vector.shape_cast %196 : vector<1x8x64xf32> to vector<8x64xf32>
    %cst_114 = arith.constant dense<0.000000e+00> : vector<8x32xf32>
    %198 = tpu.matmul %197, %167, %cst_114 {dimension_numbers = #tpu.dot_dimension_numbers<[1], [0], [0], [1], [0, 0, 1, 1], [], []>} : vector<8x64xf32>, vector<64x32xf32>, vector<8x32xf32> -> vector<8x32xf32>
    %c0_115 = arith.constant 0 : index
    %c224 = arith.constant 224 : index
    %199 = vector.load %arg29[%c0_115, %c224] : memref<8x256xf32, #tpu.memory_space<vmem>>, vector<8x32xf32>
    tpu.vector_store %arg29[%c0_115, %c224], %198 {strides = array<i32>} : memref<8x256xf32, #tpu.memory_space<vmem>>, vector<8x32xf32>,
    %c0_116 = arith.constant 0 : index
    %c0_117 = arith.constant 0 : index
    %200 = vector.load %arg29[%c0_116, %c0_117] : memref<8x256xf32, #tpu.memory_space<vmem>>, vector<8x256xf32>
    %201 = arith.truncf %200 : vector<8x256xf32> to vector<8x256xbf16>
    %c0_118 = arith.constant 0 : index
    %c0_119 = arith.constant 0 : index
    %202 = vector.load %arg14[%c0_118, %c0_119] : memref<256x1536xbf16, #tpu.memory_space<vmem>>, vector<256x1536xbf16>
    %cst_120 = arith.constant dense<0.000000e+00> : vector<8x1536xf32>
    %203 = tpu.matmul %201, %202, %cst_120 {dimension_numbers = #tpu.dot_dimension_numbers<[1], [0], [0], [1], [0, 0, 1, 1], [], []>} : vector<8x256xbf16>, vector<256x1536xbf16>, vector<8x1536xf32> -> vector<8x1536xf32>
    %c0_121 = arith.constant 0 : index
    %c0_122 = arith.constant 0 : index
    %204 = vector.load %arg15[%c0_121, %c0_122] : memref<1x1536xf32, #tpu.memory_space<vmem>>, vector<1x1536xf32>
    %205 = vector.broadcast %204 : vector<1x1536xf32> to vector<8x1536xf32>
    %206 = arith.addf %203, %205 : vector<8x1536xf32>
    %207 = arith.truncf %206 : vector<8x1536xf32> to vector<8x1536xbf16>
    %c0_123 = arith.constant 0 : index
    %c0_124 = arith.constant 0 : index
    %208 = vector.load %arg30[%c0_123, %c0_124] : memref<8x1536xbf16, #tpu.memory_space<vmem>>, vector<8x1536xbf16>
    tpu.vector_store %arg30[%c0_123, %c0_124], %207 {strides = array<i32>} : memref<8x1536xbf16, #tpu.memory_space<vmem>>, vector<8x1536xbf16>,
    %c0_125 = arith.constant 0 : index
    %c0_126 = arith.constant 0 : index
    %209 = vector.load %arg30[%c0_125, %c0_126] : memref<8x1536xbf16, #tpu.memory_space<vmem>>, vector<8x128xbf16>
    %210 = vector.shape_cast %209 : vector<8x128xbf16> to vector<1x8x128xbf16>
    %c0_127 = arith.constant 0 : index
    %c512_128 = arith.constant 512 : index
    %211 = vector.load %arg30[%c0_127, %c512_128] : memref<8x1536xbf16, #tpu.memory_space<vmem>>, vector<8x128xbf16>
    %212 = vector.shape_cast %211 : vector<8x128xbf16> to vector<1x8x128xbf16>
    %c0_129 = arith.constant 0 : index
    %c1024_130 = arith.constant 1024 : index
    %213 = vector.load %arg30[%c0_129, %c1024_130] : memref<8x1536xbf16, #tpu.memory_space<vmem>>, vector<8x128xbf16>
    %214 = vector.shape_cast %213 : vector<8x128xbf16> to vector<1x8x128xbf16>
    "tpu.trace_start"() <{level = 10 : i32, message = "bqd,bkd->bqk"}> : () -> ()
    %cst_131 = arith.constant dense<0.000000e+00> : vector<1x8x8xf32>
    %215 = tpu.matmul %210, %212, %cst_131 {dimension_numbers = #tpu.dot_dimension_numbers<[2], [2], [1], [1], [0, 0, 0, 1, 1, 1], [0], [0]>} : vector<1x8x128xbf16>, vector<1x8x128xbf16>, vector<1x8x8xf32> -> vector<1x8x8xf32>
    "tpu.trace_stop"() : () -> ()
    %cst_132 = arith.constant dense<0xFF800000> : vector<1x8xf32>
    %216 = vector.multi_reduction <maximumf>, %215, %cst_132 [2] : vector<1x8x8xf32> to vector<1x8xf32>
    %217 = vector.shape_cast %216 : vector<1x8xf32> to vector<1x8x1xf32>
    %218 = vector.broadcast %217 : vector<1x8x1xf32> to vector<1x8x8xf32>
    %219 = arith.subf %215, %218 : vector<1x8x8xf32>
    %220 = math.exp %219 : vector<1x8x8xf32>
    %cst_133 = arith.constant dense<0.000000e+00> : vector<1x8xf32>
    %221 = vector.multi_reduction <add>, %220, %cst_133 [2] : vector<1x8x8xf32> to vector<1x8xf32>
    %222 = vector.shape_cast %221 : vector<1x8xf32> to vector<1x8x1xf32>
    %223 = tpu.reciprocal %222 {approx = true} : vector<1x8x1xf32> -> vector<1x8x1xf32>
    %224 = vector.broadcast %223 : vector<1x8x1xf32> to vector<1x8x8xf32>
    %225 = arith.mulf %220, %224 : vector<1x8x8xf32>
    %226 = arith.truncf %225 : vector<1x8x8xf32> to vector<1x8x8xbf16>
    "tpu.trace_start"() <{level = 10 : i32, message = "bqk,bkd->bqd"}> : () -> ()
    %cst_134 = arith.constant dense<0.000000e+00> : vector<1x8x128xf32>
    %227 = tpu.matmul %226, %214, %cst_134 {dimension_numbers = #tpu.dot_dimension_numbers<[2], [1], [1], [2], [0, 0, 0, 1, 1, 2], [0], [0]>} : vector<1x8x8xbf16>, vector<1x8x128xbf16>, vector<1x8x128xf32> -> vector<1x8x128xf32>
    "tpu.trace_stop"() : () -> ()
    %228 = vector.shape_cast %227 : vector<1x8x128xf32> to vector<8x128xf32>
    %229 = arith.truncf %228 : vector<8x128xf32> to vector<8x128xbf16>
    %c0_135 = arith.constant 0 : index
    %c0_136 = arith.constant 0 : index
    %230 = vector.load %arg31[%c0_135, %c0_136] : memref<8x512xbf16, #tpu.memory_space<vmem>>, vector<8x128xbf16>
    tpu.vector_store %arg31[%c0_135, %c0_136], %229 {strides = array<i32>} : memref<8x512xbf16, #tpu.memory_space<vmem>>, vector<8x128xbf16>,
    %c0_137 = arith.constant 0 : index
    %c128_138 = arith.constant 128 : index
    %231 = vector.load %arg30[%c0_137, %c128_138] : memref<8x1536xbf16, #tpu.memory_space<vmem>>, vector<8x128xbf16>
    %232 = vector.shape_cast %231 : vector<8x128xbf16> to vector<1x8x128xbf16>
    %c0_139 = arith.constant 0 : index
    %c640_140 = arith.constant 640 : index
    %233 = vector.load %arg30[%c0_139, %c640_140] : memref<8x1536xbf16, #tpu.memory_space<vmem>>, vector<8x128xbf16>
    %234 = vector.shape_cast %233 : vector<8x128xbf16> to vector<1x8x128xbf16>
    %c0_141 = arith.constant 0 : index
    %c1152_142 = arith.constant 1152 : index
    %235 = vector.load %arg30[%c0_141, %c1152_142] : memref<8x1536xbf16, #tpu.memory_space<vmem>>, vector<8x128xbf16>
    %236 = vector.shape_cast %235 : vector<8x128xbf16> to vector<1x8x128xbf16>
    "tpu.trace_start"() <{level = 10 : i32, message = "bqd,bkd->bqk"}> : () -> ()
    %cst_143 = arith.constant dense<0.000000e+00> : vector<1x8x8xf32>
    %237 = tpu.matmul %232, %234, %cst_143 {dimension_numbers = #tpu.dot_dimension_numbers<[2], [2], [1], [1], [0, 0, 0, 1, 1, 1], [0], [0]>} : vector<1x8x128xbf16>, vector<1x8x128xbf16>, vector<1x8x8xf32> -> vector<1x8x8xf32>
    "tpu.trace_stop"() : () -> ()
    %cst_144 = arith.constant dense<0xFF800000> : vector<1x8xf32>
    %238 = vector.multi_reduction <maximumf>, %237, %cst_144 [2] : vector<1x8x8xf32> to vector<1x8xf32>
    %239 = vector.shape_cast %238 : vector<1x8xf32> to vector<1x8x1xf32>
    %240 = vector.broadcast %239 : vector<1x8x1xf32> to vector<1x8x8xf32>
    %241 = arith.subf %237, %240 : vector<1x8x8xf32>
    %242 = math.exp %241 : vector<1x8x8xf32>
    %cst_145 = arith.constant dense<0.000000e+00> : vector<1x8xf32>
    %243 = vector.multi_reduction <add>, %242, %cst_145 [2] : vector<1x8x8xf32> to vector<1x8xf32>
    %244 = vector.shape_cast %243 : vector<1x8xf32> to vector<1x8x1xf32>
    %245 = tpu.reciprocal %244 {approx = true} : vector<1x8x1xf32> -> vector<1x8x1xf32>
    %246 = vector.broadcast %245 : vector<1x8x1xf32> to vector<1x8x8xf32>
    %247 = arith.mulf %242, %246 : vector<1x8x8xf32>
    %248 = arith.truncf %247 : vector<1x8x8xf32> to vector<1x8x8xbf16>
    "tpu.trace_start"() <{level = 10 : i32, message = "bqk,bkd->bqd"}> : () -> ()
    %cst_146 = arith.constant dense<0.000000e+00> : vector<1x8x128xf32>
    %249 = tpu.matmul %248, %236, %cst_146 {dimension_numbers = #tpu.dot_dimension_numbers<[2], [1], [1], [2], [0, 0, 0, 1, 1, 2], [0], [0]>} : vector<1x8x8xbf16>, vector<1x8x128xbf16>, vector<1x8x128xf32> -> vector<1x8x128xf32>
    "tpu.trace_stop"() : () -> ()
    %250 = vector.shape_cast %249 : vector<1x8x128xf32> to vector<8x128xf32>
    %251 = arith.truncf %250 : vector<8x128xf32> to vector<8x128xbf16>
    %c0_147 = arith.constant 0 : index
    %c128_148 = arith.constant 128 : index
    %252 = vector.load %arg31[%c0_147, %c128_148] : memref<8x512xbf16, #tpu.memory_space<vmem>>, vector<8x128xbf16>
    tpu.vector_store %arg31[%c0_147, %c128_148], %251 {strides = array<i32>} : memref<8x512xbf16, #tpu.memory_space<vmem>>, vector<8x128xbf16>,
    %c0_149 = arith.constant 0 : index
    %c256_150 = arith.constant 256 : index
    %253 = vector.load %arg30[%c0_149, %c256_150] : memref<8x1536xbf16, #tpu.memory_space<vmem>>, vector<8x128xbf16>
    %254 = vector.shape_cast %253 : vector<8x128xbf16> to vector<1x8x128xbf16>
    %c0_151 = arith.constant 0 : index
    %c768_152 = arith.constant 768 : index
    %255 = vector.load %arg30[%c0_151, %c768_152] : memref<8x1536xbf16, #tpu.memory_space<vmem>>, vector<8x128xbf16>
    %256 = vector.shape_cast %255 : vector<8x128xbf16> to vector<1x8x128xbf16>
    %c0_153 = arith.constant 0 : index
    %c1280_154 = arith.constant 1280 : index
    %257 = vector.load %arg30[%c0_153, %c1280_154] : memref<8x1536xbf16, #tpu.memory_space<vmem>>, vector<8x128xbf16>
    %258 = vector.shape_cast %257 : vector<8x128xbf16> to vector<1x8x128xbf16>
    "tpu.trace_start"() <{level = 10 : i32, message = "bqd,bkd->bqk"}> : () -> ()
    %cst_155 = arith.constant dense<0.000000e+00> : vector<1x8x8xf32>
    %259 = tpu.matmul %254, %256, %cst_155 {dimension_numbers = #tpu.dot_dimension_numbers<[2], [2], [1], [1], [0, 0, 0, 1, 1, 1], [0], [0]>} : vector<1x8x128xbf16>, vector<1x8x128xbf16>, vector<1x8x8xf32> -> vector<1x8x8xf32>
    "tpu.trace_stop"() : () -> ()
    %cst_156 = arith.constant dense<0xFF800000> : vector<1x8xf32>
    %260 = vector.multi_reduction <maximumf>, %259, %cst_156 [2] : vector<1x8x8xf32> to vector<1x8xf32>
    %261 = vector.shape_cast %260 : vector<1x8xf32> to vector<1x8x1xf32>
    %262 = vector.broadcast %261 : vector<1x8x1xf32> to vector<1x8x8xf32>
    %263 = arith.subf %259, %262 : vector<1x8x8xf32>
    %264 = math.exp %263 : vector<1x8x8xf32>
    %cst_157 = arith.constant dense<0.000000e+00> : vector<1x8xf32>
    %265 = vector.multi_reduction <add>, %264, %cst_157 [2] : vector<1x8x8xf32> to vector<1x8xf32>
    %266 = vector.shape_cast %265 : vector<1x8xf32> to vector<1x8x1xf32>
    %267 = tpu.reciprocal %266 {approx = true} : vector<1x8x1xf32> -> vector<1x8x1xf32>
    %268 = vector.broadcast %267 : vector<1x8x1xf32> to vector<1x8x8xf32>
    %269 = arith.mulf %264, %268 : vector<1x8x8xf32>
    %270 = arith.truncf %269 : vector<1x8x8xf32> to vector<1x8x8xbf16>
    "tpu.trace_start"() <{level = 10 : i32, message = "bqk,bkd->bqd"}> : () -> ()
    %cst_158 = arith.constant dense<0.000000e+00> : vector<1x8x128xf32>
    %271 = tpu.matmul %270, %258, %cst_158 {dimension_numbers = #tpu.dot_dimension_numbers<[2], [1], [1], [2], [0, 0, 0, 1, 1, 2], [0], [0]>} : vector<1x8x8xbf16>, vector<1x8x128xbf16>, vector<1x8x128xf32> -> vector<1x8x128xf32>
    "tpu.trace_stop"() : () -> ()
    %272 = vector.shape_cast %271 : vector<1x8x128xf32> to vector<8x128xf32>
    %273 = arith.truncf %272 : vector<8x128xf32> to vector<8x128xbf16>
    %c0_159 = arith.constant 0 : index
    %c256_160 = arith.constant 256 : index
    %274 = vector.load %arg31[%c0_159, %c256_160] : memref<8x512xbf16, #tpu.memory_space<vmem>>, vector<8x128xbf16>
    tpu.vector_store %arg31[%c0_159, %c256_160], %273 {strides = array<i32>} : memref<8x512xbf16, #tpu.memory_space<vmem>>, vector<8x128xbf16>,
    %c0_161 = arith.constant 0 : index
    %c384_162 = arith.constant 384 : index
    %275 = vector.load %arg30[%c0_161, %c384_162] : memref<8x1536xbf16, #tpu.memory_space<vmem>>, vector<8x128xbf16>
    %276 = vector.shape_cast %275 : vector<8x128xbf16> to vector<1x8x128xbf16>
    %c0_163 = arith.constant 0 : index
    %c896_164 = arith.constant 896 : index
    %277 = vector.load %arg30[%c0_163, %c896_164] : memref<8x1536xbf16, #tpu.memory_space<vmem>>, vector<8x128xbf16>
    %278 = vector.shape_cast %277 : vector<8x128xbf16> to vector<1x8x128xbf16>
    %c0_165 = arith.constant 0 : index
    %c1408_166 = arith.constant 1408 : index
    %279 = vector.load %arg30[%c0_165, %c1408_166] : memref<8x1536xbf16, #tpu.memory_space<vmem>>, vector<8x128xbf16>
    %280 = vector.shape_cast %279 : vector<8x128xbf16> to vector<1x8x128xbf16>
    "tpu.trace_start"() <{level = 10 : i32, message = "bqd,bkd->bqk"}> : () -> ()
    %cst_167 = arith.constant dense<0.000000e+00> : vector<1x8x8xf32>
    %281 = tpu.matmul %276, %278, %cst_167 {dimension_numbers = #tpu.dot_dimension_numbers<[2], [2], [1], [1], [0, 0, 0, 1, 1, 1], [0], [0]>} : vector<1x8x128xbf16>, vector<1x8x128xbf16>, vector<1x8x8xf32> -> vector<1x8x8xf32>
    "tpu.trace_stop"() : () -> ()
    %cst_168 = arith.constant dense<0xFF800000> : vector<1x8xf32>
    %282 = vector.multi_reduction <maximumf>, %281, %cst_168 [2] : vector<1x8x8xf32> to vector<1x8xf32>
    %283 = vector.shape_cast %282 : vector<1x8xf32> to vector<1x8x1xf32>
    %284 = vector.broadcast %283 : vector<1x8x1xf32> to vector<1x8x8xf32>
    %285 = arith.subf %281, %284 : vector<1x8x8xf32>
    %286 = math.exp %285 : vector<1x8x8xf32>
    %cst_169 = arith.constant dense<0.000000e+00> : vector<1x8xf32>
    %287 = vector.multi_reduction <add>, %286, %cst_169 [2] : vector<1x8x8xf32> to vector<1x8xf32>
    %288 = vector.shape_cast %287 : vector<1x8xf32> to vector<1x8x1xf32>
    %289 = tpu.reciprocal %288 {approx = true} : vector<1x8x1xf32> -> vector<1x8x1xf32>
    %290 = vector.broadcast %289 : vector<1x8x1xf32> to vector<1x8x8xf32>
    %291 = arith.mulf %286, %290 : vector<1x8x8xf32>
    %292 = arith.truncf %291 : vector<1x8x8xf32> to vector<1x8x8xbf16>
    "tpu.trace_start"() <{level = 10 : i32, message = "bqk,bkd->bqd"}> : () -> ()
    %cst_170 = arith.constant dense<0.000000e+00> : vector<1x8x128xf32>
    %293 = tpu.matmul %292, %280, %cst_170 {dimension_numbers = #tpu.dot_dimension_numbers<[2], [1], [1], [2], [0, 0, 0, 1, 1, 2], [0], [0]>} : vector<1x8x8xbf16>, vector<1x8x128xbf16>, vector<1x8x128xf32> -> vector<1x8x128xf32>
    "tpu.trace_stop"() : () -> ()
    %294 = vector.shape_cast %293 : vector<1x8x128xf32> to vector<8x128xf32>
    %295 = arith.truncf %294 : vector<8x128xf32> to vector<8x128xbf16>
    %c0_171 = arith.constant 0 : index
    %c384_172 = arith.constant 384 : index
    %296 = vector.load %arg31[%c0_171, %c384_172] : memref<8x512xbf16, #tpu.memory_space<vmem>>, vector<8x128xbf16>
    tpu.vector_store %arg31[%c0_171, %c384_172], %295 {strides = array<i32>} : memref<8x512xbf16, #tpu.memory_space<vmem>>, vector<8x128xbf16>,
    %c0_173 = arith.constant 0 : index
    %c0_174 = arith.constant 0 : index
    %297 = vector.load %arg31[%c0_173, %c0_174] : memref<8x512xbf16, #tpu.memory_space<vmem>>, vector<8x512xbf16>
    %c0_175 = arith.constant 0 : index
    %c0_176 = arith.constant 0 : index
    %298 = vector.load %arg16[%c0_175, %c0_176] : memref<512x256xbf16, #tpu.memory_space<vmem>>, vector<512x256xbf16>
    %cst_177 = arith.constant dense<0.000000e+00> : vector<8x256xf32>
    %299 = tpu.matmul %297, %298, %cst_177 {dimension_numbers = #tpu.dot_dimension_numbers<[1], [0], [0], [1], [0, 0, 1, 1], [], []>} : vector<8x512xbf16>, vector<512x256xbf16>, vector<8x256xf32> -> vector<8x256xf32>
    %c0_178 = arith.constant 0 : index
    %c0_179 = arith.constant 0 : index
    %300 = vector.load %arg17[%c0_178, %c0_179] : memref<1x256xf32, #tpu.memory_space<vmem>>, vector<1x256xf32>
    %301 = vector.broadcast %300 : vector<1x256xf32> to vector<8x256xf32>
    %302 = arith.addf %299, %301 : vector<8x256xf32>
    %303 = arith.addf %200, %302 : vector<8x256xf32>
    %c0_180 = arith.constant 0 : index
    %c0_181 = arith.constant 0 : index
    %304 = vector.load %arg18[%c0_180, %c0_181] : memref<1x256xf32, #tpu.memory_space<vmem>>, vector<1x256xf32>
    %c0_182 = arith.constant 0 : index
    %c0_183 = arith.constant 0 : index
    %305 = vector.load %arg19[%c0_182, %c0_183] : memref<1x256xf32, #tpu.memory_space<vmem>>, vector<1x256xf32>
    %cst_184 = arith.constant dense<0.000000e+00> : vector<8xf32>
    %306 = vector.multi_reduction <add>, %303, %cst_184 [1] : vector<8x256xf32> to vector<8xf32>
    %307 = vector.shape_cast %306 : vector<8xf32> to vector<8x1xf32>
    %cst_185 = arith.constant 2.560000e+02 : f32
    %308 = vector.broadcast %cst_185 : f32 to vector<8x1xf32>
    %309 = arith.divf %307, %308 : vector<8x1xf32>
    %310 = vector.broadcast %309 : vector<8x1xf32> to vector<8x256xf32>
    %311 = arith.subf %303, %310 : vector<8x256xf32>
    %312 = arith.mulf %311, %311 : vector<8x256xf32>
    %cst_186 = arith.constant dense<0.000000e+00> : vector<8xf32>
    %313 = vector.multi_reduction <add>, %312, %cst_186 [1] : vector<8x256xf32> to vector<8xf32>
    %314 = vector.shape_cast %313 : vector<8xf32> to vector<8x1xf32>
    %cst_187 = arith.constant 2.560000e+02 : f32
    %315 = vector.broadcast %cst_187 : f32 to vector<8x1xf32>
    %316 = arith.divf %314, %315 : vector<8x1xf32>
    %317 = vector.broadcast %309 : vector<8x1xf32> to vector<8x256xf32>
    %318 = arith.subf %303, %317 : vector<8x256xf32>
    %cst_188 = arith.constant 9.99999974E-6 : f32
    %319 = vector.broadcast %cst_188 : f32 to vector<8x1xf32>
    %320 = arith.addf %316, %319 : vector<8x1xf32>
    %321 = math.rsqrt %320 : vector<8x1xf32>
    %322 = vector.broadcast %321 : vector<8x1xf32> to vector<8x256xf32>
    %323 = arith.mulf %318, %322 : vector<8x256xf32>
    %324 = vector.broadcast %304 : vector<1x256xf32> to vector<8x256xf32>
    %325 = arith.mulf %323, %324 : vector<8x256xf32>
    %326 = vector.broadcast %305 : vector<1x256xf32> to vector<8x256xf32>
    %327 = arith.addf %325, %326 : vector<8x256xf32>
    %328 = arith.truncf %327 : vector<8x256xf32> to vector<8x256xbf16>
    %c0_189 = arith.constant 0 : index
    %c0_190 = arith.constant 0 : index
    %329 = vector.load %arg20[%c0_189, %c0_190] : memref<256x512xbf16, #tpu.memory_space<vmem>>, vector<256x512xbf16>
    %cst_191 = arith.constant dense<0.000000e+00> : vector<8x512xf32>
    %330 = tpu.matmul %328, %329, %cst_191 {dimension_numbers = #tpu.dot_dimension_numbers<[1], [0], [0], [1], [0, 0, 1, 1], [], []>} : vector<8x256xbf16>, vector<256x512xbf16>, vector<8x512xf32> -> vector<8x512xf32>
    %c0_192 = arith.constant 0 : index
    %c0_193 = arith.constant 0 : index
    %331 = vector.load %arg21[%c0_192, %c0_193] : memref<1x512xf32, #tpu.memory_space<vmem>>, vector<1x512xf32>
    %332 = vector.broadcast %331 : vector<1x512xf32> to vector<8x512xf32>
    %333 = arith.addf %330, %332 : vector<8x512xf32>
    %cst_194 = arith.constant 0.000000e+00 : f32
    %334 = vector.broadcast %cst_194 : f32 to vector<8x512xf32>
    %335 = arith.maximumf %333, %334 : vector<8x512xf32>
    %336 = arith.truncf %335 : vector<8x512xf32> to vector<8x512xbf16>
    %c0_195 = arith.constant 0 : index
    %c0_196 = arith.constant 0 : index
    %337 = vector.load %arg22[%c0_195, %c0_196] : memref<512x256xbf16, #tpu.memory_space<vmem>>, vector<512x256xbf16>
    %cst_197 = arith.constant dense<0.000000e+00> : vector<8x256xf32>
    %338 = tpu.matmul %336, %337, %cst_197 {dimension_numbers = #tpu.dot_dimension_numbers<[1], [0], [0], [1], [0, 0, 1, 1], [], []>} : vector<8x512xbf16>, vector<512x256xbf16>, vector<8x256xf32> -> vector<8x256xf32>
    %c0_198 = arith.constant 0 : index
    %c0_199 = arith.constant 0 : index
    %339 = vector.load %arg23[%c0_198, %c0_199] : memref<1x256xf32, #tpu.memory_space<vmem>>, vector<1x256xf32>
    %340 = vector.broadcast %339 : vector<1x256xf32> to vector<8x256xf32>
    %341 = arith.addf %338, %340 : vector<8x256xf32>
    %342 = arith.addf %327, %341 : vector<8x256xf32>
    %c0_200 = arith.constant 0 : index
    %c0_201 = arith.constant 0 : index
    %343 = vector.load %arg24[%c0_200, %c0_201] : memref<1x256xf32, #tpu.memory_space<vmem>>, vector<1x256xf32>
    %c0_202 = arith.constant 0 : index
    %c0_203 = arith.constant 0 : index
    %344 = vector.load %arg25[%c0_202, %c0_203] : memref<1x256xf32, #tpu.memory_space<vmem>>, vector<1x256xf32>
    %cst_204 = arith.constant dense<0.000000e+00> : vector<8xf32>
    %345 = vector.multi_reduction <add>, %342, %cst_204 [1] : vector<8x256xf32> to vector<8xf32>
    %346 = vector.shape_cast %345 : vector<8xf32> to vector<8x1xf32>
    %cst_205 = arith.constant 2.560000e+02 : f32
    %347 = vector.broadcast %cst_205 : f32 to vector<8x1xf32>
    %348 = arith.divf %346, %347 : vector<8x1xf32>
    %349 = vector.broadcast %348 : vector<8x1xf32> to vector<8x256xf32>
    %350 = arith.subf %342, %349 : vector<8x256xf32>
    %351 = arith.mulf %350, %350 : vector<8x256xf32>
    %cst_206 = arith.constant dense<0.000000e+00> : vector<8xf32>
    %352 = vector.multi_reduction <add>, %351, %cst_206 [1] : vector<8x256xf32> to vector<8xf32>
    %353 = vector.shape_cast %352 : vector<8xf32> to vector<8x1xf32>
    %cst_207 = arith.constant 2.560000e+02 : f32
    %354 = vector.broadcast %cst_207 : f32 to vector<8x1xf32>
    %355 = arith.divf %353, %354 : vector<8x1xf32>
    %356 = vector.broadcast %348 : vector<8x1xf32> to vector<8x256xf32>
    %357 = arith.subf %342, %356 : vector<8x256xf32>
    %cst_208 = arith.constant 9.99999974E-6 : f32
    %358 = vector.broadcast %cst_208 : f32 to vector<8x1xf32>
    %359 = arith.addf %355, %358 : vector<8x1xf32>
    %360 = math.rsqrt %359 : vector<8x1xf32>
    %361 = vector.broadcast %360 : vector<8x1xf32> to vector<8x256xf32>
    %362 = arith.mulf %357, %361 : vector<8x256xf32>
    %363 = vector.broadcast %343 : vector<1x256xf32> to vector<8x256xf32>
    %364 = arith.mulf %362, %363 : vector<8x256xf32>
    %365 = vector.broadcast %344 : vector<1x256xf32> to vector<8x256xf32>
    %366 = arith.addf %364, %365 : vector<8x256xf32>
    %c0_209 = arith.constant 0 : index
    %c0_210 = arith.constant 0 : index
    %367 = vector.load %arg26[%c0_209, %c0_210] : memref<8x256xf32, #tpu.memory_space<vmem>>, vector<8x256xf32>
    tpu.vector_store %arg26[%c0_209, %c0_210], %366 {strides = array<i32>} : memref<8x256xf32, #tpu.memory_space<vmem>>, vector<8x256xf32>,
    return
  }
}

</mosaic_0001>

<bundles_post_ra>
// kernel: tpu_custom_call.1
= control target key start
LH: loop header
LB: loop body
LE: loop exit
PB: predicated region body
PF: predicated region fallthrough
CT: control target
= control target key end

     0   :  { %s14503_s0 = inlined_call_operand.vmem [shape: f32[8,8,32], index: 0, kind: input, shape index: {}]   ;;  %s14504_s1 = inlined_call_operand.vmem [shape: f32[8,8,64], index: 1, kind: input, shape index: {}]   ;;  %s14505_s2 = inlined_call_operand.vmem [shape: bf16[32,1536], index: 2, kind: input, shape index: {}]   ;;  %s14506_s3 = inlined_call_operand.vmem [shape: f32[1,1536], index: 3, kind: input, shape index: {}]   ;;  %s14507_s4 = inlined_call_operand.vmem [shape: bf16[512,32], index: 4, kind: input, shape index: {}]   ;;  %s14508_s5 = inlined_call_operand.vmem [shape: f32[1,32], index: 5, kind: input, shape index: {}]   ;;  %s14509_s6 = inlined_call_operand.hbm [shape: f32[1,32], index: 6, kind: input, shape index: {}]   ;;  %s14510_s7 = inlined_call_operand.hbm [shape: f32[1,32], index: 7, kind: input, shape index: {}]   ;;  %s14511_s8 = inlined_call_operand.vmem [shape: bf16[32,128], index: 8, kind: input, shape index: {}]   ;;  %s14512_s9 = inlined_call_operand.hbm [shape: f32[1,128], index: 9, kind: input, shape index: {}]   ;;  %s14513_s10 = inlined_call_operand.vmem [shape: bf16[128,32], index: 10, kind: input, shape index: {}]   ;;  %s14514_s11 = inlined_call_operand.hbm [shape: f32[1,32], index: 11, kind: input, shape index: {}]   ;;  %s14515_s12 = inlined_call_operand.hbm [shape: f32[1,32], index: 12, kind: input, shape index: {}]   ;;  %s14516_s13 = inlined_call_operand.hbm [shape: f32[1,32], index: 13, kind: input, shape index: {}]   ;;  %s14517_s14 = inlined_call_operand.hbm [shape: bf16[256,1536], index: 14, kind: input, shape index: {}]   ;;  %s14518_s15 = inlined_call_operand.vmem [shape: f32[1,1536], index: 15, kind: input, shape index: {}]   ;;  %s14519_s16 = inlined_call_operand.hbm [shape: bf16[512,256], index: 16, kind: input, shape index: {}]   ;;  %s14520_s17 = inlined_call_operand.vmem [shape: f32[1,256], index: 17, kind: input, shape index: {}]   ;;  %s14521_s18 = inlined_call_operand.vmem [shape: f32[1,256], index: 18, kind: input, shape index: {}]   ;;  %s14522_s19 = inlined_call_operand.vmem [shape: f32[1,256], index: 19, kind: input, shape index: {}]   ;;  %s14523_s20 = inlined_call_operand.hbm [shape: bf16[256,512], index: 20, kind: input, shape index: {}]   ;;  %s14524_s21 = inlined_call_operand.vmem [shape: f32[1,512], index: 21, kind: input, shape index: {}]   ;;  %s14525_s22 = inlined_call_operand.hbm [shape: bf16[512,256], index: 22, kind: input, shape index: {}]   ;;  %s14526_s23 = inlined_call_operand.vmem [shape: f32[1,256], index: 23, kind: input, shape index: {}]   ;;  %s14527_s24 = inlined_call_operand.vmem [shape: f32[1,256], index: 24, kind: input, shape index: {}]   ;;  %s14528_s25 = inlined_call_operand.vmem [shape: f32[1,256], index: 25, kind: input, shape index: {}]   ;;  %s14529_s26 = inlined_call_operand.hbm [shape: f32[8,256], index: 26, kind: output, shape index: {}]  }
   0x1   :  { %14550 = sst [smem:[#allocation78_spill]] %s14503_s0 }
   0x2   :  { %14551 = sst [smem:[#allocation79_spill]] %s14504_s1 }
   0x3   :  { %14552 = sst [smem:[#allocation80_spill]] %s14505_s2 }
   0x4   :  { %14553 = sst [smem:[#allocation81_spill]] %s14506_s3 }
   0x5   :  { %14554 = sst [smem:[#allocation82_spill]] %s14507_s4 }
   0x6   :  { %14555 = sst [smem:[#allocation83_spill]] %s14508_s5 }
   0x7   :  { %14556 = sst [smem:[#allocation84_spill]] %s14509_s6 }
   0x8   :  { %14557 = sst [smem:[#allocation85_spill]] %s14510_s7 }
   0x9   :  { %14558 = sst [smem:[#allocation86_spill]] %s14511_s8 }
   0xa   :  { %14559 = sst [smem:[#allocation87_spill]] %s14512_s9 }
   0xb   :  { %14560 = sst [smem:[#allocation88_spill]] %s14513_s10 }
   0xc   :  { %31 = vsyncpa [#allocation8], 0 }
   0xd   :  { %32 = vsyncpa [#allocation11], 0 }
   0xe   :  { %33 = vsyncpa [#allocation14], 0 }
   0xf   :  { %34 = vsyncpa [#allocation17], 0 }
  0x10   :  { %35 = vsyncpa [#allocation20], 0 }
  0x11   :  { %36 = vsyncpa [#allocation23], 0 }
  0x12   :  { %37 = vsyncpa [#allocation9], 0  ;;  %s12499_s27 = smov [#allocation10]   ;;  %s12500_s7 = smov [#allocation13]  }
  0x13   :  { %s66_s3 = sshll.u32 %s12499_s27, 4  ;;  %s90_s28 = sshll.u32 %s12500_s7, 4  ;;  %s67_s3 = int_to_ptr.vmem [resolvable:$true] %s66_s3  ;;  %s91_s28 = int_to_ptr.vmem [resolvable:$true] %s90_s28 }
  0x14   :  { %s14561_s29 = sld [smem:[#allocation85_spill]] }
  0x1a   :  { %s12243_s0 = scalar_lea.hbm %s14561_s29, 16 }
  0x1b   :  { %p12244_p0 = scmp.ne.s32.totalorder %s14561_s29, %s12243_s0  ;;  %p12247_p1 = scmp.lt.u32.totalorder %s12243_s0, %s14561_s29 }
  0x1d   :  { %p12249_p2 = pnand %p12247_p1, %p12244_p0 }
  0x1f   :  { %12252 = shalt.err (!%p12249_p2)
}
  0x20   :  { %s12253_s10 = scalar_lea.vmem %s67_s3, 16  ;;  %s12257_s6 = scalar_lea.vmem %s67_s3, 32 }
  0x21   :  { %p12254_p3 = scmp.ne.s32.totalorder %s67_s3, %s12253_s10  ;;  %p12258_p4 = scmp.lt.s32.totalorder %s67_s3, %s67_s3 }
  0x22   :  { %p12259_p5 = scmp.lt.s32.totalorder %s12257_s6, %s12253_s10 }
  0x24   :  { %p12260_p6 = por %p12259_p5, %p12258_p4 }
  0x26   :  { %p12261_p7 = pnand %p12260_p6, %p12254_p3 }
  0x28   :  { %12264 = shalt.err (!%p12261_p7)
}
  0x29   :  { %69 = dma.hbm_to_vmem [thread:$0]  %s14561_s29, 16, %s67_s3, [#allocation11]  }
  0x2a   :  { %s12265_s4 = scalar_lea.hbm %s14514_s11, 16 }
  0x2b   :  { %p12266_p8 = scmp.ne.s32.totalorder %s14514_s11, %s12265_s4  ;;  %p12269_p9 = scmp.lt.u32.totalorder %s12265_s4, %s14514_s11 }
  0x2d   :  { %p12271_p10 = pnand %p12269_p9, %p12266_p8 }
  0x2f   :  { %12274 = shalt.err (!%p12271_p10)
}
  0x30   :  { %s12275_s5 = scalar_lea.vmem %s91_s28, 16  ;;  %s12279_s10 = scalar_lea.vmem %s91_s28, 32 }
  0x31   :  { %p12276_p11 = scmp.ne.s32.totalorder %s91_s28, %s12275_s5  ;;  %p12280_p12 = scmp.lt.s32.totalorder %s91_s28, %s91_s28 }
  0x32   :  { %p12281_p13 = scmp.lt.s32.totalorder %s12279_s10, %s12275_s5 }
  0x34   :  { %p12282_p0 = por %p12281_p13, %p12280_p12 }
  0x36   :  { %p12283_p1 = pnand %p12282_p0, %p12276_p11 }
  0x38   :  { %12286 = shalt.err (!%p12283_p1)
}
  0x39   :  { %93 = dma.hbm_to_vmem [thread:$0]  %s14514_s11, 16, %s91_s28, [#allocation14]  }
  0x3a   :  { %s12501_s6 = smov [#allocation16]   ;;  %s12502_s27 = smov [#allocation19]  }
  0x3b   :  { %s110_s1 = sshll.u32 %s12501_s6, 4  ;;  %s133_s7 = sshll.u32 %s12502_s27, 4  ;;  %s111_s1 = int_to_ptr.vmem [resolvable:$true] %s110_s1  ;;  %s12682_s7 = int_to_ptr.vmem [resolvable:$true] %s133_s7 }
  0x3c   :  { %s12287_s9 = scalar_lea.hbm %s14516_s13, 16 }
  0x3d   :  { %p12288_p2 = scmp.ne.s32.totalorder %s14516_s13, %s12287_s9  ;;  %p12291_p3 = scmp.lt.u32.totalorder %s12287_s9, %s14516_s13 }
  0x3f   :  { %p12293_p4 = pnand %p12291_p3, %p12288_p2 }
  0x41   :  { %12296 = shalt.err (!%p12293_p4)
}
  0x42   :  { %s12297_s11 = scalar_lea.vmem %s111_s1, 16  ;;  %s12301_s28 = scalar_lea.vmem %s111_s1, 32 }
  0x43   :  { %p12298_p5 = scmp.ne.s32.totalorder %s111_s1, %s12297_s11  ;;  %p12302_p6 = scmp.lt.s32.totalorder %s111_s1, %s111_s1 }
  0x44   :  { %p12303_p7 = scmp.lt.s32.totalorder %s12301_s28, %s12297_s11 }
  0x46   :  { %p12304_p8 = por %p12303_p7, %p12302_p6 }
  0x48   :  { %p12305_p9 = pnand %p12304_p8, %p12298_p5 }
  0x4a   :  { %12308 = shalt.err (!%p12305_p9)
}
  0x4b   :  { %113 = dma.hbm_to_vmem [thread:$0]  %s14516_s13, 16, %s111_s1, [#allocation17]  }
  0x4c   :  { %s12309_s27 = scalar_lea.hbm %s14519_s16, 8192 }
  0x4d   :  { %p12310_p10 = scmp.ne.s32.totalorder %s14519_s16, %s12309_s27  ;;  %p12313_p11 = scmp.lt.u32.totalorder %s12309_s27, %s14519_s16 }
  0x4f   :  { %p12315_p12 = pnand %p12313_p11, %p12310_p10 }
  0x51   :  { %12318 = shalt.err (!%p12315_p12)
}
  0x52   :  { %s12319_s30 = scalar_lea.vmem %s12682_s7, 8192  ;;  %p12324_p0 = scmp.lt.s32.totalorder %s12682_s7, %s12682_s7 }
  0x53   :  { %p12320_p13 = scmp.ne.s32.totalorder %s12682_s7, %s12319_s30  ;;  %p12325_p1 = scmp.lt.s32.totalorder %s12319_s30, %s12319_s30 }
  0x55   :  { %p12326_p2 = por %p12325_p1, %p12324_p0 }
  0x57   :  { %p12327_p3 = pnand %p12326_p2, %p12320_p13 }
  0x59   :  { %12330 = shalt.err (!%p12327_p3)
}
  0x5a   :  { %s12503_s13 = smov 128   ;;  %s12504_s1 = smov 8  }
  0x5b   :  { %139 = dma.hbm_to_vmem [thread:$0]  %s14519_s16, 8192, %s12682_s7, [#allocation20], %s12503_s13, %s12503_s13, %s12504_s1  }
  0x5c   :  { %s12505_s11 = smov [#allocation7]   ;;  %s12506_s10 = smov [#allocation12]  }
  0x5d   :  { %s56_s28 = sshll.u32 %s12505_s11, 4  ;;  %s78_s3 = sshll.u32 %s12506_s10, 4  ;;  %s57_s28 = int_to_ptr.vmem [resolvable:$true] %s56_s28  ;;  %s79_s3 = int_to_ptr.vmem [resolvable:$true] %s78_s3 }
  0x5e   :  { %s14562_s27 = sld [smem:[#allocation84_spill]] }
  0x64   :  { %s12331_s8 = scalar_lea.hbm %s14562_s27, 16 }
  0x65   :  { %p12332_p4 = scmp.ne.s32.totalorder %s14562_s27, %s12331_s8  ;;  %p12335_p5 = scmp.lt.u32.totalorder %s12331_s8, %s14562_s27 }
  0x67   :  { %p12337_p6 = pnand %p12335_p5, %p12332_p4 }
  0x69   :  { %12340 = shalt.err (!%p12337_p6)
}
  0x6a   :  { %s12341_s16 = scalar_lea.vmem %s57_s28, 16  ;;  %s12345_s7 = scalar_lea.vmem %s57_s28, 32 }
  0x6b   :  { %p12342_p7 = scmp.ne.s32.totalorder %s57_s28, %s12341_s16  ;;  %p12346_p8 = scmp.lt.s32.totalorder %s57_s28, %s57_s28 }
  0x6c   :  { %p12347_p9 = scmp.lt.s32.totalorder %s12345_s7, %s12341_s16 }
  0x6e   :  { %p12348_p10 = por %p12347_p9, %p12346_p8 }
  0x70   :  { %p12349_p11 = pnand %p12348_p10, %p12342_p7 }
  0x72   :  { %12352 = shalt.err (!%p12349_p11)
}
  0x73   :  { %59 = dma.hbm_to_vmem [thread:$0]  %s14562_s27, 16, %s57_s28, [#allocation8]  }
  0x74   :  { %s14563_s29 = sld [smem:[#allocation87_spill]] }
  0x7a   :  { %s12353_s6 = scalar_lea.hbm %s14563_s29, 16 }
  0x7b   :  { %p12354_p12 = scmp.ne.s32.totalorder %s14563_s29, %s12353_s6  ;;  %p12357_p13 = scmp.lt.u32.totalorder %s12353_s6, %s14563_s29 }
  0x7d   :  { %p12359_p0 = pnand %p12357_p13, %p12354_p12 }
  0x7f   :  { %12362 = shalt.err (!%p12359_p0)
}
  0x80   :  { %s12363_s30 = scalar_lea.vmem %s79_s3, 16  ;;  %s12367_s16 = scalar_lea.vmem %s79_s3, 32 }
  0x81   :  { %p12364_p1 = scmp.ne.s32.totalorder %s79_s3, %s12363_s30  ;;  %p12368_p2 = scmp.lt.s32.totalorder %s79_s3, %s79_s3 }
  0x82   :  { %p12369_p3 = scmp.lt.s32.totalorder %s12367_s16, %s12363_s30 }
  0x84   :  { %p12370_p4 = por %p12369_p3, %p12368_p2 }
  0x86   :  { %p12371_p5 = pnand %p12370_p4, %p12364_p1 }
  0x88   :  { %12374 = shalt.err (!%p12371_p5)
}
  0x89   :  { %81 = dma.hbm_to_vmem [thread:$0]  %s14563_s29, 16, %s79_s3, [#allocation11]  }
  0x8a   :  { %s12507_s7 = smov [#allocation15]   ;;  %s12508_s5 = smov [#allocation18]  }
  0x8b   :  { %s100_s2 = sshll.u32 %s12507_s7, 4  ;;  %s119_s11 = sshll.u32 %s12508_s5, 4  ;;  %s101_s2 = int_to_ptr.vmem [resolvable:$true] %s100_s2  ;;  %s12740_s11 = int_to_ptr.vmem [resolvable:$true] %s119_s11 }
  0x8c   :  { %s12375_s4 = scalar_lea.hbm %s14515_s12, 16 }
  0x8d   :  { %p12376_p6 = scmp.ne.s32.totalorder %s14515_s12, %s12375_s4  ;;  %p12379_p7 = scmp.lt.u32.totalorder %s12375_s4, %s14515_s12 }
  0x8f   :  { %p12381_p8 = pnand %p12379_p7, %p12376_p6 }
  0x91   :  { %12384 = shalt.err (!%p12381_p8)
}
  0x92   :  { %s12385_s3 = scalar_lea.vmem %s101_s2, 16  ;;  %s12389_s29 = scalar_lea.vmem %s101_s2, 32 }
  0x93   :  { %p12386_p9 = scmp.ne.s32.totalorder %s101_s2, %s12385_s3  ;;  %p12390_p10 = scmp.lt.s32.totalorder %s101_s2, %s101_s2 }
  0x94   :  { %p12391_p11 = scmp.lt.s32.totalorder %s12389_s29, %s12385_s3 }
  0x96   :  { %p12392_p12 = por %p12391_p11, %p12390_p10 }
  0x98   :  { %p12393_p13 = pnand %p12392_p12, %p12386_p9 }
  0x9a   :  { %12396 = shalt.err (!%p12393_p13)
}
  0x9b   :  { %103 = dma.hbm_to_vmem [thread:$0]  %s14515_s12, 16, %s101_s2, [#allocation14]  }
  0x9c   :  { %s12397_s5 = scalar_lea.hbm %s14517_s14, 24576 }
  0x9d   :  { %p12398_p0 = scmp.ne.s32.totalorder %s14517_s14, %s12397_s5  ;;  %p12401_p1 = scmp.lt.u32.totalorder %s12397_s5, %s14517_s14 }
  0x9f   :  { %p12403_p2 = pnand %p12401_p1, %p12398_p0 }
  0xa1   :  { %12406 = shalt.err (!%p12403_p2)
}
  0xa2   :  { %s12407_s9 = scalar_lea.vmem %s12740_s11, 24576  ;;  %p12412_p4 = scmp.lt.s32.totalorder %s12740_s11, %s12740_s11 }
  0xa3   :  { %p12408_p3 = scmp.ne.s32.totalorder %s12740_s11, %s12407_s9  ;;  %p12413_p5 = scmp.lt.s32.totalorder %s12407_s9, %s12407_s9 }
  0xa5   :  { %p12414_p6 = por %p12413_p5, %p12412_p4 }
  0xa7   :  { %p12415_p7 = pnand %p12414_p6, %p12408_p3 }
  0xa9   :  { %12418 = shalt.err (!%p12415_p7)
}
  0xaa   :  { %s12509_s12 = smov 768   ;;  %s12510_s2 = smov 48  }
  0xab   :  { %125 = dma.hbm_to_vmem [thread:$0]  %s14517_s14, 24576, %s12740_s11, [#allocation17], %s12509_s12, %s12509_s12, %s12510_s2  }
  0xac   :  { %s12511_s3 = smov [#allocation21]   ;;  %s12419_s27 = scalar_lea.hbm %s14523_s20, 8192 }
  0xad   :  { %s151_s29 = sshll.u32 %s12511_s3, 4  ;;  %p12420_p8 = scmp.ne.s32.totalorder %s14523_s20, %s12419_s27  ;;  %s152_s29 = int_to_ptr.vmem [resolvable:$true] %s151_s29 }
  0xae   :  { %p12423_p9 = scmp.lt.u32.totalorder %s12419_s27, %s14523_s20 }
  0xb0   :  { %p12425_p10 = pnand %p12423_p9, %p12420_p8 }
  0xb2   :  { %12428 = shalt.err (!%p12425_p10)
}
  0xb3   :  { %s12429_s4 = scalar_lea.vmem %s152_s29, 8192  ;;  %p12434_p12 = scmp.lt.s32.totalorder %s152_s29, %s152_s29 }
  0xb4   :  { %p12430_p11 = scmp.ne.s32.totalorder %s152_s29, %s12429_s4  ;;  %p12435_p13 = scmp.lt.s32.totalorder %s12429_s4, %s12429_s4 }
  0xb6   :  { %p12436_p0 = por %p12435_p13, %p12434_p12 }
  0xb8   :  { %p12437_p1 = pnand %p12436_p0, %p12430_p11 }
  0xba   :  { %12440 = shalt.err (!%p12437_p1)
}
  0xbb   :  { %s12512_s14 = smov 256   ;;  %s12513_s11 = smov 16  }
  0xbc   :  { %157 = dma.hbm_to_vmem [thread:$0]  %s14523_s20, 8192, %s152_s29, [#allocation20], %s12512_s14, %s12512_s14, %s12513_s11  }
  0xbd   :  { %s12514_s12 = smov [#allocation22]   ;;  %s12441_s3 = scalar_lea.hbm %s14525_s22, 8192 }
  0xbe   :  { %s165_s2 = sshll.u32 %s12514_s12, 4  ;;  %p12442_p2 = scmp.ne.s32.totalorder %s14525_s22, %s12441_s3  ;;  %s166_s2 = int_to_ptr.vmem [resolvable:$true] %s165_s2 }
  0xbf   :  { %p12445_p3 = scmp.lt.u32.totalorder %s12441_s3, %s14525_s22 }
  0xc1   :  { %p12447_p4 = pnand %p12445_p3, %p12442_p2 }
  0xc3   :  { %12450 = shalt.err (!%p12447_p4)
}
  0xc4   :  { %s12451_s5 = scalar_lea.vmem %s166_s2, 8192  ;;  %p12456_p6 = scmp.lt.s32.totalorder %s166_s2, %s166_s2 }
  0xc5   :  { %p12452_p5 = scmp.ne.s32.totalorder %s166_s2, %s12451_s5  ;;  %p12457_p7 = scmp.lt.s32.totalorder %s12451_s5, %s12451_s5 }
  0xc7   :  { %p12458_p8 = por %p12457_p7, %p12456_p6 }
  0xc9   :  { %p12459_p9 = pnand %p12458_p8, %p12452_p5 }
  0xcb   :  { %12462 = shalt.err (!%p12459_p9)
}
  0xcc   :  { %171 = dma.hbm_to_vmem [thread:$0]  %s14525_s22, 8192, %s166_s2, [#allocation23], %s12503_s13, %s12503_s13, %s12504_s1  }
  0xcd   :  { %12485 = dma.done.wait [#allocation8], 16  }
  0xce   :  { %12486 = vsyncadd [#allocation8], 4294967280 }
  0xcf   :  { %12487 = dma.done.wait [#allocation11], 32  }
  0xd0   :  { %12488 = vsyncadd [#allocation11], 4294967264 }
  0xd1   :  { %12489 = dma.done.wait [#allocation14], 32  }
  0xd2   :  { %12490 = vsyncadd [#allocation14], 4294967264 }
  0xd3   :  { %12491 = dma.done.wait [#allocation17], 24592  }
  0xd4   :  { %12492 = vsyncadd [#allocation17], 4294942704 }
  0xd5   :  { %12493 = dma.done.wait [#allocation20], 16384  }
  0xd6   :  { %12494 = vsyncadd [#allocation20], 4294950912 }
  0xd7   :  { %12495 = dma.done.wait [#allocation23], 8192  }
  0xd8   :  { %12496 = vsyncadd [#allocation23], 4294959104  ;;  %v12515_v0 = vmov 0   ;;  %s14564_s22 = sld [smem:[#allocation80_spill]]  ;;  %s14565_s2 = sld [smem:[#allocation78_spill]]  ;;  %vm429_vm0 = vcmask 261120   ;;  %v249_v55 = vlaneseq }
  0xd9   :  { %474 = vmatprep.mubr.bf16.mxu0 %v12515_v0  ;;  %547 = vmatprep.mubr.bf16.mxu1 %v12515_v0  ;;  %v14541_v37 = vmov 0.0   ;;  %vm12517_vm1 = vmmov 0   ;;  %s14576_s14 = sld [smem:[#allocation81_spill]]  ;;  %vm1484_vm2 = vcmask 1043456   ;;  %vm1384_vm3 = vcmask 64512   ;;  %s14658_s3 = sld [smem:[#allocation82_spill]] }
  0xda   :  { %v13000_v59 = vshrl.u32 %v249_v55, 7  ;;  %s14662_s7 = sld [smem:[#allocation83_spill]]  ;;  %s14663_s28 = sld [smem:[#allocation86_spill]]  ;;  %vm5445_vm4 = vcmask 523264   ;;  %vm5599_vm5 = vcmask 523520   ;;  %vm5680_vm6 = vcmask 785920  }
  0xdb   :  { %s14664_s20 = sld [smem:[#allocation88_spill]]  ;;  %s12519_s8 = smov 32   ;;  %vm5761_vm7 = vcmask 1048320  }
  0xdc   :  { %v14540_v62 = vsub.s32 4, %v13000_v59  ;;  %s12520_s9 = smov 64   ;;  %s12521_s12 = smov 96  }
  0xdd   :  { %s12522_s6 = smov [#allocation24]  }
  0xde   :  { %v11394_v1 = vld [vmem:[%s14564_s22 + $0x4] ss:$48 sps:$4 sm:$0xff]   ;;  %v11396_v2 = vld [vmem:[%s14564_s22] ss:$48 sps:$4 sm:$0xff]   ;;  %v210_v6 = vld [vmem:[%s14565_s2 + $0x8] sm:$0xff]  ;;  %s9582_s13 = sshll.u32 %s12522_s6, 4  ;;  %s9583_s13 = int_to_ptr.vmem [resolvable:$true] %s9582_s13 }
  0xdf   :  { %442 = vmatprep.subr.bf16.mxu0 %v11394_v1  ;;  %v11397_v3 = vld [vmem:[%s14564_s22 + $0x64] ss:$48 sps:$4 sm:$0xff]   ;;  %v11399_v4 = vld [vmem:[%s14564_s22 + $0x60] ss:$48 sps:$4 sm:$0xff]   ;;  %v11406_v11 = vld [vmem:[%s14564_s22 + $0xc] ss:$48 sps:$4 sm:$0xff]   ;;  %p12468_p11 = scmp.lt.s32.totalorder %s9583_s13, %s9583_s13 }
  0xe0   :  { %443 = vmatpush1.bf16.msra.mxu0 %v11396_v2  ;;  %v209_v5 = vld [vmem:[%s14565_s2] sm:$0xff]  ;;  %v11408_v12 = vld [vmem:[%s14564_s22 + $0x8] ss:$48 sps:$4 sm:$0xff]   ;;  %v211_v13 = vld [vmem:[%s14565_s2 + $0x10] sm:$0xff]  ;;  %515 = vmatprep.subr.bf16.mxu1 %v11406_v11 }
  0xe1   :  { %444 = vmatprep.subr.bf16.mxu0 %v11397_v3  ;;  %v12818_v7 = vpack.c.bf16 %v210_v6, %v209_v5  ;;  %v11402_v8 = vld [vmem:[%s14564_s22 + $0x14] ss:$48 sps:$4 sm:$0xff]   ;;  %v11400_v9 = vld [vmem:[%s14564_s22 + $0x10] ss:$48 sps:$4 sm:$0xff]   ;;  %v11409_v14 = vld [vmem:[%s14564_s22 + $0x6c] ss:$48 sps:$4 sm:$0xff]   ;;  %516 = vmatpush1.bf16.msra.mxu1 %v11408_v12 }
  0xe2   :  { %v11405_v10 = vld [vmem:[%s14564_s22 + $0x74] ss:$48 sps:$4 sm:$0xff]   ;;  %v212_v15 = vld [vmem:[%s14565_s2 + $0x18] sm:$0xff]  ;;  %v11403_v16 = vld [vmem:[%s14564_s22 + $0x70] ss:$48 sps:$4 sm:$0xff]   ;;  %517 = vmatprep.subr.bf16.mxu1 %v11409_v14 }
  0xe3   :  { %v11411_v17 = vld [vmem:[%s14564_s22 + $0x68] ss:$48 sps:$4 sm:$0xff]   ;;  %v11414_v18 = vld [vmem:[%s14564_s22 + $0x1c] ss:$48 sps:$4 sm:$0xff]   ;;  %v12856_v19 = vpack.c.bf16 %v212_v15, %v211_v13  ;;  %v213_v22 = vld [vmem:[%s14565_s2 + $0x20] sm:$0xff] }
  0xe4   :  { %445 = vmatpush1.bf16.msra.mxu0 %v11399_v4  ;;  %v11412_v20 = vld [vmem:[%s14564_s22 + $0x18] ss:$48 sps:$4 sm:$0xff]   ;;  %v11417_v21 = vld [vmem:[%s14564_s22 + $0x7c] ss:$48 sps:$4 sm:$0xff]   ;;  %v215_v26 = vld [vmem:[%s14565_s2 + $0x30] sm:$0xff] }
  0xe5   :  { %588 = vmatprep.subr.bf16.mxu0 %v11402_v8  ;;  %518 = vmatpush1.bf16.msra.mxu1 %v11411_v17  ;;  %v214_v23 = vld [vmem:[%s14565_s2 + $0x28] sm:$0xff]  ;;  %v216_v27 = vld [vmem:[%s14565_s2 + $0x38] sm:$0xff]  ;;  %v11420_v29 = vld [vmem:[%s14564_s22 + $0x24] ss:$48 sps:$4 sm:$0xff]  }
  0xe6   :  { %661 = vmatprep.subr.bf16.mxu1 %v11414_v18  ;;  %v11415_v24 = vld [vmem:[%s14564_s22 + $0x78] ss:$48 sps:$4 sm:$0xff]   ;;  %v219_v25 = vpack.c.bf16 %v214_v23, %v213_v22  ;;  %v220_v28 = vpack.c.bf16 %v216_v27, %v215_v26  ;;  %v11418_v30 = vld [vmem:[%s14564_s22 + $0x20] ss:$48 sps:$4 sm:$0xff]   ;;  %v11423_v31 = vld [vmem:[%s14564_s22 + $0x2c] ss:$48 sps:$4 sm:$0xff]  }
  0xe7   :  { %9620 = vmatmul.mubr.msk.bf16.vlgmr.msra.gmra.mrb[0].mxu0 %vm429_vm0, %v12818_v7  ;;  %v11426_v32 = vld [vmem:[%s14564_s22 + $0x84] ss:$48 sps:$4 sm:$0xff]   ;;  %v11421_v33 = vld [vmem:[%s14564_s22 + $0x28] ss:$48 sps:$4 sm:$0xff]   ;;  %v11424_v34 = vld [vmem:[%s14564_s22 + $0x80] ss:$48 sps:$4 sm:$0xff]  }
  0xe8   :  { %484 = vmatprep.mubr.bf16.mxu0 %v12515_v0  ;;  %589 = vmatpush1.bf16.msra.mxu0 %v11400_v9  ;;  %v11429_v35 = vld [vmem:[%s14564_s22 + $0x8c] ss:$48 sps:$4 sm:$0xff]   ;;  %v11427_v36 = vld [vmem:[%s14564_s22 + $0x88] ss:$48 sps:$4 sm:$0xff]   ;;  %v13020_v4 = vld [vmem:[%s14576_s14] sm:$0xff] }
  0xe9   :  { %590 = vmatprep.subr.bf16.mxu0 %v11405_v10  ;;  %9624 = vmatmul.mubr.msk.bf16.vlgmr.msra.gmra.mrb[0].mxu1 %vm429_vm0, %v12818_v7  ;;  %v13027_v6 = vrot.slane %v13020_v4, %v14540_v62 }
  0xea   :  { %557 = vmatprep.mubr.bf16.mxu1 %v12515_v0  ;;  %662 = vmatpush1.bf16.msra.mxu1 %v11412_v20 }
  0xeb   :  { %663 = vmatprep.subr.bf16.mxu1 %v11417_v21 }
  0xec   :  { %591 = vmatpush1.bf16.msra.mxu0 %v11403_v16 }
  0xed   :  { %734 = vmatprep.subr.bf16.mxu0 %v11420_v29 }
  0xee   :  { %664 = vmatpush1.bf16.msra.mxu1 %v11415_v24 }
  0xef   :  { %9621 = vmatmul.mubr.msk.bf16.gmra.mrb[4].mxu0 %vm429_vm0, %v12856_v19  ;;  %807 = vmatprep.subr.bf16.mxu1 %v11423_v31 }
  0xf0   :  { %494 = vmatprep.mubr.bf16.mxu0 %v12515_v0 }
  0xf1   :  { %9625 = vmatmul.mubr.msk.bf16.gmra.mrb[4].mxu1 %vm429_vm0, %v12856_v19 }
  0xf2   :  { %567 = vmatprep.mubr.bf16.mxu1 %v12515_v0 }
  0xf7   :  { %9622 = vmatmul.mubr.msk.bf16.gmra.mrb[8].mxu0 %vm429_vm0, %v219_v25 }
  0xf8   :  { %504 = vmatprep.mubr.bf16.mxu0 %v12515_v0 }
  0xf9   :  { %9626 = vmatmul.mubr.msk.bf16.gmra.mrb[8].mxu1 %vm429_vm0, %v219_v25 }
  0xfa   :  { %577 = vmatprep.mubr.bf16.mxu1 %v12515_v0 }
  0xff   :  { %9623 = vmatmul.mubr.msk.bf16.gmra.mrb[12].mxu0 %vm429_vm0, %v220_v28 }
 0x100   :  { %620 = vmatprep.mubr.bf16.mxu0 %v12515_v0 }
 0x101   :  { %9627 = vmatmul.mubr.msk.bf16.gmra.mrb[12].mxu1 %vm429_vm0, %v220_v28 }
 0x102   :  { %693 = vmatprep.mubr.bf16.mxu1 %v12515_v0 }
 0x107   :  { %9628 = vmatmul.mubr.msk.bf16.vlgmr.msra.gmra.mrb[16].mxu0 %vm429_vm0, %v12818_v7 }
 0x108   :  { %630 = vmatprep.mubr.bf16.mxu0 %v12515_v0  ;;  %735 = vmatpush1.bf16.msra.mxu0 %v11418_v30 }
 0x109   :  { %9632 = vmatmul.mubr.msk.bf16.vlgmr.msra.gmra.mrb[16].mxu1 %vm429_vm0, %v12818_v7  ;;  %736 = vmatprep.subr.bf16.mxu0 %v11426_v32 }
 0x10a   :  { %703 = vmatprep.mubr.bf16.mxu1 %v12515_v0  ;;  %808 = vmatpush1.bf16.msra.mxu1 %v11421_v33 }
 0x10b   :  { %809 = vmatprep.subr.bf16.mxu1 %v11429_v35 }
 0x10c   :  { %737 = vmatpush1.bf16.msra.mxu0 %v11424_v34 }
 0x10d   :  { %10654 = vmatprep.subr.bf16.mxu0 %v14541_v37 }
 0x10e   :  { %810 = vmatpush1.bf16.msra.mxu1 %v11427_v36 }
 0x10f   :  { %9629 = vmatmul.mubr.msk.bf16.gmra.mrb[20].mxu0 %vm429_vm0, %v12856_v19  ;;  %10660 = vmatprep.subr.bf16.mxu1 %v14541_v37 }
 0x110   :  { %640 = vmatprep.mubr.bf16.mxu0 %v12515_v0 }
 0x111   :  { %9633 = vmatmul.mubr.msk.bf16.gmra.mrb[20].mxu1 %vm429_vm0, %v12856_v19 }
 0x112   :  { %713 = vmatprep.mubr.bf16.mxu1 %v12515_v0 }
 0x117   :  { %9630 = vmatmul.mubr.msk.bf16.gmra.mrb[24].mxu0 %vm429_vm0, %v219_v25 }
 0x118   :  { %650 = vmatprep.mubr.bf16.mxu0 %v12515_v0 }
 0x119   :  { %9634 = vmatmul.mubr.msk.bf16.gmra.mrb[24].mxu1 %vm429_vm0, %v219_v25 }
 0x11a   :  { %723 = vmatprep.mubr.bf16.mxu1 %v12515_v0 }
 0x11f   :  { %9631 = vmatmul.mubr.msk.bf16.gmra.mrb[28].mxu0 %vm429_vm0, %v220_v28 }
 0x120   :  { %766 = vmatprep.mubr.bf16.mxu0 %v12515_v0 }
 0x121   :  { %9635 = vmatmul.mubr.msk.bf16.gmra.mrb[28].mxu1 %vm429_vm0, %v220_v28 }
 0x122   :  { %839 = vmatprep.mubr.bf16.mxu1 %v12515_v0 }
 0x127   :  { %9636 = vmatmul.mubr.msk.bf16.vlgmr.msra.gmra.mrb[32].mxu0 %vm429_vm0, %v12818_v7 }
 0x128   :  { %776 = vmatprep.mubr.bf16.mxu0 %v12515_v0 }
 0x129   :  { %9640 = vmatmul.mubr.msk.bf16.vlgmr.msra.gmra.mrb[32].mxu1 %vm429_vm0, %v12818_v7  ;;  %v13030_v7 = vsub.s32 0, %v13000_v59 }
 0x12a   :  { %849 = vmatprep.mubr.bf16.mxu1 %v12515_v0 }
 0x12b   :  { %14578 = vst [vmem:[#allocation43_spill] sm:$0xff] %v13030_v7  ;;  %v13039_v12 = vrot.slane %v13020_v4, %v13030_v7 }
 0x12f   :  { %9637 = vmatmul.mubr.msk.bf16.gmra.mrb[36].mxu0 %vm429_vm0, %v12856_v19 }
 0x130   :  { %786 = vmatprep.mubr.bf16.mxu0 %v12515_v0 }
 0x131   :  { %9641 = vmatmul.mubr.msk.bf16.gmra.mrb[36].mxu1 %vm429_vm0, %v12856_v19 }
 0x132   :  { %859 = vmatprep.mubr.bf16.mxu1 %v12515_v0 }
 0x137   :  { %9638 = vmatmul.mubr.msk.bf16.gmra.mrb[40].mxu0 %vm429_vm0, %v219_v25 }
 0x138   :  { %796 = vmatprep.mubr.bf16.mxu0 %v12515_v0 }
 0x139   :  { %9642 = vmatmul.mubr.msk.bf16.gmra.mrb[40].mxu1 %vm429_vm0, %v219_v25 }
 0x13a   :  { %869 = vmatprep.mubr.bf16.mxu1 %v12515_v0 }
 0x13f   :  { %9639 = vmatmul.mubr.msk.bf16.gmra.mrb[44].mxu0 %vm429_vm0, %v220_v28 }
 0x140   :  { %10656 = vmatprep.mubr.msk.bf16.mxu0 %vm12517_vm1, %v14541_v37 }
 0x141   :  { %9643 = vmatmul.mubr.msk.bf16.gmra.mrb[44].mxu1 %vm429_vm0, %v220_v28 }
 0x142   :  { %10662 = vmatprep.mubr.msk.bf16.mxu1 %vm12517_vm1, %v14541_v37 }
 0x1ba   :  { %v476_v38 = vpop.f32.mrb[0].mxu0 }
 0x1bb   :  { %v12964_v39 = vpop.f32.mrb[1].mxu0  ;;  %v477_v21 = vadd.f32 %v476_v38, %v13039_v12 }
 0x1bc   :  { %v480_v40 = vpop.f32.mrb[2].mxu0  ;;  %v12972_v44 = vpop.f32.mrb[0].mxu1 }
 0x1bd   :  { %v12966_v41 = vpop.f32.mrb[3].mxu0  ;;  %v12976_v46 = vpop.f32.mrb[1].mxu1  ;;  %v481_v22 = vadd.f32 %v480_v40, %v13039_v12  ;;  %v10244_v27 = vpack.c.bf16 %v477_v21, %v477_v21 }
 0x1be   :  { %14566 = vst [vmem:[#allocation32_spill] sm:$0xff] %v12976_v46  ;;  %v12980_v48 = vpop.f32.mrb[2].mxu1 }
 0x1bf   :  { %14567 = vst [vmem:[#allocation33_spill] sm:$0xff] %v12980_v48  ;;  %v12982_v49 = vpop.f32.mrb[3].mxu1  ;;  %v10245_v34 = vpack.c.bf16 %v481_v22, %v481_v22 }
 0x1c0   :  { %14568 = vst [vmem:[#allocation34_spill] sm:$0xff] %v12982_v49 }
 0x1c2   :  { %v12968_v42 = vpop.f32.mrb[4].mxu0 }
 0x1c3   :  { %v12970_v43 = vpop.f32.mrb[5].mxu0  ;;  %v487_v38 = vadd.f32 %v12968_v42, %v13039_v12 }
 0x1c4   :  { %v12974_v45 = vpop.f32.mrb[6].mxu0  ;;  %v12988_v52 = vpop.f32.mrb[4].mxu1 }
 0x1c5   :  { %v12978_v47 = vpop.f32.mrb[7].mxu0  ;;  %14569 = vst [vmem:[#allocation35_spill] sm:$0xff] %v12988_v52  ;;  %v12992_v54 = vpop.f32.mrb[5].mxu1  ;;  %v491_v40 = vadd.f32 %v12974_v45, %v13039_v12  ;;  %v10246_v42 = vpack.c.bf16 %v487_v38, %v487_v38 }
 0x1c6   :  { %14570 = vst [vmem:[#allocation36_spill] sm:$0xff] %v12992_v54  ;;  %v12996_v57 = vpop.f32.mrb[6].mxu1 }
 0x1c7   :  { %14571 = vst [vmem:[#allocation37_spill] sm:$0xff] %v12996_v57  ;;  %v12998_v58 = vpop.f32.mrb[7].mxu1  ;;  %v10247_v45 = vpack.c.bf16 %v491_v40, %v491_v40 }
 0x1c8   :  { %14572 = vst [vmem:[#allocation38_spill] sm:$0xff] %v12998_v58 }
 0x1ca   :  { %v12984_v50 = vpop.f32.mrb[8].mxu0 }
 0x1cb   :  { %v12986_v51 = vpop.f32.mrb[9].mxu0 }
 0x1cc   :  { %v12990_v53 = vpop.f32.mrb[10].mxu0  ;;  %v13007_v63 = vpop.f32.mrb[8].mxu1 }
 0x1cd   :  { %v12994_v56 = vpop.f32.mrb[11].mxu0  ;;  %14573 = vst [vmem:[#allocation39_spill] sm:$0xff] %v13007_v63  ;;  %v13011_v1 = vpop.f32.mrb[9].mxu1 }
 0x1ce   :  { %14574 = vst [vmem:[#allocation40_spill] sm:$0xff] %v13011_v1  ;;  %v13015_v3 = vpop.f32.mrb[10].mxu1 }
 0x1cf   :  { %14575 = vst [vmem:[#allocation41_spill] sm:$0xff] %v13015_v3  ;;  %v13022_v5 = vpop.f32.mrb[11].mxu1 }
 0x1d0   :  { %14577 = vst [vmem:[#allocation42_spill] sm:$0xff] %v13022_v5 }
 0x1d2   :  { %v13002_v60 = vpop.f32.mrb[12].mxu0 }
 0x1d3   :  { %v13004_v61 = vpop.f32.mrb[13].mxu0 }
 0x1d4   :  { %v13009_v0 = vpop.f32.mrb[14].mxu0  ;;  %v13035_v11 = vpop.f32.mrb[12].mxu1 }
 0x1d5   :  { %v13013_v2 = vpop.f32.mrb[15].mxu0  ;;  %14579 = vst [vmem:[#allocation44_spill] sm:$0xff] %v13035_v11  ;;  %v13041_v14 = vpop.f32.mrb[13].mxu1 }
 0x1d6   :  { %14580 = vst [vmem:[#allocation45_spill] sm:$0xff] %v13041_v14  ;;  %v13046_v18 = vpop.f32.mrb[14].mxu1 }
 0x1d7   :  { %14581 = vst [vmem:[#allocation46_spill] sm:$0xff] %v13046_v18  ;;  %v13048_v19 = vpop.f32.mrb[15].mxu1 }
 0x1d8   :  { %14582 = vst [vmem:[#allocation47_spill] sm:$0xff] %v13048_v19 }
 0x1da   :  { %v622_v8 = vpop.f32.mrb[16].mxu0 }
 0x1db   :  { %v623_v9 = vadd.f32 %v622_v8, %v13027_v6  ;;  %v13033_v10 = vpop.f32.mrb[17].mxu0 }
 0x1dc   :  { %v626_v13 = vpop.f32.mrb[18].mxu0  ;;  %v13057_v26 = vpop.f32.mrb[16].mxu1 }
 0x1dd   :  { %v10252_v15 = vpack.c.bf16 %v623_v9, %v623_v9  ;;  %v627_v16 = vadd.f32 %v626_v13, %v13027_v6  ;;  %v13044_v17 = vpop.f32.mrb[19].mxu0  ;;  %v13059_v29 = vpop.f32.mrb[17].mxu1 }
 0x1de   :  { %14583 = vst [vmem:[#allocation48_spill] sm:$0xff] %v13059_v29  ;;  %v13064_v33 = vpop.f32.mrb[18].mxu1 }
 0x1df   :  { %v10253_v20 = vpack.c.bf16 %v627_v16, %v627_v16  ;;  %10655 = vmatpush3.bf16.xpose.msra.mxu0 %v10252_v15  ;;  %v13066_v35 = vpop.f32.mrb[19].mxu1 }
 0x1e0   :  { %10666 = vmatprep.subr.bf16.mxu0 %v14541_v37  ;;  %14584 = vst [vmem:[#allocation49_spill] sm:$0xff] %v13066_v35 }
 0x1e1   :  { %10661 = vmatpush3.bf16.xpose.msra.mxu1 %v10253_v20 }
 0x1e2   :  { %v632_v23 = vpop.f32.mrb[20].mxu0  ;;  %10672 = vmatprep.subr.bf16.mxu1 %v14541_v37 }
 0x1e3   :  { %v633_v24 = vadd.f32 %v632_v23, %v13027_v6  ;;  %v13055_v25 = vpop.f32.mrb[21].mxu0 }
 0x1e4   :  { %v636_v28 = vpop.f32.mrb[22].mxu0  ;;  %v13081_v13 = vpop.f32.mrb[20].mxu1 }
 0x1e5   :  { %v10254_v30 = vpack.c.bf16 %v633_v24, %v633_v24  ;;  %v637_v31 = vadd.f32 %v636_v28, %v13027_v6  ;;  %v13062_v32 = vpop.f32.mrb[23].mxu0  ;;  %v13083_v16 = vpop.f32.mrb[21].mxu1  ;;  %v497_v28 = vadd.f32 %v12984_v50, %v13039_v12 }
 0x1e6   :  { %10657 = vmatmul.mubr.bf16.vlgmr.msra.gmra.mrb[48].mxu0 %v10244_v27  ;;  %14585 = vst [vmem:[#allocation50_spill] sm:$0xff] %v13083_v16  ;;  %v13088_v23 = vpop.f32.mrb[22].mxu1 }
 0x1e7   :  { %v10255_v36 = vpack.c.bf16 %v637_v31, %v637_v31  ;;  %10667 = vmatpush3.bf16.xpose.msra.mxu0 %v10254_v30  ;;  %10668 = vmatprep.mubr.msk.bf16.mxu0 %vm12517_vm1, %v14541_v37  ;;  %14586 = vst [vmem:[#allocation51_spill] sm:$0xff] %v13088_v23  ;;  %v13090_v24 = vpop.f32.mrb[23].mxu1  ;;  %v501_v30 = vadd.f32 %v12990_v53, %v13039_v12 }
 0x1e8   :  { %10663 = vmatmul.mubr.bf16.vlgmr.msra.gmra.mrb[48].mxu1 %v10245_v34  ;;  %10678 = vmatprep.subr.bf16.mxu0 %v14541_v37  ;;  %14587 = vst [vmem:[#allocation52_spill] sm:$0xff] %v13090_v24  ;;  %v10248_v50 = vpack.c.bf16 %v497_v28, %v497_v28 }
 0x1e9   :  { %10673 = vmatpush3.bf16.xpose.msra.mxu1 %v10255_v36  ;;  %10674 = vmatprep.mubr.msk.bf16.mxu1 %vm12517_vm1, %v14541_v37  ;;  %v10249_v53 = vpack.c.bf16 %v501_v30, %v501_v30 }
 0x1ea   :  { %v642_v55 = vpop.f32.mrb[24].mxu0  ;;  %10684 = vmatprep.subr.bf16.mxu1 %v14541_v37 }
 0x1eb   :  { %v643_v8 = vadd.f32 %v642_v55, %v13027_v6  ;;  %v13079_v9 = vpop.f32.mrb[25].mxu0 }
 0x1ec   :  { %v646_v15 = vpop.f32.mrb[26].mxu0  ;;  %v13105_v38 = vpop.f32.mrb[24].mxu1 }
 0x1ed   :  { %v10256_v20 = vpack.c.bf16 %v643_v8, %v643_v8  ;;  %v647_v21 = vadd.f32 %v646_v15, %v13027_v6  ;;  %v13086_v22 = vpop.f32.mrb[27].mxu0  ;;  %14588 = vst [vmem:[#allocation53_spill] sm:$0xff] %v13105_v38  ;;  %v13107_v55 = vpop.f32.mrb[25].mxu1 }
 0x1ee   :  { %10669 = vmatmul.mubr.bf16.vlgmr.msra.gmra.mrb[52].mxu0 %v10246_v42  ;;  %14589 = vst [vmem:[#allocation54_spill] sm:$0xff] %v13107_v55 }
 0x1ef   :  { %v10257_v27 = vpack.c.bf16 %v647_v21, %v647_v21  ;;  %10679 = vmatpush3.bf16.xpose.msra.mxu0 %v10256_v20  ;;  %10680 = vmatprep.mubr.msk.bf16.mxu0 %vm12517_vm1, %v14541_v37  ;;  %v13112_v20 = vpop.f32.mrb[26].mxu1 }
 0x1f0   :  { %10675 = vmatmul.mubr.bf16.vlgmr.msra.gmra.mrb[52].mxu1 %v10247_v45  ;;  %10690 = vmatprep.subr.bf16.mxu0 %v14541_v37  ;;  %14590 = vst [vmem:[#allocation55_spill] sm:$0xff] %v13112_v20  ;;  %v13114_v21 = vpop.f32.mrb[27].mxu1 }
 0x1f1   :  { %10685 = vmatpush3.bf16.xpose.msra.mxu1 %v10257_v27  ;;  %10686 = vmatprep.mubr.msk.bf16.mxu1 %vm12517_vm1, %v14541_v37  ;;  %14591 = vst [vmem:[#allocation56_spill] sm:$0xff] %v13114_v21  ;;  %v507_v27 = vadd.f32 %v13002_v60, %v13039_v12 }
 0x1f2   :  { %v652_v31 = vpop.f32.mrb[28].mxu0  ;;  %10696 = vmatprep.subr.bf16.mxu1 %v14541_v37 }
 0x1f3   :  { %v653_v34 = vadd.f32 %v652_v31, %v13027_v6  ;;  %v13103_v36 = vpop.f32.mrb[29].mxu0  ;;  %v10250_v30 = vpack.c.bf16 %v507_v27, %v507_v27 }
 0x1f4   :  { %v656_v40 = vpop.f32.mrb[30].mxu0  ;;  %v13126_v28 = vpop.f32.mrb[28].mxu1 }
 0x1f5   :  { %v10258_v8 = vpack.c.bf16 %v653_v34, %v653_v34  ;;  %v657_v42 = vadd.f32 %v656_v40, %v13027_v6  ;;  %v13110_v15 = vpop.f32.mrb[31].mxu0  ;;  %v511_v6 = vadd.f32 %v13009_v0, %v13039_v12  ;;  %14592 = vst [vmem:[#allocation57_spill] sm:$0xff] %v13126_v28  ;;  %v13128_v31 = vpop.f32.mrb[29].mxu1  ;;  %v246_v0 = vld [vmem:[%s14576_s14 + $0x8] sm:$0xf]  ;;  %v13142_v12 = vsub.s32 1, %v13000_v59 }
 0x1f6   :  { %10681 = vmatmul.mubr.bf16.vlgmr.msra.gmra.mrb[56].mxu0 %v10248_v50  ;;  %14593 = vst [vmem:[#allocation58_spill] sm:$0xff] %v13128_v31  ;;  %v13130_v34 = vpop.f32.mrb[30].mxu1  ;;  %v13145_v40 = vrot.slane %v246_v0, %v13030_v7 }
 0x1f7   :  { %v10259_v45 = vpack.c.bf16 %v657_v42, %v657_v42  ;;  %10691 = vmatpush3.bf16.xpose.msra.mxu0 %v10258_v8  ;;  %10692 = vmatprep.mubr.msk.bf16.mxu0 %vm12517_vm1, %v14541_v37  ;;  %14594 = vst [vmem:[#allocation59_spill] sm:$0xff] %v13130_v34  ;;  %v10251_v60 = vpack.c.bf16 %v511_v6, %v511_v6  ;;  %v13132_v50 = vpop.f32.mrb[31].mxu1  ;;  %v13151_v42 = vsub.s32 2, %v13000_v59 }
 0x1f8   :  { %10687 = vmatmul.mubr.bf16.vlgmr.msra.gmra.mrb[56].mxu1 %v10249_v53  ;;  %10702 = vmatprep.subr.bf16.mxu0 %v14541_v37  ;;  %14595 = vst [vmem:[#allocation60_spill] sm:$0xff] %v13132_v50  ;;  %v13148_v8 = vrot.slane %v246_v0, %v13142_v12  ;;  %v13154_v53 = vsub.s32 3, %v13000_v59 }
 0x1f9   :  { %10697 = vmatpush3.bf16.xpose.msra.mxu1 %v10259_v45  ;;  %10698 = vmatprep.mubr.msk.bf16.mxu1 %vm12517_vm1, %v14541_v37 }
 0x1fa   :  { %10708 = vmatprep.subr.bf16.mxu1 %v14541_v37  ;;  %14596 = vst [vmem:[#allocation61_spill] sm:$0xff] %v13154_v53  ;;  %v768_v45 = vpop.f32.mrb[32].mxu0 }
 0x1fb   :  { %v769_v27 = vadd.f32 %v768_v45, %v13145_v40  ;;  %v770_v6 = vpop.f32.mrb[33].mxu0 }
 0x1fc   :  { %v772_v62 = vpop.f32.mrb[34].mxu0  ;;  %v841_v50 = vpop.f32.mrb[32].mxu1 }
 0x1fd   :  { %v10260_v7 = vpack.c.bf16 %v769_v27, %v769_v27  ;;  %v773_v19 = vadd.f32 %v772_v62, %v13145_v40  ;;  %v774_v14 = vpop.f32.mrb[35].mxu0 }
 0x1fe   :  { %10693 = vmatmul.mubr.bf16.vlgmr.msra.gmra.mrb[60].mxu0 %v10250_v30  ;;  %v13158_v30 = vrot.slane %v246_v0, %v13151_v42  ;;  %v13168_v5 = vadd.f32 %v774_v14, %v13148_v8  ;;  %v14600_v14 = vmov 0.0  }
 0x1ff   :  { %10704 = vmatprep.mubr.msk.bf16.mxu0 %vm12517_vm1, %v14541_v37  ;;  %v1486_v45 = vsel %vm1484_vm2, %v10260_v7, 0  ;;  %v10261_v31 = vpack.c.bf16 %v773_v19, %v773_v19 }
 0x200   :  { %10699 = vmatmul.mubr.bf16.vlgmr.msra.gmra.mrb[60].mxu1 %v10251_v60  ;;  %v13161_v60 = vadd.f32 %v770_v6, %v13148_v8  ;;  %v13172_v1 = vadd.f32 %v841_v50, %v13158_v30  ;;  %v843_v6 = vpop.f32.mrb[33].mxu1  ;;  %10703 = vmatpush3.bf16.msra.mxu0 %v1486_v45 }
 0x201   :  { %10710 = vmatprep.mubr.msk.bf16.mxu1 %vm12517_vm1, %v14541_v37  ;;  %v13164_v37 = vrot.slane %v246_v0, %v13154_v53  ;;  %v845_v0 = vpop.f32.mrb[34].mxu1  ;;  %v1532_v27 = vsel %vm1484_vm2, %v10261_v31, 0  ;;  %10714 = vmatprep.subr.bf16.mxu0 %v14600_v14 }
 0x202   :  { %14597 = vst [vmem:[#allocation62_spill] sm:$0xff] %v13172_v1  ;;  %v13179_v62 = vadd.f32 %v845_v0, %v13158_v30  ;;  %v847_v58 = vpop.f32.mrb[35].mxu1  ;;  %v778_v55 = vpop.f32.mrb[36].mxu0  ;;  %10709 = vmatpush3.bf16.msra.mxu1 %v1532_v27 }
 0x203   :  { %v13175_v21 = vadd.f32 %v843_v6, %v13164_v37  ;;  %v13183_v7 = vadd.f32 %v847_v58, %v13164_v37  ;;  %v13186_v19 = vadd.f32 %v778_v55, %v13145_v40  ;;  %v780_v50 = vpop.f32.mrb[37].mxu0  ;;  %10720 = vmatprep.subr.bf16.mxu1 %v14600_v14 }
 0x204   :  { %14599 = vst [vmem:[#allocation64_spill] sm:$0xff] %v13179_v62  ;;  %v13190_v45 = vadd.f32 %v780_v50, %v13148_v8  ;;  %v782_v31 = vpop.f32.mrb[38].mxu0 }
 0x205   :  { %14598 = vst [vmem:[#allocation63_spill] sm:$0xff] %v13175_v21  ;;  %14601 = vst [vmem:[#allocation65_spill] sm:$0xff] %v13183_v7  ;;  %v13193_v6 = vadd.f32 %v782_v31, %v13145_v40  ;;  %v784_v0 = vpop.f32.mrb[39].mxu0  ;;  %v851_v21 = vpop.f32.mrb[36].mxu1 }
 0x206   :  { %v13196_v54 = vadd.f32 %v784_v0, %v13148_v8  ;;  %v13199_v58 = vadd.f32 %v851_v21, %v13158_v30  ;;  %v853_v55 = vpop.f32.mrb[37].mxu1 }
 0x207   :  { %v13202_v27 = vadd.f32 %v853_v55, %v13164_v37  ;;  %v855_v7 = vpop.f32.mrb[38].mxu1 }
 0x208   :  { %14602 = vst [vmem:[#allocation66_spill] sm:$0xff] %v13199_v58  ;;  %v13205_v50 = vadd.f32 %v855_v7, %v13158_v30  ;;  %v857_v24 = vpop.f32.mrb[39].mxu1 }
 0x209   :  { %14603 = vst [vmem:[#allocation67_spill] sm:$0xff] %v13202_v27  ;;  %v13208_v31 = vadd.f32 %v857_v24, %v13164_v37 }
 0x20a   :  { %14604 = vst [vmem:[#allocation68_spill] sm:$0xff] %v13205_v50  ;;  %v788_v49 = vpop.f32.mrb[40].mxu0 }
 0x20b   :  { %14605 = vst [vmem:[#allocation69_spill] sm:$0xff] %v13208_v31  ;;  %v13211_v16 = vadd.f32 %v788_v49, %v13145_v40  ;;  %v790_v0 = vpop.f32.mrb[41].mxu0 }
 0x20c   :  { %v13214_v21 = vadd.f32 %v790_v0, %v13148_v8  ;;  %v792_v46 = vpop.f32.mrb[42].mxu0  ;;  %v861_v35 = vpop.f32.mrb[40].mxu1 }
 0x20d   :  { %v13217_v55 = vadd.f32 %v792_v46, %v13145_v40  ;;  %v794_v27 = vpop.f32.mrb[43].mxu0  ;;  %v13223_v53 = vadd.f32 %v861_v35, %v13158_v30  ;;  %v863_v24 = vpop.f32.mrb[41].mxu1 }
 0x20e   :  { %v13220_v7 = vadd.f32 %v794_v27, %v13148_v8  ;;  %v13226_v49 = vadd.f32 %v863_v24, %v13164_v37  ;;  %v865_v31 = vpop.f32.mrb[42].mxu1 }
 0x20f   :  { %14606 = vst [vmem:[#allocation70_spill] sm:$0xff] %v13223_v53  ;;  %v13229_v0 = vadd.f32 %v865_v31, %v13158_v30  ;;  %v867_v29 = vpop.f32.mrb[43].mxu1 }
 0x210   :  { %14607 = vst [vmem:[#allocation71_spill] sm:$0xff] %v13226_v49  ;;  %v13232_v46 = vadd.f32 %v867_v29, %v13164_v37 }
 0x211   :  { %14608 = vst [vmem:[#allocation72_spill] sm:$0xff] %v13229_v0 }
 0x212   :  { %v798_v50 = vpop.f32.mrb[44].mxu0  ;;  %14609 = vst [vmem:[#allocation73_spill] sm:$0xff] %v13232_v46 }
 0x213   :  { %v13235_v58 = vadd.f32 %v798_v50, %v13145_v40  ;;  %v800_v27 = vpop.f32.mrb[45].mxu0 }
 0x214   :  { %v13238_v35 = vadd.f32 %v800_v27, %v13148_v8  ;;  %v802_v53 = vpop.f32.mrb[46].mxu0  ;;  %v871_v62 = vpop.f32.mrb[44].mxu1 }
 0x215   :  { %v13241_v24 = vadd.f32 %v802_v53, %v13145_v40  ;;  %v804_v49 = vpop.f32.mrb[47].mxu0  ;;  %v13247_v0 = vadd.f32 %v871_v62, %v13158_v30  ;;  %v873_v29 = vpop.f32.mrb[45].mxu1 }
 0x216   :  { %v13244_v31 = vadd.f32 %v804_v49, %v13148_v8  ;;  %v13250_v50 = vadd.f32 %v873_v29, %v13164_v37  ;;  %v875_v46 = vpop.f32.mrb[46].mxu1 }
 0x217   :  { %14610 = vst [vmem:[#allocation74_spill] sm:$0xff] %v13247_v0  ;;  %v13253_v27 = vadd.f32 %v875_v46, %v13158_v30  ;;  %v877_v18 = vpop.f32.mrb[47].mxu1 }
 0x218   :  { %14611 = vst [vmem:[#allocation75_spill] sm:$0xff] %v13250_v50  ;;  %v13256_v40 = vadd.f32 %v877_v18, %v13164_v37 }
 0x219   :  { %14612 = vst [vmem:[#allocation76_spill] sm:$0xff] %v13253_v27 }
 0x21a   :  { %14613 = vst [vmem:[#allocation77_spill] sm:$0xff] %v13256_v40 }
 0x2b9   :  { %v1098_v53 = vpop.f32.mrb[48].mxu0 }
 0x2ba   :  { %v10658_v1 = vpop.f32.mrb[49].mxu0  ;;  %v1385_v8 = vsel %vm1384_vm3, %v1098_v53, -inf }
 0x2bb   :  { %v1138_v49 = vpop.f32.mrb[48].mxu1  ;;  %1386 = vmax.xlane.f32.xlu0 %v1385_v8  ;;  %v1101_v62 = vpop.f32.mrb[50].mxu0 }
 0x2bc   :  { %v10659_v0 = vpop.f32.mrb[51].mxu0  ;;  %v10664_v11 = vpop.f32.mrb[49].mxu1  ;;  %v1388_v34 = vsel %vm1384_vm3, %v1138_v49, -inf }
 0x2bd   :  { %v1141_v29 = vpop.f32.mrb[50].mxu1 }
 0x2be   :  { %v10665_v50 = vpop.f32.mrb[51].mxu1 }
 0x2bf   :  { %1389 = vmax.xlane.f32.xlu0 %v1388_v34 }
 0x2c1   :  { %v1178_v30 = vpop.f32.mrb[52].mxu0 }
 0x2c2   :  { %v10670_v46 = vpop.f32.mrb[53].mxu0  ;;  %v1391_v37 = vsel %vm1384_vm3, %v1178_v30, -inf }
 0x2c3   :  { %v1218_v18 = vpop.f32.mrb[52].mxu1  ;;  %1392 = vmax.xlane.f32.xlu1 %v1391_v37  ;;  %v1181_v40 = vpop.f32.mrb[54].mxu0 }
 0x2c4   :  { %v10671_v1 = vpop.f32.mrb[55].mxu0  ;;  %v10676_v27 = vpop.f32.mrb[53].mxu1  ;;  %v1394_v8 = vsel %vm1384_vm3, %v1218_v18, -inf }
 0x2c5   :  { %v1221_v3 = vpop.f32.mrb[54].mxu1 }
 0x2c6   :  { %v10677_v28 = vpop.f32.mrb[55].mxu1 }
 0x2c7   :  { %1395 = vmax.xlane.f32.xlu1 %v1394_v8 }
 0x2c9   :  { %v1258_v11 = vpop.f32.mrb[56].mxu0 }
 0x2ca   :  { %v10682_v0 = vpop.f32.mrb[57].mxu0  ;;  %v1397_v50 = vsel %vm1384_vm3, %v1258_v11, -inf }
 0x2cb   :  { %v1298_v62 = vpop.f32.mrb[56].mxu1  ;;  %1398 = vmax.xlane.f32.xlu0 %v1397_v50  ;;  %v1261_v34 = vpop.f32.mrb[58].mxu0 }
 0x2cc   :  { %v10683_v29 = vpop.f32.mrb[59].mxu0  ;;  %v10688_v46 = vpop.f32.mrb[57].mxu1  ;;  %v1400_v63 = vsel %vm1384_vm3, %v1298_v62, -inf }
 0x2cd   :  { %v1301_v37 = vpop.f32.mrb[58].mxu1  ;;  %1401 = vmax.xlane.f32.xlu1 %v1400_v63 }
 0x2ce   :  { %v10689_v40 = vpop.f32.mrb[59].mxu1 }
 0x2d1   :  { %v1338_v27 = vpop.f32.mrb[60].mxu0 }
 0x2d2   :  { %v10694_v3 = vpop.f32.mrb[61].mxu0  ;;  %v1403_v28 = vsel %vm1384_vm3, %v1338_v27, -inf }
 0x2d3   :  { %v1378_v1 = vpop.f32.mrb[60].mxu1  ;;  %1404 = vmax.xlane.f32.xlu0 %v1403_v28  ;;  %v1341_v8 = vpop.f32.mrb[62].mxu0 }
 0x2d4   :  { %v10695_v0 = vpop.f32.mrb[63].mxu0  ;;  %v10700_v20 = vpop.f32.mrb[61].mxu1  ;;  %v1406_v57 = vsel %vm1384_vm3, %v1378_v1, -inf }
 0x2d5   :  { %v1381_v50 = vpop.f32.mrb[62].mxu1  ;;  %1407 = vmax.xlane.f32.xlu1 %v1406_v57 }
 0x2d6   :  { %v10701_v34 = vpop.f32.mrb[63].mxu1 }
 0x348   :  { %v1387_v29 = vpop.xlane.xlu0 %1386 }
 0x349   :  { %v1409_v46 = vsub.f32 %v1098_v53, %v1387_v29 }
 0x34b   :  { %v1417_v38 = vmul.f32 1.442695, %v1409_v46 }
 0x34c   :  { %v1390_v37 = vpop.xlane.xlu0 %1389 }
 0x34d   :  { %12052 = vpow2.f32 %v1417_v38  ;;  %v1410_v63 = vsub.f32 %v1138_v49, %v1390_v37 }
 0x34f   :  { %v1419_v40 = vmul.f32 1.442695, %v1410_v63 }
 0x350   :  { %v1393_v3 = vpop.xlane.xlu1 %1392 }
 0x351   :  { %12054 = vpow2.f32 %v1419_v40  ;;  %v1411_v52 = vsub.f32 %v1178_v30, %v1393_v3 }
 0x353   :  { %v1421_v23 = vmul.f32 1.442695, %v1411_v52 }
 0x354   :  { %v1396_v28 = vpop.xlane.xlu1 %1395 }
 0x355   :  { %12056 = vpow2.f32 %v1421_v23  ;;  %v1412_v8 = vsub.f32 %v1218_v18, %v1396_v28 }
 0x357   :  { %v12053_v20 = vpop.eup %12052  ;;  %v1423_v0 = vmul.f32 1.442695, %v1412_v8 }
 0x358   :  { %v1399_v48 = vpop.xlane.xlu0 %1398  ;;  %v1433_v57 = vsel %vm1384_vm3, %v12053_v20, 0.0 }
 0x359   :  { %12058 = vpow2.f32 %v1423_v0  ;;  %v1413_v50 = vsub.f32 %v1258_v11, %v1399_v48  ;;  %1434 = vadd.xlane.f32.xlu0 %v1433_v57 }
 0x35a   :  { %v1402_v53 = vpop.xlane.xlu1 %1401 }
 0x35b   :  { %v12055_v34 = vpop.eup %12054  ;;  %v1425_v38 = vmul.f32 1.442695, %v1413_v50  ;;  %v1414_v49 = vsub.f32 %v1298_v62, %v1402_v53 }
 0x35c   :  { %v1436_v29 = vsel %vm1384_vm3, %v12055_v34, 0.0 }
 0x35d   :  { %12060 = vpow2.f32 %v1425_v38  ;;  %v1427_v30 = vmul.f32 1.442695, %v1414_v49  ;;  %1437 = vadd.xlane.f32.xlu1 %v1436_v29 }
 0x35f   :  { %v12057_v52 = vpop.eup %12056  ;;  %12062 = vpow2.f32 %v1427_v30  ;;  %v10262_v30 = vpack.c.bf16 %v13186_v19, %v13186_v19 }
 0x360   :  { %v1405_v23 = vpop.xlane.xlu0 %1404  ;;  %v1439_v18 = vsel %vm1384_vm3, %v12057_v52, 0.0 }
 0x361   :  { %v1415_v46 = vsub.f32 %v1338_v27, %v1405_v23  ;;  %1440 = vadd.xlane.f32.xlu0 %v1439_v18 }
 0x362   :  { %v1408_v37 = vpop.xlane.xlu1 %1407 }
 0x363   :  { %v12059_v63 = vpop.eup %12058  ;;  %v1429_v48 = vmul.f32 1.442695, %v1415_v46  ;;  %v1416_v11 = vsub.f32 %v1378_v1, %v1408_v37 }
 0x364   :  { %v1442_v40 = vsel %vm1384_vm3, %v12059_v63, 0.0 }
 0x365   :  { %12064 = vpow2.f32 %v1429_v48  ;;  %v1431_v62 = vmul.f32 1.442695, %v1416_v11  ;;  %1443 = vadd.xlane.f32.xlu1 %v1442_v40  ;;  %v1578_v48 = vsel %vm1484_vm2, %v10262_v30, 0  ;;  %v10263_v11 = vpack.c.bf16 %v13193_v6, %v13193_v6 }
 0x366   :  { %v10264_v6 = vpack.c.bf16 %v13211_v16, %v13211_v16 }
 0x367   :  { %v13270_v3 = vpop.eup %12060  ;;  %12066 = vpow2.f32 %v1431_v62 }
 0x368   :  { %v1445_v28 = vsel %vm1384_vm3, %v13270_v3, 0.0 }
 0x369   :  { %v13274_v8 = vpop.eup %12062  ;;  %1446 = vadd.xlane.f32.xlu0 %v1445_v28 }
 0x36a   :  { %v1448_v27 = vsel %vm1384_vm3, %v13274_v8, 0.0 }
 0x36b   :  { %1449 = vadd.xlane.f32.xlu1 %v1448_v27  ;;  %v1624_v27 = vsel %vm1484_vm2, %v10263_v11, 0 }
 0x36f   :  { %v13278_v0 = vpop.eup %12064 }
 0x370   :  { %v1451_v1 = vsel %vm1384_vm3, %v13278_v0, 0.0 }
 0x371   :  { %v13282_v57 = vpop.eup %12066  ;;  %1452 = vadd.xlane.f32.xlu0 %v1451_v1 }
 0x372   :  { %v1454_v50 = vsel %vm1384_vm3, %v13282_v57, 0.0 }
 0x373   :  { %1455 = vadd.xlane.f32.xlu1 %v1454_v50 }
 0x3e6   :  { %v1435_v53 = vpop.xlane.xlu0 %1434 }
 0x3e7   :  { %12068 = vrcp.f32 %v1435_v53  ;;  %v1670_v53 = vsel %vm1484_vm2, %v10264_v6, 0  ;;  %v13342_v6 = vrot.slane %v13020_v4, %v13142_v12 }
 0x3ea   :  { %v1438_v38 = vpop.xlane.xlu1 %1437 }
 0x3eb   :  { %12070 = vrcp.f32 %v1438_v38  ;;  %v10265_v38 = vpack.c.bf16 %v13217_v55, %v13217_v55  ;;  %v10266_v55 = vpack.c.bf16 %v13235_v58, %v13235_v58 }
 0x3ed   :  { %v1762_v58 = vsel %vm1484_vm2, %v10266_v55, 0 }
 0x3ee   :  { %v1441_v49 = vpop.xlane.xlu0 %1440 }
 0x3ef   :  { %12072 = vrcp.f32 %v1441_v49 }
 0x3f1   :  { %v12069_v29 = vpop.eup %12068 }
 0x3f2   :  { %v1444_v23 = vpop.xlane.xlu1 %1443  ;;  %v1465_v18 = vmul.f32 %v12069_v29, %v12053_v20 }
 0x3f3   :  { %12074 = vrcp.f32 %v1444_v23  ;;  %v14548_v23 = vsub.s32 5, %v13000_v59 }
 0x3f4   :  { %v1473_v46 = vpack.c.bf16 %v1465_v18, %v1465_v18  ;;  %v1716_v18 = vsel %vm1484_vm2, %v10265_v38, 0  ;;  %v489_v38 = vadd.f32 %v12970_v43, %v13342_v6 }
 0x3f5   :  { %v12071_v37 = vpop.eup %12070  ;;  %v13322_v11 = vrot.slane %v13020_v4, %v14548_v23 }
 0x3f6   :  { %10705 = vmatmul.mubr.msk.bf16.vlgmr.msra.gmra.mrb[64].mxu0 %vm1384_vm3, %v1473_v46  ;;  %v1447_v40 = vpop.xlane.xlu0 %1446  ;;  %v1466_v62 = vmul.f32 %v12071_v37, %v12055_v34 }
 0x3f7   :  { %10715 = vmatpush3.bf16.msra.mxu0 %v1578_v48  ;;  %12076 = vrcp.f32 %v1447_v40  ;;  %10716 = vmatprep.mubr.msk.bf16.mxu0 %vm12517_vm1, %v14600_v14  ;;  %v635_v4 = vadd.f32 %v13055_v25, %v13322_v11  ;;  %v649_v43 = vadd.f32 %v13086_v22, %v13322_v11 }
 0x3f8   :  { %v1450_v19 = vpop.xlane.xlu1 %1449  ;;  %v1474_v28 = vpack.c.bf16 %v1466_v62, %v1466_v62  ;;  %10726 = vmatprep.subr.bf16.mxu0 %v14600_v14  ;;  %v625_v62 = vadd.f32 %v13033_v10, %v13322_v11 }
 0x3f9   :  { %v12073_v20 = vpop.eup %12072  ;;  %12078 = vrcp.f32 %v1450_v19 }
 0x3fa   :  { %10711 = vmatmul.mubr.msk.bf16.vlgmr.msra.gmra.mrb[64].mxu1 %vm1384_vm3, %v1474_v28  ;;  %v1467_v1 = vmul.f32 %v12073_v20, %v12057_v52  ;;  %v10276_v10 = vpack.c.bf16 %v625_v62, %v625_v62 }
 0x3fb   :  { %10721 = vmatpush3.bf16.msra.mxu1 %v1624_v27  ;;  %10722 = vmatprep.mubr.msk.bf16.mxu1 %vm12517_vm1, %v14600_v14 }
 0x3fc   :  { %v1475_v34 = vpack.c.bf16 %v1467_v1, %v1467_v1  ;;  %10732 = vmatprep.subr.bf16.mxu1 %v14600_v14  ;;  %v629_v1 = vadd.f32 %v13044_v17, %v13322_v11 }
 0x3fd   :  { %v12075_v50 = vpop.eup %12074 }
 0x3fe   :  { %10717 = vmatmul.mubr.msk.bf16.vlgmr.msra.gmra.mrb[68].mxu0 %vm1384_vm3, %v1475_v34  ;;  %v1453_v49 = vpop.xlane.xlu0 %1452  ;;  %v1468_v16 = vmul.f32 %v12075_v50, %v12059_v63  ;;  %v10277_v34 = vpack.c.bf16 %v629_v1, %v629_v1  ;;  %v483_v50 = vadd.f32 %v12966_v41, %v13342_v6  ;;  %v645_v41 = vadd.f32 %v13079_v9, %v13322_v11 }
 0x3ff   :  { %10727 = vmatpush3.bf16.msra.mxu0 %v1670_v53  ;;  %12080 = vrcp.f32 %v1453_v49  ;;  %10728 = vmatprep.mubr.msk.bf16.mxu0 %vm12517_vm1, %v14600_v14  ;;  %v10278_v53 = vpack.c.bf16 %v635_v4, %v635_v4 }
 0x400   :  { %v1456_v52 = vpop.xlane.xlu1 %1455  ;;  %v1476_v29 = vpack.c.bf16 %v1468_v16, %v1468_v16  ;;  %10738 = vmatprep.subr.bf16.mxu0 %v14600_v14  ;;  %v10269_v25 = vpack.c.bf16 %v483_v50, %v483_v50  ;;  %v493_v16 = vadd.f32 %v12978_v47, %v13342_v6  ;;  %v655_v47 = vadd.f32 %v13103_v36, %v13322_v11 }
 0x401   :  { %v12077_v30 = vpop.eup %12076  ;;  %12082 = vrcp.f32 %v1456_v52  ;;  %v10280_v52 = vpack.c.bf16 %v645_v41, %v645_v41 }
 0x402   :  { %10723 = vmatmul.mubr.msk.bf16.vlgmr.msra.gmra.mrb[68].mxu1 %vm1384_vm3, %v1476_v29  ;;  %v1469_v63 = vmul.f32 %v12077_v30, %v13270_v3  ;;  %v10267_v3 = vpack.c.bf16 %v13241_v24, %v13241_v24  ;;  %v10271_v9 = vpack.c.bf16 %v493_v16, %v493_v16  ;;  %v499_v29 = vadd.f32 %v12986_v51, %v13342_v6 }
 0x403   :  { %v12079_v46 = vpop.eup %12078  ;;  %10733 = vmatpush3.bf16.msra.mxu1 %v1716_v18  ;;  %10734 = vmatprep.mubr.msk.bf16.mxu1 %vm12517_vm1, %v14600_v14  ;;  %v10281_v30 = vpack.c.bf16 %v649_v43, %v649_v43  ;;  %v503_v18 = vadd.f32 %v12994_v56, %v13342_v6  ;;  %v10282_v55 = vpack.c.bf16 %v655_v47, %v655_v47 }
 0x404   :  { %v1477_v37 = vpack.c.bf16 %v1469_v63, %v1469_v63  ;;  %10744 = vmatprep.subr.bf16.mxu1 %v14600_v14  ;;  %v1470_v48 = vmul.f32 %v12079_v46, %v13274_v8  ;;  %v1808_v19 = vsel %vm1484_vm2, %v10267_v3, 0  ;;  %v10272_v22 = vpack.c.bf16 %v499_v29, %v499_v29 }
 0x405   :  { %v659_v51 = vadd.f32 %v13110_v15, %v13322_v11  ;;  %v10273_v36 = vpack.c.bf16 %v503_v18, %v503_v18  ;;  %v509_v63 = vadd.f32 %v13004_v61, %v13342_v6  ;;  %v10284_v56 = vpack.c.bf16 %v13161_v60, %v13161_v60 }
 0x406   :  { %10729 = vmatmul.mubr.msk.bf16.vlgmr.msra.gmra.mrb[72].mxu0 %vm1384_vm3, %v1477_v37  ;;  %v1478_v40 = vpack.c.bf16 %v1470_v48, %v1470_v48  ;;  %v513_v37 = vadd.f32 %v13013_v2, %v13342_v6  ;;  %v10285_v61 = vpack.c.bf16 %v13168_v5, %v13168_v5 }
 0x407   :  { %10739 = vmatpush3.bf16.msra.mxu0 %v1762_v58  ;;  %10740 = vmatprep.mubr.msk.bf16.mxu0 %vm12517_vm1, %v14600_v14  ;;  %v10283_v46 = vpack.c.bf16 %v659_v51, %v659_v51  ;;  %v10274_v15 = vpack.c.bf16 %v509_v63, %v509_v63  ;;  %v2366_v48 = vsel %vm1484_vm2, %v10284_v56, 0 }
 0x408   :  { %10750 = vmatprep.subr.bf16.mxu0 %v14600_v14  ;;  %v10275_v60 = vpack.c.bf16 %v513_v37, %v513_v37 }
 0x409   :  { %v12081_v8 = vpop.eup %12080 }
 0x40a   :  { %10735 = vmatmul.mubr.msk.bf16.vlgmr.msra.gmra.mrb[72].mxu1 %vm1384_vm3, %v1478_v40  ;;  %v1471_v28 = vmul.f32 %v12081_v8, %v13278_v0 }
 0x40b   :  { %v12083_v24 = vpop.eup %12082  ;;  %10745 = vmatpush3.bf16.msra.mxu1 %v1808_v19  ;;  %10746 = vmatprep.mubr.msk.bf16.mxu1 %vm12517_vm1, %v14600_v14 }
 0x40c   :  { %v1479_v20 = vpack.c.bf16 %v1471_v28, %v1471_v28  ;;  %v1472_v27 = vmul.f32 %v12083_v24, %v13282_v57  ;;  %10756 = vmatprep.subr.bf16.mxu1 %v14600_v14  ;;  %v479_v57 = vadd.f32 %v12964_v39, %v13342_v6  ;;  %v639_v39 = vadd.f32 %v13062_v32, %v13322_v11 }
 0x40d   :  { %v10270_v32 = vpack.c.bf16 %v489_v38, %v489_v38  ;;  %v2412_v11 = vsel %vm1484_vm2, %v10285_v61, 0 }
 0x40e   :  { %10741 = vmatmul.mubr.msk.bf16.vlgmr.msra.gmra.mrb[76].mxu0 %vm1384_vm3, %v1479_v20  ;;  %v1480_v0 = vpack.c.bf16 %v1472_v27, %v1472_v27  ;;  %v10268_v17 = vpack.c.bf16 %v479_v57, %v479_v57  ;;  %v10279_v49 = vpack.c.bf16 %v639_v39, %v639_v39 }
 0x40f   :  { %10752 = vmatprep.mubr.msk.bf16.mxu0 %vm12517_vm1, %v14600_v14 }
 0x410   :  { %10751 = vmatpush3.bf16.xpose.msra.mxu0 %v10276_v10 }
 0x411   :  { %10762 = vmatprep.subr.bf16.mxu0 %v14600_v14 }
 0x412   :  { %10747 = vmatmul.mubr.msk.bf16.vlgmr.msra.gmra.mrb[76].mxu1 %vm1384_vm3, %v1480_v0 }
 0x413   :  { %10758 = vmatprep.mubr.msk.bf16.mxu1 %vm12517_vm1, %v14600_v14 }
 0x414   :  { %10757 = vmatpush3.bf16.xpose.msra.mxu1 %v10277_v34 }
 0x415   :  { %10768 = vmatprep.subr.bf16.mxu1 %v14600_v14 }
 0x417   :  { %10753 = vmatmul.mubr.bf16.vlgmr.msra.gmra.mrb[80].mxu0 %v10268_v17 }
 0x418   :  { %10763 = vmatpush3.bf16.xpose.msra.mxu0 %v10278_v53  ;;  %10764 = vmatprep.mubr.msk.bf16.mxu0 %vm12517_vm1, %v14600_v14 }
 0x419   :  { %10774 = vmatprep.subr.bf16.mxu0 %v14600_v14 }
 0x41b   :  { %10759 = vmatmul.mubr.bf16.vlgmr.msra.gmra.mrb[80].mxu1 %v10269_v25 }
 0x41c   :  { %10769 = vmatpush3.bf16.xpose.msra.mxu1 %v10279_v49  ;;  %10770 = vmatprep.mubr.msk.bf16.mxu1 %vm12517_vm1, %v14600_v14 }
 0x41d   :  { %10780 = vmatprep.subr.bf16.mxu1 %v14600_v14 }
 0x41f   :  { %10765 = vmatmul.mubr.bf16.vlgmr.msra.gmra.mrb[84].mxu0 %v10270_v32 }
 0x420   :  { %10775 = vmatpush3.bf16.xpose.msra.mxu0 %v10280_v52  ;;  %10776 = vmatprep.mubr.msk.bf16.mxu0 %vm12517_vm1, %v14600_v14 }
 0x421   :  { %10786 = vmatprep.subr.bf16.mxu0 %v14600_v14 }
 0x423   :  { %10771 = vmatmul.mubr.bf16.vlgmr.msra.gmra.mrb[84].mxu1 %v10271_v9 }
 0x424   :  { %10781 = vmatpush3.bf16.xpose.msra.mxu1 %v10281_v30  ;;  %10782 = vmatprep.mubr.msk.bf16.mxu1 %vm12517_vm1, %v14600_v14 }
 0x425   :  { %10792 = vmatprep.subr.bf16.mxu1 %v14600_v14 }
 0x427   :  { %10777 = vmatmul.mubr.bf16.vlgmr.msra.gmra.mrb[88].mxu0 %v10272_v22 }
 0x428   :  { %10787 = vmatpush3.bf16.xpose.msra.mxu0 %v10282_v55  ;;  %10788 = vmatprep.mubr.msk.bf16.mxu0 %vm12517_vm1, %v14600_v14 }
 0x429   :  { %10798 = vmatprep.subr.bf16.mxu0 %v14600_v14 }
 0x42b   :  { %10783 = vmatmul.mubr.bf16.vlgmr.msra.gmra.mrb[88].mxu1 %v10273_v36 }
 0x42c   :  { %10793 = vmatpush3.bf16.xpose.msra.mxu1 %v10283_v46  ;;  %10794 = vmatprep.mubr.msk.bf16.mxu1 %vm12517_vm1, %v14600_v14 }
 0x42d   :  { %10804 = vmatprep.subr.bf16.mxu1 %v14600_v14 }
 0x42f   :  { %10789 = vmatmul.mubr.bf16.vlgmr.msra.gmra.mrb[92].mxu0 %v10274_v15 }
 0x430   :  { %10799 = vmatpush3.bf16.msra.mxu0 %v2366_v48  ;;  %10800 = vmatprep.mubr.msk.bf16.mxu0 %vm12517_vm1, %v14600_v14 }
 0x431   :  { %10810 = vmatprep.subr.bf16.mxu0 %v14600_v14 }
 0x433   :  { %10795 = vmatmul.mubr.bf16.vlgmr.msra.gmra.mrb[92].mxu1 %v10275_v60 }
 0x434   :  { %10805 = vmatpush3.bf16.msra.mxu1 %v2412_v11  ;;  %10806 = vmatprep.mubr.msk.bf16.mxu1 %vm12517_vm1, %v14600_v14 }
 0x435   :  { %10816 = vmatprep.subr.bf16.mxu1 %v14600_v14 }
 0x4c9   :  { %v13412_v2 = vpop.f32.mrb[64].mxu0 }
 0x4ca   :  { %v10706_v5 = vpop.f32.mrb[65].mxu0 }
 0x4cb   :  { %v1525_v58 = vpop.f32.mrb[66].mxu0 }
 0x4cc   :  { %v10707_v3 = vpop.f32.mrb[67].mxu0 }
 0x4cd   :  { %v13414_v40 = vpop.f32.mrb[64].mxu1 }
 0x4ce   :  { %v1850_v8 = vpack.c.bf16 %v13414_v40, %v13412_v2  ;;  %v10712_v62 = vpop.f32.mrb[65].mxu1  ;;  %v11458_v2 = vld [vmem:[%s14658_s3 + $0xf0] sm:$0xff]  }
 0x4cf   :  { %v1571_v19 = vpop.f32.mrb[66].mxu1  ;;  %v11459_v40 = vld [vmem:[%s14658_s3 + $0xb0] sm:$0xff]  }
 0x4d0   :  { %v10713_v28 = vpop.f32.mrb[67].mxu1 }
 0x4d1   :  { %v13418_v24 = vpop.f32.mrb[68].mxu0 }
 0x4d2   :  { %v10718_v20 = vpop.f32.mrb[69].mxu0 }
 0x4d3   :  { %v1617_v27 = vpop.f32.mrb[70].mxu0 }
 0x4d4   :  { %v10719_v6 = vpop.f32.mrb[71].mxu0 }
 0x4d5   :  { %v13420_v10 = vpop.f32.mrb[68].mxu1 }
 0x4d6   :  { %v1851_v1 = vpack.c.bf16 %v13420_v10, %v13418_v24  ;;  %v10724_v0 = vpop.f32.mrb[69].mxu1  ;;  %v11461_v24 = vld [vmem:[%s14658_s3 + $0xb8] sm:$0xff]  }
 0x4d7   :  { %v1663_v57 = vpop.f32.mrb[70].mxu1 }
 0x4d8   :  { %v10725_v34 = vpop.f32.mrb[71].mxu1 }
 0x4d9   :  { %v13424_v4 = vpop.f32.mrb[72].mxu0 }
 0x4da   :  { %v10730_v17 = vpop.f32.mrb[73].mxu0 }
 0x4db   :  { %v1709_v50 = vpop.f32.mrb[74].mxu0 }
 0x4dc   :  { %v10731_v53 = vpop.f32.mrb[75].mxu0 }
 0x4dd   :  { %v13426_v39 = vpop.f32.mrb[72].mxu1 }
 0x4de   :  { %v1852_v25 = vpack.c.bf16 %v13426_v39, %v13424_v4  ;;  %v10736_v38 = vpop.f32.mrb[73].mxu1 }
 0x4df   :  { %v1755_v49 = vpop.f32.mrb[74].mxu1 }
 0x4e0   :  { %v10737_v41 = vpop.f32.mrb[75].mxu1 }
 0x4e1   :  { %v13430_v32 = vpop.f32.mrb[76].mxu0 }
 0x4e2   :  { %v10742_v16 = vpop.f32.mrb[77].mxu0 }
 0x4e3   :  { %v1801_v52 = vpop.f32.mrb[78].mxu0 }
 0x4e4   :  { %v10743_v43 = vpop.f32.mrb[79].mxu0 }
 0x4e5   :  { %v13432_v9 = vpop.f32.mrb[76].mxu1 }
 0x4e6   :  { %v1853_v29 = vpack.c.bf16 %v13432_v9, %v13430_v32  ;;  %v10748_v30 = vpop.f32.mrb[77].mxu1 }
 0x4e7   :  { %v1847_v47 = vpop.f32.mrb[78].mxu1 }
 0x4e8   :  { %v10749_v22 = vpop.f32.mrb[79].mxu1 }
 0x4ea   :  { %v1980_v18 = vpop.f32.mrb[80].mxu0 }
 0x4eb   :  { %v10754_v55 = vpop.f32.mrb[81].mxu0  ;;  %v2266_v51 = vsel %vm1384_vm3, %v1980_v18, -inf }
 0x4ec   :  { %2267 = vmax.xlane.f32.xlu0 %v2266_v51  ;;  %v1983_v36 = vpop.f32.mrb[82].mxu0 }
 0x4ed   :  { %v10755_v63 = vpop.f32.mrb[83].mxu0 }
 0x4ee   :  { %v2020_v46 = vpop.f32.mrb[80].mxu1 }
 0x4ef   :  { %v10760_v56 = vpop.f32.mrb[81].mxu1  ;;  %v2269_v15 = vsel %vm1384_vm3, %v2020_v46, -inf }
 0x4f0   :  { %2270 = vmax.xlane.f32.xlu1 %v2269_v15  ;;  %v2023_v37 = vpop.f32.mrb[82].mxu1 }
 0x4f1   :  { %v10761_v48 = vpop.f32.mrb[83].mxu1 }
 0x4f2   :  { %v2060_v61 = vpop.f32.mrb[84].mxu0 }
 0x4f3   :  { %v10766_v60 = vpop.f32.mrb[85].mxu0  ;;  %v2272_v11 = vsel %vm1384_vm3, %v2060_v61, -inf }
 0x4f4   :  { %2273 = vmax.xlane.f32.xlu0 %v2272_v11  ;;  %v2063_v5 = vpop.f32.mrb[86].mxu0 }
 0x4f5   :  { %v10767_v58 = vpop.f32.mrb[87].mxu0 }
 0x4f6   :  { %v2100_v3 = vpop.f32.mrb[84].mxu1 }
 0x4f7   :  { %v10772_v62 = vpop.f32.mrb[85].mxu1  ;;  %v2275_v19 = vsel %vm1384_vm3, %v2100_v3, -inf }
 0x4f8   :  { %2276 = vmax.xlane.f32.xlu1 %v2275_v19  ;;  %v2103_v28 = vpop.f32.mrb[86].mxu1 }
 0x4f9   :  { %v10773_v20 = vpop.f32.mrb[87].mxu1 }
 0x4fa   :  { %v2140_v27 = vpop.f32.mrb[88].mxu0 }
 0x4fb   :  { %v10778_v6 = vpop.f32.mrb[89].mxu0  ;;  %v2278_v0 = vsel %vm1384_vm3, %v2140_v27, -inf }
 0x4fc   :  { %2279 = vmax.xlane.f32.xlu0 %v2278_v0  ;;  %v2143_v57 = vpop.f32.mrb[90].mxu0 }
 0x4fd   :  { %v10779_v34 = vpop.f32.mrb[91].mxu0 }
 0x4fe   :  { %v2180_v17 = vpop.f32.mrb[88].mxu1 }
 0x4ff   :  { %v10784_v50 = vpop.f32.mrb[89].mxu1  ;;  %v2281_v53 = vsel %vm1384_vm3, %v2180_v17, -inf }
 0x500   :  { %2282 = vmax.xlane.f32.xlu1 %v2281_v53  ;;  %v2183_v38 = vpop.f32.mrb[90].mxu1 }
 0x501   :  { %v10785_v49 = vpop.f32.mrb[91].mxu1 }
 0x502   :  { %v2220_v41 = vpop.f32.mrb[92].mxu0 }
 0x503   :  { %v10790_v16 = vpop.f32.mrb[93].mxu0  ;;  %v2284_v52 = vsel %vm1384_vm3, %v2220_v41, -inf }
 0x504   :  { %2285 = vmax.xlane.f32.xlu0 %v2284_v52  ;;  %v2223_v43 = vpop.f32.mrb[94].mxu0 }
 0x505   :  { %v10791_v30 = vpop.f32.mrb[95].mxu0 }
 0x506   :  { %v2260_v47 = vpop.f32.mrb[92].mxu1 }
 0x507   :  { %v10796_v22 = vpop.f32.mrb[93].mxu1  ;;  %v2287_v55 = vsel %vm1384_vm3, %v2260_v47, -inf }
 0x508   :  { %2288 = vmax.xlane.f32.xlu1 %v2287_v55  ;;  %v2263_v51 = vpop.f32.mrb[94].mxu1 }
 0x509   :  { %v10797_v36 = vpop.f32.mrb[95].mxu1 }
 0x579   :  { %v2268_v63 = vpop.xlane.xlu0 %2267 }
 0x57a   :  { %v2290_v56 = vsub.f32 %v1980_v18, %v2268_v63 }
 0x57c   :  { %v2298_v15 = vmul.f32 1.442695, %v2290_v56 }
 0x57d   :  { %v2271_v37 = vpop.xlane.xlu1 %2270 }
 0x57e   :  { %12084 = vpow2.f32 %v2298_v15  ;;  %v2291_v48 = vsub.f32 %v2020_v46, %v2271_v37 }
 0x580   :  { %v2300_v60 = vmul.f32 1.442695, %v2291_v48 }
 0x581   :  { %v2274_v11 = vpop.xlane.xlu0 %2273 }
 0x582   :  { %12086 = vpow2.f32 %v2300_v60  ;;  %v2292_v5 = vsub.f32 %v2060_v61, %v2274_v11 }
 0x584   :  { %v2302_v58 = vmul.f32 1.442695, %v2292_v5  ;;  %v10286_v5 = vpack.c.bf16 %v13190_v45, %v13190_v45 }
 0x585   :  { %v2277_v62 = vpop.xlane.xlu1 %2276 }
 0x586   :  { %12088 = vpow2.f32 %v2302_v58  ;;  %v2293_v19 = vsub.f32 %v2100_v3, %v2277_v62 }
 0x588   :  { %v12085_v28 = vpop.eup %12084  ;;  %v2304_v20 = vmul.f32 1.442695, %v2293_v19 }
 0x589   :  { %v2280_v6 = vpop.xlane.xlu0 %2279  ;;  %v2314_v0 = vsel %vm1384_vm3, %v12085_v28, 0.0 }
 0x58a   :  { %12090 = vpow2.f32 %v2304_v20  ;;  %v2294_v57 = vsub.f32 %v2140_v27, %v2280_v6  ;;  %2315 = vadd.xlane.f32.xlu0 %v2314_v0  ;;  %v2458_v6 = vsel %vm1484_vm2, %v10286_v5, 0  ;;  %v10287_v0 = vpack.c.bf16 %v13196_v54, %v13196_v54 }
 0x58c   :  { %v12087_v18 = vpop.eup %12086  ;;  %v2306_v34 = vmul.f32 1.442695, %v2294_v57 }
 0x58d   :  { %v2283_v50 = vpop.xlane.xlu1 %2282  ;;  %v2317_v46 = vsel %vm1384_vm3, %v12087_v18, 0.0 }
 0x58e   :  { %12092 = vpow2.f32 %v2306_v34  ;;  %v2295_v53 = vsub.f32 %v2180_v17, %v2283_v50  ;;  %2318 = vadd.xlane.f32.xlu1 %v2317_v46  ;;  %v2504_v50 = vsel %vm1484_vm2, %v10287_v0, 0  ;;  %v10288_v46 = vpack.c.bf16 %v13214_v21, %v13214_v21 }
 0x590   :  { %v12089_v61 = vpop.eup %12088  ;;  %v2308_v38 = vmul.f32 1.442695, %v2295_v53 }
 0x591   :  { %v2286_v49 = vpop.xlane.xlu0 %2285  ;;  %v2320_v3 = vsel %vm1384_vm3, %v12089_v61, 0.0 }
 0x592   :  { %12094 = vpow2.f32 %v2308_v38  ;;  %v2296_v16 = vsub.f32 %v2220_v41, %v2286_v49  ;;  %2321 = vadd.xlane.f32.xlu0 %v2320_v3  ;;  %v2550_v49 = vsel %vm1484_vm2, %v10288_v46, 0  ;;  %v10289_v3 = vpack.c.bf16 %v13220_v7, %v13220_v7 }
 0x593   :  { %v10290_v7 = vpack.c.bf16 %v13238_v35, %v13238_v35 }
 0x594   :  { %v12091_v52 = vpop.eup %12090  ;;  %v2310_v43 = vmul.f32 1.442695, %v2296_v16 }
 0x595   :  { %v2289_v27 = vpop.xlane.xlu1 %2288  ;;  %v2323_v30 = vsel %vm1384_vm3, %v12091_v52, 0.0 }
 0x596   :  { %12096 = vpow2.f32 %v2310_v43  ;;  %v2297_v22 = vsub.f32 %v2260_v47, %v2289_v27  ;;  %2324 = vadd.xlane.f32.xlu1 %v2323_v30  ;;  %v14549_v27 = vsub.s32 6, %v13000_v59  ;;  %v2596_v30 = vsel %vm1484_vm2, %v10289_v3, 0 }
 0x598   :  { %v13448_v55 = vpop.eup %12092  ;;  %v2312_v17 = vmul.f32 1.442695, %v2297_v22 }
 0x599   :  { %v2326_v51 = vsel %vm1384_vm3, %v13448_v55, 0.0 }
 0x59a   :  { %12098 = vpow2.f32 %v2312_v17  ;;  %2327 = vadd.xlane.f32.xlu0 %v2326_v51 }
 0x59c   :  { %v13452_v36 = vpop.eup %12094 }
 0x59d   :  { %v2329_v41 = vsel %vm1384_vm3, %v13452_v36, 0.0 }
 0x59e   :  { %2330 = vadd.xlane.f32.xlu1 %v2329_v41  ;;  %v13499_v41 = vld [vmem:[%s14576_s14] sm:$0xff] }
 0x59f   :  { %v13504_v35 = vrot.slane %v13499_v41, %v14549_v27 }
 0x5a0   :  { %v13456_v63 = vpop.eup %12096 }
 0x5a1   :  { %v2332_v47 = vsel %vm1384_vm3, %v13456_v63, 0.0  ;;  %v706_v0 = vadd.f32 %v13081_v13, %v13504_v35 }
 0x5a2   :  { %2333 = vadd.xlane.f32.xlu0 %v2332_v47  ;;  %v10291_v47 = vpack.c.bf16 %v13244_v31, %v13244_v31 }
 0x5a4   :  { %v13460_v56 = vpop.eup %12098 }
 0x5a5   :  { %v2335_v15 = vsel %vm1384_vm3, %v13460_v56, 0.0 }
 0x5a6   :  { %2336 = vadd.xlane.f32.xlu1 %v2335_v15 }
 0x617   :  { %v2316_v37 = vpop.xlane.xlu0 %2315 }
 0x618   :  { %12100 = vrcp.f32 %v2316_v37 }
 0x61b   :  { %v2319_v48 = vpop.xlane.xlu1 %2318 }
 0x61c   :  { %12102 = vrcp.f32 %v2319_v48 }
 0x61f   :  { %v2322_v60 = vpop.xlane.xlu0 %2321 }
 0x620   :  { %12104 = vrcp.f32 %v2322_v60  ;;  %v696_v60 = vadd.f32 %v13057_v26, %v13504_v35  ;;  %v700_v26 = vadd.f32 %v13064_v33, %v13504_v35 }
 0x622   :  { %v12101_v11 = vpop.eup %12100 }
 0x623   :  { %v2346_v58 = vmul.f32 %v12101_v11, %v12085_v28  ;;  %v2325_v62 = vpop.xlane.xlu1 %2324  ;;  %v2688_v11 = vsel %vm1484_vm2, %v10291_v47, 0 }
 0x624   :  { %12106 = vrcp.f32 %v2325_v62  ;;  %v10300_v62 = vpack.c.bf16 %v696_v60, %v696_v60  ;;  %v14624_v60 = vld [vmem:[#allocation44_spill] sm:$0xff] }
 0x625   :  { %v2354_v19 = vpack.c.bf16 %v2346_v58, %v2346_v58  ;;  %v13524_v58 = vrot.slane %v13499_v41, %v13151_v42 }
 0x626   :  { %v12103_v20 = vpop.eup %12102 }
 0x627   :  { %v2347_v57 = vmul.f32 %v12103_v20, %v12087_v18  ;;  %10801 = vmatmul.mubr.msk.bf16.vlgmr.msra.gmra.mrb[96].mxu0 %vm1384_vm3, %v2354_v19  ;;  %v2328_v34 = vpop.xlane.xlu0 %2327  ;;  %v550_v20 = vadd.f32 %v12972_v44, %v13524_v58  ;;  %v14615_v44 = vld [vmem:[#allocation51_spill] sm:$0xff] }
 0x628   :  { %10811 = vmatpush3.bf16.msra.mxu0 %v2458_v6  ;;  %12108 = vrcp.f32 %v2328_v34  ;;  %10812 = vmatprep.mubr.msk.bf16.mxu0 %vm12517_vm1, %v14600_v14  ;;  %v10301_v6 = vpack.c.bf16 %v700_v26, %v700_v26  ;;  %v10302_v34 = vpack.c.bf16 %v706_v0, %v706_v0 }
 0x629   :  { %v2355_v45 = vpack.c.bf16 %v2347_v57, %v2347_v57  ;;  %10822 = vmatprep.subr.bf16.mxu0 %v14600_v14  ;;  %v10292_v33 = vpack.c.bf16 %v550_v20, %v550_v20 }
 0x62a   :  { %v12105_v28 = vpop.eup %12104 }
 0x62b   :  { %v2348_v53 = vmul.f32 %v12105_v28, %v12089_v61  ;;  %10807 = vmatmul.mubr.msk.bf16.vlgmr.msra.gmra.mrb[96].mxu1 %vm1384_vm3, %v2355_v45  ;;  %v2331_v54 = vpop.xlane.xlu1 %2330  ;;  %v710_v45 = vadd.f32 %v14615_v44, %v13504_v35  ;;  %v14616_v28 = vld [vmem:[#allocation35_spill] sm:$0xff] }
 0x62c   :  { %10817 = vmatpush3.bf16.msra.mxu1 %v2504_v50  ;;  %12110 = vrcp.f32 %v2331_v54  ;;  %10818 = vmatprep.mubr.msk.bf16.mxu1 %vm12517_vm1, %v14600_v14  ;;  %v560_v50 = vadd.f32 %v14616_v28, %v13524_v58 }
 0x62d   :  { %v2356_v18 = vpack.c.bf16 %v2348_v53, %v2348_v53  ;;  %10828 = vmatprep.subr.bf16.mxu1 %v14600_v14  ;;  %v10303_v46 = vpack.c.bf16 %v710_v45, %v710_v45  ;;  %v14617_v53 = vld [vmem:[#allocation53_spill] sm:$0xff] }
 0x62e   :  { %v12107_v38 = vpop.eup %12106  ;;  %v716_v54 = vadd.f32 %v14617_v53, %v13504_v35 }
 0x62f   :  { %v2349_v16 = vmul.f32 %v12107_v38, %v12091_v52  ;;  %10813 = vmatmul.mubr.msk.bf16.vlgmr.msra.gmra.mrb[100].mxu0 %vm1384_vm3, %v2356_v18  ;;  %v2334_v21 = vpop.xlane.xlu0 %2333  ;;  %v10294_v18 = vpack.c.bf16 %v560_v50, %v560_v50  ;;  %v14618_v38 = vld [vmem:[#allocation37_spill] sm:$0xff] }
 0x630   :  { %10823 = vmatpush3.bf16.msra.mxu0 %v2550_v49  ;;  %12112 = vrcp.f32 %v2334_v21  ;;  %10824 = vmatprep.mubr.msk.bf16.mxu0 %vm12517_vm1, %v14600_v14  ;;  %v564_v49 = vadd.f32 %v14618_v38, %v13524_v58  ;;  %v10304_v3 = vpack.c.bf16 %v716_v54, %v716_v54 }
 0x631   :  { %v2357_v61 = vpack.c.bf16 %v2349_v16, %v2349_v16  ;;  %10834 = vmatprep.subr.bf16.mxu0 %v14600_v14  ;;  %v14619_v16 = vld [vmem:[#allocation55_spill] sm:$0xff] }
 0x632   :  { %v12109_v43 = vpop.eup %12108  ;;  %v720_v21 = vadd.f32 %v14619_v16, %v13504_v35 }
 0x633   :  { %v2350_v52 = vmul.f32 %v12109_v43, %v13448_v55  ;;  %10819 = vmatmul.mubr.msk.bf16.vlgmr.msra.gmra.mrb[100].mxu1 %vm1384_vm3, %v2357_v61  ;;  %v2337_v22 = vpop.xlane.xlu1 %2336  ;;  %v2642_v55 = vsel %vm1484_vm2, %v10290_v7, 0  ;;  %v10295_v61 = vpack.c.bf16 %v564_v49, %v564_v49  ;;  %v14620_v43 = vld [vmem:[#allocation39_spill] sm:$0xff] }
 0x634   :  { %10829 = vmatpush3.bf16.msra.mxu1 %v2596_v30  ;;  %12114 = vrcp.f32 %v2337_v22  ;;  %10830 = vmatprep.mubr.msk.bf16.mxu1 %vm12517_vm1, %v14600_v14  ;;  %v570_v30 = vadd.f32 %v14620_v43, %v13524_v58  ;;  %v10305_v7 = vpack.c.bf16 %v720_v21, %v720_v21 }
 0x635   :  { %v2358_v17 = vpack.c.bf16 %v2350_v52, %v2350_v52  ;;  %10840 = vmatprep.subr.bf16.mxu1 %v14600_v14  ;;  %v14621_v52 = vld [vmem:[#allocation57_spill] sm:$0xff] }
 0x636   :  { %v12111_v51 = vpop.eup %12110  ;;  %v726_v22 = vadd.f32 %v14621_v52, %v13504_v35 }
 0x637   :  { %v2351_v15 = vmul.f32 %v12111_v51, %v13452_v36  ;;  %10825 = vmatmul.mubr.msk.bf16.vlgmr.msra.gmra.mrb[104].mxu0 %vm1384_vm3, %v2358_v17  ;;  %v10296_v17 = vpack.c.bf16 %v570_v30, %v570_v30  ;;  %v14622_v51 = vld [vmem:[#allocation41_spill] sm:$0xff] }
 0x638   :  { %10835 = vmatpush3.bf16.msra.mxu0 %v2642_v55  ;;  %10836 = vmatprep.mubr.msk.bf16.mxu0 %vm12517_vm1, %v14600_v14  ;;  %v574_v55 = vadd.f32 %v14622_v51, %v13524_v58  ;;  %v10306_v47 = vpack.c.bf16 %v726_v22, %v726_v22 }
 0x639   :  { %v2359_v37 = vpack.c.bf16 %v2351_v15, %v2351_v15  ;;  %10846 = vmatprep.subr.bf16.mxu0 %v14600_v14  ;;  %v14623_v15 = vld [vmem:[#allocation59_spill] sm:$0xff] }
 0x63a   :  { %v12113_v48 = vpop.eup %12112 }
 0x63b   :  { %v2352_v5 = vmul.f32 %v12113_v48, %v13456_v63  ;;  %10831 = vmatmul.mubr.msk.bf16.vlgmr.msra.gmra.mrb[104].mxu1 %vm1384_vm3, %v2359_v37  ;;  %v730_v37 = vadd.f32 %v14623_v15, %v13504_v35  ;;  %v10297_v48 = vpack.c.bf16 %v574_v55, %v574_v55 }
 0x63c   :  { %10841 = vmatpush3.bf16.msra.mxu1 %v2688_v11  ;;  %10842 = vmatprep.mubr.msk.bf16.mxu1 %vm12517_vm1, %v14600_v14  ;;  %v580_v11 = vadd.f32 %v14624_v60, %v13524_v58 }
 0x63d   :  { %v2360_v31 = vpack.c.bf16 %v2352_v5, %v2352_v5  ;;  %10852 = vmatprep.subr.bf16.mxu1 %v14600_v14  ;;  %v10307_v5 = vpack.c.bf16 %v730_v37, %v730_v37 }
 0x63e   :  { %v12115_v36 = vpop.eup %12114  ;;  %v10298_v35 = vpack.c.bf16 %v580_v11, %v580_v11 }
 0x63f   :  { %v2353_v63 = vmul.f32 %v12115_v36, %v13460_v56  ;;  %10837 = vmatmul.mubr.msk.bf16.vlgmr.msra.gmra.mrb[108].mxu0 %vm1384_vm3, %v2360_v31  ;;  %v14614_v56 = vld [vmem:[#allocation33_spill] sm:$0xff]  ;;  %v14625_v31 = vld [vmem:[#allocation62_spill] sm:$0xff] }
 0x640   :  { %10848 = vmatprep.mubr.msk.bf16.mxu0 %vm12517_vm1, %v14600_v14  ;;  %v554_v57 = vadd.f32 %v14614_v56, %v13524_v58  ;;  %v10308_v36 = vpack.c.bf16 %v14625_v31, %v14625_v31 }
 0x641   :  { %10847 = vmatpush3.bf16.xpose.msra.mxu0 %v10300_v62  ;;  %v2361_v19 = vpack.c.bf16 %v2353_v63, %v2353_v63  ;;  %v14626_v62 = vld [vmem:[#allocation46_spill] sm:$0xff] }
 0x642   :  { %10858 = vmatprep.subr.bf16.mxu0 %v14600_v14  ;;  %v10293_v13 = vpack.c.bf16 %v554_v57, %v554_v57  ;;  %v584_v26 = vadd.f32 %v14626_v62, %v13524_v58  ;;  %v3246_v63 = vsel %vm1484_vm2, %v10308_v36, 0 }
 0x643   :  { %10843 = vmatmul.mubr.msk.bf16.vlgmr.msra.gmra.mrb[108].mxu1 %vm1384_vm3, %v2361_v19  ;;  %v14627_v19 = vld [vmem:[#allocation64_spill] sm:$0xff] }
 0x644   :  { %10854 = vmatprep.mubr.msk.bf16.mxu1 %vm12517_vm1, %v14600_v14  ;;  %v10309_v20 = vpack.c.bf16 %v14627_v19, %v14627_v19 }
 0x645   :  { %10853 = vmatpush3.bf16.xpose.msra.mxu1 %v10301_v6  ;;  %v10299_v6 = vpack.c.bf16 %v584_v26, %v584_v26 }
 0x646   :  { %10864 = vmatprep.subr.bf16.mxu1 %v14600_v14  ;;  %v3292_v0 = vsel %vm1484_vm2, %v10309_v20, 0 }
 0x648   :  { %10849 = vmatmul.mubr.bf16.vlgmr.msra.gmra.mrb[112].mxu0 %v10292_v33 }
 0x649   :  { %10859 = vmatpush3.bf16.xpose.msra.mxu0 %v10302_v34  ;;  %10860 = vmatprep.mubr.msk.bf16.mxu0 %vm12517_vm1, %v14600_v14 }
 0x64a   :  { %10870 = vmatprep.subr.bf16.mxu0 %v14600_v14 }
 0x64c   :  { %10855 = vmatmul.mubr.bf16.vlgmr.msra.gmra.mrb[112].mxu1 %v10293_v13 }
 0x64d   :  { %10865 = vmatpush3.bf16.xpose.msra.mxu1 %v10303_v46  ;;  %10866 = vmatprep.mubr.msk.bf16.mxu1 %vm12517_vm1, %v14600_v14 }
 0x64e   :  { %10876 = vmatprep.subr.bf16.mxu1 %v14600_v14 }
 0x650   :  { %10861 = vmatmul.mubr.bf16.vlgmr.msra.gmra.mrb[116].mxu0 %v10294_v18 }
 0x651   :  { %10871 = vmatpush3.bf16.xpose.msra.mxu0 %v10304_v3  ;;  %10872 = vmatprep.mubr.msk.bf16.mxu0 %vm12517_vm1, %v14600_v14 }
 0x652   :  { %10882 = vmatprep.subr.bf16.mxu0 %v14600_v14 }
 0x654   :  { %10867 = vmatmul.mubr.bf16.vlgmr.msra.gmra.mrb[116].mxu1 %v10295_v61 }
 0x655   :  { %10877 = vmatpush3.bf16.xpose.msra.mxu1 %v10305_v7  ;;  %10878 = vmatprep.mubr.msk.bf16.mxu1 %vm12517_vm1, %v14600_v14 }
 0x656   :  { %10888 = vmatprep.subr.bf16.mxu1 %v14600_v14 }
 0x658   :  { %10873 = vmatmul.mubr.bf16.vlgmr.msra.gmra.mrb[120].mxu0 %v10296_v17 }
 0x659   :  { %10883 = vmatpush3.bf16.xpose.msra.mxu0 %v10306_v47  ;;  %10884 = vmatprep.mubr.msk.bf16.mxu0 %vm12517_vm1, %v14600_v14 }
 0x65a   :  { %10894 = vmatprep.subr.bf16.mxu0 %v14600_v14 }
 0x65c   :  { %10879 = vmatmul.mubr.bf16.vlgmr.msra.gmra.mrb[120].mxu1 %v10297_v48 }
 0x65d   :  { %10889 = vmatpush3.bf16.xpose.msra.mxu1 %v10307_v5  ;;  %10890 = vmatprep.mubr.msk.bf16.mxu1 %vm12517_vm1, %v14600_v14 }
 0x65e   :  { %10900 = vmatprep.subr.bf16.mxu1 %v14600_v14 }
 0x660   :  { %10885 = vmatmul.mubr.bf16.vlgmr.msra.gmra.mrb[124].mxu0 %v10298_v35 }
 0x661   :  { %10895 = vmatpush3.bf16.msra.mxu0 %v3246_v63  ;;  %10896 = vmatprep.mubr.msk.bf16.mxu0 %vm12517_vm1, %v14600_v14 }
 0x662   :  { %10906 = vmatprep.subr.bf16.mxu0 %v14600_v14 }
 0x664   :  { %10891 = vmatmul.mubr.bf16.vlgmr.msra.gmra.mrb[124].mxu1 %v10299_v6 }
 0x665   :  { %10901 = vmatpush3.bf16.msra.mxu1 %v3292_v0  ;;  %10902 = vmatprep.mubr.msk.bf16.mxu1 %vm12517_vm1, %v14600_v14 }
 0x666   :  { %10912 = vmatprep.subr.bf16.mxu1 %v14600_v14 }
 0x6fa   :  { %v13595_v58 = vpop.f32.mrb[96].mxu0 }
 0x6fb   :  { %v10802_v33 = vpop.f32.mrb[97].mxu0 }
 0x6fc   :  { %v2405_v56 = vpop.f32.mrb[98].mxu0 }
 0x6fd   :  { %v10803_v57 = vpop.f32.mrb[99].mxu0 }
 0x6fe   :  { %v13597_v34 = vpop.f32.mrb[96].mxu1 }
 0x6ff   :  { %v2730_v44 = vpack.c.bf16 %v13597_v34, %v13595_v58  ;;  %v10808_v45 = vpop.f32.mrb[97].mxu1  ;;  %v11435_v58 = vld [vmem:[%s14658_s3 + $0x10] sm:$0xff]   ;;  %v11449_v34 = vld [vmem:[%s14658_s3 + $0x88] sm:$0xff]  }
 0x700   :  { %v2451_v13 = vpop.f32.mrb[98].mxu1 }
 0x701   :  { %v10809_v28 = vpop.f32.mrb[99].mxu1 }
 0x702   :  { %v13601_v50 = vpop.f32.mrb[100].mxu0 }
 0x703   :  { %v10814_v46 = vpop.f32.mrb[101].mxu0 }
 0x704   :  { %v2497_v53 = vpop.f32.mrb[102].mxu0 }
 0x705   :  { %v10815_v54 = vpop.f32.mrb[103].mxu0 }
 0x706   :  { %v13603_v18 = vpop.f32.mrb[100].mxu1 }
 0x707   :  { %v2731_v38 = vpack.c.bf16 %v13603_v18, %v13601_v50  ;;  %v10820_v49 = vpop.f32.mrb[101].mxu1 }
 0x708   :  { %v2543_v3 = vpop.f32.mrb[102].mxu1 }
 0x709   :  { %v10821_v16 = vpop.f32.mrb[103].mxu1 }
 0x70a   :  { %v13607_v21 = vpop.f32.mrb[104].mxu0 }
 0x70b   :  { %v10826_v61 = vpop.f32.mrb[105].mxu0 }
 0x70c   :  { %v2589_v43 = vpop.f32.mrb[106].mxu0 }
 0x70d   :  { %v10827_v30 = vpop.f32.mrb[107].mxu0 }
 0x70e   :  { %v13609_v7 = vpop.f32.mrb[104].mxu1 }
 0x70f   :  { %v2732_v52 = vpack.c.bf16 %v13609_v7, %v13607_v21  ;;  %v10832_v22 = vpop.f32.mrb[105].mxu1 }
 0x710   :  { %v2635_v17 = vpop.f32.mrb[106].mxu1 }
 0x711   :  { %v10833_v51 = vpop.f32.mrb[107].mxu1 }
 0x712   :  { %v13613_v55 = vpop.f32.mrb[108].mxu0 }
 0x713   :  { %v10838_v47 = vpop.f32.mrb[109].mxu0 }
 0x714   :  { %v2681_v15 = vpop.f32.mrb[110].mxu0 }
 0x715   :  { %v10839_v37 = vpop.f32.mrb[111].mxu0 }
 0x716   :  { %v13615_v48 = vpop.f32.mrb[108].mxu1 }
 0x717   :  { %v2733_v60 = vpack.c.bf16 %v13615_v48, %v13613_v55  ;;  %v10844_v11 = vpop.f32.mrb[109].mxu1 }
 0x718   :  { %v2727_v5 = vpop.f32.mrb[110].mxu1 }
 0x719   :  { %v10845_v31 = vpop.f32.mrb[111].mxu1 }
 0x71b   :  { %v2860_v36 = vpop.f32.mrb[112].mxu0 }
 0x71c   :  { %v10850_v35 = vpop.f32.mrb[113].mxu0  ;;  %v3146_v62 = vsel %vm1384_vm3, %v2860_v36, -inf }
 0x71d   :  { %3147 = vmax.xlane.f32.xlu0 %v3146_v62  ;;  %v2863_v26 = vpop.f32.mrb[114].mxu0 }
 0x71e   :  { %v10851_v63 = vpop.f32.mrb[115].mxu0 }
 0x71f   :  { %v2900_v19 = vpop.f32.mrb[112].mxu1 }
 0x720   :  { %v10856_v20 = vpop.f32.mrb[113].mxu1  ;;  %v3149_v6 = vsel %vm1384_vm3, %v2900_v19, -inf }
 0x721   :  { %3150 = vmax.xlane.f32.xlu1 %v3149_v6  ;;  %v2903_v0 = vpop.f32.mrb[114].mxu1 }
 0x722   :  { %v10857_v33 = vpop.f32.mrb[115].mxu1 }
 0x723   :  { %v2940_v56 = vpop.f32.mrb[116].mxu0 }
 0x724   :  { %v10862_v57 = vpop.f32.mrb[117].mxu0  ;;  %v3152_v45 = vsel %vm1384_vm3, %v2940_v56, -inf }
 0x725   :  { %3153 = vmax.xlane.f32.xlu0 %v3152_v45  ;;  %v2943_v13 = vpop.f32.mrb[118].mxu0 }
 0x726   :  { %v10863_v28 = vpop.f32.mrb[119].mxu0 }
 0x727   :  { %v2980_v46 = vpop.f32.mrb[116].mxu1 }
 0x728   :  { %v10868_v53 = vpop.f32.mrb[117].mxu1  ;;  %v3155_v54 = vsel %vm1384_vm3, %v2980_v46, -inf }
 0x729   :  { %3156 = vmax.xlane.f32.xlu1 %v3155_v54  ;;  %v2983_v49 = vpop.f32.mrb[118].mxu1 }
 0x72a   :  { %v10869_v3 = vpop.f32.mrb[119].mxu1 }
 0x72b   :  { %v3020_v16 = vpop.f32.mrb[120].mxu0 }
 0x72c   :  { %v10874_v61 = vpop.f32.mrb[121].mxu0  ;;  %v3158_v43 = vsel %vm1384_vm3, %v3020_v16, -inf }
 0x72d   :  { %3159 = vmax.xlane.f32.xlu0 %v3158_v43  ;;  %v3023_v30 = vpop.f32.mrb[122].mxu0 }
 0x72e   :  { %v10875_v22 = vpop.f32.mrb[123].mxu0 }
 0x72f   :  { %v3060_v17 = vpop.f32.mrb[120].mxu1 }
 0x730   :  { %v10880_v51 = vpop.f32.mrb[121].mxu1  ;;  %v3161_v47 = vsel %vm1384_vm3, %v3060_v17, -inf }
 0x731   :  { %3162 = vmax.xlane.f32.xlu1 %v3161_v47  ;;  %v3063_v15 = vpop.f32.mrb[122].mxu1 }
 0x732   :  { %v10881_v37 = vpop.f32.mrb[123].mxu1 }
 0x733   :  { %v3100_v11 = vpop.f32.mrb[124].mxu0 }
 0x734   :  { %v10886_v5 = vpop.f32.mrb[125].mxu0  ;;  %v3164_v31 = vsel %vm1384_vm3, %v3100_v11, -inf }
 0x735   :  { %3165 = vmax.xlane.f32.xlu0 %v3164_v31  ;;  %v3103_v35 = vpop.f32.mrb[126].mxu0 }
 0x736   :  { %v10887_v62 = vpop.f32.mrb[127].mxu0 }
 0x737   :  { %v3140_v26 = vpop.f32.mrb[124].mxu1 }
 0x738   :  { %v10892_v63 = vpop.f32.mrb[125].mxu1  ;;  %v3167_v20 = vsel %vm1384_vm3, %v3140_v26, -inf }
 0x739   :  { %3168 = vmax.xlane.f32.xlu1 %v3167_v20  ;;  %v3143_v6 = vpop.f32.mrb[126].mxu1 }
 0x73a   :  { %v10893_v0 = vpop.f32.mrb[127].mxu1 }
 0x7aa   :  { %v3148_v33 = vpop.xlane.xlu0 %3147 }
 0x7ab   :  { %v3170_v57 = vsub.f32 %v2860_v36, %v3148_v33 }
 0x7ad   :  { %v3178_v45 = vmul.f32 1.442695, %v3170_v57 }
 0x7ae   :  { %v3151_v13 = vpop.xlane.xlu1 %3150 }
 0x7af   :  { %12116 = vpow2.f32 %v3178_v45  ;;  %v3171_v28 = vsub.f32 %v2900_v19, %v3151_v13 }
 0x7b1   :  { %v3180_v53 = vmul.f32 1.442695, %v3171_v28 }
 0x7b2   :  { %v3154_v54 = vpop.xlane.xlu0 %3153 }
 0x7b3   :  { %12118 = vpow2.f32 %v3180_v53  ;;  %v3172_v49 = vsub.f32 %v2940_v56, %v3154_v54 }
 0x7b5   :  { %v3182_v3 = vmul.f32 1.442695, %v3172_v49 }
 0x7b6   :  { %v3157_v61 = vpop.xlane.xlu1 %3156 }
 0x7b7   :  { %12120 = vpow2.f32 %v3182_v3  ;;  %v3173_v43 = vsub.f32 %v2980_v46, %v3157_v61 }
 0x7b9   :  { %v12117_v30 = vpop.eup %12116  ;;  %v3184_v22 = vmul.f32 1.442695, %v3173_v43 }
 0x7ba   :  { %v3160_v51 = vpop.xlane.xlu0 %3159  ;;  %v3194_v47 = vsel %vm1384_vm3, %v12117_v30, 0.0 }
 0x7bb   :  { %12122 = vpow2.f32 %v3184_v22  ;;  %v3174_v15 = vsub.f32 %v3020_v16, %v3160_v51  ;;  %3195 = vadd.xlane.f32.xlu0 %v3194_v47  ;;  %v14628_v22 = vld [vmem:[#allocation66_spill] sm:$0xff] }
 0x7bc   :  { %v10310_v51 = vpack.c.bf16 %v14628_v22, %v14628_v22 }
 0x7bd   :  { %v12119_v36 = vpop.eup %12118  ;;  %v3186_v37 = vmul.f32 1.442695, %v3174_v15 }
 0x7be   :  { %v3163_v5 = vpop.xlane.xlu1 %3162  ;;  %v3197_v19 = vsel %vm1384_vm3, %v12119_v36, 0.0 }
 0x7bf   :  { %12124 = vpow2.f32 %v3186_v37  ;;  %v3175_v31 = vsub.f32 %v3060_v17, %v3163_v5  ;;  %3198 = vadd.xlane.f32.xlu1 %v3197_v19  ;;  %v3338_v19 = vsel %vm1484_vm2, %v10310_v51, 0  ;;  %v14632_v51 = vld [vmem:[#allocation74_spill] sm:$0xff] }
 0x7c1   :  { %v12121_v56 = vpop.eup %12120  ;;  %v3188_v35 = vmul.f32 1.442695, %v3175_v31  ;;  %v14629_v31 = vld [vmem:[#allocation68_spill] sm:$0xff] }
 0x7c2   :  { %v3166_v62 = vpop.xlane.xlu0 %3165  ;;  %v3200_v46 = vsel %vm1384_vm3, %v12121_v56, 0.0 }
 0x7c3   :  { %12126 = vpow2.f32 %v3188_v35  ;;  %v3176_v63 = vsub.f32 %v3100_v11, %v3166_v62  ;;  %3201 = vadd.xlane.f32.xlu0 %v3200_v46  ;;  %v10311_v35 = vpack.c.bf16 %v14629_v31, %v14629_v31 }
 0x7c5   :  { %v12123_v20 = vpop.eup %12122  ;;  %v3190_v6 = vmul.f32 1.442695, %v3176_v63 }
 0x7c6   :  { %v3169_v16 = vpop.xlane.xlu1 %3168  ;;  %v3203_v0 = vsel %vm1384_vm3, %v12123_v20, 0.0 }
 0x7c7   :  { %12128 = vpow2.f32 %v3190_v6  ;;  %v3177_v33 = vsub.f32 %v3140_v26, %v3169_v16  ;;  %3204 = vadd.xlane.f32.xlu1 %v3203_v0  ;;  %v3384_v6 = vsel %vm1484_vm2, %v10311_v35, 0  ;;  %v14630_v16 = vld [vmem:[#allocation70_spill] sm:$0xff] }
 0x7c8   :  { %v10312_v0 = vpack.c.bf16 %v14630_v16, %v14630_v16 }
 0x7c9   :  { %v13631_v57 = vpop.eup %12124  ;;  %v3192_v17 = vmul.f32 1.442695, %v3177_v33 }
 0x7ca   :  { %v3206_v45 = vsel %vm1384_vm3, %v13631_v57, 0.0 }
 0x7cb   :  { %12130 = vpow2.f32 %v3192_v17  ;;  %3207 = vadd.xlane.f32.xlu0 %v3206_v45 }
 0x7cd   :  { %v13635_v13 = vpop.eup %12126 }
 0x7ce   :  { %v3209_v11 = vsel %vm1384_vm3, %v13635_v13, 0.0 }
 0x7cf   :  { %3210 = vadd.xlane.f32.xlu1 %v3209_v11  ;;  %v3430_v11 = vsel %vm1484_vm2, %v10312_v0, 0 }
 0x7d1   :  { %v13639_v28 = vpop.eup %12128 }
 0x7d2   :  { %v3212_v26 = vsel %vm1384_vm3, %v13639_v28, 0.0 }
 0x7d3   :  { %3213 = vadd.xlane.f32.xlu0 %v3212_v26  ;;  %v14631_v26 = vld [vmem:[#allocation72_spill] sm:$0xff] }
 0x7d5   :  { %v13643_v53 = vpop.eup %12130 }
 0x7d6   :  { %v3215_v54 = vsel %vm1384_vm3, %v13643_v53, 0.0 }
 0x7d7   :  { %3216 = vadd.xlane.f32.xlu1 %v3215_v54  ;;  %v10313_v54 = vpack.c.bf16 %v14631_v26, %v14631_v26 }
 0x7d9   :  { %v3476_v22 = vsel %vm1484_vm2, %v10313_v54, 0 }
 0x848   :  { %v3196_v49 = vpop.xlane.xlu0 %3195 }
 0x849   :  { %12132 = vrcp.f32 %v3196_v49 }
 0x84c   :  { %v3199_v3 = vpop.xlane.xlu1 %3198 }
 0x84d   :  { %12134 = vrcp.f32 %v3199_v3 }
 0x850   :  { %v3202_v61 = vpop.xlane.xlu0 %3201 }
 0x851   :  { %12136 = vrcp.f32 %v3202_v61 }
 0x853   :  { %v12133_v43 = vpop.eup %12132 }
 0x854   :  { %v3226_v47 = vmul.f32 %v12133_v43, %v12117_v30  ;;  %v3205_v15 = vpop.xlane.xlu1 %3204  ;;  %v14547_v43 = vsub.s32 7, %v13000_v59 }
 0x855   :  { %12138 = vrcp.f32 %v3205_v15 }
 0x856   :  { %v3234_v37 = vpack.c.bf16 %v3226_v47, %v3226_v47  ;;  %v10314_v47 = vpack.c.bf16 %v14632_v51, %v14632_v51 }
 0x857   :  { %v12135_v5 = vpop.eup %12134 }
 0x858   :  { %v3227_v62 = vmul.f32 %v12135_v5, %v12119_v36  ;;  %10897 = vmatmul.mubr.msk.bf16.vlgmr.msra.gmra.mrb[128].mxu0 %vm1384_vm3, %v3234_v37  ;;  %v3208_v46 = vpop.xlane.xlu0 %3207  ;;  %v3522_v31 = vsel %vm1484_vm2, %v10314_v47, 0 }
 0x859   :  { %10907 = vmatpush3.bf16.msra.mxu0 %v3338_v19  ;;  %12140 = vrcp.f32 %v3208_v46  ;;  %10908 = vmatprep.mubr.msk.bf16.mxu0 %vm12517_vm1, %v14600_v14  ;;  %v13682_v19 = vrot.slane %v13499_v41, %v14547_v43 }
 0x85a   :  { %v3235_v63 = vpack.c.bf16 %v3227_v62, %v3227_v62  ;;  %10918 = vmatprep.subr.bf16.mxu0 %v14600_v14 }
 0x85b   :  { %v12137_v30 = vpop.eup %12136 }
 0x85c   :  { %v3228_v33 = vmul.f32 %v12137_v30, %v12121_v56  ;;  %10903 = vmatmul.mubr.msk.bf16.vlgmr.msra.gmra.mrb[128].mxu1 %vm1384_vm3, %v3235_v63  ;;  %v3211_v36 = vpop.xlane.xlu1 %3210  ;;  %v14634_v30 = vld [vmem:[#allocation48_spill] sm:$0xff] }
 0x85d   :  { %10913 = vmatpush3.bf16.msra.mxu1 %v3384_v6  ;;  %12142 = vrcp.f32 %v3211_v36  ;;  %10914 = vmatprep.mubr.msk.bf16.mxu1 %vm12517_vm1, %v14600_v14  ;;  %v698_v6 = vadd.f32 %v14634_v30, %v13682_v19  ;;  %v14635_v36 = vld [vmem:[#allocation61_spill] sm:$0xff] }
 0x85e   :  { %v3236_v17 = vpack.c.bf16 %v3228_v33, %v3228_v33  ;;  %10924 = vmatprep.subr.bf16.mxu1 %v14600_v14 }
 0x85f   :  { %v12139_v45 = vpop.eup %12138 }
 0x860   :  { %v3229_v49 = vmul.f32 %v12139_v45, %v12123_v20  ;;  %10909 = vmatmul.mubr.msk.bf16.vlgmr.msra.gmra.mrb[132].mxu0 %vm1384_vm3, %v3236_v17  ;;  %v3214_v56 = vpop.xlane.xlu0 %3213  ;;  %v13702_v17 = vrot.slane %v13499_v41, %v14635_v36  ;;  %v10324_v45 = vpack.c.bf16 %v698_v6, %v698_v6 }
 0x861   :  { %10919 = vmatpush3.bf16.msra.mxu0 %v3430_v11  ;;  %12144 = vrcp.f32 %v3214_v56  ;;  %10920 = vmatprep.mubr.msk.bf16.mxu0 %vm12517_vm1, %v14600_v14  ;;  %v14636_v11 = vld [vmem:[#allocation49_spill] sm:$0xff] }
 0x862   :  { %v3237_v3 = vpack.c.bf16 %v3229_v49, %v3229_v49  ;;  %10930 = vmatprep.subr.bf16.mxu0 %v14600_v14  ;;  %v702_v26 = vadd.f32 %v14636_v11, %v13682_v19  ;;  %v14637_v49 = vld [vmem:[#allocation32_spill] sm:$0xff] }
 0x863   :  { %v12141_v61 = vpop.eup %12140  ;;  %v552_v56 = vadd.f32 %v14637_v49, %v13702_v17  ;;  %v14647_v49 = vld [vmem:[#allocation42_spill] sm:$0xff] }
 0x864   :  { %v3230_v20 = vmul.f32 %v12141_v61, %v13631_v57  ;;  %10915 = vmatmul.mubr.msk.bf16.vlgmr.msra.gmra.mrb[132].mxu1 %vm1384_vm3, %v3237_v3  ;;  %v3217_v15 = vpop.xlane.xlu1 %3216  ;;  %v14633_v57 = vld [vmem:[#allocation76_spill] sm:$0xff]  ;;  %v10325_v41 = vpack.c.bf16 %v702_v26, %v702_v26  ;;  %v14638_v3 = vld [vmem:[#allocation50_spill] sm:$0xff] }
 0x865   :  { %10925 = vmatpush3.bf16.msra.mxu1 %v3476_v22  ;;  %12146 = vrcp.f32 %v3217_v15  ;;  %10926 = vmatprep.mubr.msk.bf16.mxu1 %vm12517_vm1, %v14600_v14  ;;  %v10315_v35 = vpack.c.bf16 %v14633_v57, %v14633_v57  ;;  %v708_v61 = vadd.f32 %v14638_v3, %v13682_v19  ;;  %v14639_v22 = vld [vmem:[#allocation34_spill] sm:$0xff]  ;;  %v14648_v3 = vld [vmem:[#allocation60_spill] sm:$0xff] }
 0x866   :  { %v3238_v37 = vpack.c.bf16 %v3230_v20, %v3230_v20  ;;  %10936 = vmatprep.subr.bf16.mxu1 %v14600_v14  ;;  %v556_v51 = vadd.f32 %v14639_v22, %v13702_v17  ;;  %v14640_v20 = vld [vmem:[#allocation52_spill] sm:$0xff]  ;;  %v14646_v26 = vld [vmem:[#allocation58_spill] sm:$0xff]  ;;  %v14649_v22 = vld [vmem:[#allocation45_spill] sm:$0xff] }
 0x867   :  { %v12143_v5 = vpop.eup %12142  ;;  %v3568_v16 = vsel %vm1484_vm2, %v10315_v35, 0  ;;  %v10326_v47 = vpack.c.bf16 %v708_v61, %v708_v61  ;;  %v712_v15 = vadd.f32 %v14640_v20, %v13682_v19  ;;  %v14642_v35 = vld [vmem:[#allocation54_spill] sm:$0xff]  ;;  %v732_v61 = vadd.f32 %v14648_v3, %v13682_v19  ;;  %v14650_v20 = vld [vmem:[#allocation63_spill] sm:$0xff] }
 0x868   :  { %v3231_v62 = vmul.f32 %v12143_v5, %v13635_v13  ;;  %10921 = vmatmul.mubr.msk.bf16.vlgmr.msra.gmra.mrb[136].mxu0 %vm1384_vm3, %v3238_v37  ;;  %v10317_v37 = vpack.c.bf16 %v556_v51, %v556_v51  ;;  %v14641_v5 = vld [vmem:[#allocation36_spill] sm:$0xff]  ;;  %v582_v51 = vadd.f32 %v14649_v22, %v13702_v17 }
 0x869   :  { %10931 = vmatpush3.bf16.msra.mxu0 %v3522_v31  ;;  %10932 = vmatprep.mubr.msk.bf16.mxu0 %vm12517_vm1, %v14600_v14  ;;  %v562_v31 = vadd.f32 %v14641_v5, %v13702_v17  ;;  %v10327_v57 = vpack.c.bf16 %v712_v15, %v712_v15  ;;  %v10332_v15 = vpack.c.bf16 %v14650_v20, %v14650_v20 }
 0x86a   :  { %v3239_v46 = vpack.c.bf16 %v3231_v62, %v3231_v62  ;;  %10942 = vmatprep.subr.bf16.mxu0 %v14600_v14  ;;  %v718_v62 = vadd.f32 %v14642_v35, %v13682_v19 }
 0x86b   :  { %v12145_v63 = vpop.eup %12144 }
 0x86c   :  { %v3232_v0 = vmul.f32 %v12145_v63, %v13639_v28  ;;  %10927 = vmatmul.mubr.msk.bf16.vlgmr.msra.gmra.mrb[136].mxu1 %vm1384_vm3, %v3239_v46  ;;  %v10318_v46 = vpack.c.bf16 %v562_v31, %v562_v31  ;;  %v14643_v63 = vld [vmem:[#allocation38_spill] sm:$0xff]  ;;  %v10328_v6 = vpack.c.bf16 %v718_v62, %v718_v62  ;;  %v4126_v31 = vsel %vm1484_vm2, %v10332_v15, 0 }
 0x86d   :  { %10937 = vmatpush3.bf16.msra.mxu1 %v3568_v16  ;;  %10938 = vmatprep.mubr.msk.bf16.mxu1 %vm12517_vm1, %v14600_v14  ;;  %v566_v30 = vadd.f32 %v14643_v63, %v13702_v17  ;;  %v14644_v16 = vld [vmem:[#allocation56_spill] sm:$0xff] }
 0x86e   :  { %v3240_v13 = vpack.c.bf16 %v3232_v0, %v3232_v0  ;;  %10948 = vmatprep.subr.bf16.mxu1 %v14600_v14  ;;  %v722_v0 = vadd.f32 %v14644_v16, %v13682_v19 }
 0x86f   :  { %v12147_v33 = vpop.eup %12146 }
 0x870   :  { %v3233_v28 = vmul.f32 %v12147_v33, %v13643_v53  ;;  %10933 = vmatmul.mubr.msk.bf16.vlgmr.msra.gmra.mrb[140].mxu0 %vm1384_vm3, %v3240_v13  ;;  %v10316_v53 = vpack.c.bf16 %v552_v56, %v552_v56  ;;  %v10319_v13 = vpack.c.bf16 %v566_v30, %v566_v30  ;;  %v14645_v33 = vld [vmem:[#allocation40_spill] sm:$0xff]  ;;  %v10329_v11 = vpack.c.bf16 %v722_v0, %v722_v0 }
 0x871   :  { %10944 = vmatprep.mubr.msk.bf16.mxu0 %vm12517_vm1, %v14600_v14  ;;  %v576_v56 = vadd.f32 %v14647_v49, %v13702_v17 }
 0x872   :  { %10943 = vmatpush3.bf16.xpose.msra.mxu0 %v10324_v45  ;;  %v3241_v54 = vpack.c.bf16 %v3233_v28, %v3233_v28  ;;  %v572_v45 = vadd.f32 %v14645_v33, %v13702_v17  ;;  %v728_v28 = vadd.f32 %v14646_v26, %v13682_v19  ;;  %v10322_v19 = vpack.c.bf16 %v582_v51, %v582_v51 }
 0x873   :  { %10954 = vmatprep.subr.bf16.mxu0 %v14600_v14 }
 0x874   :  { %10939 = vmatmul.mubr.msk.bf16.vlgmr.msra.gmra.mrb[140].mxu1 %vm1384_vm3, %v3241_v54  ;;  %v10320_v54 = vpack.c.bf16 %v572_v45, %v572_v45 }
 0x875   :  { %10950 = vmatprep.mubr.msk.bf16.mxu1 %vm12517_vm1, %v14600_v14 }
 0x876   :  { %10949 = vmatpush3.bf16.xpose.msra.mxu1 %v10325_v41  ;;  %v10330_v41 = vpack.c.bf16 %v728_v28, %v728_v28 }
 0x877   :  { %10960 = vmatprep.subr.bf16.mxu1 %v14600_v14 }
 0x879   :  { %10945 = vmatmul.mubr.bf16.vlgmr.msra.gmra.mrb[144].mxu0 %v10316_v53  ;;  %v10321_v53 = vpack.c.bf16 %v576_v56, %v576_v56 }
 0x87a   :  { %10955 = vmatpush3.bf16.xpose.msra.mxu0 %v10326_v47  ;;  %10956 = vmatprep.mubr.msk.bf16.mxu0 %vm12517_vm1, %v14600_v14  ;;  %v10331_v47 = vpack.c.bf16 %v732_v61, %v732_v61 }
 0x87b   :  { %10966 = vmatprep.subr.bf16.mxu0 %v14600_v14 }
 0x87d   :  { %10951 = vmatmul.mubr.bf16.vlgmr.msra.gmra.mrb[144].mxu1 %v10317_v37  ;;  %v14651_v37 = vld [vmem:[#allocation47_spill] sm:$0xff] }
 0x87e   :  { %10961 = vmatpush3.bf16.xpose.msra.mxu1 %v10327_v57  ;;  %10962 = vmatprep.mubr.msk.bf16.mxu1 %vm12517_vm1, %v14600_v14  ;;  %v586_v5 = vadd.f32 %v14651_v37, %v13702_v17  ;;  %v14652_v57 = vld [vmem:[#allocation65_spill] sm:$0xff] }
 0x87f   :  { %10972 = vmatprep.subr.bf16.mxu1 %v14600_v14  ;;  %v10333_v35 = vpack.c.bf16 %v14652_v57, %v14652_v57 }
 0x880   :  { %v10323_v62 = vpack.c.bf16 %v586_v5, %v586_v5 }
 0x881   :  { %10957 = vmatmul.mubr.bf16.vlgmr.msra.gmra.mrb[148].mxu0 %v10318_v46  ;;  %v4172_v46 = vsel %vm1484_vm2, %v10333_v35, 0 }
 0x882   :  { %10967 = vmatpush3.bf16.xpose.msra.mxu0 %v10328_v6  ;;  %10968 = vmatprep.mubr.msk.bf16.mxu0 %vm12517_vm1, %v14600_v14 }
 0x883   :  { %10978 = vmatprep.subr.bf16.mxu0 %v14600_v14 }
 0x885   :  { %10963 = vmatmul.mubr.bf16.vlgmr.msra.gmra.mrb[148].mxu1 %v10319_v13 }
 0x886   :  { %10973 = vmatpush3.bf16.xpose.msra.mxu1 %v10329_v11  ;;  %10974 = vmatprep.mubr.msk.bf16.mxu1 %vm12517_vm1, %v14600_v14 }
 0x887   :  { %10984 = vmatprep.subr.bf16.mxu1 %v14600_v14 }
 0x889   :  { %10969 = vmatmul.mubr.bf16.vlgmr.msra.gmra.mrb[152].mxu0 %v10320_v54 }
 0x88a   :  { %10979 = vmatpush3.bf16.xpose.msra.mxu0 %v10330_v41  ;;  %10980 = vmatprep.mubr.msk.bf16.mxu0 %vm12517_vm1, %v14600_v14 }
 0x88b   :  { %10990 = vmatprep.subr.bf16.mxu0 %v14600_v14 }
 0x88d   :  { %10975 = vmatmul.mubr.bf16.vlgmr.msra.gmra.mrb[152].mxu1 %v10321_v53 }
 0x88e   :  { %10985 = vmatpush3.bf16.xpose.msra.mxu1 %v10331_v47  ;;  %10986 = vmatprep.mubr.msk.bf16.mxu1 %vm12517_vm1, %v14600_v14 }
 0x88f   :  { %10996 = vmatprep.subr.bf16.mxu1 %v14600_v14 }
 0x891   :  { %10981 = vmatmul.mubr.bf16.vlgmr.msra.gmra.mrb[156].mxu0 %v10322_v19 }
 0x892   :  { %10991 = vmatpush3.bf16.msra.mxu0 %v4126_v31  ;;  %10992 = vmatprep.mubr.msk.bf16.mxu0 %vm12517_vm1, %v14600_v14 }
 0x893   :  { %11002 = vmatprep.subr.bf16.mxu0 %v14600_v14 }
 0x895   :  { %10987 = vmatmul.mubr.bf16.vlgmr.msra.gmra.mrb[156].mxu1 %v10323_v62 }
 0x896   :  { %10997 = vmatpush3.bf16.msra.mxu1 %v4172_v46  ;;  %10998 = vmatprep.mubr.msk.bf16.mxu1 %vm12517_vm1, %v14600_v14 }
 0x897   :  { %11008 = vmatprep.subr.bf16.mxu1 %v14600_v14 }
 0x92b   :  { %v13773_v17 = vpop.f32.mrb[128].mxu0 }
 0x92c   :  { %v10898_v63 = vpop.f32.mrb[129].mxu0 }
 0x92d   :  { %v3285_v30 = vpop.f32.mrb[130].mxu0 }
 0x92e   :  { %v10899_v6 = vpop.f32.mrb[131].mxu0 }
 0x92f   :  { %v13775_v16 = vpop.f32.mrb[128].mxu1 }
 0x930   :  { %v3610_v0 = vpack.c.bf16 %v13775_v16, %v13773_v17  ;;  %v10904_v13 = vpop.f32.mrb[129].mxu1 }
 0x931   :  { %v3331_v33 = vpop.f32.mrb[130].mxu1 }
 0x932   :  { %v10905_v45 = vpop.f32.mrb[131].mxu1 }
 0x933   :  { %v13779_v11 = vpop.f32.mrb[132].mxu0 }
 0x934   :  { %v10910_v26 = vpop.f32.mrb[133].mxu0 }
 0x935   :  { %v3377_v28 = vpop.f32.mrb[134].mxu0 }
 0x936   :  { %v10911_v54 = vpop.f32.mrb[135].mxu0 }
 0x937   :  { %v13781_v49 = vpop.f32.mrb[132].mxu1 }
 0x938   :  { %v3611_v56 = vpack.c.bf16 %v13781_v49, %v13779_v11  ;;  %v10916_v41 = vpop.f32.mrb[133].mxu1 }
 0x939   :  { %v3423_v3 = vpop.f32.mrb[134].mxu1 }
 0x93a   :  { %v10917_v61 = vpop.f32.mrb[135].mxu1 }
 0x93b   :  { %v13785_v53 = vpop.f32.mrb[136].mxu0 }
 0x93c   :  { %v10922_v22 = vpop.f32.mrb[137].mxu0 }
 0x93d   :  { %v3469_v51 = vpop.f32.mrb[138].mxu0 }
 0x93e   :  { %v10923_v47 = vpop.f32.mrb[139].mxu0 }
 0x93f   :  { %v13787_v20 = vpop.f32.mrb[136].mxu1 }
 0x940   :  { %v10928_v19 = vpop.f32.mrb[137].mxu1 }
 0x941   :  { %v3515_v37 = vpop.f32.mrb[138].mxu1 }
 0x942   :  { %v10929_v5 = vpop.f32.mrb[139].mxu1 }
 0x943   :  { %v13791_v31 = vpop.f32.mrb[140].mxu0 }
 0x944   :  { %v10934_v57 = vpop.f32.mrb[141].mxu0 }
 0x945   :  { %v3561_v35 = vpop.f32.mrb[142].mxu0 }
 0x946   :  { %v10935_v62 = vpop.f32.mrb[143].mxu0 }
 0x947   :  { %v13793_v46 = vpop.f32.mrb[140].mxu1 }
 0x948   :  { %v10940_v30 = vpop.f32.mrb[141].mxu1 }
 0x949   :  { %v3607_v6 = vpop.f32.mrb[142].mxu1 }
 0x94a   :  { %v10941_v13 = vpop.f32.mrb[143].mxu1 }
 0x94c   :  { %v3740_v33 = vpop.f32.mrb[144].mxu0 }
 0x94d   :  { %v10946_v45 = vpop.f32.mrb[145].mxu0  ;;  %v4026_v26 = vsel %vm1384_vm3, %v3740_v33, -inf }
 0x94e   :  { %4027 = vmax.xlane.f32.xlu0 %v4026_v26  ;;  %v3743_v28 = vpop.f32.mrb[146].mxu0 }
 0x94f   :  { %v10947_v54 = vpop.f32.mrb[147].mxu0 }
 0x950   :  { %v3780_v41 = vpop.f32.mrb[144].mxu1 }
 0x951   :  { %v10952_v3 = vpop.f32.mrb[145].mxu1  ;;  %v4029_v61 = vsel %vm1384_vm3, %v3780_v41, -inf }
 0x952   :  { %4030 = vmax.xlane.f32.xlu1 %v4029_v61  ;;  %v3783_v22 = vpop.f32.mrb[146].mxu1 }
 0x953   :  { %v10953_v51 = vpop.f32.mrb[147].mxu1 }
 0x954   :  { %v3820_v47 = vpop.f32.mrb[148].mxu0 }
 0x955   :  { %v10958_v19 = vpop.f32.mrb[149].mxu0  ;;  %v4032_v37 = vsel %vm1384_vm3, %v3820_v47, -inf }
 0x956   :  { %4033 = vmax.xlane.f32.xlu0 %v4032_v37  ;;  %v3823_v5 = vpop.f32.mrb[150].mxu0 }
 0x957   :  { %v10959_v57 = vpop.f32.mrb[151].mxu0 }
 0x958   :  { %v3860_v35 = vpop.f32.mrb[148].mxu1 }
 0x959   :  { %v10964_v62 = vpop.f32.mrb[149].mxu1  ;;  %v4035_v30 = vsel %vm1384_vm3, %v3860_v35, -inf }
 0x95a   :  { %4036 = vmax.xlane.f32.xlu1 %v4035_v30  ;;  %v3863_v6 = vpop.f32.mrb[150].mxu1 }
 0x95b   :  { %v10965_v13 = vpop.f32.mrb[151].mxu1 }
 0x95c   :  { %v3900_v45 = vpop.f32.mrb[152].mxu0 }
 0x95d   :  { %v10970_v26 = vpop.f32.mrb[153].mxu0  ;;  %v4038_v28 = vsel %vm1384_vm3, %v3900_v45, -inf }
 0x95e   :  { %4039 = vmax.xlane.f32.xlu0 %v4038_v28  ;;  %v3903_v54 = vpop.f32.mrb[154].mxu0 }
 0x95f   :  { %v10971_v3 = vpop.f32.mrb[155].mxu0 }
 0x960   :  { %v3940_v61 = vpop.f32.mrb[152].mxu1 }
 0x961   :  { %v10976_v22 = vpop.f32.mrb[153].mxu1  ;;  %v4041_v51 = vsel %vm1384_vm3, %v3940_v61, -inf }
 0x962   :  { %4042 = vmax.xlane.f32.xlu1 %v4041_v51  ;;  %v3943_v19 = vpop.f32.mrb[154].mxu1 }
 0x963   :  { %v10977_v37 = vpop.f32.mrb[155].mxu1 }
 0x964   :  { %v3980_v5 = vpop.f32.mrb[156].mxu0 }
 0x965   :  { %v10982_v57 = vpop.f32.mrb[157].mxu0  ;;  %v4044_v62 = vsel %vm1384_vm3, %v3980_v5, -inf }
 0x966   :  { %4045 = vmax.xlane.f32.xlu0 %v4044_v62  ;;  %v3983_v30 = vpop.f32.mrb[158].mxu0 }
 0x967   :  { %v10983_v6 = vpop.f32.mrb[159].mxu0 }
 0x968   :  { %v4020_v13 = vpop.f32.mrb[156].mxu1 }
 0x969   :  { %v10988_v26 = vpop.f32.mrb[157].mxu1  ;;  %v4047_v28 = vsel %vm1384_vm3, %v4020_v13, -inf }
 0x96a   :  { %4048 = vmax.xlane.f32.xlu1 %v4047_v28  ;;  %v4023_v54 = vpop.f32.mrb[158].mxu1 }
 0x96b   :  { %v10989_v3 = vpop.f32.mrb[159].mxu1 }
 0x9db   :  { %v4028_v22 = vpop.xlane.xlu0 %4027 }
 0x9dc   :  { %v4050_v43 = vsub.f32 %v3740_v33, %v4028_v22 }
 0x9de   :  { %v4058_v23 = vmul.f32 1.442695, %v4050_v43 }
 0x9df   :  { %v4031_v51 = vpop.xlane.xlu1 %4030 }
 0x9e0   :  { %12148 = vpow2.f32 %v4058_v23  ;;  %v4051_v19 = vsub.f32 %v3780_v41, %v4031_v51 }
 0x9e2   :  { %v4060_v37 = vmul.f32 1.442695, %v4051_v19 }
 0x9e3   :  { %v4034_v57 = vpop.xlane.xlu0 %4033 }
 0x9e4   :  { %12150 = vpow2.f32 %v4060_v37  ;;  %v4052_v27 = vsub.f32 %v3820_v47, %v4034_v57 }
 0x9e6   :  { %v4062_v62 = vmul.f32 1.442695, %v4052_v27 }
 0x9e7   :  { %v4037_v30 = vpop.xlane.xlu1 %4036 }
 0x9e8   :  { %12152 = vpow2.f32 %v4062_v62  ;;  %v4053_v6 = vsub.f32 %v3860_v35, %v4037_v30 }
 0x9ea   :  { %v12149_v26 = vpop.eup %12148  ;;  %v4064_v63 = vmul.f32 1.442695, %v4053_v6 }
 0x9eb   :  { %v4040_v15 = vpop.xlane.xlu0 %4039  ;;  %v4074_v28 = vsel %vm1384_vm3, %v12149_v26, 0.0 }
 0x9ec   :  { %12154 = vpow2.f32 %v4064_v63  ;;  %v4054_v54 = vsub.f32 %v3900_v45, %v4040_v15  ;;  %4075 = vadd.xlane.f32.xlu0 %v4074_v28 }
 0x9ee   :  { %v12151_v43 = vpop.eup %12150  ;;  %v4066_v33 = vmul.f32 1.442695, %v4054_v54 }
 0x9ef   :  { %v4043_v23 = vpop.xlane.xlu1 %4042  ;;  %v4077_v41 = vsel %vm1384_vm3, %v12151_v43, 0.0 }
 0x9f0   :  { %12156 = vpow2.f32 %v4066_v33  ;;  %v4055_v3 = vsub.f32 %v3940_v61, %v4043_v23  ;;  %4078 = vadd.xlane.f32.xlu1 %v4077_v41 }
 0x9f2   :  { %v12153_v27 = vpop.eup %12152  ;;  %v4068_v47 = vmul.f32 1.442695, %v4055_v3 }
 0x9f3   :  { %v4046_v22 = vpop.xlane.xlu0 %4045  ;;  %v4080_v35 = vsel %vm1384_vm3, %v12153_v27, 0.0 }
 0x9f4   :  { %12158 = vpow2.f32 %v4068_v47  ;;  %v4056_v51 = vsub.f32 %v3980_v5, %v4046_v22  ;;  %4081 = vadd.xlane.f32.xlu0 %v4080_v35  ;;  %v14653_v47 = vld [vmem:[#allocation67_spill] sm:$0xff] }
 0x9f5   :  { %v10334_v22 = vpack.c.bf16 %v14653_v47, %v14653_v47 }
 0x9f6   :  { %v12155_v19 = vpop.eup %12154  ;;  %v4070_v63 = vmul.f32 1.442695, %v4056_v51 }
 0x9f7   :  { %v4049_v15 = vpop.xlane.xlu1 %4048  ;;  %v4083_v45 = vsel %vm1384_vm3, %v12155_v19, 0.0 }
 0x9f8   :  { %12160 = vpow2.f32 %v4070_v63  ;;  %v4057_v37 = vsub.f32 %v4020_v13, %v4049_v15  ;;  %4084 = vadd.xlane.f32.xlu1 %v4083_v45  ;;  %v4218_v45 = vsel %vm1484_vm2, %v10334_v22, 0 }
 0x9fa   :  { %v12157_v57 = vpop.eup %12156  ;;  %v4072_v62 = vmul.f32 1.442695, %v4057_v37  ;;  %v14654_v37 = vld [vmem:[#allocation69_spill] sm:$0xff] }
 0x9fb   :  { %v4086_v61 = vsel %vm1384_vm3, %v12157_v57, 0.0 }
 0x9fc   :  { %12162 = vpow2.f32 %v4072_v62  ;;  %4087 = vadd.xlane.f32.xlu0 %v4086_v61  ;;  %v10335_v62 = vpack.c.bf16 %v14654_v37, %v14654_v37 }
 0x9fe   :  { %v13810_v30 = vpop.eup %12158 }
 0x9ff   :  { %v4089_v5 = vsel %vm1384_vm3, %v13810_v30, 0.0 }
 0xa00   :  { %4090 = vadd.xlane.f32.xlu1 %v4089_v5 }
 0xa02   :  { %v13814_v6 = vpop.eup %12160 }
 0xa03   :  { %v4092_v28 = vsel %vm1384_vm3, %v13814_v6, 0.0 }
 0xa04   :  { %4093 = vadd.xlane.f32.xlu0 %v4092_v28 }
 0xa06   :  { %v13818_v13 = vpop.eup %12162 }
 0xa07   :  { %v4095_v54 = vsel %vm1384_vm3, %v13818_v13, 0.0 }
 0xa08   :  { %4096 = vadd.xlane.f32.xlu1 %v4095_v54  ;;  %v4264_v54 = vsel %vm1484_vm2, %v10335_v62, 0  ;;  %v14657_v62 = vld [vmem:[#allocation75_spill] sm:$0xff] }
 0xa79   :  { %v4076_v33 = vpop.xlane.xlu0 %4075 }
 0xa7a   :  { %12164 = vrcp.f32 %v4076_v33  ;;  %v14655_v33 = vld [vmem:[#allocation71_spill] sm:$0xff] }
 0xa7d   :  { %v4079_v23 = vpop.xlane.xlu1 %4078 }
 0xa7e   :  { %12166 = vrcp.f32 %v4079_v23  ;;  %v10336_v23 = vpack.c.bf16 %v14655_v33, %v14655_v33 }
 0xa80   :  { %v4310_v22 = vsel %vm1484_vm2, %v10336_v23, 0  ;;  %v14659_v23 = vld [vmem:[#allocation77_spill] sm:$0xff] }
 0xa81   :  { %v4082_v41 = vpop.xlane.xlu0 %4081 }
 0xa82   :  { %12168 = vrcp.f32 %v4082_v41 }
 0xa84   :  { %v12165_v3 = vpop.eup %12164 }
 0xa85   :  { %v4106_v35 = vmul.f32 %v12165_v3, %v12149_v26  ;;  %v4085_v51 = vpop.xlane.xlu1 %4084 }
 0xa86   :  { %12170 = vrcp.f32 %v4085_v51 }
 0xa87   :  { %v4114_v63 = vpack.c.bf16 %v4106_v35, %v4106_v35  ;;  %v14656_v35 = vld [vmem:[#allocation73_spill] sm:$0xff] }
 0xa88   :  { %v12167_v15 = vpop.eup %12166  ;;  %v10337_v51 = vpack.c.bf16 %v14656_v35, %v14656_v35 }
 0xa89   :  { %v4107_v61 = vmul.f32 %v12167_v15, %v12151_v43  ;;  %10993 = vmatmul.mubr.msk.bf16.vlgmr.msra.gmra.mrb[160].mxu0 %vm1384_vm3, %v4114_v63  ;;  %v4088_v5 = vpop.xlane.xlu0 %4087 }
 0xa8a   :  { %11003 = vmatpush3.bf16.msra.mxu0 %v4218_v45  ;;  %12172 = vrcp.f32 %v4088_v5  ;;  %11004 = vmatprep.mubr.msk.bf16.mxu0 %vm12517_vm1, %v14600_v14  ;;  %v4356_v37 = vsel %vm1484_vm2, %v10337_v51, 0 }
 0xa8b   :  { %v4115_v28 = vpack.c.bf16 %v4107_v61, %v4107_v61  ;;  %11014 = vmatprep.subr.bf16.mxu0 %v14600_v14  ;;  %v10338_v61 = vpack.c.bf16 %v14657_v62, %v14657_v62  ;;  %v11448_v62 = vld [vmem:[%s14658_s3 + $0xc8] sm:$0xff]  }
 0xa8c   :  { %v12169_v26 = vpop.eup %12168 }
 0xa8d   :  { %v4108_v41 = vmul.f32 %v12169_v26, %v12153_v27  ;;  %10999 = vmatmul.mubr.msk.bf16.vlgmr.msra.gmra.mrb[160].mxu1 %vm1384_vm3, %v4115_v28  ;;  %v4091_v43 = vpop.xlane.xlu1 %4090  ;;  %v11430_v26 = vld [vmem:[%s14658_s3 + $0x40] sm:$0xff]   ;;  %v4402_v33 = vsel %vm1484_vm2, %v10338_v61, 0  ;;  %v11450_v61 = vld [vmem:[%s14658_s3 + $0xd0] sm:$0xff]  }
 0xa8e   :  { %11009 = vmatpush3.bf16.msra.mxu1 %v4264_v54  ;;  %12174 = vrcp.f32 %v4091_v43  ;;  %11010 = vmatprep.mubr.msk.bf16.mxu1 %vm12517_vm1, %v14600_v14 }
 0xa8f   :  { %v4116_v3 = vpack.c.bf16 %v4108_v41, %v4108_v41  ;;  %11020 = vmatprep.subr.bf16.mxu1 %v14600_v14 }
 0xa90   :  { %v12171_v47 = vpop.eup %12170 }
 0xa91   :  { %v4109_v63 = vmul.f32 %v12171_v47, %v12155_v19  ;;  %11005 = vmatmul.mubr.msk.bf16.vlgmr.msra.gmra.mrb[164].mxu0 %vm1384_vm3, %v4116_v3  ;;  %v4094_v27 = vpop.xlane.xlu0 %4093  ;;  %v11446_v3 = vld [vmem:[%s14658_s3 + $0xc0] sm:$0xff]  }
 0xa92   :  { %11015 = vmatpush3.bf16.msra.mxu0 %v4310_v22  ;;  %12176 = vrcp.f32 %v4094_v27  ;;  %11016 = vmatprep.mubr.msk.bf16.mxu0 %vm12517_vm1, %v14600_v14 }
 0xa93   :  { %v4117_v15 = vpack.c.bf16 %v4109_v63, %v4109_v63  ;;  %11026 = vmatprep.subr.bf16.mxu0 %v14600_v14  ;;  %v11432_v63 = vld [vmem:[%s14658_s3 + $0x48] sm:$0xff]  }
 0xa94   :  { %v12173_v45 = vpop.eup %12172 }
 0xa95   :  { %v4110_v5 = vmul.f32 %v12173_v45, %v12157_v57  ;;  %11011 = vmatmul.mubr.msk.bf16.vlgmr.msra.gmra.mrb[164].mxu1 %vm1384_vm3, %v4117_v15  ;;  %v4097_v19 = vpop.xlane.xlu1 %4096  ;;  %v10339_v57 = vpack.c.bf16 %v14659_v23, %v14659_v23  ;;  %v11447_v45 = vld [vmem:[%s14658_s3 + $0x80] sm:$0xff]   ;;  %v11440_v23 = vld [vmem:[%s14658_s3 + $0x68] sm:$0xff]  }
 0xa96   :  { %11021 = vmatpush3.bf16.msra.mxu1 %v4356_v37  ;;  %12178 = vrcp.f32 %v4097_v19  ;;  %11022 = vmatprep.mubr.msk.bf16.mxu1 %vm12517_vm1, %v14600_v14  ;;  %v11451_v19 = vld [vmem:[%s14658_s3 + $0x90] sm:$0xff]  }
 0xa97   :  { %v4118_v28 = vpack.c.bf16 %v4110_v5, %v4110_v5  ;;  %11032 = vmatprep.subr.bf16.mxu1 %v14600_v14  ;;  %v4448_v22 = vsel %vm1484_vm2, %v10339_v57, 0  ;;  %v11437_v5 = vld [vmem:[%s14658_s3 + $0x18] sm:$0xff]   ;;  %v11454_v57 = vld [vmem:[%s14658_s3 + $0xe0] sm:$0xff]  }
 0xa98   :  { %v12175_v54 = vpop.eup %12174 }
 0xa99   :  { %v4111_v41 = vmul.f32 %v12175_v54, %v13810_v30  ;;  %11017 = vmatmul.mubr.msk.bf16.vlgmr.msra.gmra.mrb[168].mxu0 %vm1384_vm3, %v4118_v28  ;;  %v11431_v30 = vld [vmem:[%s14658_s3] sm:$0xff]  }
 0xa9a   :  { %11027 = vmatpush3.bf16.msra.mxu0 %v4402_v33  ;;  %11028 = vmatprep.mubr.msk.bf16.mxu0 %vm12517_vm1, %v14600_v14  ;;  %v11438_v28 = vld [vmem:[%s14658_s3 + $0x60] sm:$0xff]   ;;  %v11453_v33 = vld [vmem:[%s14658_s3 + $0x98] sm:$0xff]  }
 0xa9b   :  { %v4119_v43 = vpack.c.bf16 %v4111_v41, %v4111_v41  ;;  %10468 = vmatprep.subr.bf16.mxu0 %v11430_v26  ;;  %v11452_v26 = vld [vmem:[%s14658_s3 + $0xd8] sm:$0xff]   ;;  %v11439_v54 = vld [vmem:[%s14658_s3 + $0x20] sm:$0xff]   ;;  %v11441_v41 = vld [vmem:[%s14658_s3 + $0x28] sm:$0xff]  }
 0xa9c   :  { %v12177_v47 = vpop.eup %12176 }
 0xa9d   :  { %v4112_v35 = vmul.f32 %v12177_v47, %v13814_v6  ;;  %11023 = vmatmul.mubr.msk.bf16.vlgmr.msra.gmra.mrb[168].mxu1 %vm1384_vm3, %v4119_v43  ;;  %v11433_v6 = vld [vmem:[%s14658_s3 + $0x8] sm:$0xff]   ;;  %v11455_v43 = vld [vmem:[%s14658_s3 + $0xa0] sm:$0xff]  }
 0xa9e   :  { %11033 = vmatpush3.bf16.msra.mxu1 %v4448_v22  ;;  %11034 = vmatprep.mubr.msk.bf16.mxu1 %vm12517_vm1, %v14600_v14  ;;  %v11456_v47 = vld [vmem:[%s14658_s3 + $0xe8] sm:$0xff]   ;;  %v11443_v22 = vld [vmem:[%s14658_s3 + $0x30] sm:$0xff]  }
 0xa9f   :  { %v4120_v51 = vpack.c.bf16 %v4112_v35, %v4112_v35  ;;  %10508 = vmatprep.subr.bf16.mxu1 %v11446_v3  ;;  %v11442_v3 = vld [vmem:[%s14658_s3 + $0x70] sm:$0xff]   ;;  %v11457_v35 = vld [vmem:[%s14658_s3 + $0xa8] sm:$0xff]  }
 0xaa0   :  { %v12179_v27 = vpop.eup %12178 }
 0xaa1   :  { %v4113_v15 = vmul.f32 %v12179_v27, %v13818_v13  ;;  %11029 = vmatmul.mubr.msk.bf16.vlgmr.msra.gmra.mrb[172].mxu0 %vm1384_vm3, %v4120_v51  ;;  %v11434_v13 = vld [vmem:[%s14658_s3 + $0x50] sm:$0xff]   ;;  %v11445_v51 = vld [vmem:[%s14658_s3 + $0x38] sm:$0xff]  }
 0xaa2   :  { %10469 = vmatpush3.bf16.msra.mxu0 %v11431_v30  ;;  %4809 = vmatprep.mubr.bf16.mxu0 %v2730_v44  ;;  %v11436_v44 = vld [vmem:[%s14658_s3 + $0x58] sm:$0xff]  }
 0xaa3   :  { %10470 = vmatprep.subr.bf16.mxu0 %v11432_v63  ;;  %v4121_v37 = vpack.c.bf16 %v4113_v15, %v4113_v15  ;;  %v11444_v30 = vld [vmem:[%s14658_s3 + $0x78] sm:$0xff]  }
 0xaa5   :  { %11035 = vmatmul.mubr.msk.bf16.vlgmr.msra.gmra.mrb[172].mxu1 %vm1384_vm3, %v4121_v37 }
 0xaa6   :  { %10471 = vmatpush3.bf16.msra.mxu0 %v11433_v6  ;;  %10509 = vmatpush3.bf16.msra.mxu1 %v11447_v45 }
 0xaa7   :  { %10472 = vmatprep.subr.bf16.mxu0 %v11434_v13  ;;  %10510 = vmatprep.subr.bf16.mxu1 %v11448_v62 }
 0xaaa   :  { %10473 = vmatpush3.bf16.msra.mxu0 %v11435_v58  ;;  %10511 = vmatpush3.bf16.msra.mxu1 %v11449_v34  ;;  %v14660_v58 = vpack.c.bf16 %v13787_v20, %v13785_v53 }
 0xaab   :  { %10474 = vmatprep.subr.bf16.mxu0 %v11436_v44  ;;  %10512 = vmatprep.subr.bf16.mxu1 %v11450_v61 }
 0xaae   :  { %10475 = vmatpush3.bf16.msra.mxu0 %v11437_v5  ;;  %10513 = vmatpush3.bf16.msra.mxu1 %v11451_v19 }
 0xaaf   :  { %10476 = vmatprep.subr.bf16.mxu0 %v11438_v28  ;;  %10514 = vmatprep.subr.bf16.mxu1 %v11452_v26  ;;  %v14661_v28 = vpack.c.bf16 %v13793_v46, %v13791_v31 }
 0xab2   :  { %10477 = vmatpush3.bf16.msra.mxu0 %v11439_v54  ;;  %10515 = vmatpush3.bf16.msra.mxu1 %v11453_v33 }
 0xab3   :  { %10478 = vmatprep.subr.bf16.mxu0 %v11440_v23  ;;  %10516 = vmatprep.subr.bf16.mxu1 %v11454_v57 }
 0xab6   :  { %10479 = vmatpush3.bf16.msra.mxu0 %v11441_v41  ;;  %10517 = vmatpush3.bf16.msra.mxu1 %v11455_v43 }
 0xab7   :  { %10480 = vmatprep.subr.bf16.mxu0 %v11442_v3  ;;  %10518 = vmatprep.subr.bf16.mxu1 %v11456_v47 }
 0xaba   :  { %10481 = vmatpush3.bf16.msra.mxu0 %v11443_v22  ;;  %10519 = vmatpush3.bf16.msra.mxu1 %v11457_v35 }
 0xabb   :  { %10482 = vmatprep.subr.bf16.mxu0 %v11444_v30  ;;  %10520 = vmatprep.subr.bf16.mxu1 %v11458_v2 }
 0xabe   :  { %10483 = vmatpush3.bf16.msra.mxu0 %v11445_v51  ;;  %10521 = vmatpush3.bf16.msra.mxu1 %v11459_v40 }
 0xac1   :  { %4810 = vmatmul.mubr.bf16.vlgmr.msra.gmra.mrb[176].mxu0 %v1850_v8  ;;  %v11460_v8 = vld [vmem:[%s14658_s3 + $0xf8] sm:$0xff]  }
 0xac2   :  { %4817 = vmatprep.mubr.bf16.mxu0 %v2731_v38  ;;  %10522 = vmatprep.subr.bf16.mxu1 %v11460_v8 }
 0xac3   :  { %10523 = vmatpush3.bf16.msra.mxu1 %v11461_v24 }
 0xac9   :  { %4818 = vmatmul.mubr.bf16.gmra.mrb[180].mxu0 %v1851_v1 }
 0xaca   :  { %4825 = vmatprep.mubr.bf16.mxu0 %v2732_v52 }
 0xad1   :  { %4826 = vmatmul.mubr.bf16.gmra.mrb[184].mxu0 %v1852_v25 }
 0xad2   :  { %4833 = vmatprep.mubr.bf16.mxu0 %v2733_v60 }
 0xad9   :  { %4834 = vmatmul.mubr.bf16.gmra.mrb[188].mxu0 %v1853_v29 }
 0xb5c   :  { %v4162_v10 = vpop.f32.mrb[160].mxu0 }
 0xb5d   :  { %v10994_v1 = vpop.f32.mrb[161].mxu0 }
 0xb5e   :  { %v4165_v4 = vpop.f32.mrb[162].mxu0 }
 0xb5f   :  { %v10995_v39 = vpop.f32.mrb[163].mxu0 }
 0xb60   :  { %v4208_v25 = vpop.f32.mrb[160].mxu1  ;;  %v9772_v39 = vld [vmem:[%s14662_s7] ss:$0 sm:$0xff] }
 0xb61   :  { %v4490_v32 = vpack.c.bf16 %v4208_v25, %v4162_v10  ;;  %v11000_v9 = vpop.f32.mrb[161].mxu1 }
 0xb62   :  { %v4211_v29 = vpop.f32.mrb[162].mxu1 }
 0xb63   :  { %v11001_v50 = vpop.f32.mrb[163].mxu1  ;;  %4874 = vmatprep.mubr.bf16.mxu1 %v4490_v32 }
 0xb64   :  { %v4254_v18 = vpop.f32.mrb[164].mxu0  ;;  %4875 = vmatmul.mubr.bf16.vlgmr.msra.gmra.mrb[176].mxu1 %v3610_v0 }
 0xb65   :  { %v11006_v38 = vpop.f32.mrb[165].mxu0 }
 0xb66   :  { %v4257_v21 = vpop.f32.mrb[166].mxu0 }
 0xb67   :  { %v11007_v7 = vpop.f32.mrb[167].mxu0 }
 0xb68   :  { %v4300_v52 = vpop.f32.mrb[164].mxu1 }
 0xb69   :  { %v4491_v55 = vpack.c.bf16 %v4300_v52, %v4254_v18  ;;  %v11012_v48 = vpop.f32.mrb[165].mxu1 }
 0xb6a   :  { %v4303_v60 = vpop.f32.mrb[166].mxu1 }
 0xb6b   :  { %v11013_v63 = vpop.f32.mrb[167].mxu1  ;;  %4882 = vmatprep.mubr.bf16.mxu1 %v4491_v55  ;;  %v12233_v55 = vld [vmem:[%s14565_s2] sm:$0xff] }
 0xb6c   :  { %v4346_v27 = vpop.f32.mrb[168].mxu0  ;;  %4883 = vmatmul.mubr.bf16.gmra.mrb[180].mxu1 %v3611_v56 }
 0xb6d   :  { %v11018_v15 = vpop.f32.mrb[169].mxu0 }
 0xb6e   :  { %v4349_v6 = vpop.f32.mrb[170].mxu0 }
 0xb6f   :  { %v11019_v45 = vpop.f32.mrb[171].mxu0 }
 0xb70   :  { %v4392_v37 = vpop.f32.mrb[168].mxu1 }
 0xb71   :  { %v4492_v17 = vpack.c.bf16 %v4392_v37, %v4346_v27  ;;  %v11024_v16 = vpop.f32.mrb[169].mxu1  ;;  %v12234_v27 = vld [vmem:[%s14565_s2 + $0x8] sm:$0xff] }
 0xb72   :  { %v4395_v0 = vpop.f32.mrb[170].mxu1 }
 0xb73   :  { %v11025_v13 = vpop.f32.mrb[171].mxu1  ;;  %4890 = vmatprep.mubr.bf16.mxu1 %v4492_v17 }
 0xb74   :  { %v4438_v62 = vpop.f32.mrb[172].mxu0  ;;  %4891 = vmatmul.mubr.bf16.gmra.mrb[184].mxu1 %v14660_v58 }
 0xb75   :  { %v11030_v34 = vpop.f32.mrb[173].mxu0 }
 0xb76   :  { %v4441_v44 = vpop.f32.mrb[174].mxu0 }
 0xb77   :  { %v11031_v61 = vpop.f32.mrb[175].mxu0  ;;  %v12235_v44 = vld [vmem:[%s14565_s2 + $0x10] sm:$0xff] }
 0xb78   :  { %v4484_v5 = vpop.f32.mrb[172].mxu1 }
 0xb79   :  { %v4493_v11 = vpack.c.bf16 %v4484_v5, %v4438_v62  ;;  %v11036_v49 = vpop.f32.mrb[173].mxu1 }
 0xb7a   :  { %v4487_v56 = vpop.f32.mrb[174].mxu1  ;;  %v12236_v49 = vld [vmem:[%s14565_s2 + $0x18] sm:$0xff] }
 0xb7b   :  { %v11037_v19 = vpop.f32.mrb[175].mxu1  ;;  %4898 = vmatprep.mubr.bf16.mxu1 %v4493_v11 }
 0xb7c   :  { %4899 = vmatmul.mubr.bf16.gmra.mrb[188].mxu1 %v14661_v28 }
 0xb94   :  { %v10484_v26 = vpop.f32.mrb[176].mxu0 }
 0xb95   :  { %v10485_v54 = vpop.f32.mrb[177].mxu0 }
 0xb96   :  { %v10486_v33 = vadd.f32 %v10485_v54, %v10484_v26  ;;  %v10487_v23 = vpop.f32.mrb[178].mxu0 }
 0xb97   :  { %v10488_v57 = vpop.f32.mrb[179].mxu0 }
 0xb98   :  { %v10489_v53 = vadd.f32 %v10488_v57, %v10487_v23  ;;  %v4812_v9 = vadd.f32 %v10486_v33, %v9772_v39 }
 0xb9a   :  { %v4815_v38 = vadd.f32 %v10489_v53, %v9772_v39 }
 0xb9c   :  { %v10490_v20 = vpop.f32.mrb[180].mxu0 }
 0xb9d   :  { %v10491_v41 = vpop.f32.mrb[181].mxu0 }
 0xb9e   :  { %v10492_v43 = vadd.f32 %v10491_v41, %v10490_v20  ;;  %v10493_v3 = vpop.f32.mrb[182].mxu0 }
 0xb9f   :  { %v10494_v47 = vpop.f32.mrb[183].mxu0 }
 0xba0   :  { %v10495_v22 = vadd.f32 %v10494_v47, %v10493_v3  ;;  %v4820_v45 = vadd.f32 %v10492_v43, %v9772_v39  ;;  %v12237_v43 = vld [vmem:[%s14565_s2 + $0x20] sm:$0xff] }
 0xba2   :  { %v4823_v13 = vadd.f32 %v10495_v22, %v9772_v39 }
 0xba4   :  { %v10496_v35 = vpop.f32.mrb[184].mxu0 }
 0xba5   :  { %v10497_v30 = vpop.f32.mrb[185].mxu0 }
 0xba6   :  { %v10498_v51 = vadd.f32 %v10497_v30, %v10496_v35  ;;  %v10499_v2 = vpop.f32.mrb[186].mxu0  ;;  %v12238_v35 = vld [vmem:[%s14565_s2 + $0x28] sm:$0xff] }
 0xba7   :  { %v10500_v40 = vpop.f32.mrb[187].mxu0 }
 0xba8   :  { %v10501_v8 = vadd.f32 %v10500_v40, %v10499_v2  ;;  %v4828_v28 = vadd.f32 %v10498_v51, %v9772_v39 }
 0xbaa   :  { %v4831_v57 = vadd.f32 %v10501_v8, %v9772_v39 }
 0xbac   :  { %v10502_v31 = vpop.f32.mrb[188].mxu0 }
 0xbad   :  { %v10503_v46 = vpop.f32.mrb[189].mxu0 }
 0xbae   :  { %v10504_v24 = vadd.f32 %v10503_v46, %v10502_v31  ;;  %v10505_v10 = vpop.f32.mrb[190].mxu0 }
 0xbaf   :  { %v10506_v1 = vpop.f32.mrb[191].mxu0 }
 0xbb0   :  { %v10507_v4 = vadd.f32 %v10506_v1, %v10505_v10  ;;  %v4836_v2 = vadd.f32 %v10504_v24, %v9772_v39  ;;  %v12240_v24 = vld [vmem:[%s14565_s2 + $0x38] sm:$0xff] }
 0xbb2   :  { %v4839_v10 = vadd.f32 %v10507_v4, %v9772_v39 }
 0xc37   :  { %v10524_v25 = vpop.f32.mrb[176].mxu1 }
 0xc38   :  { %v10525_v32 = vpop.f32.mrb[177].mxu1 }
 0xc39   :  { %v10526_v29 = vadd.f32 %v10525_v32, %v10524_v25  ;;  %v10527_v50 = vpop.f32.mrb[178].mxu1 }
 0xc3a   :  { %v10528_v18 = vpop.f32.mrb[179].mxu1 }
 0xc3b   :  { %v4877_v21 = vadd.f32 %v10526_v29, %v4812_v9  ;;  %v10529_v7 = vadd.f32 %v10528_v18, %v10527_v50  ;;  %v12239_v9 = vld [vmem:[%s14565_s2 + $0x30] sm:$0xff] }
 0xc3d   :  { %v4880_v52 = vadd.f32 %v10529_v7, %v4815_v38  ;;  %v14005_v48 = vadd.f32 %v12233_v55, %v4877_v21 }
 0xc3f   :  { %v10530_v60 = vpop.f32.mrb[180].mxu1  ;;  %v4917_v63 = vsel %vm429_vm0, %v14005_v48, 0.0  ;;  %v4908_v15 = vadd.f32 %v12234_v27, %v4880_v52 }
 0xc40   :  { %v10531_v6 = vpop.f32.mrb[181].mxu1  ;;  %4918 = vadd.xlane.f32.xlu0 %v4917_v63 }
 0xc41   :  { %v10532_v37 = vadd.f32 %v10531_v6, %v10530_v60  ;;  %v10533_v17 = vpop.f32.mrb[182].mxu1  ;;  %v4920_v16 = vsel %vm429_vm0, %v4908_v15, 0.0 }
 0xc42   :  { %v10534_v0 = vpop.f32.mrb[183].mxu1  ;;  %4921 = vadd.xlane.f32.xlu1 %v4920_v16 }
 0xc43   :  { %v4885_v62 = vadd.f32 %v10532_v37, %v4820_v45  ;;  %v10535_v58 = vadd.f32 %v10534_v0, %v10533_v17 }
 0xc45   :  { %v4888_v34 = vadd.f32 %v10535_v58, %v4823_v13  ;;  %v4909_v61 = vadd.f32 %v12235_v44, %v4885_v62 }
 0xc47   :  { %v10536_v5 = vpop.f32.mrb[184].mxu1  ;;  %v4923_v11 = vsel %vm429_vm0, %v4909_v61, 0.0  ;;  %v4910_v56 = vadd.f32 %v12236_v49, %v4888_v34 }
 0xc48   :  { %v10537_v19 = vpop.f32.mrb[185].mxu1  ;;  %4924 = vadd.xlane.f32.xlu0 %v4923_v11 }
 0xc49   :  { %v10538_v26 = vadd.f32 %v10537_v19, %v10536_v5  ;;  %v10539_v54 = vpop.f32.mrb[186].mxu1  ;;  %v4926_v33 = vsel %vm429_vm0, %v4910_v56, 0.0 }
 0xc4a   :  { %v10540_v23 = vpop.f32.mrb[187].mxu1  ;;  %4927 = vadd.xlane.f32.xlu1 %v4926_v33 }
 0xc4b   :  { %v4893_v53 = vadd.f32 %v10538_v26, %v4828_v28  ;;  %v10541_v20 = vadd.f32 %v10540_v23, %v10539_v54 }
 0xc4d   :  { %v4896_v41 = vadd.f32 %v10541_v20, %v4831_v57  ;;  %v4911_v3 = vadd.f32 %v12237_v43, %v4893_v53 }
 0xc4f   :  { %v10542_v47 = vpop.f32.mrb[188].mxu1  ;;  %v4929_v22 = vsel %vm429_vm0, %v4911_v3, 0.0  ;;  %v4912_v30 = vadd.f32 %v12238_v35, %v4896_v41  ;;  %v11463_v35 = vld [vmem:[%s14663_s28 + $0x8] sm:$0xff]  }
 0xc50   :  { %v10543_v51 = vpop.f32.mrb[189].mxu1  ;;  %4930 = vadd.xlane.f32.xlu0 %v4929_v22  ;;  %v11462_v22 = vld [vmem:[%s14663_s28] sm:$0xff]   ;;  %s14665_s28 = sld [smem:[#allocation79_spill]] }
 0xc51   :  { %v10544_v40 = vadd.f32 %v10543_v51, %v10542_v47  ;;  %v10545_v8 = vpop.f32.mrb[190].mxu1  ;;  %v4932_v31 = vsel %vm429_vm0, %v4912_v30, 0.0  ;;  %11038 = vmatprep.subr.bf16.mxu0 %v11462_v22  ;;  %v11465_v51 = vld [vmem:[%s14664_s20 + $0x8] sm:$0xff]  }
 0xc52   :  { %v10546_v46 = vpop.f32.mrb[191].mxu1  ;;  %4933 = vadd.xlane.f32.xlu1 %v4932_v31  ;;  %11039 = vmatpush3.bf16.msra.mxu0 %v11462_v22  ;;  %v11469_v31 = vld [vmem:[%s14664_s20 + $0x28] sm:$0xff]  }
 0xc53   :  { %v4901_v1 = vadd.f32 %v10544_v40, %v4836_v2  ;;  %v10547_v25 = vadd.f32 %v10546_v46, %v10545_v8  ;;  %11040 = vmatprep.subr.bf16.mxu0 %v11463_v35  ;;  %v11466_v2 = vld [vmem:[%s14664_s20 + $0x10] sm:$0xff]   ;;  %v11467_v40 = vld [vmem:[%s14664_s20 + $0x18] sm:$0xff]   ;;  %v11468_v8 = vld [vmem:[%s14664_s20 + $0x20] sm:$0xff]  }
 0xc55   :  { %v4904_v32 = vadd.f32 %v10547_v25, %v4839_v10  ;;  %v4913_v29 = vadd.f32 %v12239_v9, %v4901_v1 }
 0xc56   :  { %11041 = vmatpush3.bf16.msra.mxu0 %v11463_v35 }
 0xc57   :  { %v4935_v50 = vsel %vm429_vm0, %v4913_v29, 0.0  ;;  %v4914_v18 = vadd.f32 %v12240_v24, %v4904_v32 }
 0xc58   :  { %4936 = vadd.xlane.f32.xlu0 %v4935_v50 }
 0xc59   :  { %v4938_v38 = vsel %vm429_vm0, %v4914_v18, 0.0 }
 0xc5a   :  { %4939 = vadd.xlane.f32.xlu1 %v4938_v38 }
 0xccd   :  { %v4919_v4 = vpop.xlane.xlu0 %4918 }
 0xcce   :  { %v4942_v39 = vmul.f32 0.03125, %v4919_v4 }
 0xccf   :  { %v4922_v21 = vpop.xlane.xlu1 %4921 }
 0xcd0   :  { %v14038_v7 = vsub.f32 %v14005_v48, %v4942_v39  ;;  %v4943_v52 = vmul.f32 0.03125, %v4922_v21  ;;  %v9805_v21 = vld [vmem:[#allocation7] ss:$0 sm:$0xff] }
 0xcd2   :  { %v14040_v55 = vsub.f32 %v4908_v15, %v4943_v52  ;;  %v4958_v60 = vmul.f32 %v14038_v7, %v14038_v7 }
 0xcd4   :  { %v4966_v63 = vsel %vm429_vm0, %v4958_v60, 0.0  ;;  %v4959_v27 = vmul.f32 %v14040_v55, %v14040_v55 }
 0xcd5   :  { %4967 = vadd.xlane.f32.xlu0 %v4966_v63  ;;  %v4925_v6 = vpop.xlane.xlu0 %4924 }
 0xcd6   :  { %v4944_v45 = vmul.f32 0.03125, %v4925_v6  ;;  %v4969_v37 = vsel %vm429_vm0, %v4959_v27, 0.0 }
 0xcd7   :  { %4970 = vadd.xlane.f32.xlu1 %v4969_v37  ;;  %v4928_v17 = vpop.xlane.xlu1 %4927 }
 0xcd8   :  { %v14048_v48 = vsub.f32 %v4909_v61, %v4944_v45  ;;  %v4945_v16 = vmul.f32 0.03125, %v4928_v17  ;;  %v9806_v17 = vld [vmem:[#allocation10] ss:$0 sm:$0xff] }
 0xcda   :  { %v14050_v15 = vsub.f32 %v4910_v56, %v4945_v16  ;;  %v4960_v0 = vmul.f32 %v14048_v48, %v14048_v48 }
 0xcdc   :  { %v4972_v13 = vsel %vm429_vm0, %v4960_v0, 0.0  ;;  %v4961_v62 = vmul.f32 %v14050_v15, %v14050_v15 }
 0xcdd   :  { %4973 = vadd.xlane.f32.xlu0 %v4972_v13  ;;  %v4931_v58 = vpop.xlane.xlu0 %4930 }
 0xcde   :  { %v4946_v34 = vmul.f32 0.03125, %v4931_v58  ;;  %v4975_v44 = vsel %vm429_vm0, %v4961_v62, 0.0 }
 0xcdf   :  { %4976 = vadd.xlane.f32.xlu1 %v4975_v44  ;;  %v4934_v5 = vpop.xlane.xlu1 %4933 }
 0xce0   :  { %v14058_v61 = vsub.f32 %v4911_v3, %v4946_v34  ;;  %v4947_v11 = vmul.f32 0.03125, %v4934_v5 }
 0xce2   :  { %v14060_v49 = vsub.f32 %v4912_v30, %v4947_v11  ;;  %v4962_v56 = vmul.f32 %v14058_v61, %v14058_v61  ;;  %v11464_v30 = vld [vmem:[%s14664_s20] sm:$0xff]  }
 0xce3   :  { %11050 = vmatprep.subr.bf16.mxu1 %v11464_v30 }
 0xce4   :  { %v4978_v19 = vsel %vm429_vm0, %v4962_v56, 0.0  ;;  %v4963_v28 = vmul.f32 %v14060_v49, %v14060_v49  ;;  %11051 = vmatpush3.bf16.msra.mxu1 %v11464_v30 }
 0xce5   :  { %4979 = vadd.xlane.f32.xlu0 %v4978_v19  ;;  %v4937_v26 = vpop.xlane.xlu0 %4936  ;;  %11052 = vmatprep.subr.bf16.mxu1 %v11465_v51 }
 0xce6   :  { %v4948_v54 = vmul.f32 0.03125, %v4937_v26  ;;  %v4981_v33 = vsel %vm429_vm0, %v4963_v28, 0.0 }
 0xce7   :  { %4982 = vadd.xlane.f32.xlu1 %v4981_v33  ;;  %v4940_v23 = vpop.xlane.xlu1 %4939 }
 0xce8   :  { %v14068_v57 = vsub.f32 %v4913_v29, %v4948_v54  ;;  %v4949_v53 = vmul.f32 0.03125, %v4940_v23  ;;  %11053 = vmatpush3.bf16.msra.mxu1 %v11465_v51 }
 0xce9   :  { %11054 = vmatprep.subr.bf16.mxu1 %v11466_v2 }
 0xcea   :  { %v14070_v20 = vsub.f32 %v4914_v18, %v4949_v53  ;;  %v4964_v41 = vmul.f32 %v14068_v57, %v14068_v57 }
 0xcec   :  { %v4984_v43 = vsel %vm429_vm0, %v4964_v41, 0.0  ;;  %v4965_v3 = vmul.f32 %v14070_v20, %v14070_v20  ;;  %11055 = vmatpush3.bf16.msra.mxu1 %v11466_v2 }
 0xced   :  { %4985 = vadd.xlane.f32.xlu0 %v4984_v43  ;;  %11056 = vmatprep.subr.bf16.mxu1 %v11467_v40 }
 0xcee   :  { %v4987_v47 = vsel %vm429_vm0, %v4965_v3, 0.0 }
 0xcef   :  { %4988 = vadd.xlane.f32.xlu1 %v4987_v47 }
 0xcf0   :  { %11057 = vmatpush3.bf16.msra.mxu1 %v11467_v40 }
 0xcf1   :  { %11058 = vmatprep.subr.bf16.mxu1 %v11468_v8 }
 0xcf4   :  { %11059 = vmatpush3.bf16.msra.mxu1 %v11468_v8 }
 0xcf5   :  { %11060 = vmatprep.subr.bf16.mxu1 %v11469_v31 }
 0xcf8   :  { %11061 = vmatpush3.bf16.msra.mxu1 %v11469_v31 }
 0xd62   :  { %v4968_v46 = vpop.xlane.xlu0 %4967 }
 0xd63   :  { %v4990_v10 = vmul.f32 0.03125, %v4968_v46 }
 0xd64   :  { %v4971_v1 = vpop.xlane.xlu1 %4970 }
 0xd65   :  { %v4998_v25 = vadd.f32 1e-05, %v4990_v10  ;;  %v4991_v32 = vmul.f32 0.03125, %v4971_v1 }
 0xd67   :  { %12180 = vrsqrt.f32 %v4998_v25  ;;  %v4999_v9 = vadd.f32 1e-05, %v4991_v32 }
 0xd69   :  { %12182 = vrsqrt.f32 %v4999_v9  ;;  %v9807_v9 = vld [vmem:[#allocation12] ss:$0 sm:$0xff] }
 0xd6a   :  { %v4974_v29 = vpop.xlane.xlu0 %4973 }
 0xd6b   :  { %v4992_v50 = vmul.f32 0.03125, %v4974_v29 }
 0xd6c   :  { %v4977_v24 = vpop.xlane.xlu1 %4976 }
 0xd6d   :  { %v5000_v18 = vadd.f32 1e-05, %v4992_v50  ;;  %v4993_v38 = vmul.f32 0.03125, %v4977_v24 }
 0xd6f   :  { %12184 = vrsqrt.f32 %v5000_v18  ;;  %v5001_v4 = vadd.f32 1e-05, %v4993_v38 }
 0xd71   :  { %v12181_v39 = vpop.eup %12180  ;;  %12186 = vrsqrt.f32 %v5001_v4 }
 0xd72   :  { %v5014_v52 = vmul.f32 %v12181_v39, %v14038_v7  ;;  %v4980_v60 = vpop.xlane.xlu0 %4979 }
 0xd73   :  { %v12183_v63 = vpop.eup %12182  ;;  %v4994_v27 = vmul.f32 0.03125, %v4980_v60 }
 0xd74   :  { %v5015_v6 = vmul.f32 %v12183_v63, %v14040_v55  ;;  %v4983_v45 = vpop.xlane.xlu1 %4982  ;;  %v5028_v37 = vmul.f32 %v9805_v21, %v5014_v52 }
 0xd75   :  { %v5002_v16 = vadd.f32 1e-05, %v4994_v27  ;;  %v4995_v0 = vmul.f32 0.03125, %v4983_v45 }
 0xd76   :  { %v5029_v13 = vmul.f32 %v9805_v21, %v5015_v6  ;;  %v14104_v58 = vadd.f32 %v9806_v17, %v5028_v37 }
 0xd77   :  { %12188 = vrsqrt.f32 %v5002_v16  ;;  %v5003_v62 = vadd.f32 1e-05, %v4995_v0 }
 0xd78   :  { %v14106_v34 = vadd.f32 %v9806_v17, %v5029_v13 }
 0xd79   :  { %v12185_v44 = vpop.eup %12184  ;;  %12190 = vrsqrt.f32 %v5003_v62 }
 0xd7a   :  { %v5016_v7 = vmul.f32 %v12185_v44, %v14048_v48  ;;  %v4986_v5 = vpop.xlane.xlu0 %4985  ;;  %v5050_v55 = vpack.c.bf16 %v14106_v34, %v14104_v58 }
 0xd7b   :  { %v12187_v11 = vpop.eup %12186  ;;  %v4996_v56 = vmul.f32 0.03125, %v4986_v5 }
 0xd7c   :  { %v5030_v19 = vmul.f32 %v9805_v21, %v5016_v7  ;;  %v5017_v28 = vmul.f32 %v12187_v11, %v14050_v15  ;;  %v4989_v26 = vpop.xlane.xlu1 %4988  ;;  %11042 = vmatprep.mubr.msk.bf16.mxu0 %vm429_vm0, %v5050_v55 }
 0xd7d   :  { %v5004_v54 = vadd.f32 1e-05, %v4996_v56  ;;  %v4997_v33 = vmul.f32 0.03125, %v4989_v26  ;;  %v9814_v26 = vld [vmem:[#allocation13] ss:$0 sm:$0xff] }
 0xd7e   :  { %v5031_v23 = vmul.f32 %v9805_v21, %v5017_v28  ;;  %v14113_v41 = vadd.f32 %v9806_v17, %v5030_v19 }
 0xd7f   :  { %12192 = vrsqrt.f32 %v5004_v54  ;;  %v5005_v53 = vadd.f32 1e-05, %v4997_v33 }
 0xd80   :  { %v14115_v48 = vadd.f32 %v9806_v17, %v5031_v23 }
 0xd81   :  { %v12189_v43 = vpop.eup %12188  ;;  %12194 = vrsqrt.f32 %v5005_v53 }
 0xd82   :  { %v5018_v3 = vmul.f32 %v12189_v43, %v14058_v61  ;;  %v5051_v47 = vpack.c.bf16 %v14115_v48, %v14113_v41 }
 0xd83   :  { %v12191_v15 = vpop.eup %12190 }
 0xd84   :  { %v5019_v22 = vmul.f32 %v12191_v15, %v14060_v49  ;;  %11043 = vmatmul.mubr.msk.bf16.vlgmr.msra.gmra.mrb[192].mxu0 %vm429_vm0, %v5051_v47  ;;  %v5032_v35 = vmul.f32 %v9805_v21, %v5018_v3 }
 0xd86   :  { %v5033_v30 = vmul.f32 %v9805_v21, %v5019_v22  ;;  %v14122_v51 = vadd.f32 %v9806_v17, %v5032_v35 }
 0xd88   :  { %v14124_v2 = vadd.f32 %v9806_v17, %v5033_v30 }
 0xd89   :  { %v12193_v40 = vpop.eup %12192 }
 0xd8a   :  { %v5020_v8 = vmul.f32 %v12193_v40, %v14068_v57  ;;  %v5052_v61 = vpack.c.bf16 %v14124_v2, %v14122_v51  ;;  %v11470_v57 = vld [vmem:[%s14664_s20 + $0x30] sm:$0xff]  }
 0xd8b   :  { %v12195_v31 = vpop.eup %12194  ;;  %11062 = vmatprep.subr.bf16.mxu1 %v11470_v57 }
 0xd8c   :  { %v5021_v46 = vmul.f32 %v12195_v31, %v14070_v20  ;;  %11046 = vmatprep.mubr.msk.bf16.mxu0 %vm429_vm0, %v5052_v61  ;;  %v5034_v49 = vmul.f32 %v9805_v21, %v5020_v8  ;;  %11063 = vmatpush3.bf16.msra.mxu1 %v11470_v57  ;;  %v11471_v20 = vld [vmem:[%s14664_s20 + $0x38] sm:$0xff]  }
 0xd8d   :  { %11064 = vmatprep.subr.bf16.mxu1 %v11471_v20 }
 0xd8e   :  { %v5035_v10 = vmul.f32 %v9805_v21, %v5021_v46  ;;  %v14131_v1 = vadd.f32 %v9806_v17, %v5034_v49 }
 0xd90   :  { %v14133_v25 = vadd.f32 %v9806_v17, %v5035_v10  ;;  %11065 = vmatpush3.bf16.msra.mxu1 %v11471_v20 }
 0xd92   :  { %v5053_v32 = vpack.c.bf16 %v14133_v25, %v14131_v1 }
 0xd94   :  { %11047 = vmatmul.mubr.msk.bf16.gmra.mrb[196].mxu0 %vm429_vm0, %v5053_v32 }
 0xd95   :  { %11090 = vmatprep.mubr.msk.f32.mxu0 %vm12517_vm1, %v14600_v14 }
 0xe57   :  { %v11044_v29 = vpop.f32.mrb[192].mxu0 }
 0xe58   :  { %v5132_v50 = vadd.f32 %v11044_v29, %v9807_v9  ;;  %v5123_v24 = vpop.f32.mrb[193].mxu0 }
 0xe59   :  { %v5124_v18 = vadd.f32 %v9807_v9, %v5123_v24  ;;  %v11045_v38 = vpop.f32.mrb[194].mxu0 }
 0xe5a   :  { %v5135_v4 = vadd.f32 %v11045_v38, %v9807_v9  ;;  %v5126_v39 = vpop.f32.mrb[195].mxu0  ;;  %v5156_v52 = vmax.f32 %v5132_v50, 0.0 }
 0xe5b   :  { %v5127_v21 = vadd.f32 %v9807_v9, %v5126_v39  ;;  %v5154_v63 = vmax.f32 %v5124_v18, 0.0 }
 0xe5c   :  { %v5157_v60 = vmax.f32 %v5135_v4, 0.0 }
 0xe5d   :  { %v5155_v27 = vmax.f32 %v5127_v21, 0.0 }
 0xe5e   :  { %v5163_v6 = vpack.c.bf16 %v5157_v60, %v5156_v52 }
 0xe5f   :  { %v5162_v45 = vpack.c.bf16 %v5155_v27, %v5154_v63 }
 0xe61   :  { %11066 = vmatprep.mubr.bf16.mxu1 %v5162_v45 }
 0xe62   :  { %11067 = vmatmul.mubr.bf16.vlgmr.msra.gmra.mrb[192].mxu1 %v5163_v6 }
 0xe67   :  { %v11048_v37 = vpop.f32.mrb[196].mxu0 }
 0xe68   :  { %v5148_v17 = vadd.f32 %v11048_v37, %v9807_v9  ;;  %v5139_v16 = vpop.f32.mrb[197].mxu0 }
 0xe69   :  { %v5140_v0 = vadd.f32 %v9807_v9, %v5139_v16  ;;  %v11049_v13 = vpop.f32.mrb[198].mxu0 }
 0xe6a   :  { %v5151_v62 = vadd.f32 %v11049_v13, %v9807_v9  ;;  %v5142_v44 = vpop.f32.mrb[199].mxu0  ;;  %v5160_v5 = vmax.f32 %v5148_v17, 0.0 }
 0xe6b   :  { %v5143_v7 = vadd.f32 %v9807_v9, %v5142_v44  ;;  %v5158_v11 = vmax.f32 %v5140_v0, 0.0 }
 0xe6c   :  { %v5161_v55 = vmax.f32 %v5151_v62, 0.0 }
 0xe6d   :  { %v5159_v56 = vmax.f32 %v5143_v7, 0.0 }
 0xe6e   :  { %v5165_v19 = vpack.c.bf16 %v5161_v55, %v5160_v5 }
 0xe6f   :  { %v5164_v28 = vpack.c.bf16 %v5159_v56, %v5158_v11 }
 0xe71   :  { %11070 = vmatprep.mubr.bf16.mxu1 %v5164_v28 }
 0xe72   :  { %11071 = vmatmul.mubr.bf16.gmra.mrb[196].mxu1 %v5165_v19 }
 0xe73   :  { %11109 = vmatprep.mubr.msk.f32.mxu1 %vm12517_vm1, %v14600_v14 }
 0xf35   :  { %v11068_v54 = vpop.f32.mrb[192].mxu1 }
 0xf36   :  { %v5271_v33 = vpop.f32.mrb[193].mxu1  ;;  %v5280_v23 = vadd.f32 %v11068_v54, %v9814_v26 }
 0xf37   :  { %v5272_v53 = vadd.f32 %v9814_v26, %v5271_v33  ;;  %v11069_v43 = vpop.f32.mrb[194].mxu1 }
 0xf38   :  { %v5274_v3 = vpop.f32.mrb[195].mxu1  ;;  %v5283_v47 = vadd.f32 %v11069_v43, %v9814_v26  ;;  %v5304_v40 = vadd.f32 %v5280_v23, %v14113_v41 }
 0xf39   :  { %v5275_v15 = vadd.f32 %v9814_v26, %v5274_v3  ;;  %v5302_v22 = vadd.f32 %v5272_v53, %v14104_v58 }
 0xf3a   :  { %v5305_v61 = vadd.f32 %v5283_v47, %v14115_v48  ;;  %v5318_v31 = vsel %vm429_vm0, %v5304_v40, 0.0 }
 0xf3b   :  { %v5312_v35 = vsel %vm429_vm0, %v5302_v22, 0.0  ;;  %v5303_v30 = vadd.f32 %v5275_v15, %v14106_v34 }
 0xf3c   :  { %5313 = vadd.xlane.f32.xlu0 %v5312_v35  ;;  %v5321_v46 = vsel %vm429_vm0, %v5305_v61, 0.0 }
 0xf3d   :  { %v5315_v8 = vsel %vm429_vm0, %v5303_v30, 0.0 }
 0xf3e   :  { %5316 = vadd.xlane.f32.xlu1 %v5315_v8 }
 0xf40   :  { %5319 = vadd.xlane.f32.xlu0 %v5318_v31 }
 0xf42   :  { %5322 = vadd.xlane.f32.xlu1 %v5321_v46 }
 0xf45   :  { %v11072_v49 = vpop.f32.mrb[196].mxu1 }
 0xf46   :  { %v5287_v58 = vpop.f32.mrb[197].mxu1  ;;  %v5296_v10 = vadd.f32 %v11072_v49, %v9814_v26 }
 0xf47   :  { %v5288_v32 = vadd.f32 %v9814_v26, %v5287_v58  ;;  %v11073_v57 = vpop.f32.mrb[198].mxu1 }
 0xf48   :  { %v5290_v34 = vpop.f32.mrb[199].mxu1  ;;  %v5299_v20 = vadd.f32 %v11073_v57, %v9814_v26  ;;  %v5308_v50 = vadd.f32 %v5296_v10, %v14131_v1 }
 0xf49   :  { %v5291_v41 = vadd.f32 %v9814_v26, %v5290_v34  ;;  %v5306_v9 = vadd.f32 %v5288_v32, %v14122_v51 }
 0xf4a   :  { %v5309_v18 = vadd.f32 %v5299_v20, %v14133_v25  ;;  %v5330_v38 = vsel %vm429_vm0, %v5308_v50, 0.0 }
 0xf4b   :  { %v5324_v29 = vsel %vm429_vm0, %v5306_v9, 0.0  ;;  %v5307_v48 = vadd.f32 %v5291_v41, %v14124_v2 }
 0xf4c   :  { %5325 = vadd.xlane.f32.xlu0 %v5324_v29  ;;  %v5333_v4 = vsel %vm429_vm0, %v5309_v18, 0.0 }
 0xf4d   :  { %v5327_v24 = vsel %vm429_vm0, %v5307_v48, 0.0 }
 0xf4e   :  { %5328 = vadd.xlane.f32.xlu1 %v5327_v24 }
 0xf50   :  { %5331 = vadd.xlane.f32.xlu0 %v5330_v38 }
 0xf52   :  { %5334 = vadd.xlane.f32.xlu1 %v5333_v4 }
 0xfc9   :  { %v5314_v39 = vpop.xlane.xlu0 %5313 }
 0xfca   :  { %v5336_v51 = vmul.f32 0.03125, %v5314_v39 }
 0xfcb   :  { %v5317_v21 = vpop.xlane.xlu1 %5316 }
 0xfcc   :  { %v14164_v52 = vsub.f32 %v5302_v22, %v5336_v51  ;;  %v5337_v2 = vmul.f32 0.03125, %v5317_v21 }
 0xfcd   :  { %v5320_v60 = vpop.xlane.xlu0 %5319 }
 0xfce   :  { %v14166_v1 = vsub.f32 %v5303_v30, %v5337_v2  ;;  %v5338_v63 = vmul.f32 0.03125, %v5320_v60  ;;  %v5352_v25 = vmul.f32 %v14164_v52, %v14164_v52  ;;  %v9824_v60 = vld [vmem:[#allocation16] ss:$0 sm:$0xff] }
 0xfcf   :  { %v5323_v27 = vpop.xlane.xlu1 %5322 }
 0xfd0   :  { %v14170_v6 = vsub.f32 %v5304_v40, %v5338_v63  ;;  %v5339_v45 = vmul.f32 0.03125, %v5323_v27  ;;  %v5360_v37 = vsel %vm429_vm0, %v5352_v25, 0.0  ;;  %v5353_v17 = vmul.f32 %v14166_v1, %v14166_v1 }
 0xfd1   :  { %5361 = vadd.xlane.f32.xlu0 %v5360_v37 }
 0xfd2   :  { %v14175_v16 = vsub.f32 %v5305_v61, %v5339_v45  ;;  %v5363_v0 = vsel %vm429_vm0, %v5353_v17, 0.0  ;;  %v5354_v13 = vmul.f32 %v14170_v6, %v14170_v6  ;;  %v12518_v61 = vmov 0.0|0.0  }
 0xfd3   :  { %5364 = vadd.xlane.f32.xlu1 %v5363_v0  ;;  %11274 = vmatprep.subr.bf16.mxu0 %v12518_v61 }
 0xfd4   :  { %v5366_v62 = vsel %vm429_vm0, %v5354_v13, 0.0  ;;  %v5355_v44 = vmul.f32 %v14175_v16, %v14175_v16  ;;  %11286 = vmatprep.subr.bf16.mxu1 %v12518_v61 }
 0xfd5   :  { %5367 = vadd.xlane.f32.xlu0 %v5366_v62 }
 0xfd6   :  { %v5369_v7 = vsel %vm429_vm0, %v5355_v44, 0.0 }
 0xfd7   :  { %5370 = vadd.xlane.f32.xlu1 %v5369_v7 }
 0xfd9   :  { %v5326_v5 = vpop.xlane.xlu0 %5325 }
 0xfda   :  { %v5340_v55 = vmul.f32 0.03125, %v5326_v5 }
 0xfdb   :  { %v5329_v11 = vpop.xlane.xlu1 %5328 }
 0xfdc   :  { %v14184_v56 = vsub.f32 %v5306_v9, %v5340_v55  ;;  %v5341_v19 = vmul.f32 0.03125, %v5329_v11 }
 0xfdd   :  { %v5332_v28 = vpop.xlane.xlu0 %5331 }
 0xfde   :  { %v14186_v26 = vsub.f32 %v5307_v48, %v5341_v19  ;;  %v5342_v54 = vmul.f32 0.03125, %v5332_v28  ;;  %v5356_v33 = vmul.f32 %v14184_v56, %v14184_v56 }
 0xfdf   :  { %v5335_v23 = vpop.xlane.xlu1 %5334 }
 0xfe0   :  { %v14190_v53 = vsub.f32 %v5308_v50, %v5342_v54  ;;  %v5343_v43 = vmul.f32 0.03125, %v5335_v23  ;;  %v5372_v3 = vsel %vm429_vm0, %v5356_v33, 0.0  ;;  %v5357_v47 = vmul.f32 %v14186_v26, %v14186_v26  ;;  %v9823_v50 = vld [vmem:[#allocation15] ss:$0 sm:$0xff] }
 0xfe1   :  { %5373 = vadd.xlane.f32.xlu0 %v5372_v3 }
 0xfe2   :  { %v14195_v15 = vsub.f32 %v5309_v18, %v5343_v43  ;;  %v5375_v22 = vsel %vm429_vm0, %v5357_v47, 0.0  ;;  %v5358_v35 = vmul.f32 %v14190_v53, %v14190_v53 }
 0xfe3   :  { %5376 = vadd.xlane.f32.xlu1 %v5375_v22 }
 0xfe4   :  { %v5378_v30 = vsel %vm429_vm0, %v5358_v35, 0.0  ;;  %v5359_v40 = vmul.f32 %v14195_v15, %v14195_v15 }
 0xfe5   :  { %5379 = vadd.xlane.f32.xlu0 %v5378_v30 }
 0xfe6   :  { %v5381_v8 = vsel %vm429_vm0, %v5359_v40, 0.0 }
 0xfe7   :  { %5382 = vadd.xlane.f32.xlu1 %v5381_v8 }
0x105e   :  { %v5362_v31 = vpop.xlane.xlu0 %5361 }
0x105f   :  { %v5384_v46 = vmul.f32 0.03125, %v5362_v31 }
0x1060   :  { %v5365_v49 = vpop.xlane.xlu1 %5364 }
0x1061   :  { %v5392_v58 = vadd.f32 1e-05, %v5384_v46  ;;  %v5385_v10 = vmul.f32 0.03125, %v5365_v49 }
0x1062   :  { %v5368_v32 = vpop.xlane.xlu0 %5367 }
0x1063   :  { %12196 = vrsqrt.f32 %v5392_v58  ;;  %v5393_v57 = vadd.f32 1e-05, %v5385_v10  ;;  %v5386_v34 = vmul.f32 0.03125, %v5368_v32 }
0x1064   :  { %v5371_v20 = vpop.xlane.xlu1 %5370 }
0x1065   :  { %12198 = vrsqrt.f32 %v5393_v57  ;;  %v5394_v41 = vadd.f32 1e-05, %v5386_v34  ;;  %v5387_v9 = vmul.f32 0.03125, %v5371_v20  ;;  %v9830_v34 = vld [vmem:[%s14665_s28 + $0x18] sm:$0xff]  ;;  %v9832_v20 = vld [vmem:[%s14665_s28 + $0x20] sm:$0xff] }
0x1067   :  { %12200 = vrsqrt.f32 %v5394_v41  ;;  %v5395_v29 = vadd.f32 1e-05, %v5387_v9  ;;  %v9834_v41 = vld [vmem:[%s14665_s28 + $0x28] sm:$0xff]  ;;  %v9836_v9 = vld [vmem:[%s14665_s28 + $0x30] sm:$0xff] }
0x1069   :  { %12202 = vrsqrt.f32 %v5395_v29  ;;  %v9838_v29 = vld [vmem:[%s14665_s28 + $0x38] sm:$0xff] }
0x106d   :  { %v12197_v48 = vpop.eup %12196 }
0x106e   :  { %v5408_v24 = vmul.f32 %v12197_v48, %v14164_v52  ;;  %v5374_v18 = vpop.xlane.xlu0 %5373  ;;  %v11472_v48 = vld [vmem:[#allocation18] ss:$48 sps:$4 sm:$0xff]  }
0x106f   :  { %v12199_v38 = vpop.eup %12198  ;;  %v5388_v4 = vmul.f32 0.03125, %v5374_v18  ;;  %v11480_v18 = vld [vmem:[#allocation18 + $0x64] ss:$48 sps:$4 sm:$0xff]  }
0x1070   :  { %v5422_v39 = vmul.f32 %v9823_v50, %v5408_v24  ;;  %v5409_v51 = vmul.f32 %v12199_v38, %v14166_v1  ;;  %v5377_v21 = vpop.xlane.xlu1 %5376  ;;  %v11475_v24 = vld [vmem:[#allocation18 + $0x8] ss:$48 sps:$4 sm:$0xff]   ;;  %v11483_v38 = vld [vmem:[#allocation18 + $0x6c] ss:$48 sps:$4 sm:$0xff]  }
0x1071   :  { %v12201_v2 = vpop.eup %12200  ;;  %v5396_v63 = vadd.f32 1e-05, %v5388_v4  ;;  %v5389_v25 = vmul.f32 0.03125, %v5377_v21  ;;  %v11478_v4 = vld [vmem:[#allocation18 + $0x60] ss:$48 sps:$4 sm:$0xff]  }
0x1072   :  { %v5423_v27 = vmul.f32 %v9823_v50, %v5409_v51  ;;  %v5410_v45 = vmul.f32 %v12201_v2, %v14170_v6  ;;  %v5380_v37 = vpop.xlane.xlu0 %5379  ;;  %v5436_v52 = vadd.f32 %v9824_v60, %v5422_v39  ;;  %v11481_v39 = vld [vmem:[#allocation18 + $0x68] ss:$48 sps:$4 sm:$0xff]   ;;  %v11486_v51 = vld [vmem:[#allocation18 + $0xc4] ss:$48 sps:$4 sm:$0xff]   ;;  %v11489_v21 = vld [vmem:[#allocation18 + $0xcc] ss:$48 sps:$4 sm:$0xff]  }
0x1073   :  { %v12203_v17 = vpop.eup %12202  ;;  %12204 = vrsqrt.f32 %v5396_v63  ;;  %v5397_v0 = vadd.f32 1e-05, %v5389_v25  ;;  %v5390_v13 = vmul.f32 0.03125, %v5380_v37  ;;  %v11484_v2 = vld [vmem:[#allocation18 + $0xc0] ss:$48 sps:$4 sm:$0xff]  }
0x1074   :  { %v5437_v62 = vadd.f32 %v9824_v60, %v5423_v27  ;;  %v5424_v44 = vmul.f32 %v9823_v50, %v5410_v45  ;;  %v5411_v7 = vmul.f32 %v12203_v17, %v14175_v16  ;;  %v5383_v5 = vpop.xlane.xlu1 %5382  ;;  %v11492_v63 = vld [vmem:[#allocation18 + $0x124] ss:$48 sps:$4 sm:$0xff]   ;;  %v11495_v25 = vld [vmem:[#allocation18 + $0x12c] ss:$48 sps:$4 sm:$0xff]   ;;  %v11490_v27 = vld [vmem:[#allocation18 + $0x120] ss:$48 sps:$4 sm:$0xff]  }
0x1075   :  { %12206 = vrsqrt.f32 %v5397_v0  ;;  %v5398_v1 = vadd.f32 1e-05, %v5390_v13  ;;  %v5391_v55 = vmul.f32 0.03125, %v5383_v5  ;;  %v11493_v45 = vld [vmem:[#allocation18 + $0x128] ss:$48 sps:$4 sm:$0xff]  }
0x1076   :  { %v14210_v11 = vpack.c.bf16 %v5437_v62, %v5436_v52  ;;  %v5425_v19 = vmul.f32 %v9823_v50, %v5411_v7  ;;  %v5438_v6 = vadd.f32 %v9824_v60, %v5424_v44  ;;  %v11498_v37 = vld [vmem:[#allocation18 + $0x184] ss:$48 sps:$4 sm:$0xff]   ;;  %v11501_v17 = vld [vmem:[#allocation18 + $0x18c] ss:$48 sps:$4 sm:$0xff]   ;;  %v11496_v0 = vld [vmem:[#allocation18 + $0x180] ss:$48 sps:$4 sm:$0xff]  }
0x1077   :  { %12208 = vrsqrt.f32 %v5398_v1  ;;  %v5399_v28 = vadd.f32 1e-05, %v5391_v55  ;;  %v11499_v13 = vld [vmem:[#allocation18 + $0x188] ss:$48 sps:$4 sm:$0xff]   ;;  %v11504_v52 = vld [vmem:[#allocation18 + $0x1e4] ss:$48 sps:$4 sm:$0xff]  }
0x1078   :  { %v5439_v54 = vadd.f32 %v9824_v60, %v5425_v19  ;;  %11276 = vmatpush3.bf16.msra.mxu0 %v14210_v11  ;;  %11288 = vmatpush3.bf16.msra.mxu1 %v14210_v11  ;;  %v11507_v62 = vld [vmem:[#allocation18 + $0x1ec] ss:$48 sps:$4 sm:$0xff]   ;;  %v11502_v44 = vld [vmem:[#allocation18 + $0x1e0] ss:$48 sps:$4 sm:$0xff]   ;;  %v11505_v7 = vld [vmem:[#allocation18 + $0x1e8] ss:$48 sps:$4 sm:$0xff]  }
0x1079   :  { %12210 = vrsqrt.f32 %v5399_v28  ;;  %11277 = vmatprep.subr.bf16.mxu0 %v12518_v61  ;;  %11289 = vmatprep.subr.bf16.mxu1 %v12518_v61  ;;  %v11510_v5 = vld [vmem:[#allocation18 + $0x244] ss:$48 sps:$4 sm:$0xff]   ;;  %v11513_v1 = vld [vmem:[#allocation18 + $0x24c] ss:$48 sps:$4 sm:$0xff]   ;;  %v11508_v55 = vld [vmem:[#allocation18 + $0x240] ss:$48 sps:$4 sm:$0xff]  }
0x107a   :  { %v14216_v16 = vpack.c.bf16 %v5439_v54, %v5438_v6  ;;  %v11516_v19 = vld [vmem:[#allocation18 + $0x2a4] ss:$48 sps:$4 sm:$0xff]   ;;  %v11519_v28 = vld [vmem:[#allocation18 + $0x2ac] ss:$48 sps:$4 sm:$0xff]   ;;  %v11514_v6 = vld [vmem:[#allocation18 + $0x2a0] ss:$48 sps:$4 sm:$0xff]  }
0x107b   :  { %v11517_v54 = vld [vmem:[#allocation18 + $0x2a8] ss:$48 sps:$4 sm:$0xff]  }
0x107c   :  { %11279 = vmatpush3.bf16.msra.mxu0 %v14216_v16  ;;  %11291 = vmatpush3.bf16.msra.mxu1 %v14216_v16 }
0x107d   :  { %v12205_v33 = vpop.eup %12204  ;;  %11280 = vmatprep.subr.bf16.mxu0 %v12518_v61  ;;  %11292 = vmatprep.subr.bf16.mxu1 %v12518_v61 }
0x107e   :  { %v5412_v23 = vmul.f32 %v12205_v33, %v14184_v56  ;;  %v11522_v33 = vld [vmem:[#allocation18 + $0x304] ss:$48 sps:$4 sm:$0xff]  }
0x107f   :  { %v12207_v43 = vpop.eup %12206 }
0x1080   :  { %v5426_v3 = vmul.f32 %v9823_v50, %v5412_v23  ;;  %v5413_v47 = vmul.f32 %v12207_v43, %v14186_v26  ;;  %v5444_v26 = vld [vmem:[%s14665_s28] sm:$0xff]  ;;  %v11525_v43 = vld [vmem:[#allocation18 + $0x30c] ss:$48 sps:$4 sm:$0xff]  }
0x1081   :  { %v12209_v22 = vpop.eup %12208  ;;  %v11523_v23 = vld [vmem:[#allocation18 + $0x308] ss:$48 sps:$4 sm:$0xff]  }
0x1082   :  { %v5427_v35 = vmul.f32 %v9823_v50, %v5413_v47  ;;  %v5414_v30 = vmul.f32 %v12209_v22, %v14190_v53  ;;  %v5440_v8 = vadd.f32 %v9824_v60, %v5426_v3  ;;  %v9826_v53 = vld [vmem:[%s14665_s28 + $0x8] sm:$0xff]  ;;  %v11528_v3 = vld [vmem:[#allocation18 + $0x364] ss:$48 sps:$4 sm:$0xff]  }
0x1083   :  { %v12211_v40 = vpop.eup %12210  ;;  %v11531_v47 = vld [vmem:[#allocation18 + $0x36c] ss:$48 sps:$4 sm:$0xff]   ;;  %v11526_v22 = vld [vmem:[#allocation18 + $0x360] ss:$48 sps:$4 sm:$0xff]  }
0x1084   :  { %v5441_v31 = vadd.f32 %v9824_v60, %v5427_v35  ;;  %v5428_v46 = vmul.f32 %v9823_v50, %v5414_v30  ;;  %v5415_v49 = vmul.f32 %v12211_v40, %v14195_v15  ;;  %v9828_v15 = vld [vmem:[%s14665_s28 + $0x10] sm:$0xff]  ;;  %v11537_v40 = vld [vmem:[#allocation18 + $0x3cc] ss:$48 sps:$4 sm:$0xff]  }
0x1085   :  { %v11529_v35 = vld [vmem:[#allocation18 + $0x368] ss:$48 sps:$4 sm:$0xff]   ;;  %v11534_v30 = vld [vmem:[#allocation18 + $0x3c4] ss:$48 sps:$4 sm:$0xff]  }
0x1086   :  { %v14226_v58 = vpack.c.bf16 %v5441_v31, %v5440_v8  ;;  %v5429_v10 = vmul.f32 %v9823_v50, %v5415_v49  ;;  %v5442_v32 = vadd.f32 %v9824_v60, %v5428_v46  ;;  %v11474_v50 = vld [vmem:[#allocation18 + $0x4] ss:$48 sps:$4 sm:$0xff]   ;;  %v11532_v8 = vld [vmem:[#allocation18 + $0x3c0] ss:$48 sps:$4 sm:$0xff]   ;;  %v11535_v31 = vld [vmem:[#allocation18 + $0x3c8] ss:$48 sps:$4 sm:$0xff]  }
0x1088   :  { %v5443_v57 = vadd.f32 %v9824_v60, %v5429_v10  ;;  %11282 = vmatpush3.bf16.msra.mxu0 %v14226_v58  ;;  %11294 = vmatpush3.bf16.msra.mxu1 %v14226_v58  ;;  %v11487_v60 = vld [vmem:[#allocation18 + $0xc8] ss:$48 sps:$4 sm:$0xff]  }
0x1089   :  { %11283 = vmatprep.subr.bf16.mxu0 %v12518_v61  ;;  %11295 = vmatprep.subr.bf16.mxu1 %v12518_v61 }
0x108a   :  { %v14232_v56 = vpack.c.bf16 %v5443_v57, %v5442_v32  ;;  %v11538_v32 = vld [vmem:[#allocation18 + $0x420] ss:$48 sps:$4 sm:$0xff]   ;;  %v11540_v57 = vld [vmem:[#allocation18 + $0x424] ss:$48 sps:$4 sm:$0xff]  }
0x108c   :  { %11285 = vmatpush3.bf16.msra.mxu0 %v14232_v56  ;;  %11297 = vmatpush3.bf16.msra.mxu1 %v14232_v56 }
0x108d   :  { %11298 = vmatprep.subr.bf16.mxu0 %v12518_v61  ;;  %11310 = vmatprep.subr.bf16.mxu1 %v12518_v61 }
0x108f   :  { %11091 = vmatmul.mubr.msk.f32.vlgmr.msra.gmra.mrb[200].mxu0 %vm5445_vm4, %v5444_v26  ;;  %11110 = vmatmul.mubr.msk.f32.vlgmr.msra.gmra.mrb[200].mxu1 %vm5445_vm4, %v9826_v53  ;;  %v11543_v26 = vld [vmem:[#allocation18 + $0x42c] ss:$48 sps:$4 sm:$0xff]   ;;  %v11546_v53 = vld [vmem:[#allocation18 + $0x484] ss:$48 sps:$4 sm:$0xff]  }
0x1090   :  { %11300 = vmatpush3.bf16.msra.mxu0 %v14210_v11  ;;  %11312 = vmatpush3.bf16.msra.mxu1 %v14210_v11 }
0x1091   :  { %11301 = vmatprep.subr.bf16.mxu0 %v12518_v61  ;;  %11313 = vmatprep.subr.bf16.mxu1 %v12518_v61 }
0x1092   :  { %11128 = vmatprep.mubr.msk.f32.mxu0 %vm12517_vm1, %v14600_v14  ;;  %11147 = vmatprep.mubr.msk.f32.mxu1 %vm12517_vm1, %v14600_v14 }
0x1094   :  { %11303 = vmatpush3.bf16.msra.mxu0 %v14216_v16  ;;  %11315 = vmatpush3.bf16.msra.mxu1 %v14216_v16 }
0x1095   :  { %11304 = vmatprep.subr.bf16.mxu0 %v12518_v61  ;;  %11316 = vmatprep.subr.bf16.mxu1 %v12518_v61 }
0x1098   :  { %11306 = vmatpush3.bf16.msra.mxu0 %v14226_v58  ;;  %11318 = vmatpush3.bf16.msra.mxu1 %v14226_v58 }
0x1099   :  { %11307 = vmatprep.subr.bf16.mxu0 %v12518_v61  ;;  %11319 = vmatprep.subr.bf16.mxu1 %v12518_v61 }
0x109c   :  { %11309 = vmatpush3.bf16.msra.mxu0 %v14232_v56  ;;  %11321 = vmatpush3.bf16.msra.mxu1 %v14232_v56 }
0x109d   :  { %11322 = vmatprep.subr.bf16.mxu0 %v12518_v61  ;;  %11334 = vmatprep.subr.bf16.mxu1 %v12518_v61 }
0x109f   :  { %11129 = vmatmul.mubr.msk.f32.vlgmr.msra.gmra.mrb[202].mxu0 %vm5445_vm4, %v9828_v15  ;;  %11148 = vmatmul.mubr.msk.f32.vlgmr.msra.gmra.mrb[202].mxu1 %vm5445_vm4, %v9830_v34  ;;  %v11549_v15 = vld [vmem:[#allocation18 + $0x48c] ss:$48 sps:$4 sm:$0xff]   ;;  %v11544_v34 = vld [vmem:[#allocation18 + $0x480] ss:$48 sps:$4 sm:$0xff]  }
0x10a0   :  { %11324 = vmatpush3.bf16.msra.mxu0 %v14210_v11  ;;  %11336 = vmatpush3.bf16.msra.mxu1 %v14210_v11 }
0x10a1   :  { %11325 = vmatprep.subr.bf16.mxu0 %v12518_v61  ;;  %11337 = vmatprep.subr.bf16.mxu1 %v12518_v61 }
0x10a2   :  { %11166 = vmatprep.mubr.msk.f32.mxu0 %vm12517_vm1, %v14600_v14  ;;  %11185 = vmatprep.mubr.msk.f32.mxu1 %vm12517_vm1, %v14600_v14 }
0x10a4   :  { %11327 = vmatpush3.bf16.msra.mxu0 %v14216_v16  ;;  %11339 = vmatpush3.bf16.msra.mxu1 %v14216_v16 }
0x10a5   :  { %11328 = vmatprep.subr.bf16.mxu0 %v12518_v61  ;;  %11340 = vmatprep.subr.bf16.mxu1 %v12518_v61 }
0x10a8   :  { %11330 = vmatpush3.bf16.msra.mxu0 %v14226_v58  ;;  %11342 = vmatpush3.bf16.msra.mxu1 %v14226_v58 }
0x10a9   :  { %11331 = vmatprep.subr.bf16.mxu0 %v12518_v61  ;;  %11343 = vmatprep.subr.bf16.mxu1 %v12518_v61 }
0x10ac   :  { %11333 = vmatpush3.bf16.msra.mxu0 %v14232_v56  ;;  %11345 = vmatpush3.bf16.msra.mxu1 %v14232_v56 }
0x10ad   :  { %11346 = vmatprep.subr.bf16.mxu0 %v12518_v61  ;;  %11358 = vmatprep.subr.bf16.mxu1 %v12518_v61 }
0x10af   :  { %11167 = vmatmul.mubr.msk.f32.vlgmr.msra.gmra.mrb[204].mxu0 %vm5445_vm4, %v9832_v20  ;;  %11186 = vmatmul.mubr.msk.f32.vlgmr.msra.gmra.mrb[204].mxu1 %vm5445_vm4, %v9834_v41  ;;  %v11547_v20 = vld [vmem:[#allocation18 + $0x488] ss:$48 sps:$4 sm:$0xff]  }
0x10b0   :  { %11348 = vmatpush3.bf16.msra.mxu0 %v14210_v11  ;;  %11360 = vmatpush3.bf16.msra.mxu1 %v14210_v11  ;;  %v11511_v11 = vld [vmem:[#allocation18 + $0x248] ss:$48 sps:$4 sm:$0xff]  }
0x10b1   :  { %11349 = vmatprep.subr.bf16.mxu0 %v12518_v61  ;;  %11361 = vmatprep.subr.bf16.mxu1 %v12518_v61 }
0x10b2   :  { %11204 = vmatprep.mubr.msk.f32.mxu0 %vm12517_vm1, %v14600_v14  ;;  %11223 = vmatprep.mubr.msk.f32.mxu1 %vm12517_vm1, %v14600_v14 }
0x10b4   :  { %11351 = vmatpush3.bf16.msra.mxu0 %v14216_v16  ;;  %11363 = vmatpush3.bf16.msra.mxu1 %v14216_v16  ;;  %v11520_v16 = vld [vmem:[#allocation18 + $0x300] ss:$48 sps:$4 sm:$0xff]  }
0x10b5   :  { %11352 = vmatprep.subr.bf16.mxu0 %v12518_v61  ;;  %11364 = vmatprep.subr.bf16.mxu1 %v12518_v61 }
0x10b8   :  { %11354 = vmatpush3.bf16.msra.mxu0 %v14226_v58  ;;  %11366 = vmatpush3.bf16.msra.mxu1 %v14226_v58 }
0x10b9   :  { %11355 = vmatprep.subr.bf16.mxu0 %v12518_v61  ;;  %11367 = vmatprep.subr.bf16.mxu1 %v12518_v61  ;;  %v11477_v61 = vld [vmem:[#allocation18 + $0xc] ss:$48 sps:$4 sm:$0xff]  }
0x10bc   :  { %11357 = vmatpush3.bf16.msra.mxu0 %v14232_v56  ;;  %11369 = vmatpush3.bf16.msra.mxu1 %v14232_v56  ;;  %v11541_v56 = vld [vmem:[#allocation18 + $0x428] ss:$48 sps:$4 sm:$0xff]  }
0x10bd   :  { %7299 = vmatprep.subr.bf16.mxu0 %v11474_v50  ;;  %7340 = vmatprep.subr.bf16.mxu1 %v11477_v61 }
0x10bf   :  { %11205 = vmatmul.mubr.msk.f32.vlgmr.msra.gmra.mrb[206].mxu0 %vm5445_vm4, %v9836_v9  ;;  %11224 = vmatmul.mubr.msk.f32.vlgmr.msra.gmra.mrb[206].mxu1 %vm5445_vm4, %v9838_v29 }
0x10c0   :  { %7300 = vmatpush1.bf16.msra.mxu0 %v11472_v48  ;;  %7341 = vmatpush1.bf16.msra.mxu1 %v11475_v24 }
0x10c1   :  { %7301 = vmatprep.subr.bf16.mxu0 %v11480_v18  ;;  %7342 = vmatprep.subr.bf16.mxu1 %v11483_v38  ;;  %v11550_v38 = vld [vmem:[#allocation18 + $0x4e0] ss:$48 sps:$4 sm:$0xff]  }
0x10c4   :  { %7302 = vmatpush1.bf16.msra.mxu0 %v11478_v4  ;;  %7343 = vmatpush1.bf16.msra.mxu1 %v11481_v39  ;;  %v11552_v4 = vld [vmem:[#allocation18 + $0x4e4] ss:$48 sps:$4 sm:$0xff]   ;;  %v11553_v39 = vld [vmem:[#allocation18 + $0x4e8] ss:$48 sps:$4 sm:$0xff]  }
0x10c5   :  { %7303 = vmatprep.subr.bf16.mxu0 %v11486_v51  ;;  %7344 = vmatprep.subr.bf16.mxu1 %v11489_v21  ;;  %v11555_v51 = vld [vmem:[#allocation18 + $0x4ec] ss:$48 sps:$4 sm:$0xff]   ;;  %v11556_v21 = vld [vmem:[#allocation18 + $0x540] ss:$48 sps:$4 sm:$0xff]  }
0x10c8   :  { %7304 = vmatpush1.bf16.msra.mxu0 %v11484_v2  ;;  %7345 = vmatpush1.bf16.msra.mxu1 %v11487_v60  ;;  %v11558_v2 = vld [vmem:[#allocation18 + $0x544] ss:$48 sps:$4 sm:$0xff]   ;;  %v11559_v60 = vld [vmem:[#allocation18 + $0x548] ss:$48 sps:$4 sm:$0xff]  }
0x10c9   :  { %7305 = vmatprep.subr.bf16.mxu0 %v11492_v63  ;;  %7346 = vmatprep.subr.bf16.mxu1 %v11495_v25  ;;  %v11561_v63 = vld [vmem:[#allocation18 + $0x54c] ss:$48 sps:$4 sm:$0xff]   ;;  %v11564_v25 = vld [vmem:[#allocation18 + $0x5a4] ss:$48 sps:$4 sm:$0xff]  }
0x10cc   :  { %7306 = vmatpush1.bf16.msra.mxu0 %v11490_v27  ;;  %7347 = vmatpush1.bf16.msra.mxu1 %v11493_v45  ;;  %v11567_v27 = vld [vmem:[#allocation18 + $0x5ac] ss:$48 sps:$4 sm:$0xff]   ;;  %v11562_v45 = vld [vmem:[#allocation18 + $0x5a0] ss:$48 sps:$4 sm:$0xff]  }
0x10cd   :  { %7307 = vmatprep.subr.bf16.mxu0 %v11498_v37  ;;  %7348 = vmatprep.subr.bf16.mxu1 %v11501_v17  ;;  %v11565_v37 = vld [vmem:[#allocation18 + $0x5a8] ss:$48 sps:$4 sm:$0xff]   ;;  %v11570_v17 = vld [vmem:[#allocation18 + $0x14] ss:$48 sps:$4 sm:$0xff]  }
0x10d0   :  { %7308 = vmatpush1.bf16.msra.mxu0 %v11496_v0  ;;  %7349 = vmatpush1.bf16.msra.mxu1 %v11499_v13 }
0x10d1   :  { %7309 = vmatprep.subr.bf16.mxu0 %v11504_v52  ;;  %7350 = vmatprep.subr.bf16.mxu1 %v11507_v62  ;;  %v11573_v52 = vld [vmem:[#allocation18 + $0x1c] ss:$48 sps:$4 sm:$0xff]  }
0x10d4   :  { %7310 = vmatpush1.bf16.msra.mxu0 %v11502_v44  ;;  %7351 = vmatpush1.bf16.msra.mxu1 %v11505_v7 }
0x10d5   :  { %7311 = vmatprep.subr.bf16.mxu0 %v11510_v5  ;;  %7352 = vmatprep.subr.bf16.mxu1 %v11513_v1 }
0x10d8   :  { %7312 = vmatpush1.bf16.msra.mxu0 %v11508_v55  ;;  %7353 = vmatpush1.bf16.msra.mxu1 %v11511_v11 }
0x10d9   :  { %7313 = vmatprep.subr.bf16.mxu0 %v11516_v19  ;;  %7354 = vmatprep.subr.bf16.mxu1 %v11519_v28 }
0x10dc   :  { %7314 = vmatpush1.bf16.msra.mxu0 %v11514_v6  ;;  %7355 = vmatpush1.bf16.msra.mxu1 %v11517_v54  ;;  %v11568_v54 = vld [vmem:[#allocation18 + $0x10] ss:$48 sps:$4 sm:$0xff]  }
0x10dd   :  { %7315 = vmatprep.subr.bf16.mxu0 %v11522_v33  ;;  %7356 = vmatprep.subr.bf16.mxu1 %v11525_v43  ;;  %v11576_v43 = vld [vmem:[#allocation18 + $0x74] ss:$48 sps:$4 sm:$0xff]  }
0x10e0   :  { %7316 = vmatpush1.bf16.msra.mxu0 %v11520_v16  ;;  %7357 = vmatpush1.bf16.msra.mxu1 %v11523_v23  ;;  %v11571_v16 = vld [vmem:[#allocation18 + $0x18] ss:$48 sps:$4 sm:$0xff]  }
0x10e1   :  { %7317 = vmatprep.subr.bf16.mxu0 %v11528_v3  ;;  %7358 = vmatprep.subr.bf16.mxu1 %v11531_v47  ;;  %v11579_v3 = vld [vmem:[#allocation18 + $0x7c] ss:$48 sps:$4 sm:$0xff]   ;;  %v11574_v47 = vld [vmem:[#allocation18 + $0x70] ss:$48 sps:$4 sm:$0xff]  }
0x10e4   :  { %7318 = vmatpush1.bf16.msra.mxu0 %v11526_v22  ;;  %7359 = vmatpush1.bf16.msra.mxu1 %v11529_v35  ;;  %v11577_v22 = vld [vmem:[#allocation18 + $0x78] ss:$48 sps:$4 sm:$0xff]   ;;  %v11582_v35 = vld [vmem:[#allocation18 + $0xd4] ss:$48 sps:$4 sm:$0xff]  }
0x10e5   :  { %7319 = vmatprep.subr.bf16.mxu0 %v11534_v30  ;;  %7360 = vmatprep.subr.bf16.mxu1 %v11537_v40  ;;  %v11585_v30 = vld [vmem:[#allocation18 + $0xdc] ss:$48 sps:$4 sm:$0xff]   ;;  %v11580_v40 = vld [vmem:[#allocation18 + $0xd0] ss:$48 sps:$4 sm:$0xff]  }
0x10e8   :  { %7320 = vmatpush1.bf16.msra.mxu0 %v11532_v8  ;;  %7361 = vmatpush1.bf16.msra.mxu1 %v11535_v31  ;;  %v11583_v8 = vld [vmem:[#allocation18 + $0xd8] ss:$48 sps:$4 sm:$0xff]   ;;  %v11588_v31 = vld [vmem:[#allocation18 + $0x134] ss:$48 sps:$4 sm:$0xff]  }
0x10e9   :  { %7321 = vmatprep.subr.bf16.mxu0 %v11540_v57  ;;  %7362 = vmatprep.subr.bf16.mxu1 %v11543_v26  ;;  %v11592_v57 = vld [vmem:[#allocation18 + $0x190] ss:$48 sps:$4 sm:$0xff]   ;;  %v11600_v26 = vld [vmem:[#allocation18 + $0x1f4] ss:$48 sps:$4 sm:$0xff]  }
0x10ec   :  { %7322 = vmatpush1.bf16.msra.mxu0 %v11538_v32  ;;  %7363 = vmatpush1.bf16.msra.mxu1 %v11541_v56  ;;  %v11597_v32 = vld [vmem:[#allocation18 + $0x19c] ss:$48 sps:$4 sm:$0xff]   ;;  %v11595_v56 = vld [vmem:[#allocation18 + $0x198] ss:$48 sps:$4 sm:$0xff]  }
0x10ed   :  { %7323 = vmatprep.subr.bf16.mxu0 %v11546_v53  ;;  %7364 = vmatprep.subr.bf16.mxu1 %v11549_v15  ;;  %v11603_v53 = vld [vmem:[#allocation18 + $0x1fc] ss:$48 sps:$4 sm:$0xff]   ;;  %v11598_v15 = vld [vmem:[#allocation18 + $0x1f0] ss:$48 sps:$4 sm:$0xff]  }
0x10f0   :  { %7324 = vmatpush1.bf16.msra.mxu0 %v11544_v34  ;;  %7365 = vmatpush1.bf16.msra.mxu1 %v11547_v20  ;;  %v11601_v34 = vld [vmem:[#allocation18 + $0x1f8] ss:$48 sps:$4 sm:$0xff]   ;;  %v11606_v20 = vld [vmem:[#allocation18 + $0x254] ss:$48 sps:$4 sm:$0xff]  }
0x10f1   :  { %7325 = vmatprep.subr.bf16.mxu0 %v11552_v4  ;;  %7366 = vmatprep.subr.bf16.mxu1 %v11555_v51  ;;  %v11616_v4 = vld [vmem:[#allocation18 + $0x310] ss:$48 sps:$4 sm:$0xff]   ;;  %v11624_v51 = vld [vmem:[#allocation18 + $0x374] ss:$48 sps:$4 sm:$0xff]  }
0x10f4   :  { %7326 = vmatpush1.bf16.msra.mxu0 %v11550_v38  ;;  %7367 = vmatpush1.bf16.msra.mxu1 %v11553_v39  ;;  %v11621_v38 = vld [vmem:[#allocation18 + $0x31c] ss:$48 sps:$4 sm:$0xff]   ;;  %v11619_v39 = vld [vmem:[#allocation18 + $0x318] ss:$48 sps:$4 sm:$0xff]  }
0x10f5   :  { %7327 = vmatprep.subr.bf16.mxu0 %v11558_v2  ;;  %7368 = vmatprep.subr.bf16.mxu1 %v11561_v63  ;;  %v11622_v2 = vld [vmem:[#allocation18 + $0x370] ss:$48 sps:$4 sm:$0xff]   ;;  %v11630_v63 = vld [vmem:[#allocation18 + $0x3d4] ss:$48 sps:$4 sm:$0xff]  }
0x10f8   :  { %7328 = vmatpush1.bf16.msra.mxu0 %v11556_v21  ;;  %7369 = vmatpush1.bf16.msra.mxu1 %v11559_v60  ;;  %v11627_v21 = vld [vmem:[#allocation18 + $0x37c] ss:$48 sps:$4 sm:$0xff]   ;;  %v11625_v60 = vld [vmem:[#allocation18 + $0x378] ss:$48 sps:$4 sm:$0xff]  }
0x10f9   :  { %7329 = vmatprep.subr.bf16.mxu0 %v11564_v25  ;;  %7370 = vmatprep.subr.bf16.mxu1 %v11567_v27  ;;  %v11633_v25 = vld [vmem:[#allocation18 + $0x3dc] ss:$48 sps:$4 sm:$0xff]   ;;  %v11628_v27 = vld [vmem:[#allocation18 + $0x3d0] ss:$48 sps:$4 sm:$0xff]  }
0x10fc   :  { %7330 = vmatpush1.bf16.msra.mxu0 %v11562_v45  ;;  %7371 = vmatpush1.bf16.msra.mxu1 %v11565_v37  ;;  %v11631_v45 = vld [vmem:[#allocation18 + $0x3d8] ss:$48 sps:$4 sm:$0xff]   ;;  %v11636_v37 = vld [vmem:[#allocation18 + $0x434] ss:$48 sps:$4 sm:$0xff]  }
0x10fd   :  { %7381 = vmatprep.subr.bf16.mxu0 %v11570_v17  ;;  %7422 = vmatprep.subr.bf16.mxu1 %v11573_v52  ;;  %v11639_v17 = vld [vmem:[#allocation18 + $0x43c] ss:$48 sps:$4 sm:$0xff]   ;;  %v11642_v52 = vld [vmem:[#allocation18 + $0x494] ss:$48 sps:$4 sm:$0xff]  }
0x1162   :  { %v5515_v46 = vpop.f32.mrb[200].mxu0  ;;  %v5591_v49 = vpop.f32.mrb[200].mxu1 }
0x1163   :  { %5519 = vst.msk [vmem:[#allocation4] sm:$0xff] %vm429_vm0, %v5515_v46  ;;  %v11092_v58 = vpop.f32.mrb[201].mxu0  ;;  %v11111_v10 = vpop.f32.mrb[201].mxu1  ;;  %5596 = vrot.lane.b32.xlu1 %v5591_v49, %s12519_s8  ;;  %v11591_v46 = vld [vmem:[#allocation18 + $0x13c] ss:$48 sps:$4 sm:$0xff]  }
0x1164   :  { %v11586_v49 = vld [vmem:[#allocation18 + $0x130] ss:$48 sps:$4 sm:$0xff]   ;;  %v11589_v58 = vld [vmem:[#allocation18 + $0x138] ss:$48 sps:$4 sm:$0xff]   ;;  %v11594_v10 = vld [vmem:[#allocation18 + $0x194] ss:$48 sps:$4 sm:$0xff]  }
0x1172   :  { %v5672_v41 = vpop.f32.mrb[202].mxu0  ;;  %v5753_v9 = vpop.f32.mrb[202].mxu1 }
0x1173   :  { %v11130_v29 = vpop.f32.mrb[203].mxu0  ;;  %5677 = vrot.lane.b32.xlu1 %v5672_v41, %s12520_s9  ;;  %v11149_v48 = vpop.f32.mrb[203].mxu1  ;;  %v11609_v41 = vld [vmem:[#allocation18 + $0x25c] ss:$48 sps:$4 sm:$0xff]  }
0x1174   :  { %v11607_v29 = vld [vmem:[#allocation18 + $0x258] ss:$48 sps:$4 sm:$0xff]   ;;  %v11612_v48 = vld [vmem:[#allocation18 + $0x2b4] ss:$48 sps:$4 sm:$0xff]  }
0x1182   :  { %v5834_v50 = vpop.f32.mrb[204].mxu0  ;;  %v5910_v24 = vpop.f32.mrb[204].mxu1 }
0x1183   :  { %5838 = vst.msk [vmem:[#allocation4 + $0x8] sm:$0xff] %vm429_vm0, %v5834_v50  ;;  %v11168_v61 = vpop.f32.mrb[205].mxu0  ;;  %5915 = vrot.lane.b32.xlu0 %v5910_v24, %s12519_s8  ;;  %v11187_v18 = vpop.f32.mrb[205].mxu1  ;;  %v11615_v50 = vld [vmem:[#allocation18 + $0x2bc] ss:$48 sps:$4 sm:$0xff]  }
0x1184   :  { %v11610_v24 = vld [vmem:[#allocation18 + $0x2b0] ss:$48 sps:$4 sm:$0xff]   ;;  %v11613_v61 = vld [vmem:[#allocation18 + $0x2b8] ss:$48 sps:$4 sm:$0xff]   ;;  %v11618_v18 = vld [vmem:[#allocation18 + $0x314] ss:$48 sps:$4 sm:$0xff]  }
0x1192   :  { %v5990_v0 = vpop.f32.mrb[206].mxu0  ;;  %v6070_v13 = vpop.f32.mrb[206].mxu1 }
0x1193   :  { %5995 = vrot.lane.b32.xlu1 %v5990_v0, %s12520_s9  ;;  %6075 = vrot.lane.b32.xlu0 %v6070_v13, %s12521_s12  ;;  %v11206_v62 = vpop.f32.mrb[207].mxu0  ;;  %v11225_v44 = vpop.f32.mrb[207].mxu1  ;;  %v11634_v0 = vld [vmem:[#allocation18 + $0x430] ss:$48 sps:$4 sm:$0xff]   ;;  %v11637_v13 = vld [vmem:[#allocation18 + $0x438] ss:$48 sps:$4 sm:$0xff]  }
0x1194   :  { %v11645_v62 = vld [vmem:[#allocation18 + $0x49c] ss:$48 sps:$4 sm:$0xff]   ;;  %v11640_v44 = vld [vmem:[#allocation18 + $0x490] ss:$48 sps:$4 sm:$0xff]  }
0x1197   :  { %5758 = vrot.lane.b32.xlu1 %v5753_v9, %s12521_s12  ;;  %v11604_v9 = vld [vmem:[#allocation18 + $0x250] ss:$48 sps:$4 sm:$0xff]  }
0x11d5   :  { %v5597_v7 = vpop.permute.xlu1 %5596 }
0x11d6   :  { %5600 = vst.msk [vmem:[#allocation4] sm:$0xff] %vm5599_vm5, %v5597_v7  ;;  %v11643_v7 = vld [vmem:[#allocation18 + $0x498] ss:$48 sps:$4 sm:$0xff]  }
0x11e5   :  { %v5678_v5 = vpop.permute.xlu1 %5677 }
0x11e6   :  { %5681 = vst.msk [vmem:[#allocation4] sm:$0xff] %vm5680_vm6, %v5678_v5  ;;  %v11648_v5 = vld [vmem:[#allocation18 + $0x4f4] ss:$48 sps:$4 sm:$0xff]  }
0x11f5   :  { %v5916_v1 = vpop.permute.xlu0 %5915 }
0x11f6   :  { %5918 = vst.msk [vmem:[#allocation4 + $0x8] sm:$0xff] %vm5599_vm5, %v5916_v1  ;;  %v11651_v1 = vld [vmem:[#allocation18 + $0x4fc] ss:$48 sps:$4 sm:$0xff]  }
0x1205   :  { %v5996_v55 = vpop.permute.xlu1 %5995  ;;  %v6076_v11 = vpop.permute.xlu0 %6075 }
0x1206   :  { %5998 = vst.msk [vmem:[#allocation4 + $0x8] sm:$0xff] %vm5680_vm6, %v5996_v55  ;;  %v11646_v55 = vld [vmem:[#allocation18 + $0x4f0] ss:$48 sps:$4 sm:$0xff]  }
0x1207   :  { %6078 = vst.msk [vmem:[#allocation4 + $0x8] sm:$0xff] %vm5761_vm7, %v6076_v11  ;;  %v11649_v11 = vld [vmem:[#allocation18 + $0x4f8] ss:$48 sps:$4 sm:$0xff]  }
0x1209   :  { %v5759_v19 = vpop.permute.xlu1 %5758 }
0x120a   :  { %5762 = vst.msk [vmem:[#allocation4] sm:$0xff] %vm5761_vm7, %v5759_v19  ;;  %v11654_v19 = vld [vmem:[#allocation18 + $0x554] ss:$48 sps:$4 sm:$0xff]  }
0x120e   :  { %v6080_v28 = vld [vmem:[#allocation4 + $0x8] sm:$0xff] }
0x120f   :  { %v14332_v6 = vpack.c.bf16 %v6080_v28, %v6080_v28  ;;  %v11657_v28 = vld [vmem:[#allocation18 + $0x55c] ss:$48 sps:$4 sm:$0xff]  }
0x1211   :  { %7331 = vmatprep.mubr.bf16.mxu0 %v14332_v6  ;;  %7372 = vmatprep.mubr.bf16.mxu1 %v14332_v6  ;;  %v6079_v33 = vld [vmem:[#allocation4] sm:$0xff] }
0x1212   :  { %v14336_v23 = vpack.c.bf16 %v6079_v33, %v6079_v33  ;;  %v11660_v33 = vld [vmem:[#allocation18 + $0x5b4] ss:$48 sps:$4 sm:$0xff]  }
0x1214   :  { %7332 = vmatmul.mubr.bf16.vlgmr.msra.gmra.mrb[208].mxu0 %v14336_v23  ;;  %7373 = vmatmul.mubr.bf16.vlgmr.msra.gmra.mrb[208].mxu1 %v14336_v23 }
0x1215   :  { %7382 = vmatpush1.bf16.msra.mxu0 %v11568_v54  ;;  %7423 = vmatpush1.bf16.msra.mxu1 %v11571_v16  ;;  %v11652_v54 = vld [vmem:[#allocation18 + $0x550] ss:$48 sps:$4 sm:$0xff]   ;;  %v11655_v16 = vld [vmem:[#allocation18 + $0x558] ss:$48 sps:$4 sm:$0xff]  }
0x1216   :  { %7383 = vmatprep.subr.bf16.mxu0 %v11576_v43  ;;  %7424 = vmatprep.subr.bf16.mxu1 %v11579_v3  ;;  %v11663_v43 = vld [vmem:[#allocation18 + $0x5bc] ss:$48 sps:$4 sm:$0xff]   ;;  %v11658_v3 = vld [vmem:[#allocation18 + $0x5b0] ss:$48 sps:$4 sm:$0xff]  }
0x1217   :  { %7413 = vmatprep.mubr.bf16.mxu0 %v14332_v6  ;;  %7454 = vmatprep.mubr.bf16.mxu1 %v14332_v6 }
0x1219   :  { %7384 = vmatpush1.bf16.msra.mxu0 %v11574_v47  ;;  %7425 = vmatpush1.bf16.msra.mxu1 %v11577_v22  ;;  %v11661_v47 = vld [vmem:[#allocation18 + $0x5b8] ss:$48 sps:$4 sm:$0xff]   ;;  %v11666_v22 = vld [vmem:[#allocation18 + $0x24] ss:$48 sps:$4 sm:$0xff]  }
0x121a   :  { %7385 = vmatprep.subr.bf16.mxu0 %v11582_v35  ;;  %7426 = vmatprep.subr.bf16.mxu1 %v11585_v30  ;;  %v11669_v35 = vld [vmem:[#allocation18 + $0x2c] ss:$48 sps:$4 sm:$0xff]   ;;  %v11664_v30 = vld [vmem:[#allocation18 + $0x20] ss:$48 sps:$4 sm:$0xff]  }
0x121d   :  { %7386 = vmatpush1.bf16.msra.mxu0 %v11580_v40  ;;  %7427 = vmatpush1.bf16.msra.mxu1 %v11583_v8  ;;  %v11667_v40 = vld [vmem:[#allocation18 + $0x28] ss:$48 sps:$4 sm:$0xff]   ;;  %v11672_v8 = vld [vmem:[#allocation18 + $0x84] ss:$48 sps:$4 sm:$0xff]  }
0x121e   :  { %7387 = vmatprep.subr.bf16.mxu0 %v11588_v31  ;;  %7428 = vmatprep.subr.bf16.mxu1 %v11591_v46  ;;  %v11675_v31 = vld [vmem:[#allocation18 + $0x8c] ss:$48 sps:$4 sm:$0xff]   ;;  %v11670_v46 = vld [vmem:[#allocation18 + $0x80] ss:$48 sps:$4 sm:$0xff]  }
0x1221   :  { %7388 = vmatpush1.bf16.msra.mxu0 %v11586_v49  ;;  %7429 = vmatpush1.bf16.msra.mxu1 %v11589_v58  ;;  %v11673_v49 = vld [vmem:[#allocation18 + $0x88] ss:$48 sps:$4 sm:$0xff]   ;;  %v11678_v58 = vld [vmem:[#allocation18 + $0xe4] ss:$48 sps:$4 sm:$0xff]  }
0x1222   :  { %7389 = vmatprep.subr.bf16.mxu0 %v11594_v10  ;;  %7430 = vmatprep.subr.bf16.mxu1 %v11597_v32  ;;  %v11681_v10 = vld [vmem:[#allocation18 + $0xec] ss:$48 sps:$4 sm:$0xff]   ;;  %v11676_v32 = vld [vmem:[#allocation18 + $0xe0] ss:$48 sps:$4 sm:$0xff]  }
0x1225   :  { %7390 = vmatpush1.bf16.msra.mxu0 %v11592_v57  ;;  %7431 = vmatpush1.bf16.msra.mxu1 %v11595_v56  ;;  %v11679_v57 = vld [vmem:[#allocation18 + $0xe8] ss:$48 sps:$4 sm:$0xff]   ;;  %v11684_v56 = vld [vmem:[#allocation18 + $0x144] ss:$48 sps:$4 sm:$0xff]  }
0x1226   :  { %7391 = vmatprep.subr.bf16.mxu0 %v11600_v26  ;;  %7432 = vmatprep.subr.bf16.mxu1 %v11603_v53  ;;  %v11687_v26 = vld [vmem:[#allocation18 + $0x14c] ss:$48 sps:$4 sm:$0xff]   ;;  %v11682_v53 = vld [vmem:[#allocation18 + $0x140] ss:$48 sps:$4 sm:$0xff]  }
0x1229   :  { %7392 = vmatpush1.bf16.msra.mxu0 %v11598_v15  ;;  %7433 = vmatpush1.bf16.msra.mxu1 %v11601_v34  ;;  %v11685_v15 = vld [vmem:[#allocation18 + $0x148] ss:$48 sps:$4 sm:$0xff]   ;;  %v11690_v34 = vld [vmem:[#allocation18 + $0x1a4] ss:$48 sps:$4 sm:$0xff]  }
0x122a   :  { %7393 = vmatprep.subr.bf16.mxu0 %v11606_v20  ;;  %7434 = vmatprep.subr.bf16.mxu1 %v11609_v41  ;;  %v11688_v20 = vld [vmem:[#allocation18 + $0x1a0] ss:$48 sps:$4 sm:$0xff]   ;;  %v11691_v41 = vld [vmem:[#allocation18 + $0x1a8] ss:$48 sps:$4 sm:$0xff]  }
0x122d   :  { %7394 = vmatpush1.bf16.msra.mxu0 %v11604_v9  ;;  %7435 = vmatpush1.bf16.msra.mxu1 %v11607_v29  ;;  %v11696_v9 = vld [vmem:[#allocation18 + $0x204] ss:$48 sps:$4 sm:$0xff]   ;;  %v11699_v29 = vld [vmem:[#allocation18 + $0x20c] ss:$48 sps:$4 sm:$0xff]  }
0x122e   :  { %7395 = vmatprep.subr.bf16.mxu0 %v11612_v48  ;;  %7436 = vmatprep.subr.bf16.mxu1 %v11615_v50  ;;  %v11694_v48 = vld [vmem:[#allocation18 + $0x200] ss:$48 sps:$4 sm:$0xff]   ;;  %v11697_v50 = vld [vmem:[#allocation18 + $0x208] ss:$48 sps:$4 sm:$0xff]  }
0x1231   :  { %7396 = vmatpush1.bf16.msra.mxu0 %v11610_v24  ;;  %7437 = vmatpush1.bf16.msra.mxu1 %v11613_v61  ;;  %v11702_v24 = vld [vmem:[#allocation18 + $0x264] ss:$48 sps:$4 sm:$0xff]   ;;  %v11705_v61 = vld [vmem:[#allocation18 + $0x26c] ss:$48 sps:$4 sm:$0xff]  }
0x1232   :  { %7397 = vmatprep.subr.bf16.mxu0 %v11618_v18  ;;  %7438 = vmatprep.subr.bf16.mxu1 %v11621_v38  ;;  %v11700_v18 = vld [vmem:[#allocation18 + $0x260] ss:$48 sps:$4 sm:$0xff]   ;;  %v11703_v38 = vld [vmem:[#allocation18 + $0x268] ss:$48 sps:$4 sm:$0xff]  }
0x1235   :  { %7398 = vmatpush1.bf16.msra.mxu0 %v11616_v4  ;;  %7439 = vmatpush1.bf16.msra.mxu1 %v11619_v39  ;;  %v11708_v4 = vld [vmem:[#allocation18 + $0x2c4] ss:$48 sps:$4 sm:$0xff]   ;;  %v11711_v39 = vld [vmem:[#allocation18 + $0x2cc] ss:$48 sps:$4 sm:$0xff]  }
0x1236   :  { %7399 = vmatprep.subr.bf16.mxu0 %v11624_v51  ;;  %7440 = vmatprep.subr.bf16.mxu1 %v11627_v21  ;;  %v11706_v51 = vld [vmem:[#allocation18 + $0x2c0] ss:$48 sps:$4 sm:$0xff]   ;;  %v11709_v21 = vld [vmem:[#allocation18 + $0x2c8] ss:$48 sps:$4 sm:$0xff]  }
0x1239   :  { %7400 = vmatpush1.bf16.msra.mxu0 %v11622_v2  ;;  %7441 = vmatpush1.bf16.msra.mxu1 %v11625_v60  ;;  %v11714_v2 = vld [vmem:[#allocation18 + $0x324] ss:$48 sps:$4 sm:$0xff]   ;;  %v11717_v60 = vld [vmem:[#allocation18 + $0x32c] ss:$48 sps:$4 sm:$0xff]  }
0x123a   :  { %7401 = vmatprep.subr.bf16.mxu0 %v11630_v63  ;;  %7442 = vmatprep.subr.bf16.mxu1 %v11633_v25  ;;  %v11712_v63 = vld [vmem:[#allocation18 + $0x320] ss:$48 sps:$4 sm:$0xff]   ;;  %v11715_v25 = vld [vmem:[#allocation18 + $0x328] ss:$48 sps:$4 sm:$0xff]  }
0x123d   :  { %7402 = vmatpush1.bf16.msra.mxu0 %v11628_v27  ;;  %7443 = vmatpush1.bf16.msra.mxu1 %v11631_v45  ;;  %v11720_v27 = vld [vmem:[#allocation18 + $0x384] ss:$48 sps:$4 sm:$0xff]   ;;  %v11723_v45 = vld [vmem:[#allocation18 + $0x38c] ss:$48 sps:$4 sm:$0xff]  }
0x123e   :  { %7403 = vmatprep.subr.bf16.mxu0 %v11636_v37  ;;  %7444 = vmatprep.subr.bf16.mxu1 %v11639_v17  ;;  %v11718_v37 = vld [vmem:[#allocation18 + $0x380] ss:$48 sps:$4 sm:$0xff]   ;;  %v11721_v17 = vld [vmem:[#allocation18 + $0x388] ss:$48 sps:$4 sm:$0xff]  }
0x1241   :  { %7404 = vmatpush1.bf16.msra.mxu0 %v11634_v0  ;;  %7445 = vmatpush1.bf16.msra.mxu1 %v11637_v13  ;;  %v11726_v0 = vld [vmem:[#allocation18 + $0x3e4] ss:$48 sps:$4 sm:$0xff]   ;;  %v11729_v13 = vld [vmem:[#allocation18 + $0x3ec] ss:$48 sps:$4 sm:$0xff]  }
0x1242   :  { %7405 = vmatprep.subr.bf16.mxu0 %v11642_v52  ;;  %7446 = vmatprep.subr.bf16.mxu1 %v11645_v62  ;;  %v11724_v52 = vld [vmem:[#allocation18 + $0x3e0] ss:$48 sps:$4 sm:$0xff]   ;;  %v11727_v62 = vld [vmem:[#allocation18 + $0x3e8] ss:$48 sps:$4 sm:$0xff]  }
0x1245   :  { %7406 = vmatpush1.bf16.msra.mxu0 %v11640_v44  ;;  %7447 = vmatpush1.bf16.msra.mxu1 %v11643_v7  ;;  %v11732_v44 = vld [vmem:[#allocation18 + $0x444] ss:$48 sps:$4 sm:$0xff]   ;;  %v11735_v7 = vld [vmem:[#allocation18 + $0x44c] ss:$48 sps:$4 sm:$0xff]  }
0x1246   :  { %7407 = vmatprep.subr.bf16.mxu0 %v11648_v5  ;;  %7448 = vmatprep.subr.bf16.mxu1 %v11651_v1  ;;  %v11730_v5 = vld [vmem:[#allocation18 + $0x440] ss:$48 sps:$4 sm:$0xff]   ;;  %v11733_v1 = vld [vmem:[#allocation18 + $0x448] ss:$48 sps:$4 sm:$0xff]  }
0x1249   :  { %7408 = vmatpush1.bf16.msra.mxu0 %v11646_v55  ;;  %7449 = vmatpush1.bf16.msra.mxu1 %v11649_v11  ;;  %v11738_v55 = vld [vmem:[#allocation18 + $0x4a4] ss:$48 sps:$4 sm:$0xff]   ;;  %v11741_v11 = vld [vmem:[#allocation18 + $0x4ac] ss:$48 sps:$4 sm:$0xff]  }
0x124a   :  { %7409 = vmatprep.subr.bf16.mxu0 %v11654_v19  ;;  %7450 = vmatprep.subr.bf16.mxu1 %v11657_v28  ;;  %v11736_v19 = vld [vmem:[#allocation18 + $0x4a0] ss:$48 sps:$4 sm:$0xff]   ;;  %v11739_v28 = vld [vmem:[#allocation18 + $0x4a8] ss:$48 sps:$4 sm:$0xff]  }
0x124d   :  { %7410 = vmatpush1.bf16.msra.mxu0 %v11652_v54  ;;  %7451 = vmatpush1.bf16.msra.mxu1 %v11655_v16  ;;  %v11744_v54 = vld [vmem:[#allocation18 + $0x504] ss:$48 sps:$4 sm:$0xff]   ;;  %v11747_v16 = vld [vmem:[#allocation18 + $0x50c] ss:$48 sps:$4 sm:$0xff]  }
0x124e   :  { %7411 = vmatprep.subr.bf16.mxu0 %v11660_v33  ;;  %7452 = vmatprep.subr.bf16.mxu1 %v11663_v43  ;;  %v11742_v33 = vld [vmem:[#allocation18 + $0x500] ss:$48 sps:$4 sm:$0xff]   ;;  %v11745_v43 = vld [vmem:[#allocation18 + $0x508] ss:$48 sps:$4 sm:$0xff]  }
0x1251   :  { %7412 = vmatpush1.bf16.msra.mxu0 %v11658_v3  ;;  %7453 = vmatpush1.bf16.msra.mxu1 %v11661_v47  ;;  %v11750_v3 = vld [vmem:[#allocation18 + $0x564] ss:$48 sps:$4 sm:$0xff]   ;;  %v11753_v47 = vld [vmem:[#allocation18 + $0x56c] ss:$48 sps:$4 sm:$0xff]  }
0x1252   :  { %7463 = vmatprep.subr.bf16.mxu0 %v11666_v22  ;;  %7504 = vmatprep.subr.bf16.mxu1 %v11669_v35  ;;  %v11748_v22 = vld [vmem:[#allocation18 + $0x560] ss:$48 sps:$4 sm:$0xff]   ;;  %v11751_v35 = vld [vmem:[#allocation18 + $0x568] ss:$48 sps:$4 sm:$0xff]  }
0x1254   :  { %7414 = vmatmul.mubr.bf16.vlgmr.msra.gmra.mrb[212].mxu0 %v14336_v23  ;;  %7455 = vmatmul.mubr.bf16.vlgmr.msra.gmra.mrb[212].mxu1 %v14336_v23 }
0x1255   :  { %7464 = vmatpush1.bf16.msra.mxu0 %v11664_v30  ;;  %7495 = vmatprep.mubr.bf16.mxu0 %v14332_v6  ;;  %v11756_v30 = vld [vmem:[#allocation18 + $0x5c4] ss:$48 sps:$4 sm:$0xff]  }
0x1256   :  { %7505 = vmatpush1.bf16.msra.mxu1 %v11667_v40  ;;  %7536 = vmatprep.mubr.bf16.mxu1 %v14332_v6  ;;  %v11693_v6 = vld [vmem:[#allocation18 + $0x1ac] ss:$48 sps:$4 sm:$0xff]  }
0x1257   :  { %7465 = vmatprep.subr.bf16.mxu0 %v11672_v8  ;;  %7506 = vmatprep.subr.bf16.mxu1 %v11675_v31  ;;  %v11759_v40 = vld [vmem:[#allocation18 + $0x5cc] ss:$48 sps:$4 sm:$0xff]   ;;  %v11754_v8 = vld [vmem:[#allocation18 + $0x5c0] ss:$48 sps:$4 sm:$0xff]   ;;  %v11757_v31 = vld [vmem:[#allocation18 + $0x5c8] ss:$48 sps:$4 sm:$0xff]  }
0x1259   :  { %7466 = vmatpush1.bf16.msra.mxu0 %v11670_v46  ;;  %v6275_v46 = vld [vmem:[%s14518_s15] sm:$0xff] }
0x125a   :  { %7507 = vmatpush1.bf16.msra.mxu1 %v11673_v49  ;;  %7467 = vmatprep.subr.bf16.mxu0 %v11678_v58  ;;  %v14666_v49 = vld [vmem:[#allocation43_spill] sm:$0xff] }
0x125b   :  { %7508 = vmatprep.subr.bf16.mxu1 %v11681_v10  ;;  %v6282_v58 = vrot.slane %v6275_v46, %v14666_v49  ;;  %v6290_v10 = vrot.slane %v6275_v46, %v13151_v42 }
0x125d   :  { %7468 = vmatpush1.bf16.msra.mxu0 %v11676_v32  ;;  %v6286_v32 = vrot.slane %v6275_v46, %v13142_v12 }
0x125e   :  { %7509 = vmatpush1.bf16.msra.mxu1 %v11679_v57  ;;  %7469 = vmatprep.subr.bf16.mxu0 %v11684_v56  ;;  %v6294_v57 = vrot.slane %v6275_v46, %v14635_v36 }
0x125f   :  { %7510 = vmatprep.subr.bf16.mxu1 %v11687_v26 }
0x1261   :  { %7470 = vmatpush1.bf16.msra.mxu0 %v11682_v53 }
0x1262   :  { %7511 = vmatpush1.bf16.msra.mxu1 %v11685_v15  ;;  %7471 = vmatprep.subr.bf16.mxu0 %v11690_v34 }
0x1263   :  { %7512 = vmatprep.subr.bf16.mxu1 %v11693_v6 }
0x1265   :  { %7472 = vmatpush1.bf16.msra.mxu0 %v11688_v20 }
0x1266   :  { %7513 = vmatpush1.bf16.msra.mxu1 %v11691_v41  ;;  %7473 = vmatprep.subr.bf16.mxu0 %v11696_v9 }
0x1267   :  { %7514 = vmatprep.subr.bf16.mxu1 %v11699_v29 }
0x1269   :  { %7474 = vmatpush1.bf16.msra.mxu0 %v11694_v48 }
0x126a   :  { %7515 = vmatpush1.bf16.msra.mxu1 %v11697_v50  ;;  %7475 = vmatprep.subr.bf16.mxu0 %v11702_v24 }
0x126b   :  { %7516 = vmatprep.subr.bf16.mxu1 %v11705_v61  ;;  %v14667_v61 = vsub.s32 4, %v13000_v59 }
0x126d   :  { %7476 = vmatpush1.bf16.msra.mxu0 %v11700_v18  ;;  %v6298_v18 = vrot.slane %v6275_v46, %v14667_v61 }
0x126e   :  { %7517 = vmatpush1.bf16.msra.mxu1 %v11703_v38  ;;  %7477 = vmatprep.subr.bf16.mxu0 %v11708_v4  ;;  %v14668_v38 = vsub.s32 6, %v13000_v59 }
0x126f   :  { %7518 = vmatprep.subr.bf16.mxu1 %v11711_v39  ;;  %v14669_v39 = vsub.s32 5, %v13000_v59 }
0x1270   :  { %v6306_v4 = vrot.slane %v6275_v46, %v14668_v38 }
0x1271   :  { %7478 = vmatpush1.bf16.msra.mxu0 %v11706_v51  ;;  %v6302_v51 = vrot.slane %v6275_v46, %v14669_v39 }
0x1272   :  { %7519 = vmatpush1.bf16.msra.mxu1 %v11709_v21  ;;  %7479 = vmatprep.subr.bf16.mxu0 %v11714_v2  ;;  %v14670_v21 = vsub.s32 7, %v13000_v59 }
0x1273   :  { %7520 = vmatprep.subr.bf16.mxu1 %v11717_v60 }
0x1274   :  { %v6310_v2 = vrot.slane %v6275_v46, %v14670_v21 }
0x1275   :  { %7480 = vmatpush1.bf16.msra.mxu0 %v11712_v63 }
0x1276   :  { %7521 = vmatpush1.bf16.msra.mxu1 %v11715_v25  ;;  %7481 = vmatprep.subr.bf16.mxu0 %v11720_v27 }
0x1277   :  { %7522 = vmatprep.subr.bf16.mxu1 %v11723_v45 }
0x1279   :  { %7482 = vmatpush1.bf16.msra.mxu0 %v11718_v37 }
0x127a   :  { %7523 = vmatpush1.bf16.msra.mxu1 %v11721_v17  ;;  %7483 = vmatprep.subr.bf16.mxu0 %v11726_v0 }
0x127b   :  { %7524 = vmatprep.subr.bf16.mxu1 %v11729_v13 }
0x127d   :  { %7484 = vmatpush1.bf16.msra.mxu0 %v11724_v52 }
0x127e   :  { %7525 = vmatpush1.bf16.msra.mxu1 %v11727_v62  ;;  %7485 = vmatprep.subr.bf16.mxu0 %v11732_v44 }
0x127f   :  { %7526 = vmatprep.subr.bf16.mxu1 %v11735_v7 }
0x1281   :  { %7486 = vmatpush1.bf16.msra.mxu0 %v11730_v5 }
0x1282   :  { %7527 = vmatpush1.bf16.msra.mxu1 %v11733_v1  ;;  %7487 = vmatprep.subr.bf16.mxu0 %v11738_v55 }
0x1283   :  { %7528 = vmatprep.subr.bf16.mxu1 %v11741_v11 }
0x1285   :  { %7488 = vmatpush1.bf16.msra.mxu0 %v11736_v19 }
0x1286   :  { %7529 = vmatpush1.bf16.msra.mxu1 %v11739_v28  ;;  %7489 = vmatprep.subr.bf16.mxu0 %v11744_v54 }
0x1287   :  { %7530 = vmatprep.subr.bf16.mxu1 %v11747_v16 }
0x1289   :  { %7490 = vmatpush1.bf16.msra.mxu0 %v11742_v33  ;;  %v6276_v33 = vld [vmem:[%s14518_s15 + $0x8] sm:$0xf] }
0x128a   :  { %7531 = vmatpush1.bf16.msra.mxu1 %v11745_v43  ;;  %7491 = vmatprep.subr.bf16.mxu0 %v11750_v3  ;;  %v6314_v43 = vrot.slane %v6276_v33, %v14666_v49  ;;  %v6322_v3 = vrot.slane %v6276_v33, %v13151_v42 }
0x128b   :  { %7532 = vmatprep.subr.bf16.mxu1 %v11753_v47  ;;  %v6318_v47 = vrot.slane %v6276_v33, %v13142_v12 }
0x128d   :  { %7492 = vmatpush1.bf16.msra.mxu0 %v11748_v22  ;;  %v6326_v22 = vrot.slane %v6276_v33, %v14635_v36 }
0x128e   :  { %7533 = vmatpush1.bf16.msra.mxu1 %v11751_v35  ;;  %7493 = vmatprep.subr.bf16.mxu0 %v11756_v30 }
0x128f   :  { %7534 = vmatprep.subr.bf16.mxu1 %v11759_v40 }
0x1291   :  { %7494 = vmatpush1.bf16.msra.mxu0 %v11754_v8 }
0x1292   :  { %7535 = vmatpush1.bf16.msra.mxu1 %v11757_v31  ;;  %11226 = vmatprep.subr.bf16.mxu0 %v14600_v14 }
0x1293   :  { %11232 = vmatprep.subr.bf16.mxu1 %v14600_v14 }
0x1294   :  { %7496 = vmatmul.mubr.bf16.vlgmr.msra.gmra.mrb[216].mxu0 %v14336_v23 }
0x1295   :  { %7537 = vmatmul.mubr.bf16.vlgmr.msra.gmra.mrb[216].mxu1 %v14336_v23  ;;  %11228 = vmatprep.mubr.msk.bf16.mxu0 %vm12517_vm1, %v14600_v14 }
0x1296   :  { %11234 = vmatprep.mubr.msk.bf16.mxu1 %vm12517_vm1, %v14600_v14 }
0x12e7   :  { %v7333_v56 = vpop.f32.mrb[208].mxu0  ;;  %v7374_v23 = vpop.f32.mrb[208].mxu1 }
0x12e8   :  { %v7334_v26 = vadd.f32 %v7333_v56, %v6282_v58  ;;  %v7375_v53 = vadd.f32 %v7374_v23, %v6290_v10  ;;  %v7335_v15 = vpop.f32.mrb[209].mxu0  ;;  %v7376_v34 = vpop.f32.mrb[209].mxu1 }
0x12e9   :  { %v7336_v6 = vadd.f32 %v7335_v15, %v6286_v32  ;;  %v7377_v20 = vadd.f32 %v7376_v34, %v6294_v57  ;;  %v7337_v41 = vpop.f32.mrb[210].mxu0  ;;  %v7378_v9 = vpop.f32.mrb[210].mxu1 }
0x12ea   :  { %v7338_v29 = vpop.f32.mrb[211].mxu0  ;;  %v7379_v48 = vpop.f32.mrb[211].mxu1 }
0x12eb   :  { %v10238_v50 = vpack.c.bf16 %v7336_v6, %v7334_v26  ;;  %v10239_v24 = vpack.c.bf16 %v7377_v20, %v7375_v53 }
0x12ed   :  { %7593 = vst [vmem:[#allocation5] sm:$0xff] %v10238_v50  ;;  %7594 = vst [vmem:[#allocation5 + $0x8] sm:$0xff] %v10239_v24 }
0x12f4   :  { %v7599_v59 = vld [vmem:[#allocation5] sm:$0xf]  ;;  %v7702_v11 = vld [vmem:[#allocation5 + $0x4] sm:$0xf]  ;;  %v7805_v28 = vld [vmem:[#allocation5 + $0x8] sm:$0xf] }
0x12f5   :  { %v7908_v16 = vld [vmem:[#allocation5 + $0xc] sm:$0xf] }
0x1327   :  { %v7415_v60 = vpop.f32.mrb[212].mxu0  ;;  %v7456_v63 = vpop.f32.mrb[212].mxu1 }
0x1328   :  { %v7416_v25 = vadd.f32 %v7415_v60, %v6298_v18  ;;  %v7457_v27 = vadd.f32 %v7456_v63, %v6306_v4  ;;  %v7417_v45 = vpop.f32.mrb[213].mxu0  ;;  %v7458_v37 = vpop.f32.mrb[213].mxu1 }
0x1329   :  { %v7418_v17 = vadd.f32 %v7417_v45, %v6302_v51  ;;  %v7459_v0 = vadd.f32 %v7458_v37, %v6310_v2  ;;  %v7419_v13 = vpop.f32.mrb[214].mxu0  ;;  %v7460_v52 = vpop.f32.mrb[214].mxu1 }
0x132a   :  { %v7420_v62 = vpop.f32.mrb[215].mxu0  ;;  %v7461_v44 = vpop.f32.mrb[215].mxu1 }
0x132b   :  { %v10240_v7 = vpack.c.bf16 %v7418_v17, %v7416_v25  ;;  %v10241_v5 = vpack.c.bf16 %v7459_v0, %v7457_v27 }
0x132d   :  { %7595 = vst [vmem:[#allocation5 + $0x10] sm:$0xff] %v10240_v7  ;;  %7596 = vst [vmem:[#allocation5 + $0x18] sm:$0xff] %v10241_v5 }
0x1334   :  { %v7600_v1 = vld [vmem:[#allocation5 + $0x10] sm:$0xf]  ;;  %v7703_v55 = vld [vmem:[#allocation5 + $0x14] sm:$0xf]  ;;  %v7806_v19 = vld [vmem:[#allocation5 + $0x18] sm:$0xf] }
0x1335   :  { %11227 = vmatpush3.bf16.xpose.msra.mxu0 %v7600_v1  ;;  %v7909_v54 = vld [vmem:[#allocation5 + $0x1c] sm:$0xf] }
0x1336   :  { %11238 = vmatprep.subr.bf16.mxu0 %v14600_v14 }
0x133c   :  { %11229 = vmatmul.mubr.bf16.vlgmr.msra.gmra.mrb[220].mxu0 %v7599_v59 }
0x133d   :  { %11239 = vmatpush3.bf16.xpose.msra.mxu0 %v7703_v55  ;;  %11240 = vmatprep.mubr.msk.bf16.mxu0 %vm12517_vm1, %v14600_v14 }
0x133e   :  { %11250 = vmatprep.subr.bf16.mxu0 %v14600_v14 }
0x1344   :  { %11241 = vmatmul.mubr.bf16.vlgmr.msra.gmra.mrb[224].mxu0 %v7702_v11 }
0x1345   :  { %11251 = vmatpush3.bf16.xpose.msra.mxu0 %v7806_v19  ;;  %11252 = vmatprep.mubr.msk.bf16.mxu0 %vm12517_vm1, %v14600_v14 }
0x1346   :  { %11262 = vmatprep.subr.bf16.mxu0 %v14600_v14 }
0x134c   :  { %11253 = vmatmul.mubr.bf16.vlgmr.msra.gmra.mrb[228].mxu0 %v7805_v28 }
0x134d   :  { %11263 = vmatpush3.bf16.xpose.msra.mxu0 %v7909_v54  ;;  %11264 = vmatprep.mubr.msk.bf16.mxu0 %vm12517_vm1, %v14600_v14 }
0x1354   :  { %11265 = vmatmul.mubr.bf16.vlgmr.msra.gmra.mrb[232].mxu0 %v7908_v16 }
0x1367   :  { %v7497_v35 = vpop.f32.mrb[216].mxu0 }
0x1368   :  { %v7498_v30 = vadd.f32 %v7497_v35, %v6314_v43  ;;  %v7538_v40 = vpop.f32.mrb[216].mxu1  ;;  %v7499_v8 = vpop.f32.mrb[217].mxu0  ;;  %v11763_v35 = vld [vmem:[#allocation19 + $0x10] ss:$8 sps:$4 sm:$0xff]  }
0x1369   :  { %v7539_v31 = vadd.f32 %v7538_v40, %v6322_v3  ;;  %v7500_v46 = vadd.f32 %v7499_v8, %v6318_v47  ;;  %v7540_v58 = vpop.f32.mrb[217].mxu1  ;;  %v7501_v10 = vpop.f32.mrb[218].mxu0  ;;  %v11760_v3 = vld [vmem:[#allocation19] ss:$8 sps:$4 sm:$0xff]   ;;  %v11762_v47 = vld [vmem:[#allocation19 + $0x4] ss:$8 sps:$4 sm:$0xff]  }
0x136a   :  { %v7541_v32 = vadd.f32 %v7540_v58, %v6326_v22  ;;  %v7542_v57 = vpop.f32.mrb[218].mxu1  ;;  %v7502_v56 = vpop.f32.mrb[219].mxu0  ;;  %v11765_v22 = vld [vmem:[#allocation19 + $0x14] ss:$8 sps:$4 sm:$0xff]   ;;  %8423 = vmatprep.subr.bf16.mxu0 %v11762_v47  ;;  %v11766_v40 = vld [vmem:[#allocation19 + $0x20] ss:$8 sps:$4 sm:$0xff]  }
0x136b   :  { %v10242_v23 = vpack.c.bf16 %v7500_v46, %v7498_v30  ;;  %v7543_v26 = vpop.f32.mrb[219].mxu1  ;;  %8424 = vmatpush1.bf16.msra.mxu0 %v11760_v3  ;;  %v11768_v30 = vld [vmem:[#allocation19 + $0x24] ss:$8 sps:$4 sm:$0xff]   ;;  %v11771_v8 = vld [vmem:[#allocation19 + $0x34] ss:$8 sps:$4 sm:$0xff]  }
0x136c   :  { %v10243_v53 = vpack.c.bf16 %v7541_v32, %v7539_v31  ;;  %8425 = vmatprep.subr.bf16.mxu0 %v11765_v22  ;;  %v11769_v31 = vld [vmem:[#allocation19 + $0x30] ss:$8 sps:$4 sm:$0xff]   ;;  %v11774_v46 = vld [vmem:[#allocation19 + $0x44] ss:$8 sps:$4 sm:$0xff]   ;;  %v11772_v58 = vld [vmem:[#allocation19 + $0x40] ss:$8 sps:$4 sm:$0xff]  }
0x136d   :  { %7597 = vst [vmem:[#allocation5 + $0x20] sm:$0xff] %v10242_v23  ;;  %v11780_v10 = vld [vmem:[#allocation19 + $0x54] ss:$8 sps:$4 sm:$0xff]   ;;  %v11778_v32 = vld [vmem:[#allocation19 + $0x50] ss:$8 sps:$4 sm:$0xff]  }
0x136e   :  { %7598 = vst [vmem:[#allocation5 + $0x28] sm:$0xff] %v10243_v53  ;;  %v11786_v57 = vld [vmem:[#allocation19 + $0x64] ss:$8 sps:$4 sm:$0xff]   ;;  %v11784_v56 = vld [vmem:[#allocation19 + $0x60] ss:$8 sps:$4 sm:$0xff]  }
0x136f   :  { %8426 = vmatpush1.bf16.msra.mxu0 %v11763_v35  ;;  %v11792_v23 = vld [vmem:[#allocation19 + $0x74] ss:$8 sps:$4 sm:$0xff]   ;;  %v11790_v26 = vld [vmem:[#allocation19 + $0x70] ss:$8 sps:$4 sm:$0xff]   ;;  %v11798_v53 = vld [vmem:[#allocation19 + $0x84] ss:$8 sps:$4 sm:$0xff]  }
0x1370   :  { %8427 = vmatprep.subr.bf16.mxu0 %v11768_v30  ;;  %v11814_v3 = vld [vmem:[#allocation19 + $0xb0] ss:$8 sps:$4 sm:$0xff]   ;;  %v11822_v22 = vld [vmem:[#allocation19 + $0xc4] ss:$8 sps:$4 sm:$0xff]   ;;  %v11820_v35 = vld [vmem:[#allocation19 + $0xc0] ss:$8 sps:$4 sm:$0xff]  }
0x1371   :  { %v11817_v47 = vld [vmem:[#allocation19 + $0x170] ss:$8 sps:$4 sm:$0xff]   ;;  %v11823_v30 = vld [vmem:[#allocation19 + $0x180] ss:$8 sps:$4 sm:$0xff]  }
0x1373   :  { %8428 = vmatpush1.bf16.msra.mxu0 %v11766_v40  ;;  %v11825_v40 = vld [vmem:[#allocation19 + $0x184] ss:$8 sps:$4 sm:$0xff]  }
0x1374   :  { %v7601_v15 = vld [vmem:[#allocation5 + $0x20] sm:$0xf]  ;;  %8429 = vmatprep.subr.bf16.mxu0 %v11771_v8 }
0x1375   :  { %v7658_v34 = vsel %vm1484_vm2, %v7601_v15, 0  ;;  %v11796_v15 = vld [vmem:[#allocation19 + $0x80] ss:$8 sps:$4 sm:$0xff]   ;;  %v11828_v8 = vld [vmem:[#allocation19 + $0xd4] ss:$8 sps:$4 sm:$0xff]  }
0x1376   :  { %11233 = vmatpush3.bf16.msra.mxu1 %v7658_v34  ;;  %v11804_v34 = vld [vmem:[#allocation19 + $0x94] ss:$8 sps:$4 sm:$0xff]  }
0x1377   :  { %11244 = vmatprep.subr.bf16.mxu1 %v14600_v14  ;;  %8430 = vmatpush1.bf16.msra.mxu0 %v11769_v31  ;;  %v11831_v31 = vld [vmem:[#allocation19 + $0x194] ss:$8 sps:$4 sm:$0xff]  }
0x1378   :  { %8431 = vmatprep.subr.bf16.mxu0 %v11774_v46  ;;  %v11826_v46 = vld [vmem:[#allocation19 + $0xd0] ss:$8 sps:$4 sm:$0xff]  }
0x137b   :  { %8432 = vmatpush1.bf16.msra.mxu0 %v11772_v58  ;;  %v11829_v58 = vld [vmem:[#allocation19 + $0x190] ss:$8 sps:$4 sm:$0xff]  }
0x137c   :  { %8433 = vmatprep.subr.bf16.mxu0 %v11780_v10  ;;  %v11834_v10 = vld [vmem:[#allocation19 + $0xe4] ss:$8 sps:$4 sm:$0xff]  }
0x137f   :  { %8434 = vmatpush1.bf16.msra.mxu0 %v11778_v32  ;;  %v11832_v32 = vld [vmem:[#allocation19 + $0xe0] ss:$8 sps:$4 sm:$0xff]  }
0x1380   :  { %8435 = vmatprep.subr.bf16.mxu0 %v11786_v57  ;;  %v11835_v57 = vld [vmem:[#allocation19 + $0x1a0] ss:$8 sps:$4 sm:$0xff]  }
0x1383   :  { %8436 = vmatpush1.bf16.msra.mxu0 %v11784_v56  ;;  %v11837_v56 = vld [vmem:[#allocation19 + $0x1a4] ss:$8 sps:$4 sm:$0xff]  }
0x1384   :  { %8437 = vmatprep.subr.bf16.mxu0 %v11792_v23  ;;  %v11840_v23 = vld [vmem:[#allocation19 + $0xf4] ss:$8 sps:$4 sm:$0xff]  }
0x1387   :  { %8438 = vmatpush1.bf16.msra.mxu0 %v11790_v26  ;;  %v11843_v26 = vld [vmem:[#allocation19 + $0x1b4] ss:$8 sps:$4 sm:$0xff]  }
0x1388   :  { %8439 = vmatprep.subr.bf16.mxu0 %v11798_v53  ;;  %v11838_v53 = vld [vmem:[#allocation19 + $0xf0] ss:$8 sps:$4 sm:$0xff]  }
0x138b   :  { %8440 = vmatpush1.bf16.msra.mxu0 %v11796_v15  ;;  %v11841_v15 = vld [vmem:[#allocation19 + $0x1b0] ss:$8 sps:$4 sm:$0xff]  }
0x138c   :  { %8441 = vmatprep.subr.bf16.mxu0 %v11804_v34  ;;  %v11848_v34 = vld [vmem:[#allocation19 + $0x1c4] ss:$8 sps:$4 sm:$0xff]  }
0x140f   :  { %v7636_v6 = vpop.f32.mrb[220].mxu0 }
0x1410   :  { %v11230_v20 = vpop.f32.mrb[221].mxu0  ;;  %v7642_v41 = vsel %vm1384_vm3, %v7636_v6, -inf }
0x1411   :  { %7643 = vmax.xlane.f32.xlu0 %v7642_v41  ;;  %v7639_v9 = vpop.f32.mrb[222].mxu0  ;;  %v11810_v20 = vld [vmem:[#allocation19 + $0xa4] ss:$8 sps:$4 sm:$0xff]   ;;  %v11808_v41 = vld [vmem:[#allocation19 + $0xa0] ss:$8 sps:$4 sm:$0xff]  }
0x1412   :  { %v11231_v29 = vpop.f32.mrb[223].mxu0 }
0x1417   :  { %v7739_v48 = vpop.f32.mrb[224].mxu0 }
0x1418   :  { %v11242_v50 = vpop.f32.mrb[225].mxu0  ;;  %v7745_v24 = vsel %vm1384_vm3, %v7739_v48, -inf }
0x1419   :  { %7746 = vmax.xlane.f32.xlu1 %v7745_v24  ;;  %v7742_v61 = vpop.f32.mrb[226].mxu0  ;;  %v7704_v24 = vld [vmem:[#allocation5 + $0x24] sm:$0xf] }
0x141a   :  { %v11243_v18 = vpop.f32.mrb[227].mxu0 }
0x141b   :  { %v7761_v18 = vsel %vm1484_vm2, %v7704_v24, 0 }
0x141f   :  { %v7842_v38 = vpop.f32.mrb[228].mxu0 }
0x1420   :  { %v11254_v4 = vpop.f32.mrb[229].mxu0  ;;  %v7848_v39 = vsel %vm1384_vm3, %v7842_v38, -inf }
0x1421   :  { %7849 = vmax.xlane.f32.xlu0 %v7848_v39  ;;  %v7845_v51 = vpop.f32.mrb[230].mxu0 }
0x1422   :  { %v11255_v21 = vpop.f32.mrb[231].mxu0  ;;  %v7807_v51 = vld [vmem:[#allocation5 + $0x28] sm:$0xf] }
0x1427   :  { %v7945_v2 = vpop.f32.mrb[232].mxu0 }
0x1428   :  { %v11266_v60 = vpop.f32.mrb[233].mxu0  ;;  %v7951_v63 = vsel %vm1384_vm3, %v7945_v2, -inf }
0x1429   :  { %7952 = vmax.xlane.f32.xlu0 %v7951_v63  ;;  %v7948_v25 = vpop.f32.mrb[234].mxu0  ;;  %v7864_v60 = vsel %vm1484_vm2, %v7807_v51, 0 }
0x142a   :  { %v11267_v27 = vpop.f32.mrb[235].mxu0 }
0x142b   :  { %v7910_v27 = vld [vmem:[#allocation5 + $0x2c] sm:$0xf] }
0x149e   :  { %v7644_v45 = vpop.xlane.xlu0 %7643 }
0x149f   :  { %v7645_v37 = vsub.f32 %v7636_v6, %v7644_v45  ;;  %v11802_v6 = vld [vmem:[#allocation19 + $0x90] ss:$8 sps:$4 sm:$0xff]  }
0x14a0   :  { %8442 = vmatpush1.bf16.msra.mxu0 %v11802_v6  ;;  %v11846_v6 = vld [vmem:[#allocation19 + $0x1c0] ss:$8 sps:$4 sm:$0xff]  }
0x14a1   :  { %v7646_v17 = vmul.f32 1.442695, %v7645_v37  ;;  %8443 = vmatprep.subr.bf16.mxu0 %v11810_v20  ;;  %v11777_v37 = vld [vmem:[#allocation19 + $0x104] ss:$8 sps:$4 sm:$0xff]   ;;  %v11851_v20 = vld [vmem:[#allocation19 + $0x1d4] ss:$8 sps:$4 sm:$0xff]  }
0x14a3   :  { %12212 = vpow2.f32 %v7646_v17  ;;  %v7967_v17 = vsel %vm1484_vm2, %v7910_v27, 0 }
0x14a4   :  { %8444 = vmatpush1.bf16.msra.mxu0 %v11808_v41  ;;  %v11849_v41 = vld [vmem:[#allocation19 + $0x1d0] ss:$8 sps:$4 sm:$0xff]  }
0x14a6   :  { %v7747_v0 = vpop.xlane.xlu1 %7746 }
0x14a7   :  { %v7748_v13 = vsub.f32 %v7739_v48, %v7747_v0 }
0x14a9   :  { %v7749_v52 = vmul.f32 1.442695, %v7748_v13 }
0x14ab   :  { %12214 = vpow2.f32 %v7749_v52  ;;  %v11775_v52 = vld [vmem:[#allocation19 + $0x100] ss:$8 sps:$4 sm:$0xff]  }
0x14ad   :  { %v14391_v62 = vpop.eup %12212 }
0x14ae   :  { %v7850_v44 = vpop.xlane.xlu0 %7849  ;;  %v7648_v7 = vsel %vm1384_vm3, %v14391_v62, 0.0 }
0x14af   :  { %v7851_v5 = vsub.f32 %v7842_v38, %v7850_v44  ;;  %7649 = vadd.xlane.f32.xlu0 %v7648_v7  ;;  %v11783_v44 = vld [vmem:[#allocation19 + $0x114] ss:$8 sps:$4 sm:$0xff]   ;;  %v11781_v7 = vld [vmem:[#allocation19 + $0x110] ss:$8 sps:$4 sm:$0xff]  }
0x14b1   :  { %v7852_v1 = vmul.f32 1.442695, %v7851_v5  ;;  %v11789_v5 = vld [vmem:[#allocation19 + $0x124] ss:$8 sps:$4 sm:$0xff]  }
0x14b3   :  { %12216 = vpow2.f32 %v7852_v1  ;;  %v11787_v1 = vld [vmem:[#allocation19 + $0x120] ss:$8 sps:$4 sm:$0xff]  }
0x14b5   :  { %v14395_v59 = vpop.eup %12214 }
0x14b6   :  { %v7953_v55 = vpop.xlane.xlu0 %7952  ;;  %v7751_v11 = vsel %vm1384_vm3, %v14395_v59, 0.0 }
0x14b7   :  { %v7954_v19 = vsub.f32 %v7945_v2, %v7953_v55  ;;  %7752 = vadd.xlane.f32.xlu1 %v7751_v11  ;;  %v11793_v55 = vld [vmem:[#allocation19 + $0x130] ss:$8 sps:$4 sm:$0xff]   ;;  %v11799_v11 = vld [vmem:[#allocation19 + $0x140] ss:$8 sps:$4 sm:$0xff]  }
0x14b9   :  { %v7955_v28 = vmul.f32 1.442695, %v7954_v19  ;;  %v11807_v19 = vld [vmem:[#allocation19 + $0x154] ss:$8 sps:$4 sm:$0xff]  }
0x14bb   :  { %12218 = vpow2.f32 %v7955_v28  ;;  %v11805_v28 = vld [vmem:[#allocation19 + $0x150] ss:$8 sps:$4 sm:$0xff]  }
0x14bd   :  { %v14399_v54 = vpop.eup %12216 }
0x14be   :  { %v7854_v16 = vsel %vm1384_vm3, %v14399_v54, 0.0 }
0x14bf   :  { %7855 = vadd.xlane.f32.xlu0 %v7854_v16  ;;  %v11811_v16 = vld [vmem:[#allocation19 + $0x160] ss:$8 sps:$4 sm:$0xff]  }
0x14c5   :  { %v14403_v33 = vpop.eup %12218 }
0x14c6   :  { %v7957_v43 = vsel %vm1384_vm3, %v14403_v33, 0.0 }
0x14c7   :  { %7958 = vadd.xlane.f32.xlu1 %v7957_v43  ;;  %v11819_v43 = vld [vmem:[#allocation19 + $0x174] ss:$8 sps:$4 sm:$0xff]  }
0x153c   :  { %v7650_v9 = vpop.xlane.xlu0 %7649 }
0x153d   :  { %12220 = vrcp.f32 %v7650_v9  ;;  %v11854_v9 = vld [vmem:[#allocation19 + $0x1e4] ss:$8 sps:$4 sm:$0xff]  }
0x1544   :  { %v7753_v29 = vpop.xlane.xlu1 %7752 }
0x1545   :  { %12222 = vrcp.f32 %v7753_v29  ;;  %v11852_v29 = vld [vmem:[#allocation19 + $0x1e0] ss:$8 sps:$4 sm:$0xff]  }
0x1547   :  { %v12221_v48 = vpop.eup %12220 }
0x1548   :  { %v7652_v50 = vmul.f32 %v12221_v48, %v14391_v62  ;;  %v11857_v48 = vld [vmem:[#allocation19 + $0x1f4] ss:$8 sps:$4 sm:$0xff]  }
0x154a   :  { %v7653_v61 = vpack.c.bf16 %v7652_v50, %v7652_v50  ;;  %v11855_v50 = vld [vmem:[#allocation19 + $0x1f0] ss:$8 sps:$4 sm:$0xff]  }
0x154c   :  { %11235 = vmatmul.mubr.msk.bf16.vlgmr.msra.gmra.mrb[220].mxu1 %vm1384_vm3, %v7653_v61  ;;  %v7856_v38 = vpop.xlane.xlu0 %7855 }
0x154d   :  { %11245 = vmatpush3.bf16.msra.mxu1 %v7761_v18  ;;  %12224 = vrcp.f32 %v7856_v38  ;;  %11246 = vmatprep.mubr.msk.bf16.mxu1 %vm12517_vm1, %v14600_v14 }
0x154e   :  { %11256 = vmatprep.subr.bf16.mxu1 %v14600_v14 }
0x154f   :  { %v12223_v4 = vpop.eup %12222 }
0x1550   :  { %v7755_v39 = vmul.f32 %v12223_v4, %v14395_v59  ;;  %v11795_v59 = vld [vmem:[#allocation19 + $0x134] ss:$8 sps:$4 sm:$0xff]  }
0x1552   :  { %v7756_v21 = vpack.c.bf16 %v7755_v39, %v7755_v39 }
0x1554   :  { %v7959_v2 = vpop.xlane.xlu1 %7958  ;;  %11247 = vmatmul.mubr.msk.bf16.vlgmr.msra.gmra.mrb[224].mxu1 %vm1384_vm3, %v7756_v21 }
0x1555   :  { %12226 = vrcp.f32 %v7959_v2  ;;  %11257 = vmatpush3.bf16.msra.mxu1 %v7864_v60  ;;  %11258 = vmatprep.mubr.msk.bf16.mxu1 %vm12517_vm1, %v14600_v14 }
0x1556   :  { %11268 = vmatprep.subr.bf16.mxu1 %v14600_v14 }
0x1557   :  { %v12225_v63 = vpop.eup %12224 }
0x1558   :  { %v7858_v25 = vmul.f32 %v12225_v63, %v14399_v54  ;;  %v11813_v54 = vld [vmem:[#allocation19 + $0x164] ss:$8 sps:$4 sm:$0xff]  }
0x155a   :  { %v7859_v45 = vpack.c.bf16 %v7858_v25, %v7858_v25 }
0x155c   :  { %11259 = vmatmul.mubr.msk.bf16.vlgmr.msra.gmra.mrb[228].mxu1 %vm1384_vm3, %v7859_v45 }
0x155d   :  { %11269 = vmatpush3.bf16.msra.mxu1 %v7967_v17  ;;  %11270 = vmatprep.mubr.msk.bf16.mxu1 %vm12517_vm1, %v14600_v14  ;;  %v11801_v14 = vld [vmem:[#allocation19 + $0x144] ss:$8 sps:$4 sm:$0xff]  }
0x155e   :  { %8464 = vmatprep.subr.bf16.mxu1 %v11777_v37 }
0x155f   :  { %v12227_v0 = vpop.eup %12226 }
0x1560   :  { %v7961_v13 = vmul.f32 %v12227_v0, %v14403_v33  ;;  %v11816_v33 = vld [vmem:[#allocation19 + $0xb4] ss:$8 sps:$4 sm:$0xff]  }
0x1561   :  { %8445 = vmatprep.subr.bf16.mxu0 %v11816_v33 }
0x1562   :  { %v7962_v62 = vpack.c.bf16 %v7961_v13, %v7961_v13  ;;  %8446 = vmatpush1.bf16.msra.mxu0 %v11814_v3 }
0x1563   :  { %8447 = vmatprep.subr.bf16.mxu0 %v11822_v22 }
0x1564   :  { %11271 = vmatmul.mubr.msk.bf16.vlgmr.msra.gmra.mrb[232].mxu1 %vm1384_vm3, %v7962_v62 }
0x1565   :  { %8465 = vmatpush1.bf16.msra.mxu1 %v11775_v52 }
0x1566   :  { %8466 = vmatprep.subr.bf16.mxu1 %v11783_v44  ;;  %8448 = vmatpush1.bf16.msra.mxu0 %v11820_v35 }
0x1567   :  { %8449 = vmatprep.subr.bf16.mxu0 %v11828_v8  ;;  %v12241_v8 = vld [vmem:[#allocation4] sm:$0xff] }
0x1569   :  { %8467 = vmatpush1.bf16.msra.mxu1 %v11781_v7 }
0x156a   :  { %8468 = vmatprep.subr.bf16.mxu1 %v11789_v5  ;;  %8450 = vmatpush1.bf16.msra.mxu0 %v11826_v46 }
0x156b   :  { %8451 = vmatprep.subr.bf16.mxu0 %v11834_v10 }
0x156d   :  { %8469 = vmatpush1.bf16.msra.mxu1 %v11787_v1 }
0x156e   :  { %8470 = vmatprep.subr.bf16.mxu1 %v11795_v59  ;;  %8452 = vmatpush1.bf16.msra.mxu0 %v11832_v32 }
0x156f   :  { %8453 = vmatprep.subr.bf16.mxu0 %v11840_v23  ;;  %v11863_v23 = vld [vmem:[#allocation21 + $0x8] ss:$16 sps:$4 sm:$0xff]  }
0x1571   :  { %8471 = vmatpush1.bf16.msra.mxu1 %v11793_v55 }
0x1572   :  { %8472 = vmatprep.subr.bf16.mxu1 %v11801_v14  ;;  %8454 = vmatpush1.bf16.msra.mxu0 %v11838_v53  ;;  %v11868_v53 = vld [vmem:[#allocation21 + $0x24] ss:$16 sps:$4 sm:$0xff]  }
0x1575   :  { %8473 = vmatpush1.bf16.msra.mxu1 %v11799_v11 }
0x1576   :  { %8474 = vmatprep.subr.bf16.mxu1 %v11807_v19 }
0x1579   :  { %8475 = vmatpush1.bf16.msra.mxu1 %v11805_v28 }
0x157a   :  { %8476 = vmatprep.subr.bf16.mxu1 %v11813_v54  ;;  %v8077_v54 = vld [vmem:[%s14520_s17] sm:$0x3] }
0x157b   :  { %v8086_v33 = vrot.slane %v8077_v54, %v13142_v12 }
0x157d   :  { %8477 = vmatpush1.bf16.msra.mxu1 %v11811_v16  ;;  %v8082_v16 = vrot.slane %v8077_v54, %v14666_v49 }
0x157e   :  { %8478 = vmatprep.subr.bf16.mxu1 %v11819_v43 }
0x1581   :  { %8479 = vmatpush1.bf16.msra.mxu1 %v11817_v47 }
0x1582   :  { %8480 = vmatprep.subr.bf16.mxu1 %v11825_v40 }
0x1585   :  { %8481 = vmatpush1.bf16.msra.mxu1 %v11823_v30 }
0x1586   :  { %8482 = vmatprep.subr.bf16.mxu1 %v11831_v31 }
0x1589   :  { %8483 = vmatpush1.bf16.msra.mxu1 %v11829_v58  ;;  %v12242_v58 = vld [vmem:[#allocation4 + $0x8] sm:$0xff] }
0x158a   :  { %8484 = vmatprep.subr.bf16.mxu1 %v11837_v56  ;;  %v11862_v56 = vld [vmem:[#allocation21 + $0x4] ss:$16 sps:$4 sm:$0xff]  }
0x158b   :  { %8960 = vmatprep.subr.bf16.mxu0 %v11862_v56  ;;  %v11938_v56 = vld [vmem:[#allocation21 + $0x1a0] ss:$16 sps:$4 sm:$0xff]  }
0x158d   :  { %8485 = vmatpush1.bf16.msra.mxu1 %v11835_v57  ;;  %v11860_v57 = vld [vmem:[#allocation21] ss:$16 sps:$4 sm:$0xff]  }
0x158e   :  { %8486 = vmatprep.subr.bf16.mxu1 %v11843_v26  ;;  %v11865_v26 = vld [vmem:[#allocation21 + $0xc] ss:$16 sps:$4 sm:$0xff]  }
0x1591   :  { %8487 = vmatpush1.bf16.msra.mxu1 %v11841_v15  ;;  %v11871_v15 = vld [vmem:[#allocation21 + $0x2c] ss:$16 sps:$4 sm:$0xff]  }
0x1592   :  { %8488 = vmatprep.subr.bf16.mxu1 %v11848_v34  ;;  %v11866_v34 = vld [vmem:[#allocation21 + $0x20] ss:$16 sps:$4 sm:$0xff]  }
0x1595   :  { %8489 = vmatpush1.bf16.msra.mxu1 %v11846_v6  ;;  %v11869_v6 = vld [vmem:[#allocation21 + $0x28] ss:$16 sps:$4 sm:$0xff]  }
0x1596   :  { %8490 = vmatprep.subr.bf16.mxu1 %v11851_v20  ;;  %v11874_v20 = vld [vmem:[#allocation21 + $0x44] ss:$16 sps:$4 sm:$0xff]  }
0x1599   :  { %8491 = vmatpush1.bf16.msra.mxu1 %v11849_v41  ;;  %v11877_v41 = vld [vmem:[#allocation21 + $0x4c] ss:$16 sps:$4 sm:$0xff]  }
0x159a   :  { %8492 = vmatprep.subr.bf16.mxu1 %v11854_v9  ;;  %v11872_v9 = vld [vmem:[#allocation21 + $0x40] ss:$16 sps:$4 sm:$0xff]  }
0x159d   :  { %8493 = vmatpush1.bf16.msra.mxu1 %v11852_v29  ;;  %v11875_v29 = vld [vmem:[#allocation21 + $0x48] ss:$16 sps:$4 sm:$0xff]  }
0x159e   :  { %8494 = vmatprep.subr.bf16.mxu1 %v11857_v48  ;;  %v11880_v48 = vld [vmem:[#allocation21 + $0x64] ss:$16 sps:$4 sm:$0xff]  }
0x15a1   :  { %8495 = vmatpush1.bf16.msra.mxu1 %v11855_v50  ;;  %v11883_v50 = vld [vmem:[#allocation21 + $0x6c] ss:$16 sps:$4 sm:$0xff]  }
0x15a2   :  { %9001 = vmatprep.subr.bf16.mxu1 %v11865_v26  ;;  %v11944_v26 = vld [vmem:[#allocation21 + $0x1c0] ss:$16 sps:$4 sm:$0xff]  }
0x161f   :  { %v7694_v24 = vpop.f32.mrb[220].mxu1 }
0x1620   :  { %v7700_v61 = vpack.c.bf16 %v7694_v24, %v7694_v24  ;;  %v11236_v18 = vpop.f32.mrb[221].mxu1  ;;  %v11878_v24 = vld [vmem:[#allocation21 + $0x60] ss:$16 sps:$4 sm:$0xff]  }
0x1621   :  { %v7697_v38 = vpop.f32.mrb[222].mxu1  ;;  %v11886_v18 = vld [vmem:[#allocation21 + $0x84] ss:$16 sps:$4 sm:$0xff]  }
0x1622   :  { %7701 = vst [vmem:[#allocation6] sm:$0xf] %v7700_v61  ;;  %v11237_v4 = vpop.f32.mrb[223].mxu1  ;;  %v11881_v61 = vld [vmem:[#allocation21 + $0x68] ss:$16 sps:$4 sm:$0xff]  }
0x1623   :  { %v11889_v38 = vld [vmem:[#allocation21 + $0x8c] ss:$16 sps:$4 sm:$0xff]   ;;  %v11884_v4 = vld [vmem:[#allocation21 + $0x80] ss:$16 sps:$4 sm:$0xff]  }
0x1627   :  { %v7797_v39 = vpop.f32.mrb[224].mxu1 }
0x1628   :  { %v7803_v51 = vpack.c.bf16 %v7797_v39, %v7797_v39  ;;  %v11248_v21 = vpop.f32.mrb[225].mxu1  ;;  %v11887_v39 = vld [vmem:[#allocation21 + $0x88] ss:$16 sps:$4 sm:$0xff]  }
0x1629   :  { %v7800_v2 = vpop.f32.mrb[226].mxu1  ;;  %v11895_v21 = vld [vmem:[#allocation21 + $0xac] ss:$16 sps:$4 sm:$0xff]  }
0x162a   :  { %7804 = vst [vmem:[#allocation6 + $0x4] sm:$0xf] %v7803_v51  ;;  %v11249_v60 = vpop.f32.mrb[227].mxu1  ;;  %v11892_v51 = vld [vmem:[#allocation21 + $0xa4] ss:$16 sps:$4 sm:$0xff]  }
0x162b   :  { %v11890_v2 = vld [vmem:[#allocation21 + $0xa0] ss:$16 sps:$4 sm:$0xff]   ;;  %v11893_v60 = vld [vmem:[#allocation21 + $0xa8] ss:$16 sps:$4 sm:$0xff]  }
0x162f   :  { %v7900_v63 = vpop.f32.mrb[228].mxu1 }
0x1630   :  { %v7906_v25 = vpack.c.bf16 %v7900_v63, %v7900_v63  ;;  %v11260_v27 = vpop.f32.mrb[229].mxu1  ;;  %v11898_v63 = vld [vmem:[#allocation21 + $0xc4] ss:$16 sps:$4 sm:$0xff]  }
0x1631   :  { %v7903_v45 = vpop.f32.mrb[230].mxu1  ;;  %v8011_v37 = vld [vmem:[#allocation6] sm:$0xff]  ;;  %v11896_v27 = vld [vmem:[#allocation21 + $0xc0] ss:$16 sps:$4 sm:$0xff]  }
0x1632   :  { %7907 = vst [vmem:[#allocation6 + $0x8] sm:$0xf] %v7906_v25  ;;  %v11261_v17 = vpop.f32.mrb[231].mxu1  ;;  %v10042_v0 = vcombine.low %v8011_v37, %v8011_v37  ;;  %v10043_v13 = vcombine.high %v8011_v37, %v8011_v37  ;;  %v11901_v25 = vld [vmem:[#allocation21 + $0xcc] ss:$16 sps:$4 sm:$0xff]  }
0x1633   :  { %v11899_v45 = vld [vmem:[#allocation21 + $0xc8] ss:$16 sps:$4 sm:$0xff]   ;;  %v11904_v37 = vld [vmem:[#allocation21 + $0xe4] ss:$16 sps:$4 sm:$0xff]   ;;  %v11907_v17 = vld [vmem:[#allocation21 + $0xec] ss:$16 sps:$4 sm:$0xff]  }
0x1634   :  { %8455 = vmatprep.mubr.bf16.mxu0 %v10043_v13  ;;  %v11905_v13 = vld [vmem:[#allocation21 + $0xe8] ss:$16 sps:$4 sm:$0xff]  }
0x1635   :  { %8456 = vmatmul.mubr.bf16.vlgmr.msra.gmra.mrb[236].mxu0 %v10042_v0  ;;  %v11902_v0 = vld [vmem:[#allocation21 + $0xe0] ss:$16 sps:$4 sm:$0xff]  }
0x1636   :  { %8961 = vmatpush1.bf16.msra.mxu0 %v11860_v57  ;;  %v11943_v57 = vld [vmem:[#allocation21 + $0x1ac] ss:$16 sps:$4 sm:$0xff]  }
0x1637   :  { %v8003_v52 = vpop.f32.mrb[232].mxu1  ;;  %8962 = vmatprep.subr.bf16.mxu0 %v11868_v53  ;;  %v11946_v53 = vld [vmem:[#allocation21 + $0x1c4] ss:$16 sps:$4 sm:$0xff]  }
0x1638   :  { %v8009_v62 = vpack.c.bf16 %v8003_v52, %v8003_v52  ;;  %v11272_v44 = vpop.f32.mrb[233].mxu1  ;;  %v11910_v52 = vld [vmem:[#allocation21 + $0x104] ss:$16 sps:$4 sm:$0xff]  }
0x1639   :  { %v8006_v7 = vpop.f32.mrb[234].mxu1  ;;  %v11908_v44 = vld [vmem:[#allocation21 + $0x100] ss:$16 sps:$4 sm:$0xff]  }
0x163a   :  { %8010 = vst [vmem:[#allocation6 + $0xc] sm:$0xf] %v8009_v62  ;;  %v11273_v5 = vpop.f32.mrb[235].mxu1  ;;  %8963 = vmatpush1.bf16.msra.mxu0 %v11866_v34  ;;  %v11913_v62 = vld [vmem:[#allocation21 + $0x10c] ss:$16 sps:$4 sm:$0xff]  }
0x163b   :  { %8964 = vmatprep.subr.bf16.mxu0 %v11874_v20  ;;  %v11911_v7 = vld [vmem:[#allocation21 + $0x108] ss:$16 sps:$4 sm:$0xff]   ;;  %v11916_v5 = vld [vmem:[#allocation21 + $0x124] ss:$16 sps:$4 sm:$0xff]   ;;  %v11949_v34 = vld [vmem:[#allocation21 + $0x1cc] ss:$16 sps:$4 sm:$0xff]  }
0x163c   :  { %v11955_v20 = vld [vmem:[#allocation21 + $0x1ec] ss:$16 sps:$4 sm:$0xff]  }
0x163e   :  { %8965 = vmatpush1.bf16.msra.mxu0 %v11872_v9  ;;  %v11953_v9 = vld [vmem:[#allocation21 + $0x1e8] ss:$16 sps:$4 sm:$0xff]  }
0x163f   :  { %8966 = vmatprep.subr.bf16.mxu0 %v11880_v48  ;;  %v11961_v48 = vld [vmem:[#allocation22 + $0x104] ss:$8 sps:$4 sm:$0xff]  }
0x1641   :  { %v8012_v1 = vld [vmem:[#allocation6 + $0x8] sm:$0xff] }
0x1642   :  { %v10044_v59 = vcombine.low %v8012_v1, %v8012_v1  ;;  %v10045_v55 = vcombine.high %v8012_v1, %v8012_v1  ;;  %8967 = vmatpush1.bf16.msra.mxu0 %v11878_v24  ;;  %v11919_v1 = vld [vmem:[#allocation21 + $0x12c] ss:$16 sps:$4 sm:$0xff]  }
0x1643   :  { %8968 = vmatprep.subr.bf16.mxu0 %v11886_v18  ;;  %v8507_v18 = vld [vmem:[%s14521_s18] sm:$0x3] }
0x1644   :  { %8496 = vmatprep.mubr.bf16.mxu1 %v10045_v55  ;;  %v11917_v55 = vld [vmem:[#allocation21 + $0x128] ss:$16 sps:$4 sm:$0xff]  }
0x1645   :  { %8497 = vmatmul.mubr.bf16.vlgmr.msra.gmra.mrb[236].mxu1 %v10044_v59  ;;  %v11914_v59 = vld [vmem:[#allocation21 + $0x120] ss:$16 sps:$4 sm:$0xff]  }
0x1646   :  { %9002 = vmatpush1.bf16.msra.mxu1 %v11863_v23  ;;  %8969 = vmatpush1.bf16.msra.mxu0 %v11884_v4  ;;  %v11941_v23 = vld [vmem:[#allocation21 + $0x1a8] ss:$16 sps:$4 sm:$0xff]   ;;  %v8530_v4 = vrot.slane %v8507_v18, %v14666_v49 }
0x1647   :  { %9003 = vmatprep.subr.bf16.mxu1 %v11871_v15  ;;  %8970 = vmatprep.subr.bf16.mxu0 %v11892_v51  ;;  %v11947_v15 = vld [vmem:[#allocation21 + $0x1c8] ss:$16 sps:$4 sm:$0xff]  }
0x164a   :  { %9004 = vmatpush1.bf16.msra.mxu1 %v11869_v6  ;;  %8971 = vmatpush1.bf16.msra.mxu0 %v11890_v2  ;;  %v11952_v6 = vld [vmem:[#allocation21 + $0x1e4] ss:$16 sps:$4 sm:$0xff]  }
0x164b   :  { %9005 = vmatprep.subr.bf16.mxu1 %v11877_v41  ;;  %8972 = vmatprep.subr.bf16.mxu0 %v11898_v63  ;;  %v11950_v41 = vld [vmem:[#allocation21 + $0x1e0] ss:$16 sps:$4 sm:$0xff]  }
0x164e   :  { %9006 = vmatpush1.bf16.msra.mxu1 %v11875_v29  ;;  %8973 = vmatpush1.bf16.msra.mxu0 %v11896_v27  ;;  %v11958_v29 = vld [vmem:[#allocation22 + $0x4] ss:$8 sps:$4 sm:$0xff]  }
0x164f   :  { %9007 = vmatprep.subr.bf16.mxu1 %v11883_v50  ;;  %8974 = vmatprep.subr.bf16.mxu0 %v11904_v37 }
0x1652   :  { %9008 = vmatpush1.bf16.msra.mxu1 %v11881_v61  ;;  %8975 = vmatpush1.bf16.msra.mxu0 %v11902_v0 }
0x1653   :  { %9009 = vmatprep.subr.bf16.mxu1 %v11889_v38  ;;  %8976 = vmatprep.subr.bf16.mxu0 %v11910_v52  ;;  %v8508_v38 = vld [vmem:[%s14522_s19] sm:$0x3]  ;;  %v11959_v52 = vld [vmem:[#allocation22 + $0x100] ss:$8 sps:$4 sm:$0xff]  }
0x1654   :  { %v8547_v63 = vrot.slane %v8508_v38, %v13142_v12 }
0x1656   :  { %9010 = vmatpush1.bf16.msra.mxu1 %v11887_v39  ;;  %8977 = vmatpush1.bf16.msra.mxu0 %v11908_v44  ;;  %v8534_v39 = vrot.slane %v8507_v18, %v13142_v12  ;;  %v11967_v44 = vld [vmem:[#allocation22 + $0x114] ss:$8 sps:$4 sm:$0xff]   ;;  %v12025_v18 = vld [vmem:[#allocation22 + $0x1b0] ss:$8 sps:$4 sm:$0xff]  }
0x1657   :  { %9011 = vmatprep.subr.bf16.mxu1 %v11895_v21  ;;  %8978 = vmatprep.subr.bf16.mxu0 %v11916_v5  ;;  %v11965_v5 = vld [vmem:[#allocation22 + $0x110] ss:$8 sps:$4 sm:$0xff]  }
0x165a   :  { %9012 = vmatpush1.bf16.msra.mxu1 %v11893_v60  ;;  %8979 = vmatpush1.bf16.msra.mxu0 %v11914_v59  ;;  %v8543_v60 = vrot.slane %v8508_v38, %v14666_v49  ;;  %v11973_v59 = vld [vmem:[#allocation22 + $0x124] ss:$8 sps:$4 sm:$0xff]  }
0x165b   :  { %9013 = vmatprep.subr.bf16.mxu1 %v11901_v25  ;;  %v12030_v38 = vld [vmem:[#allocation22 + $0xc4] ss:$8 sps:$4 sm:$0xff]  }
0x165e   :  { %9014 = vmatpush1.bf16.msra.mxu1 %v11899_v45 }
0x165f   :  { %9015 = vmatprep.subr.bf16.mxu1 %v11907_v17 }
0x1662   :  { %9016 = vmatpush1.bf16.msra.mxu1 %v11905_v13  ;;  %v11956_v13 = vld [vmem:[#allocation22] ss:$8 sps:$4 sm:$0xff]  }
0x1663   :  { %9017 = vmatprep.subr.bf16.mxu1 %v11913_v62  ;;  %v11964_v62 = vld [vmem:[#allocation22 + $0x14] ss:$8 sps:$4 sm:$0xff]  }
0x1666   :  { %9018 = vmatpush1.bf16.msra.mxu1 %v11911_v7  ;;  %v11962_v7 = vld [vmem:[#allocation22 + $0x10] ss:$8 sps:$4 sm:$0xff]  }
0x1667   :  { %9019 = vmatprep.subr.bf16.mxu1 %v11919_v1  ;;  %v11970_v1 = vld [vmem:[#allocation22 + $0x24] ss:$8 sps:$4 sm:$0xff]  }
0x166a   :  { %9020 = vmatpush1.bf16.msra.mxu1 %v11917_v55  ;;  %v11968_v55 = vld [vmem:[#allocation22 + $0x20] ss:$8 sps:$4 sm:$0xff]  }
0x1708   :  { %v8457_v14 = vpop.f32.mrb[236].mxu0 }
0x1709   :  { %v8459_v11 = vpop.f32.mrb[237].mxu0  ;;  %v8458_v43 = vadd.f32 %v8457_v14, %v8082_v16 }
0x170a   :  { %v8461_v19 = vpop.f32.mrb[238].mxu0  ;;  %v8460_v3 = vadd.f32 %v8459_v11, %v8086_v33 }
0x170b   :  { %v8462_v28 = vpop.f32.mrb[239].mxu0 }
0x1718   :  { %v8498_v47 = vpop.f32.mrb[236].mxu1 }
0x1719   :  { %v8499_v22 = vadd.f32 %v8498_v47, %v8458_v43  ;;  %v8500_v35 = vpop.f32.mrb[237].mxu1  ;;  %v11922_v43 = vld [vmem:[#allocation21 + $0x144] ss:$16 sps:$4 sm:$0xff]   ;;  %v11920_v47 = vld [vmem:[#allocation21 + $0x140] ss:$16 sps:$4 sm:$0xff]  }
0x171a   :  { %v8501_v30 = vadd.f32 %v8500_v35, %v8460_v3  ;;  %v8502_v40 = vpop.f32.mrb[238].mxu1  ;;  %v11925_v3 = vld [vmem:[#allocation21 + $0x14c] ss:$16 sps:$4 sm:$0xff]   ;;  %8980 = vmatprep.subr.bf16.mxu0 %v11922_v43  ;;  %v11928_v35 = vld [vmem:[#allocation21 + $0x164] ss:$16 sps:$4 sm:$0xff]  }
0x171b   :  { %v14431_v31 = vadd.f32 %v12241_v8, %v8499_v22  ;;  %v8503_v46 = vpop.f32.mrb[239].mxu1  ;;  %v11923_v22 = vld [vmem:[#allocation21 + $0x148] ss:$16 sps:$4 sm:$0xff]   ;;  %9021 = vmatprep.subr.bf16.mxu1 %v11925_v3  ;;  %8981 = vmatpush1.bf16.msra.mxu0 %v11920_v47  ;;  %v11926_v40 = vld [vmem:[#allocation21 + $0x160] ss:$16 sps:$4 sm:$0xff]  }
0x171c   :  { %v14433_v10 = vadd.f32 %v12242_v58, %v8501_v30  ;;  %9022 = vmatpush1.bf16.msra.mxu1 %v11923_v22  ;;  %v11931_v30 = vld [vmem:[#allocation21 + $0x16c] ss:$16 sps:$4 sm:$0xff]   ;;  %v11929_v8 = vld [vmem:[#allocation21 + $0x168] ss:$16 sps:$4 sm:$0xff]   ;;  %8982 = vmatprep.subr.bf16.mxu0 %v11928_v35  ;;  %v11932_v58 = vld [vmem:[#allocation21 + $0x180] ss:$16 sps:$4 sm:$0xff]  }
0x171d   :  { %9023 = vmatprep.subr.bf16.mxu1 %v11931_v30  ;;  %v11937_v46 = vld [vmem:[#allocation21 + $0x18c] ss:$16 sps:$4 sm:$0xff]   ;;  %v11980_v43 = vld [vmem:[#allocation22 + $0x40] ss:$8 sps:$4 sm:$0xff]   ;;  %v11986_v35 = vld [vmem:[#allocation22 + $0x50] ss:$8 sps:$4 sm:$0xff]  }
0x171e   :  { %v8509_v32 = vadd.f32 %v14433_v10, %v14431_v31  ;;  %v11983_v3 = vld [vmem:[#allocation22 + $0x140] ss:$8 sps:$4 sm:$0xff]   ;;  %v11988_v47 = vld [vmem:[#allocation22 + $0x54] ss:$8 sps:$4 sm:$0xff]   ;;  %v11989_v30 = vld [vmem:[#allocation22 + $0x150] ss:$8 sps:$4 sm:$0xff]  }
0x171f   :  { %8983 = vmatpush1.bf16.msra.mxu0 %v11926_v40  ;;  %v11991_v22 = vld [vmem:[#allocation22 + $0x154] ss:$8 sps:$4 sm:$0xff]   ;;  %v11994_v40 = vld [vmem:[#allocation22 + $0x64] ss:$8 sps:$4 sm:$0xff]  }
0x1720   :  { %8510 = vadd.xlane.f32.xlu0 %v8509_v32  ;;  %9024 = vmatpush1.bf16.msra.mxu1 %v11929_v8  ;;  %v11940_v32 = vld [vmem:[#allocation21 + $0x1a4] ss:$16 sps:$4 sm:$0xff]  }
0x1721   :  { %9025 = vmatprep.subr.bf16.mxu1 %v11937_v46  ;;  %v11997_v8 = vld [vmem:[#allocation22 + $0x164] ss:$8 sps:$4 sm:$0xff]   ;;  %v11995_v46 = vld [vmem:[#allocation22 + $0x160] ss:$8 sps:$4 sm:$0xff]  }
0x17ad   :  { %v8511_v14 = vpop.xlane.xlu0 %8510 }
0x17ae   :  { %v8513_v11 = vmul.f32 0.00390625, %v8511_v14  ;;  %v11971_v14 = vld [vmem:[#allocation22 + $0x120] ss:$8 sps:$4 sm:$0xff]  }
0x17b0   :  { %v14438_v19 = vsub.f32 %v14431_v31, %v8513_v11  ;;  %v14441_v28 = vsub.f32 %v14433_v10, %v8513_v11  ;;  %v11934_v31 = vld [vmem:[#allocation21 + $0x184] ss:$16 sps:$4 sm:$0xff]   ;;  %v11935_v10 = vld [vmem:[#allocation21 + $0x188] ss:$16 sps:$4 sm:$0xff]  }
0x17b1   :  { %8984 = vmatprep.subr.bf16.mxu0 %v11934_v31  ;;  %9026 = vmatpush1.bf16.msra.mxu1 %v11935_v10  ;;  %v11976_v11 = vld [vmem:[#allocation22 + $0x34] ss:$8 sps:$4 sm:$0xff]   ;;  %v11992_v31 = vld [vmem:[#allocation22 + $0x60] ss:$8 sps:$4 sm:$0xff]  }
0x17b2   :  { %v8516_v54 = vmul.f32 %v14438_v19, %v14438_v19  ;;  %v8517_v16 = vmul.f32 %v14441_v28, %v14441_v28  ;;  %8985 = vmatpush1.bf16.msra.mxu0 %v11932_v58  ;;  %9027 = vmatprep.subr.bf16.mxu1 %v11943_v57  ;;  %v12000_v58 = vld [vmem:[#allocation22 + $0x74] ss:$8 sps:$4 sm:$0xff]   ;;  %v12001_v57 = vld [vmem:[#allocation22 + $0x170] ss:$8 sps:$4 sm:$0xff]  }
0x17b3   :  { %8986 = vmatprep.subr.bf16.mxu0 %v11940_v32  ;;  %v12003_v10 = vld [vmem:[#allocation22 + $0x174] ss:$8 sps:$4 sm:$0xff]   ;;  %v11998_v32 = vld [vmem:[#allocation22 + $0x70] ss:$8 sps:$4 sm:$0xff]  }
0x17b4   :  { %v8518_v33 = vadd.f32 %v8517_v16, %v8516_v54  ;;  %v11977_v54 = vld [vmem:[#allocation22 + $0x130] ss:$8 sps:$4 sm:$0xff]   ;;  %v11982_v16 = vld [vmem:[#allocation22 + $0x44] ss:$8 sps:$4 sm:$0xff]  }
0x17b5   :  { %9028 = vmatpush1.bf16.msra.mxu1 %v11941_v23  ;;  %v12009_v23 = vld [vmem:[#allocation22 + $0x184] ss:$8 sps:$4 sm:$0xff]  }
0x17b6   :  { %8519 = vadd.xlane.f32.xlu1 %v8518_v33  ;;  %8987 = vmatpush1.bf16.msra.mxu0 %v11938_v56  ;;  %v11985_v33 = vld [vmem:[#allocation22 + $0x144] ss:$8 sps:$4 sm:$0xff]  }
0x17b7   :  { %8988 = vmatprep.subr.bf16.mxu0 %v11946_v53  ;;  %9029 = vmatprep.subr.bf16.mxu1 %v11949_v34  ;;  %v12006_v56 = vld [vmem:[#allocation22 + $0x84] ss:$8 sps:$4 sm:$0xff]   ;;  %v12007_v53 = vld [vmem:[#allocation22 + $0x180] ss:$8 sps:$4 sm:$0xff]   ;;  %v12015_v34 = vld [vmem:[#allocation22 + $0x194] ss:$8 sps:$4 sm:$0xff]  }
0x17b9   :  { %9030 = vmatpush1.bf16.msra.mxu1 %v11947_v15  ;;  %v12012_v15 = vld [vmem:[#allocation22 + $0x94] ss:$8 sps:$4 sm:$0xff]  }
0x17ba   :  { %8989 = vmatpush1.bf16.msra.mxu0 %v11944_v26  ;;  %9031 = vmatprep.subr.bf16.mxu1 %v11955_v20  ;;  %v12004_v26 = vld [vmem:[#allocation22 + $0x80] ss:$8 sps:$4 sm:$0xff]   ;;  %v12013_v20 = vld [vmem:[#allocation22 + $0x190] ss:$8 sps:$4 sm:$0xff]  }
0x17bb   :  { %8990 = vmatprep.subr.bf16.mxu0 %v11952_v6  ;;  %v12010_v6 = vld [vmem:[#allocation22 + $0x90] ss:$8 sps:$4 sm:$0xff]  }
0x17bd   :  { %9032 = vmatpush1.bf16.msra.mxu1 %v11953_v9  ;;  %v12021_v9 = vld [vmem:[#allocation22 + $0x1a4] ss:$8 sps:$4 sm:$0xff]  }
0x17be   :  { %8991 = vmatpush1.bf16.msra.mxu0 %v11950_v41  ;;  %9487 = vmatprep.subr.bf16.mxu1 %v11961_v48  ;;  %v12018_v41 = vld [vmem:[#allocation22 + $0xa4] ss:$8 sps:$4 sm:$0xff]   ;;  %v12019_v48 = vld [vmem:[#allocation22 + $0x1a0] ss:$8 sps:$4 sm:$0xff]  }
0x17bf   :  { %9446 = vmatprep.subr.bf16.mxu0 %v11958_v29  ;;  %v12016_v29 = vld [vmem:[#allocation22 + $0xa0] ss:$8 sps:$4 sm:$0xff]  }
0x1843   :  { %v8520_v50 = vpop.xlane.xlu1 %8519 }
0x1844   :  { %v8521_v24 = vmul.f32 0.00390625, %v8520_v50  ;;  %v12024_v50 = vld [vmem:[#allocation22 + $0xb4] ss:$8 sps:$4 sm:$0xff]  }
0x1846   :  { %v8522_v61 = vadd.f32 1e-05, %v8521_v24  ;;  %v12027_v24 = vld [vmem:[#allocation22 + $0x1b4] ss:$8 sps:$4 sm:$0xff]  }
0x1848   :  { %12228 = vrsqrt.f32 %v8522_v61  ;;  %v12022_v61 = vld [vmem:[#allocation22 + $0xb0] ss:$8 sps:$4 sm:$0xff]  }
0x1852   :  { %v12229_v51 = vpop.eup %12228 }
0x1853   :  { %v8524_v21 = vmul.f32 %v12229_v51, %v14438_v19  ;;  %v8525_v2 = vmul.f32 %v12229_v51, %v14441_v28  ;;  %v11979_v19 = vld [vmem:[#allocation22 + $0x134] ss:$8 sps:$4 sm:$0xff]   ;;  %v11974_v28 = vld [vmem:[#allocation22 + $0x30] ss:$8 sps:$4 sm:$0xff]   ;;  %v12031_v51 = vld [vmem:[#allocation22 + $0x1c0] ss:$8 sps:$4 sm:$0xff]  }
0x1855   :  { %v8538_v25 = vmul.f32 %v8534_v39, %v8525_v2  ;;  %v8537_v27 = vmul.f32 %v8530_v4, %v8524_v21  ;;  %v12033_v4 = vld [vmem:[#allocation22 + $0x1c4] ss:$8 sps:$4 sm:$0xff]   ;;  %v12028_v39 = vld [vmem:[#allocation22 + $0xc0] ss:$8 sps:$4 sm:$0xff]   ;;  %v12036_v21 = vld [vmem:[#allocation22 + $0xd4] ss:$8 sps:$4 sm:$0xff]  }
0x1856   :  { %v12039_v2 = vld [vmem:[#allocation22 + $0x1d4] ss:$8 sps:$4 sm:$0xff]  }
0x1857   :  { %v14459_v45 = vadd.f32 %v8547_v63, %v8538_v25  ;;  %v14461_v37 = vadd.f32 %v8543_v60, %v8537_v27  ;;  %v12034_v60 = vld [vmem:[#allocation22 + $0xd0] ss:$8 sps:$4 sm:$0xff]   ;;  %v12042_v25 = vld [vmem:[#allocation22 + $0xe4] ss:$8 sps:$4 sm:$0xff]  }
0x1858   :  { %v12037_v63 = vld [vmem:[#allocation22 + $0x1d0] ss:$8 sps:$4 sm:$0xff]   ;;  %v12045_v27 = vld [vmem:[#allocation22 + $0x1e4] ss:$8 sps:$4 sm:$0xff]  }
0x1859   :  { %v8553_v17 = vpack.c.bf16 %v14459_v45, %v14459_v45  ;;  %v8552_v0 = vpack.c.bf16 %v14461_v37, %v14461_v37 }
0x185b   :  { %8992 = vmatprep.mubr.bf16.mxu0 %v8553_v17  ;;  %9033 = vmatprep.mubr.bf16.mxu1 %v8553_v17  ;;  %v12040_v17 = vld [vmem:[#allocation22 + $0xe0] ss:$8 sps:$4 sm:$0xff]  }
0x185c   :  { %8993 = vmatmul.mubr.bf16.vlgmr.msra.gmra.mrb[240].mxu0 %v8552_v0  ;;  %9034 = vmatmul.mubr.bf16.vlgmr.msra.gmra.mrb[240].mxu1 %v8552_v0  ;;  %v12043_v0 = vld [vmem:[#allocation22 + $0x1e0] ss:$8 sps:$4 sm:$0xff]  }
0x185d   :  { %9447 = vmatpush1.bf16.msra.mxu0 %v11956_v13  ;;  %9488 = vmatpush1.bf16.msra.mxu1 %v11959_v52  ;;  %v12048_v13 = vld [vmem:[#allocation22 + $0xf4] ss:$8 sps:$4 sm:$0xff]  }
0x185e   :  { %9448 = vmatprep.subr.bf16.mxu0 %v11964_v62  ;;  %9489 = vmatprep.subr.bf16.mxu1 %v11967_v44  ;;  %v12051_v52 = vld [vmem:[#allocation22 + $0x1f4] ss:$8 sps:$4 sm:$0xff]   ;;  %v12046_v62 = vld [vmem:[#allocation22 + $0xf0] ss:$8 sps:$4 sm:$0xff]  }
0x185f   :  { %v12049_v44 = vld [vmem:[#allocation22 + $0x1f0] ss:$8 sps:$4 sm:$0xff]  }
0x1861   :  { %9449 = vmatpush1.bf16.msra.mxu0 %v11962_v7  ;;  %9490 = vmatpush1.bf16.msra.mxu1 %v11965_v5  ;;  %v8618_v7 = vld [vmem:[%s14524_s21] sm:$0xf] }
0x1862   :  { %9450 = vmatprep.subr.bf16.mxu0 %v11970_v1  ;;  %9491 = vmatprep.subr.bf16.mxu1 %v11973_v59  ;;  %v8623_v5 = vrot.slane %v8618_v7, %v14666_v49  ;;  %v8631_v1 = vrot.slane %v8618_v7, %v13151_v42  ;;  %v8627_v59 = vrot.slane %v8618_v7, %v13142_v12 }
0x1865   :  { %9451 = vmatpush1.bf16.msra.mxu0 %v11968_v55  ;;  %9492 = vmatpush1.bf16.msra.mxu1 %v11971_v14  ;;  %v8635_v55 = vrot.slane %v8618_v7, %v14635_v36 }
0x1866   :  { %9452 = vmatprep.subr.bf16.mxu0 %v11976_v11  ;;  %9493 = vmatprep.subr.bf16.mxu1 %v11979_v19 }
0x1869   :  { %9453 = vmatpush1.bf16.msra.mxu0 %v11974_v28  ;;  %9494 = vmatpush1.bf16.msra.mxu1 %v11977_v54 }
0x186a   :  { %9454 = vmatprep.subr.bf16.mxu0 %v11982_v16  ;;  %9495 = vmatprep.subr.bf16.mxu1 %v11985_v33 }
0x186d   :  { %9455 = vmatpush1.bf16.msra.mxu0 %v11980_v43  ;;  %9496 = vmatpush1.bf16.msra.mxu1 %v11983_v3 }
0x186e   :  { %9456 = vmatprep.subr.bf16.mxu0 %v11988_v47  ;;  %9497 = vmatprep.subr.bf16.mxu1 %v11991_v22 }
0x1871   :  { %9457 = vmatpush1.bf16.msra.mxu0 %v11986_v35  ;;  %9498 = vmatpush1.bf16.msra.mxu1 %v11989_v30 }
0x1872   :  { %9458 = vmatprep.subr.bf16.mxu0 %v11994_v40  ;;  %9499 = vmatprep.subr.bf16.mxu1 %v11997_v8 }
0x1875   :  { %9459 = vmatpush1.bf16.msra.mxu0 %v11992_v31  ;;  %9500 = vmatpush1.bf16.msra.mxu1 %v11995_v46 }
0x1876   :  { %9460 = vmatprep.subr.bf16.mxu0 %v12000_v58  ;;  %9501 = vmatprep.subr.bf16.mxu1 %v12003_v10  ;;  %v9114_v10 = vld [vmem:[%s14526_s23] sm:$0x3] }
0x1879   :  { %9461 = vmatpush1.bf16.msra.mxu0 %v11998_v32  ;;  %9502 = vmatpush1.bf16.msra.mxu1 %v12001_v57  ;;  %v9119_v32 = vrot.slane %v9114_v10, %v14666_v49  ;;  %v9123_v57 = vrot.slane %v9114_v10, %v13142_v12 }
0x187a   :  { %9462 = vmatprep.subr.bf16.mxu0 %v12006_v56  ;;  %9503 = vmatprep.subr.bf16.mxu1 %v12009_v23 }
0x187d   :  { %9463 = vmatpush1.bf16.msra.mxu0 %v12004_v26  ;;  %9504 = vmatpush1.bf16.msra.mxu1 %v12007_v53 }
0x187e   :  { %9464 = vmatprep.subr.bf16.mxu0 %v12012_v15  ;;  %9505 = vmatprep.subr.bf16.mxu1 %v12015_v34 }
0x1881   :  { %9465 = vmatpush1.bf16.msra.mxu0 %v12010_v6  ;;  %9506 = vmatpush1.bf16.msra.mxu1 %v12013_v20 }
0x1882   :  { %9466 = vmatprep.subr.bf16.mxu0 %v12018_v41  ;;  %9507 = vmatprep.subr.bf16.mxu1 %v12021_v9 }
0x1885   :  { %9467 = vmatpush1.bf16.msra.mxu0 %v12016_v29  ;;  %9508 = vmatpush1.bf16.msra.mxu1 %v12019_v48 }
0x1886   :  { %9468 = vmatprep.subr.bf16.mxu0 %v12024_v50  ;;  %9509 = vmatprep.subr.bf16.mxu1 %v12027_v24 }
0x1889   :  { %9469 = vmatpush1.bf16.msra.mxu0 %v12022_v61  ;;  %9510 = vmatpush1.bf16.msra.mxu1 %v12025_v18 }
0x188a   :  { %9470 = vmatprep.subr.bf16.mxu0 %v12030_v38  ;;  %9511 = vmatprep.subr.bf16.mxu1 %v12033_v4 }
0x188d   :  { %9471 = vmatpush1.bf16.msra.mxu0 %v12028_v39  ;;  %9512 = vmatpush1.bf16.msra.mxu1 %v12031_v51 }
0x188e   :  { %9472 = vmatprep.subr.bf16.mxu0 %v12036_v21  ;;  %9513 = vmatprep.subr.bf16.mxu1 %v12039_v2 }
0x1891   :  { %9473 = vmatpush1.bf16.msra.mxu0 %v12034_v60  ;;  %9514 = vmatpush1.bf16.msra.mxu1 %v12037_v63 }
0x1892   :  { %9474 = vmatprep.subr.bf16.mxu0 %v12042_v25  ;;  %9515 = vmatprep.subr.bf16.mxu1 %v12045_v27 }
0x1895   :  { %9475 = vmatpush1.bf16.msra.mxu0 %v12040_v17  ;;  %9516 = vmatpush1.bf16.msra.mxu1 %v12043_v0 }
0x1896   :  { %9476 = vmatprep.subr.bf16.mxu0 %v12048_v13  ;;  %9517 = vmatprep.subr.bf16.mxu1 %v12051_v52 }
0x1899   :  { %9477 = vmatpush1.bf16.msra.mxu0 %v12046_v62  ;;  %9518 = vmatpush1.bf16.msra.mxu1 %v12049_v44 }
0x192f   :  { %v8994_v14 = vpop.f32.mrb[240].mxu0  ;;  %v9035_v11 = vpop.f32.mrb[240].mxu1 }
0x1930   :  { %v8995_v19 = vadd.f32 %v8994_v14, %v8623_v5  ;;  %v9036_v28 = vadd.f32 %v9035_v11, %v8631_v1  ;;  %v8996_v54 = vpop.f32.mrb[241].mxu0  ;;  %v9037_v16 = vpop.f32.mrb[241].mxu1 }
0x1931   :  { %v8997_v33 = vadd.f32 %v8996_v54, %v8627_v59  ;;  %v9038_v43 = vadd.f32 %v9037_v16, %v8635_v55  ;;  %v8998_v3 = vpop.f32.mrb[242].mxu0  ;;  %v9039_v47 = vpop.f32.mrb[242].mxu1 }
0x1932   :  { %v9042_v22 = vmax.f32 %v8995_v19, 0.0  ;;  %v9044_v35 = vmax.f32 %v9036_v28, 0.0  ;;  %v8999_v30 = vpop.f32.mrb[243].mxu0  ;;  %v9040_v40 = vpop.f32.mrb[243].mxu1 }
0x1933   :  { %v9043_v8 = vmax.f32 %v8997_v33, 0.0  ;;  %v9045_v42 = vmax.f32 %v9038_v43, 0.0 }
0x1934   :  { %v9046_v58 = vpack.c.bf16 %v9042_v22, %v9042_v22  ;;  %v9048_v36 = vpack.c.bf16 %v9044_v35, %v9044_v35 }
0x1935   :  { %v9047_v31 = vpack.c.bf16 %v9043_v8, %v9043_v8  ;;  %v9049_v46 = vpack.c.bf16 %v9045_v42, %v9045_v42 }
0x1937   :  { %9478 = vmatprep.mubr.bf16.mxu0 %v9047_v31  ;;  %9519 = vmatprep.mubr.bf16.mxu1 %v9049_v46 }
0x1938   :  { %9479 = vmatmul.mubr.bf16.vlgmr.msra.gmra.mrb[244].mxu0 %v9046_v58  ;;  %9520 = vmatmul.mubr.bf16.vlgmr.msra.gmra.mrb[244].mxu1 %v9048_v36 }
0x1a0b   :  { %v9480_v56 = vpop.f32.mrb[244].mxu0  ;;  %v9521_v23 = vpop.f32.mrb[244].mxu1 }
0x1a0c   :  { %v9481_v26 = vadd.f32 %v9480_v56, %v9119_v32  ;;  %v9482_v53 = vpop.f32.mrb[245].mxu0  ;;  %v9523_v15 = vpop.f32.mrb[245].mxu1 }
0x1a0d   :  { %v9483_v34 = vadd.f32 %v9482_v53, %v9123_v57  ;;  %v9484_v6 = vpop.f32.mrb[246].mxu0  ;;  %v9525_v20 = vpop.f32.mrb[246].mxu1 }
0x1a0e   :  { %v9522_v41 = vadd.f32 %v9521_v23, %v9481_v26  ;;  %v9485_v9 = vpop.f32.mrb[247].mxu0  ;;  %v9526_v29 = vpop.f32.mrb[247].mxu1 }
0x1a0f   :  { %v9524_v48 = vadd.f32 %v9523_v15, %v9483_v34 }
0x1a10   :  { %v9528_v50 = vadd.f32 %v9522_v41, %v14461_v37  ;;  %v9530_v37 = vld [vmem:[%s14527_s24] sm:$0x3]  ;;  %s12463_s24 = scalar_lea.vmem %s9583_s13, 256 }
0x1a11   :  { %v9529_v24 = vadd.f32 %v9524_v48, %v14459_v45  ;;  %v9531_v45 = vld [vmem:[%s14528_s25] sm:$0x3]  ;;  %v9552_v27 = vrot.slane %v9530_v37, %v14666_v49  ;;  %v9556_v17 = vrot.slane %v9530_v37, %v13142_v12  ;;  %p12464_p10 = scmp.ne.s32.totalorder %s9583_s13, %s12463_s24  ;;  %p12469_p12 = scmp.lt.s32.totalorder %s12463_s24, %s12463_s24 }
0x1a12   :  { %v9565_v62 = vrot.slane %v9531_v45, %v14666_v49  ;;  %v9569_v44 = vrot.slane %v9531_v45, %v13142_v12 }
0x1a13   :  { %v9532_v61 = vadd.f32 %v9529_v24, %v9528_v50  ;;  %p12470_p13 = por %p12469_p12, %p12468_p11 }
0x1a15   :  { %9533 = vadd.xlane.f32.xlu0 %v9532_v61  ;;  %p12471_p0 = pnand %p12470_p13, %p12464_p10 }
0x1aa2   :  { %v9534_v18 = vpop.xlane.xlu0 %9533 }
0x1aa3   :  { %v9535_v38 = vmul.f32 0.00390625, %v9534_v18 }
0x1aa5   :  { %v9536_v4 = vsub.f32 %v9528_v50, %v9535_v38  ;;  %v9537_v39 = vsub.f32 %v9529_v24, %v9535_v38 }
0x1aa7   :  { %v9538_v51 = vmul.f32 %v9536_v4, %v9536_v4  ;;  %v9539_v21 = vmul.f32 %v9537_v39, %v9537_v39 }
0x1aa9   :  { %v9540_v2 = vadd.f32 %v9539_v21, %v9538_v51 }
0x1aab   :  { %9541 = vadd.xlane.f32.xlu1 %v9540_v2 }
0x1b38   :  { %v9542_v60 = vpop.xlane.xlu1 %9541 }
0x1b39   :  { %v9543_v63 = vmul.f32 0.00390625, %v9542_v60 }
0x1b3b   :  { %v9544_v25 = vadd.f32 1e-05, %v9543_v63 }
0x1b3d   :  { %12230 = vrsqrt.f32 %v9544_v25 }
0x1b47   :  { %v12231_v0 = vpop.eup %12230 }
0x1b48   :  { %v9546_v13 = vmul.f32 %v12231_v0, %v9536_v4  ;;  %v9547_v52 = vmul.f32 %v12231_v0, %v9537_v39 }
0x1b4a   :  { %v9559_v7 = vmul.f32 %v9552_v27, %v9546_v13  ;;  %v9560_v5 = vmul.f32 %v9556_v17, %v9547_v52 }
0x1b4c   :  { %v9572_v1 = vadd.f32 %v9565_v62, %v9559_v7  ;;  %v9573_v59 = vadd.f32 %v9569_v44, %v9560_v5 }
0x1b4e   :  { %9574 = vst [vmem:[#allocation24] sm:$0xff] %v9572_v1  ;;  %9575 = vst [vmem:[#allocation24 + $0x8] sm:$0xff] %v9573_v59 }
0x1b4f   :  { %12474 = shalt.err (!%p12471_p0)
}
0x1b50   :  { %s12475_s22 = scalar_lea.hbm %s14529_s26, 256 }
0x1b51   :  { %p12476_p1 = scmp.ne.s32.totalorder %s14529_s26, %s12475_s22  ;;  %p12479_p2 = scmp.lt.u32.totalorder %s12475_s22, %s14529_s26 }
0x1b53   :  { %p12481_p3 = pnand %p12479_p2, %p12476_p1 }
0x1b55   :  { %12484 = shalt.err (!%p12481_p3)
}
0x1b56   :  { %9585 = dma.vmem_to_hbm [thread:$0]  %s9583_s13, 256, %s14529_s26, [#allocation9]  }
0x1b57   :  { %12497 = dma.done.wait [#allocation9], 256  }
0x1b58   :  { %12498 = vsyncadd [#allocation9], 4294967040 }
0x1b59   :  { %9589 = vsyncpa [#allocation8], 1 }
0x1b5a   :  { %9590 = vsyncpa [#allocation11], 1 }
0x1b5b   :  { %9591 = vsyncpa [#allocation14], 1 }
0x1b5c   :  { %9592 = vsyncpa [#allocation17], 1 }
0x1b5d   :  { %9593 = vsyncpa [#allocation20], 1 }
0x1b5e   :  { %9594 = vsyncpa [#allocation23], 1 }
0x1b5f   :  { %9595 = vsyncpa [#allocation9], 1 }

</bundles_post_ra>
